<compile_context>
chip_gen: v6e
topology: v6e:2x2x1
jax: 0.10.0
libtpu: 0.0.40
codegen_flags: <defaults>
</compile_context>

<pallas_src>
import functools

import jax
import jax.numpy as jnp
import numpy as np
from jax import lax
from jax.experimental import pallas as pl
from jax.experimental.pallas import tpu as pltpu

EPS = 1e-5


def _vmem():
    # Whole array resident in VMEM (everything here is small).
    return pl.BlockSpec(memory_space=pltpu.MemorySpace.VMEM)


# ---------------------------------------------------------------------------
# Fused forward kernel
# ---------------------------------------------------------------------------
def fused_forward_kernel(x_ref, rmask_ref,
                         wb1_ref, g1_ref, be1_ref, cs1_ref, bc1_ref,
                         wb2_ref, g2_ref, be2_ref, cs2_ref, bc2_ref,
                         wfc_ref, gfc_ref, befc_ref,
                         wh_ref, bh_ref,
                         pol_ref, val_ref,
                         *, B, H, W, Hp, Wp, A):
    # Activation layout: rows = ip*B + b (padded board row major, batch minor),
    # lanes = jp*C + c.  B == 8 makes every kh row-shift an 8-aligned slice.
    rows = B * Hp
    n_valid = float(B * H * W)
    rmask = rmask_ref[...]                      # (rows, 1): 1 on valid board rows

    def conv3x3_bn_relu(act, wb_ref, gamma, beta, csum, bcast, c_out):
        # act: (rows, Wp*Cin) bf16, exact zeros at padded rows/cols.
        lanes_in = act.shape[1]
        zg = jnp.zeros((B, lanes_in), act.dtype)
        ext = jnp.concatenate([zg, act, zg], axis=0)        # (rows + 2B, lanes_in)
        acc = jnp.zeros((rows, Wp * c_out), jnp.float32)
        # One dot per kh (K = Wp*Cin); the kw taps are folded into the banded
        # weight wb[kh].  All slices start at multiples of B (=8): aligned.
        for kh in range(3):
            v = ext[kh * B: kh * B + rows, :]
            acc = acc + jnp.dot(v, wb_ref[kh],
                                preferred_element_type=jnp.float32)
        # One-pass train-mode BatchNorm2d statistics over the B*H*W valid
        # pixels: csum groups lanes by channel and drops padded columns.
        msk = acc * rmask
        s1 = jnp.dot(jnp.sum(msk, axis=0, keepdims=True), csum)        # (1, c_out)
        s2 = jnp.dot(jnp.sum(msk * acc, axis=0, keepdims=True), csum)  # (1, c_out)
        mean = s1 / n_valid
        var = s2 / n_valid - mean * mean
        scale = gamma * lax.rsqrt(var + EPS)
        shift = beta - mean * scale
        # bcast has zero columns at padded board columns -> those come out 0,
        # which keeps the zero-padding invariant for the next conv.
        y = acc * jnp.dot(scale, bcast) + jnp.dot(shift, bcast)
        return (jnp.maximum(y, 0.0) * rmask).astype(jnp.bfloat16)

    h1 = conv3x3_bn_relu(x_ref[...], wb1_ref, g1_ref[...], be1_ref[...],
                         cs1_ref[...], bc1_ref[...], 32)
    h2 = conv3x3_bn_relu(h1, wb2_ref, g2_ref[...], be2_ref[...],
                         cs2_ref[...], bc2_ref[...], 64)

    # torch x.view(B, -1): Hp lane-aligned (8, Wp*64) slices concatenated along
    # lanes -> (B, Hp*Wp*64).  Padded positions are zero rows in wfc.
    flat = jnp.concatenate([h2[ip * B:(ip + 1) * B, :] for ip in range(Hp)],
                           axis=1)

    # fc1 (bias dropped: cancels under batch-stat BN) + BatchNorm1d + ReLU.
    z = jnp.dot(flat, wfc_ref[...], preferred_element_type=jnp.float32)
    mean = jnp.mean(z, axis=0, keepdims=True)
    var = jnp.mean(z * z, axis=0, keepdims=True) - mean * mean
    z = jnp.maximum((z - mean) * lax.rsqrt(var + EPS) * gfc_ref[...]
                    + befc_ref[...], 0.0)

    # Fused policy/value heads: one matmul against the concatenated weights.
    ho = jnp.dot(z.astype(jnp.bfloat16), wh_ref[...],
                 preferred_element_type=jnp.float32) + bh_ref[...]
    logits = ho[:, :A]
    m = jnp.max(logits, axis=-1, keepdims=True)
    sl = logits - m
    pol_ref[...] = sl - jnp.log(jnp.sum(jnp.exp(sl), axis=-1, keepdims=True))
    val_ref[...] = jnp.tanh(ho[:, A:A + 1])


# ---------------------------------------------------------------------------
# Wrapper: tiny XLA layout glue (NCHW -> padded ip-major rows) + one call
# ---------------------------------------------------------------------------
def alphazero_forward(x_nchw, kp, *, H, W, A):
    B, C = x_nchw.shape[0], x_nchw.shape[1]
    Hp, Wp = H + 2, W + 2

    x = jnp.transpose(x_nchw, (0, 2, 3, 1)).astype(jnp.float32)   # (B,H,W,C)
    x = jnp.pad(x, ((0, 0), (1, 1), (1, 1), (0, 0)))              # (B,Hp,Wp,C)
    x = jnp.transpose(x, (1, 0, 2, 3)).reshape(Hp * B, Wp * C)    # row = ip*B+b
    x = x.astype(jnp.bfloat16)

    kernel = functools.partial(fused_forward_kernel,
                               B=B, H=H, W=W, Hp=Hp, Wp=Wp, A=A)
    return pl.pallas_call(
        kernel,
        out_shape=(jax.ShapeDtypeStruct((B, A), jnp.float32),
                   jax.ShapeDtypeStruct((B, 1), jnp.float32)),
        in_specs=[_vmem()] * 17,
        out_specs=(_vmem(), _vmem()),
        compiler_params=pltpu.CompilerParams(vmem_limit_bytes=16 * 1024 * 1024),
    )(x, kp["rmask"],
      kp["wb1"], kp["g1"], kp["be1"], kp["cs1"], kp["bc1"],
      kp["wb2"], kp["g2"], kp["be2"], kp["cs2"], kp["bc2"],
      kp["wfc"], kp["gfc"], kp["befc"],
      kp["wh"], kp["bh"])


# ---------------------------------------------------------------------------
# One-time parameter preparation (host side): banded conv weights, channel
# reduce/broadcast matrices, expanded/permuted fc1 weight, row mask.
# ---------------------------------------------------------------------------
def prepare_params(p, B, C, H, W):
    Hp, Wp = H + 2, W + 2

    def banded(w_hwio):
        # (3,3,Cin,Cout) HWIO -> (3, Wp*Cin, Wp*Cout): kw offsets folded into a
        # block-tridiagonal weight so the conv is 3 matmuls (one per kh).
        w = np.asarray(w_hwio, np.float32)
        cin, cout = w.shape[2], w.shape[3]
        wb = np.zeros((3, Wp * cin, Wp * cout), np.float32)
        for kh in range(3):
            for kw in range(3):
                for jo in range(Wp):
                    jp = jo + kw - 1
                    if 0 <= jp < Wp:
                        wb[kh, jp * cin:(jp + 1) * cin,
                           jo * cout:(jo + 1) * cout] = w[kh, kw]
        return jnp.asarray(wb, jnp.bfloat16)

    def ch_reduce(cout):
        # csum: (Wp*cout, cout) 0/1, sums valid board columns per channel.
        # bcast = csum.T broadcasts per-channel scale/shift back to lanes
        # (zero at padded columns, which re-zeros them for free).
        colv = np.zeros((Wp,), np.float32)
        colv[1:W + 1] = 1.0
        cs = np.kron(colv[:, None], np.eye(cout, dtype=np.float32))
        return jnp.asarray(cs), jnp.asarray(np.ascontiguousarray(cs.T))

    rmask = np.zeros((B * Hp, 1), np.float32)
    rmask[B:(H + 1) * B, 0] = 1.0                 # rows ip*B+b valid iff 1<=ip<=H

    cs1, bc1 = ch_reduce(32)
    cs2, bc2 = ch_reduce(64)

    # fc1 rows: torch NCHW-flatten order c*H*W + i*W + j  ->  kernel column
    # order (ip*Wp + jp)*64 + c with zero rows at padded positions.
    wfc = np.asarray(p["fc1_w"], np.float32).reshape(64, H, W, 256)
    wfc = np.transpose(wfc, (1, 2, 0, 3))                    # (H, W, 64, 256)
    wfc = np.pad(wfc, ((1, 1), (1, 1), (0, 0), (0, 0)))      # (Hp, Wp, 64, 256)
    wfc = wfc.reshape(Hp * Wp * 64, 256)

    return {
        "rmask": jnp.asarray(rmask),
        "wb1": banded(p["conv1_w"]), "g1": p["bn1_g"], "be1": p["bn1_b"],
        "cs1": cs1, "bc1": bc1,
        "wb2": banded(p["conv2_w"]), "g2": p["bn2_g"], "be2": p["bn2_b"],
        "cs2": cs2, "bc2": bc2,
        "wfc": jnp.asarray(wfc, jnp.bfloat16),
        "gfc": p["bnfc_g"], "befc": p["bnfc_b"],
        "wh": jnp.concatenate([p["policy_w"], p["value_w"]],
                              axis=1).astype(jnp.bfloat16),
        "bh": jnp.concatenate([p["policy_b"], p["value_b"]], axis=1),
        # conv1_b / conv2_b / fc1_b intentionally dropped: exact cancellation
        # under train-mode (batch-statistics) BatchNorm.
    }


# ---------------------------------------------------------------------------
# Pure-JAX reference (matches the PyTorch module, biases included, f32 HIGHEST)
# ---------------------------------------------------------------------------
def reference_forward(x_nchw, p):
    b = x_nchw.shape[0]
    x = jnp.transpose(x_nchw, (0, 2, 3, 1))
    hp = lax.Precision.HIGHEST

    def conv_bn_relu_ref(x, w, bias, g, be):
        y = lax.conv_general_dilated(x, w, (1, 1), "SAME",
                                     dimension_numbers=("NHWC", "HWIO", "NHWC"),
                                     precision=hp)
        y = y + bias.reshape(1, 1, 1, -1)
        mean = jnp.mean(y, axis=(0, 1, 2), keepdims=True)
        var = jnp.mean(jnp.square(y - mean), axis=(0, 1, 2), keepdims=True)
        y = (y - mean) * lax.rsqrt(var + EPS) * g.reshape(1, 1, 1, -1) \
            + be.reshape(1, 1, 1, -1)
        return jnp.maximum(y, 0.0)

    h = conv_bn_relu_ref(x, p["conv1_w"], p["conv1_b"], p["bn1_g"], p["bn1_b"])
    h = conv_bn_relu_ref(h, p["conv2_w"], p["conv2_b"], p["bn2_g"], p["bn2_b"])
    flat = jnp.transpose(h, (0, 3, 1, 2)).reshape(b, -1)     # torch NCHW flatten

    z = jnp.dot(flat, p["fc1_w"], precision=hp) + p["fc1_b"]
    mean = jnp.mean(z, axis=0, keepdims=True)
    var = jnp.mean(jnp.square(z - mean), axis=0, keepdims=True)
    z = jnp.maximum((z - mean) * lax.rsqrt(var + EPS) * p["bnfc_g"]
                    + p["bnfc_b"], 0.0)

    logits = jnp.dot(z, p["policy_w"], precision=hp) + p["policy_b"]
    pol = jax.nn.log_softmax(logits, axis=1)
    val = jnp.tanh(jnp.dot(z, p["value_w"], precision=hp) + p["value_b"])
    return pol, val


if __name__ == "__main__":
    B, C, H, W = 8, 4, 8, 8          # input_shape = (4, 8, 8), batch 8
    A = 8                            # num_actions

    root = jax.random.PRNGKey(0)
    kx, kpar = jax.random.split(root)
    keys = jax.random.split(kpar, 16)

    def nrm(k, shape, scale=0.1):
        return scale * jax.random.normal(k, shape, jnp.float32)

    params = {
        "conv1_w": nrm(keys[0], (3, 3, C, 32)),       # HWIO
        "conv1_b": nrm(keys[1], (1, 32)),
        "bn1_g":   1.0 + nrm(keys[2], (1, 32)),
        "bn1_b":   nrm(keys[3], (1, 32)),
        "conv2_w": nrm(keys[4], (3, 3, 32, 64)),
        "conv2_b": nrm(keys[5], (1, 64)),
        "bn2_g":   1.0 + nrm(keys[6], (1, 64)),
        "bn2_b":   nrm(keys[7], (1, 64)),
        "fc1_w":   nrm(keys[8], (64 * H * W, 256), 0.02),
        "fc1_b":   nrm(keys[9], (1, 256)),
        "bnfc_g":  1.0 + nrm(keys[10], (1, 256)),
        "bnfc_b":  nrm(keys[11], (1, 256)),
        "policy_w": nrm(keys[12], (256, A)),
        "policy_b": nrm(keys[13], (1, A)),
        "value_w":  nrm(keys[14], (256, 1)),
        "value_b":  nrm(keys[15], (1, 1)),
    }

    x = jax.random.normal(kx, (B, C, H, W), jnp.float32)

    kernel_params = prepare_params(params, B, C, H, W)    # one-time prep
    fwd = jax.jit(functools.partial(alphazero_forward, H=H, W=W, A=A))

    policy, value = jax.block_until_ready(fwd(x, kernel_params))

    pol_ref, val_ref = reference_forward(x, params)
    # Kernel uses bf16 MXU operands (f32 accumulation / BN stats); reference is
    # f32 HIGHEST -> tolerance reflects bf16 operand rounding through 3 BN layers.
    np.testing.assert_allclose(np.asarray(policy), np.asarray(pol_ref),
                               atol=5e-2, rtol=5e-2)
    np.testing.assert_allclose(np.asarray(value), np.asarray(val_ref),
                               atol=5e-2, rtol=5e-2)

    print("KERNEL_OK")
</pallas_src>

<mosaic_0001>
module attributes {stable_mosaic.version = 11 : i64} {
  func.func @fused_forward_kernel(%arg0: memref<80x40xbf16, #tpu.memory_space<vmem>>, %arg1: memref<80x1xf32, #tpu.memory_space<vmem>>, %arg2: memref<3x40x320xbf16, #tpu.memory_space<vmem>>, %arg3: memref<1x32xf32, #tpu.memory_space<vmem>>, %arg4: memref<1x32xf32, #tpu.memory_space<vmem>>, %arg5: memref<320x32xf32, #tpu.memory_space<vmem>>, %arg6: memref<32x320xf32, #tpu.memory_space<vmem>>, %arg7: memref<3x320x640xbf16, #tpu.memory_space<vmem>>, %arg8: memref<1x64xf32, #tpu.memory_space<vmem>>, %arg9: memref<1x64xf32, #tpu.memory_space<vmem>>, %arg10: memref<640x64xf32, #tpu.memory_space<vmem>>, %arg11: memref<64x640xf32, #tpu.memory_space<vmem>>, %arg12: memref<6400x256xbf16, #tpu.memory_space<vmem>>, %arg13: memref<1x256xf32, #tpu.memory_space<vmem>>, %arg14: memref<1x256xf32, #tpu.memory_space<vmem>>, %arg15: memref<256x9xbf16, #tpu.memory_space<vmem>>, %arg16: memref<1x9xf32, #tpu.memory_space<vmem>>, %arg17: memref<8x8xf32, #tpu.memory_space<vmem>>, %arg18: memref<8x1xf32, #tpu.memory_space<vmem>>) attributes {dimension_semantics = [], scalar_prefetch = 0 : i64, scratch_operands = 0 : i64, tpu.core_type = #tpu.core_type<tc>} {
    %c0 = arith.constant 0 : index
    %c0_0 = arith.constant 0 : index
    %0 = vector.load %arg1[%c0, %c0_0] : memref<80x1xf32, #tpu.memory_space<vmem>>, vector<80x1xf32>
    %c0_1 = arith.constant 0 : index
    %c0_2 = arith.constant 0 : index
    %1 = vector.load %arg0[%c0_1, %c0_2] : memref<80x40xbf16, #tpu.memory_space<vmem>>, vector<80x40xbf16>
    %c0_3 = arith.constant 0 : index
    %c0_4 = arith.constant 0 : index
    %2 = vector.load %arg3[%c0_3, %c0_4] : memref<1x32xf32, #tpu.memory_space<vmem>>, vector<1x32xf32>
    %c0_5 = arith.constant 0 : index
    %c0_6 = arith.constant 0 : index
    %3 = vector.load %arg4[%c0_5, %c0_6] : memref<1x32xf32, #tpu.memory_space<vmem>>, vector<1x32xf32>
    %c0_7 = arith.constant 0 : index
    %c0_8 = arith.constant 0 : index
    %4 = vector.load %arg5[%c0_7, %c0_8] : memref<320x32xf32, #tpu.memory_space<vmem>>, vector<320x32xf32>
    %c0_9 = arith.constant 0 : index
    %c0_10 = arith.constant 0 : index
    %5 = vector.load %arg6[%c0_9, %c0_10] : memref<32x320xf32, #tpu.memory_space<vmem>>, vector<32x320xf32>
    %cst = arith.constant 0.000000e+00 : bf16
    %6 = vector.broadcast %cst : bf16 to vector<8x40xbf16>
    %7 = tpu.concatenate %6, %1, %6 in 0 : vector<8x40xbf16>, vector<80x40xbf16>, vector<8x40xbf16> -> vector<96x40xbf16>
    %cst_11 = arith.constant 0.000000e+00 : f32
    %8 = vector.broadcast %cst_11 : f32 to vector<80x320xf32>
    %9 = vector.extract_strided_slice %7 {offsets = [0, 0], sizes = [80, 40], strides = [1, 1]} : vector<96x40xbf16> to vector<80x40xbf16>
    %c0_12 = arith.constant 0 : index
    %c0_13 = arith.constant 0 : index
    %c0_14 = arith.constant 0 : index
    %10 = vector.load %arg2[%c0_12, %c0_13, %c0_14] : memref<3x40x320xbf16, #tpu.memory_space<vmem>>, vector<1x40x320xbf16>
    %11 = vector.shape_cast %10 : vector<1x40x320xbf16> to vector<40x320xbf16>
    %cst_15 = arith.constant dense<0.000000e+00> : vector<80x320xf32>
    %12 = tpu.matmul %9, %11, %cst_15 {dimension_numbers = #tpu.dot_dimension_numbers<[1], [0], [0], [1], [0, 0, 1, 1], [], []>} : vector<80x40xbf16>, vector<40x320xbf16>, vector<80x320xf32> -> vector<80x320xf32>
    %13 = arith.addf %8, %12 : vector<80x320xf32>
    %14 = vector.extract_strided_slice %7 {offsets = [8, 0], sizes = [80, 40], strides = [1, 1]} : vector<96x40xbf16> to vector<80x40xbf16>
    %c1 = arith.constant 1 : index
    %c0_16 = arith.constant 0 : index
    %c0_17 = arith.constant 0 : index
    %15 = vector.load %arg2[%c1, %c0_16, %c0_17] : memref<3x40x320xbf16, #tpu.memory_space<vmem>>, vector<1x40x320xbf16>
    %16 = vector.shape_cast %15 : vector<1x40x320xbf16> to vector<40x320xbf16>
    %cst_18 = arith.constant dense<0.000000e+00> : vector<80x320xf32>
    %17 = tpu.matmul %14, %16, %cst_18 {dimension_numbers = #tpu.dot_dimension_numbers<[1], [0], [0], [1], [0, 0, 1, 1], [], []>} : vector<80x40xbf16>, vector<40x320xbf16>, vector<80x320xf32> -> vector<80x320xf32>
    %18 = arith.addf %13, %17 : vector<80x320xf32>
    %19 = vector.extract_strided_slice %7 {offsets = [16, 0], sizes = [80, 40], strides = [1, 1]} : vector<96x40xbf16> to vector<80x40xbf16>
    %c2 = arith.constant 2 : index
    %c0_19 = arith.constant 0 : index
    %c0_20 = arith.constant 0 : index
    %20 = vector.load %arg2[%c2, %c0_19, %c0_20] : memref<3x40x320xbf16, #tpu.memory_space<vmem>>, vector<1x40x320xbf16>
    %21 = vector.shape_cast %20 : vector<1x40x320xbf16> to vector<40x320xbf16>
    %cst_21 = arith.constant dense<0.000000e+00> : vector<80x320xf32>
    %22 = tpu.matmul %19, %21, %cst_21 {dimension_numbers = #tpu.dot_dimension_numbers<[1], [0], [0], [1], [0, 0, 1, 1], [], []>} : vector<80x40xbf16>, vector<40x320xbf16>, vector<80x320xf32> -> vector<80x320xf32>
    %23 = arith.addf %18, %22 : vector<80x320xf32>
    %24 = vector.broadcast %0 : vector<80x1xf32> to vector<80x320xf32>
    %25 = arith.mulf %23, %24 : vector<80x320xf32>
    %cst_22 = arith.constant dense<0.000000e+00> : vector<320xf32>
    %26 = vector.multi_reduction <add>, %25, %cst_22 [0] : vector<80x320xf32> to vector<320xf32>
    %27 = vector.shape_cast %26 : vector<320xf32> to vector<1x320xf32>
    %cst_23 = arith.constant dense<0.000000e+00> : vector<1x32xf32>
    %28 = tpu.matmul %27, %4, %cst_23 {dimension_numbers = #tpu.dot_dimension_numbers<[1], [0], [0], [1], [0, 0, 1, 1], [], []>} : vector<1x320xf32>, vector<320x32xf32>, vector<1x32xf32> -> vector<1x32xf32>
    %29 = arith.mulf %25, %23 : vector<80x320xf32>
    %cst_24 = arith.constant dense<0.000000e+00> : vector<320xf32>
    %30 = vector.multi_reduction <add>, %29, %cst_24 [0] : vector<80x320xf32> to vector<320xf32>
    %31 = vector.shape_cast %30 : vector<320xf32> to vector<1x320xf32>
    %cst_25 = arith.constant dense<0.000000e+00> : vector<1x32xf32>
    %32 = tpu.matmul %31, %4, %cst_25 {dimension_numbers = #tpu.dot_dimension_numbers<[1], [0], [0], [1], [0, 0, 1, 1], [], []>} : vector<1x320xf32>, vector<320x32xf32>, vector<1x32xf32> -> vector<1x32xf32>
    %cst_26 = arith.constant 5.120000e+02 : f32
    %33 = vector.broadcast %cst_26 : f32 to vector<1x32xf32>
    %34 = arith.divf %28, %33 : vector<1x32xf32>
    %cst_27 = arith.constant 5.120000e+02 : f32
    %35 = vector.broadcast %cst_27 : f32 to vector<1x32xf32>
    %36 = arith.divf %32, %35 : vector<1x32xf32>
    %37 = arith.mulf %34, %34 : vector<1x32xf32>
    %38 = arith.subf %36, %37 : vector<1x32xf32>
    %cst_28 = arith.constant 9.99999974E-6 : f32
    %39 = vector.broadcast %cst_28 : f32 to vector<1x32xf32>
    %40 = arith.addf %38, %39 : vector<1x32xf32>
    %41 = math.rsqrt %40 : vector<1x32xf32>
    %42 = arith.mulf %2, %41 : vector<1x32xf32>
    %43 = arith.mulf %34, %42 : vector<1x32xf32>
    %44 = arith.subf %3, %43 : vector<1x32xf32>
    %cst_29 = arith.constant dense<0.000000e+00> : vector<1x320xf32>
    %45 = tpu.matmul %42, %5, %cst_29 {dimension_numbers = #tpu.dot_dimension_numbers<[1], [0], [0], [1], [0, 0, 1, 1], [], []>} : vector<1x32xf32>, vector<32x320xf32>, vector<1x320xf32> -> vector<1x320xf32>
    %46 = vector.broadcast %45 : vector<1x320xf32> to vector<80x320xf32>
    %47 = arith.mulf %23, %46 : vector<80x320xf32>
    %cst_30 = arith.constant dense<0.000000e+00> : vector<1x320xf32>
    %48 = tpu.matmul %44, %5, %cst_30 {dimension_numbers = #tpu.dot_dimension_numbers<[1], [0], [0], [1], [0, 0, 1, 1], [], []>} : vector<1x32xf32>, vector<32x320xf32>, vector<1x320xf32> -> vector<1x320xf32>
    %49 = vector.broadcast %48 : vector<1x320xf32> to vector<80x320xf32>
    %50 = arith.addf %47, %49 : vector<80x320xf32>
    %cst_31 = arith.constant 0.000000e+00 : f32
    %51 = vector.broadcast %cst_31 : f32 to vector<80x320xf32>
    %52 = arith.maximumf %50, %51 : vector<80x320xf32>
    %53 = vector.broadcast %0 : vector<80x1xf32> to vector<80x320xf32>
    %54 = arith.mulf %52, %53 : vector<80x320xf32>
    %55 = arith.truncf %54 : vector<80x320xf32> to vector<80x320xbf16>
    %c0_32 = arith.constant 0 : index
    %c0_33 = arith.constant 0 : index
    %56 = vector.load %arg8[%c0_32, %c0_33] : memref<1x64xf32, #tpu.memory_space<vmem>>, vector<1x64xf32>
    %c0_34 = arith.constant 0 : index
    %c0_35 = arith.constant 0 : index
    %57 = vector.load %arg9[%c0_34, %c0_35] : memref<1x64xf32, #tpu.memory_space<vmem>>, vector<1x64xf32>
    %c0_36 = arith.constant 0 : index
    %c0_37 = arith.constant 0 : index
    %58 = vector.load %arg10[%c0_36, %c0_37] : memref<640x64xf32, #tpu.memory_space<vmem>>, vector<640x64xf32>
    %c0_38 = arith.constant 0 : index
    %c0_39 = arith.constant 0 : index
    %59 = vector.load %arg11[%c0_38, %c0_39] : memref<64x640xf32, #tpu.memory_space<vmem>>, vector<64x640xf32>
    %cst_40 = arith.constant 0.000000e+00 : bf16
    %60 = vector.broadcast %cst_40 : bf16 to vector<8x320xbf16>
    %61 = tpu.concatenate %60, %55, %60 in 0 : vector<8x320xbf16>, vector<80x320xbf16>, vector<8x320xbf16> -> vector<96x320xbf16>
    %cst_41 = arith.constant 0.000000e+00 : f32
    %62 = vector.broadcast %cst_41 : f32 to vector<80x640xf32>
    %63 = vector.extract_strided_slice %61 {offsets = [0, 0], sizes = [80, 320], strides = [1, 1]} : vector<96x320xbf16> to vector<80x320xbf16>
    %c0_42 = arith.constant 0 : index
    %c0_43 = arith.constant 0 : index
    %c0_44 = arith.constant 0 : index
    %64 = vector.load %arg7[%c0_42, %c0_43, %c0_44] : memref<3x320x640xbf16, #tpu.memory_space<vmem>>, vector<1x320x640xbf16>
    %65 = vector.shape_cast %64 : vector<1x320x640xbf16> to vector<320x640xbf16>
    %cst_45 = arith.constant dense<0.000000e+00> : vector<80x640xf32>
    %66 = tpu.matmul %63, %65, %cst_45 {dimension_numbers = #tpu.dot_dimension_numbers<[1], [0], [0], [1], [0, 0, 1, 1], [], []>} : vector<80x320xbf16>, vector<320x640xbf16>, vector<80x640xf32> -> vector<80x640xf32>
    %67 = arith.addf %62, %66 : vector<80x640xf32>
    %68 = vector.extract_strided_slice %61 {offsets = [8, 0], sizes = [80, 320], strides = [1, 1]} : vector<96x320xbf16> to vector<80x320xbf16>
    %c1_46 = arith.constant 1 : index
    %c0_47 = arith.constant 0 : index
    %c0_48 = arith.constant 0 : index
    %69 = vector.load %arg7[%c1_46, %c0_47, %c0_48] : memref<3x320x640xbf16, #tpu.memory_space<vmem>>, vector<1x320x640xbf16>
    %70 = vector.shape_cast %69 : vector<1x320x640xbf16> to vector<320x640xbf16>
    %cst_49 = arith.constant dense<0.000000e+00> : vector<80x640xf32>
    %71 = tpu.matmul %68, %70, %cst_49 {dimension_numbers = #tpu.dot_dimension_numbers<[1], [0], [0], [1], [0, 0, 1, 1], [], []>} : vector<80x320xbf16>, vector<320x640xbf16>, vector<80x640xf32> -> vector<80x640xf32>
    %72 = arith.addf %67, %71 : vector<80x640xf32>
    %73 = vector.extract_strided_slice %61 {offsets = [16, 0], sizes = [80, 320], strides = [1, 1]} : vector<96x320xbf16> to vector<80x320xbf16>
    %c2_50 = arith.constant 2 : index
    %c0_51 = arith.constant 0 : index
    %c0_52 = arith.constant 0 : index
    %74 = vector.load %arg7[%c2_50, %c0_51, %c0_52] : memref<3x320x640xbf16, #tpu.memory_space<vmem>>, vector<1x320x640xbf16>
    %75 = vector.shape_cast %74 : vector<1x320x640xbf16> to vector<320x640xbf16>
    %cst_53 = arith.constant dense<0.000000e+00> : vector<80x640xf32>
    %76 = tpu.matmul %73, %75, %cst_53 {dimension_numbers = #tpu.dot_dimension_numbers<[1], [0], [0], [1], [0, 0, 1, 1], [], []>} : vector<80x320xbf16>, vector<320x640xbf16>, vector<80x640xf32> -> vector<80x640xf32>
    %77 = arith.addf %72, %76 : vector<80x640xf32>
    %78 = vector.broadcast %0 : vector<80x1xf32> to vector<80x640xf32>
    %79 = arith.mulf %77, %78 : vector<80x640xf32>
    %cst_54 = arith.constant dense<0.000000e+00> : vector<640xf32>
    %80 = vector.multi_reduction <add>, %79, %cst_54 [0] : vector<80x640xf32> to vector<640xf32>
    %81 = vector.shape_cast %80 : vector<640xf32> to vector<1x640xf32>
    %cst_55 = arith.constant dense<0.000000e+00> : vector<1x64xf32>
    %82 = tpu.matmul %81, %58, %cst_55 {dimension_numbers = #tpu.dot_dimension_numbers<[1], [0], [0], [1], [0, 0, 1, 1], [], []>} : vector<1x640xf32>, vector<640x64xf32>, vector<1x64xf32> -> vector<1x64xf32>
    %83 = arith.mulf %79, %77 : vector<80x640xf32>
    %cst_56 = arith.constant dense<0.000000e+00> : vector<640xf32>
    %84 = vector.multi_reduction <add>, %83, %cst_56 [0] : vector<80x640xf32> to vector<640xf32>
    %85 = vector.shape_cast %84 : vector<640xf32> to vector<1x640xf32>
    %cst_57 = arith.constant dense<0.000000e+00> : vector<1x64xf32>
    %86 = tpu.matmul %85, %58, %cst_57 {dimension_numbers = #tpu.dot_dimension_numbers<[1], [0], [0], [1], [0, 0, 1, 1], [], []>} : vector<1x640xf32>, vector<640x64xf32>, vector<1x64xf32> -> vector<1x64xf32>
    %cst_58 = arith.constant 5.120000e+02 : f32
    %87 = vector.broadcast %cst_58 : f32 to vector<1x64xf32>
    %88 = arith.divf %82, %87 : vector<1x64xf32>
    %cst_59 = arith.constant 5.120000e+02 : f32
    %89 = vector.broadcast %cst_59 : f32 to vector<1x64xf32>
    %90 = arith.divf %86, %89 : vector<1x64xf32>
    %91 = arith.mulf %88, %88 : vector<1x64xf32>
    %92 = arith.subf %90, %91 : vector<1x64xf32>
    %cst_60 = arith.constant 9.99999974E-6 : f32
    %93 = vector.broadcast %cst_60 : f32 to vector<1x64xf32>
    %94 = arith.addf %92, %93 : vector<1x64xf32>
    %95 = math.rsqrt %94 : vector<1x64xf32>
    %96 = arith.mulf %56, %95 : vector<1x64xf32>
    %97 = arith.mulf %88, %96 : vector<1x64xf32>
    %98 = arith.subf %57, %97 : vector<1x64xf32>
    %cst_61 = arith.constant dense<0.000000e+00> : vector<1x640xf32>
    %99 = tpu.matmul %96, %59, %cst_61 {dimension_numbers = #tpu.dot_dimension_numbers<[1], [0], [0], [1], [0, 0, 1, 1], [], []>} : vector<1x64xf32>, vector<64x640xf32>, vector<1x640xf32> -> vector<1x640xf32>
    %100 = vector.broadcast %99 : vector<1x640xf32> to vector<80x640xf32>
    %101 = arith.mulf %77, %100 : vector<80x640xf32>
    %cst_62 = arith.constant dense<0.000000e+00> : vector<1x640xf32>
    %102 = tpu.matmul %98, %59, %cst_62 {dimension_numbers = #tpu.dot_dimension_numbers<[1], [0], [0], [1], [0, 0, 1, 1], [], []>} : vector<1x64xf32>, vector<64x640xf32>, vector<1x640xf32> -> vector<1x640xf32>
    %103 = vector.broadcast %102 : vector<1x640xf32> to vector<80x640xf32>
    %104 = arith.addf %101, %103 : vector<80x640xf32>
    %cst_63 = arith.constant 0.000000e+00 : f32
    %105 = vector.broadcast %cst_63 : f32 to vector<80x640xf32>
    %106 = arith.maximumf %104, %105 : vector<80x640xf32>
    %107 = vector.broadcast %0 : vector<80x1xf32> to vector<80x640xf32>
    %108 = arith.mulf %106, %107 : vector<80x640xf32>
    %109 = arith.truncf %108 : vector<80x640xf32> to vector<80x640xbf16>
    %110 = vector.extract_strided_slice %109 {offsets = [0, 0], sizes = [8, 640], strides = [1, 1]} : vector<80x640xbf16> to vector<8x640xbf16>
    %111 = vector.extract_strided_slice %109 {offsets = [8, 0], sizes = [8, 640], strides = [1, 1]} : vector<80x640xbf16> to vector<8x640xbf16>
    %112 = vector.extract_strided_slice %109 {offsets = [16, 0], sizes = [8, 640], strides = [1, 1]} : vector<80x640xbf16> to vector<8x640xbf16>
    %113 = vector.extract_strided_slice %109 {offsets = [24, 0], sizes = [8, 640], strides = [1, 1]} : vector<80x640xbf16> to vector<8x640xbf16>
    %114 = vector.extract_strided_slice %109 {offsets = [32, 0], sizes = [8, 640], strides = [1, 1]} : vector<80x640xbf16> to vector<8x640xbf16>
    %115 = vector.extract_strided_slice %109 {offsets = [40, 0], sizes = [8, 640], strides = [1, 1]} : vector<80x640xbf16> to vector<8x640xbf16>
    %116 = vector.extract_strided_slice %109 {offsets = [48, 0], sizes = [8, 640], strides = [1, 1]} : vector<80x640xbf16> to vector<8x640xbf16>
    %117 = vector.extract_strided_slice %109 {offsets = [56, 0], sizes = [8, 640], strides = [1, 1]} : vector<80x640xbf16> to vector<8x640xbf16>
    %118 = vector.extract_strided_slice %109 {offsets = [64, 0], sizes = [8, 640], strides = [1, 1]} : vector<80x640xbf16> to vector<8x640xbf16>
    %119 = vector.extract_strided_slice %109 {offsets = [72, 0], sizes = [8, 640], strides = [1, 1]} : vector<80x640xbf16> to vector<8x640xbf16>
    %120 = tpu.concatenate %110, %111, %112, %113, %114, %115, %116, %117, %118, %119 in 1 : vector<8x640xbf16>, vector<8x640xbf16>, vector<8x640xbf16>, vector<8x640xbf16>, vector<8x640xbf16>, vector<8x640xbf16>, vector<8x640xbf16>, vector<8x640xbf16>, vector<8x640xbf16>, vector<8x640xbf16> -> vector<8x6400xbf16>
    %c0_64 = arith.constant 0 : index
    %c0_65 = arith.constant 0 : index
    %121 = vector.load %arg12[%c0_64, %c0_65] : memref<6400x256xbf16, #tpu.memory_space<vmem>>, vector<6400x256xbf16>
    %cst_66 = arith.constant dense<0.000000e+00> : vector<8x256xf32>
    %122 = tpu.matmul %120, %121, %cst_66 {dimension_numbers = #tpu.dot_dimension_numbers<[1], [0], [0], [1], [0, 0, 1, 1], [], []>} : vector<8x6400xbf16>, vector<6400x256xbf16>, vector<8x256xf32> -> vector<8x256xf32>
    %cst_67 = arith.constant dense<0.000000e+00> : vector<256xf32>
    %123 = vector.multi_reduction <add>, %122, %cst_67 [0] : vector<8x256xf32> to vector<256xf32>
    %124 = vector.shape_cast %123 : vector<256xf32> to vector<1x256xf32>
    %cst_68 = arith.constant 8.000000e+00 : f32
    %125 = vector.broadcast %cst_68 : f32 to vector<1x256xf32>
    %126 = arith.divf %124, %125 : vector<1x256xf32>
    %127 = arith.mulf %122, %122 : vector<8x256xf32>
    %cst_69 = arith.constant dense<0.000000e+00> : vector<256xf32>
    %128 = vector.multi_reduction <add>, %127, %cst_69 [0] : vector<8x256xf32> to vector<256xf32>
    %129 = vector.shape_cast %128 : vector<256xf32> to vector<1x256xf32>
    %cst_70 = arith.constant 8.000000e+00 : f32
    %130 = vector.broadcast %cst_70 : f32 to vector<1x256xf32>
    %131 = arith.divf %129, %130 : vector<1x256xf32>
    %132 = arith.mulf %126, %126 : vector<1x256xf32>
    %133 = arith.subf %131, %132 : vector<1x256xf32>
    %134 = vector.broadcast %126 : vector<1x256xf32> to vector<8x256xf32>
    %135 = arith.subf %122, %134 : vector<8x256xf32>
    %cst_71 = arith.constant 9.99999974E-6 : f32
    %136 = vector.broadcast %cst_71 : f32 to vector<1x256xf32>
    %137 = arith.addf %133, %136 : vector<1x256xf32>
    %138 = math.rsqrt %137 : vector<1x256xf32>
    %139 = vector.broadcast %138 : vector<1x256xf32> to vector<8x256xf32>
    %140 = arith.mulf %135, %139 : vector<8x256xf32>
    %c0_72 = arith.constant 0 : index
    %c0_73 = arith.constant 0 : index
    %141 = vector.load %arg13[%c0_72, %c0_73] : memref<1x256xf32, #tpu.memory_space<vmem>>, vector<1x256xf32>
    %142 = vector.broadcast %141 : vector<1x256xf32> to vector<8x256xf32>
    %143 = arith.mulf %140, %142 : vector<8x256xf32>
    %c0_74 = arith.constant 0 : index
    %c0_75 = arith.constant 0 : index
    %144 = vector.load %arg14[%c0_74, %c0_75] : memref<1x256xf32, #tpu.memory_space<vmem>>, vector<1x256xf32>
    %145 = vector.broadcast %144 : vector<1x256xf32> to vector<8x256xf32>
    %146 = arith.addf %143, %145 : vector<8x256xf32>
    %cst_76 = arith.constant 0.000000e+00 : f32
    %147 = vector.broadcast %cst_76 : f32 to vector<8x256xf32>
    %148 = arith.maximumf %146, %147 : vector<8x256xf32>
    %149 = arith.truncf %148 : vector<8x256xf32> to vector<8x256xbf16>
    %c0_77 = arith.constant 0 : index
    %c0_78 = arith.constant 0 : index
    %150 = vector.load %arg15[%c0_77, %c0_78] : memref<256x9xbf16, #tpu.memory_space<vmem>>, vector<256x9xbf16>
    %cst_79 = arith.constant dense<0.000000e+00> : vector<8x9xf32>
    %151 = tpu.matmul %149, %150, %cst_79 {dimension_numbers = #tpu.dot_dimension_numbers<[1], [0], [0], [1], [0, 0, 1, 1], [], []>} : vector<8x256xbf16>, vector<256x9xbf16>, vector<8x9xf32> -> vector<8x9xf32>
    %c0_80 = arith.constant 0 : index
    %c0_81 = arith.constant 0 : index
    %152 = vector.load %arg16[%c0_80, %c0_81] : memref<1x9xf32, #tpu.memory_space<vmem>>, vector<1x9xf32>
    %153 = vector.broadcast %152 : vector<1x9xf32> to vector<8x9xf32>
    %154 = arith.addf %151, %153 : vector<8x9xf32>
    %155 = vector.extract_strided_slice %154 {offsets = [0, 0], sizes = [8, 8], strides = [1, 1]} : vector<8x9xf32> to vector<8x8xf32>
    %cst_82 = arith.constant dense<0xFF800000> : vector<8xf32>
    %156 = vector.multi_reduction <maximumf>, %155, %cst_82 [1] : vector<8x8xf32> to vector<8xf32>
    %157 = vector.shape_cast %156 : vector<8xf32> to vector<8x1xf32>
    %158 = vector.broadcast %157 : vector<8x1xf32> to vector<8x8xf32>
    %159 = arith.subf %155, %158 : vector<8x8xf32>
    %160 = math.exp %159 : vector<8x8xf32>
    %cst_83 = arith.constant dense<0.000000e+00> : vector<8xf32>
    %161 = vector.multi_reduction <add>, %160, %cst_83 [1] : vector<8x8xf32> to vector<8xf32>
    %162 = vector.shape_cast %161 : vector<8xf32> to vector<8x1xf32>
    %163 = math.log %162 : vector<8x1xf32>
    %164 = vector.broadcast %163 : vector<8x1xf32> to vector<8x8xf32>
    %165 = arith.subf %159, %164 : vector<8x8xf32>
    %c0_84 = arith.constant 0 : index
    %c0_85 = arith.constant 0 : index
    %166 = vector.load %arg17[%c0_84, %c0_85] : memref<8x8xf32, #tpu.memory_space<vmem>>, vector<8x8xf32>
    tpu.vector_store %arg17[%c0_84, %c0_85], %165 {strides = array<i32>} : memref<8x8xf32, #tpu.memory_space<vmem>>, vector<8x8xf32>,
    %167 = vector.extract_strided_slice %154 {offsets = [0, 8], sizes = [8, 1], strides = [1, 1]} : vector<8x9xf32> to vector<8x1xf32>
    %168 = math.tanh %167 : vector<8x1xf32>
    %c0_86 = arith.constant 0 : index
    %c0_87 = arith.constant 0 : index
    %169 = vector.load %arg18[%c0_86, %c0_87] : memref<8x1xf32, #tpu.memory_space<vmem>>, vector<8x1xf32>
    tpu.vector_store %arg18[%c0_86, %c0_87], %168 {strides = array<i32>} : memref<8x1xf32, #tpu.memory_space<vmem>>, vector<8x1xf32>,
    return
  }
}

</mosaic_0001>

<bundles_post_ra>
// kernel: alphazero_forward.1
= control target key start
LH: loop header
LB: loop body
LE: loop exit
PB: predicated region body
PF: predicated region fallthrough
CT: control target
= control target key end

     0   :  { %s21206_s0 = inlined_call_operand.vmem [shape: bf16[80,40], index: 0, kind: input, shape index: {}]   ;;  %s21207_s1 = inlined_call_operand.vmem [shape: f32[80,1], index: 1, kind: input, shape index: {}]   ;;  %s21208_s2 = inlined_call_operand.hbm [shape: bf16[3,40,320], index: 2, kind: input, shape index: {}]   ;;  %s21209_s3 = inlined_call_operand.hbm [shape: f32[1,32], index: 3, kind: input, shape index: {}]   ;;  %s21210_s4 = inlined_call_operand.hbm [shape: f32[1,32], index: 4, kind: input, shape index: {}]   ;;  %s21211_s5 = inlined_call_operand.vmem [shape: f32[320,32], index: 5, kind: input, shape index: {}]   ;;  %s21212_s6 = inlined_call_operand.hbm [shape: f32[32,320], index: 6, kind: input, shape index: {}]   ;;  %s21213_s7 = inlined_call_operand.hbm [shape: bf16[3,320,640], index: 7, kind: input, shape index: {}]   ;;  %s21214_s8 = inlined_call_operand.hbm [shape: f32[1,64], index: 8, kind: input, shape index: {}]   ;;  %s21215_s9 = inlined_call_operand.hbm [shape: f32[1,64], index: 9, kind: input, shape index: {}]   ;;  %s21216_s10 = inlined_call_operand.vmem [shape: f32[640,64], index: 10, kind: input, shape index: {}]   ;;  %s21217_s11 = inlined_call_operand.hbm [shape: f32[64,640], index: 11, kind: input, shape index: {}]   ;;  %s21218_s12 = inlined_call_operand.hbm [shape: bf16[6400,256], index: 12, kind: input, shape index: {}]   ;;  %s21219_s13 = inlined_call_operand.hbm [shape: f32[1,256], index: 13, kind: input, shape index: {}]   ;;  %s21220_s14 = inlined_call_operand.hbm [shape: f32[1,256], index: 14, kind: input, shape index: {}]   ;;  %s21221_s15 = inlined_call_operand.vmem [shape: bf16[256,9], index: 15, kind: input, shape index: {}]   ;;  %s21222_s16 = inlined_call_operand.hbm [shape: f32[1,9], index: 16, kind: input, shape index: {}]   ;;  %s21223_s17 = inlined_call_operand.hbm [shape: f32[8,8], index: 17, kind: output, shape index: {0}]   ;;  %s21224_s18 = inlined_call_operand.vmem [shape: f32[8,1], index: 18, kind: output, shape index: {1}]  }
   0x1   :  { %21334 = sst [smem:[#allocation109_spill]] %s21206_s0 }
   0x2   :  { %21335 = sst [smem:[#allocation110_spill]] %s21207_s1 }
   0x3   :  { %21336 = sst [smem:[#allocation111_spill]] %s21208_s2 }
   0x4   :  { %24 = vsyncpa [#allocation3], 0 }
   0x5   :  { %25 = vsyncpa [#allocation6], 0 }
   0x6   :  { %26 = vsyncpa [#allocation9], 0 }
   0x7   :  { %27 = vsyncpa [#allocation12], 0 }
   0x8   :  { %28 = vsyncpa [#allocation15], 0 }
   0x9   :  { %29 = vsyncpa [#allocation18], 0 }
   0xa   :  { %30 = vsyncpa [#allocation21], 0 }
   0xb   :  { %31 = vsyncpa [#allocation4], 0  ;;  %s17438_s27 = smov [#allocation5]   ;;  %s17439_s29 = smov [#allocation8]  }
   0xc   :  { %s54_s28 = sshll.u32 %s17438_s27, 4  ;;  %s75_s30 = sshll.u32 %s17439_s29, 4  ;;  %s55_s28 = int_to_ptr.vmem [resolvable:$true] %s54_s28  ;;  %s76_s30 = int_to_ptr.vmem [resolvable:$true] %s75_s30 }
   0xd   :  { %s17170_s0 = scalar_lea.vmem %s55_s28, 16  ;;  %s17174_s19 = scalar_lea.vmem %s55_s28, 32 }
   0xe   :  { %p17171_p0 = scmp.ne.s32.totalorder %s55_s28, %s17170_s0  ;;  %p17175_p1 = scmp.lt.s32.totalorder %s55_s28, %s55_s28 }
   0xf   :  { %p17176_p2 = scmp.lt.s32.totalorder %s17174_s19, %s17170_s0 }
  0x11   :  { %p17177_p3 = por %p17176_p2, %p17175_p1 }
  0x13   :  { %p17178_p4 = pnand %p17177_p3, %p17171_p0 }
  0x15   :  { %17181 = shalt.err (!%p17178_p4)
}
  0x16   :  { %57 = dma.hbm_to_vmem [thread:$0]  %s21209_s3, 16, %s55_s28, [#allocation6]  }
  0x17   :  { %s17190_s21 = scalar_lea.vmem %s76_s30, 1536  ;;  %p17195_p6 = scmp.lt.s32.totalorder %s76_s30, %s76_s30 }
  0x18   :  { %p17191_p5 = scmp.ne.s32.totalorder %s76_s30, %s17190_s21  ;;  %p17196_p7 = scmp.lt.s32.totalorder %s17190_s21, %s17190_s21 }
  0x1a   :  { %p17197_p8 = por %p17196_p7, %p17195_p6 }
  0x1c   :  { %p17198_p9 = pnand %p17197_p8, %p17191_p5 }
  0x1e   :  { %17201 = shalt.err (!%p17198_p9)
}
  0x1f   :  { %s17440_s22 = smov 384   ;;  %s17441_s2 = smov 24  }
  0x20   :  { %81 = dma.hbm_to_vmem [thread:$0]  %s21212_s6, 1536, %s76_s30, [#allocation9], %s17440_s22, %s17440_s22, %s17441_s2  }
  0x21   :  { %s17442_s25 = smov [#allocation11]   ;;  %s17443_s27 = smov [#allocation14]  }
  0x22   :  { %s100_s26 = sshll.u32 %s17442_s25, 4  ;;  %s121_s29 = sshll.u32 %s17443_s27, 4  ;;  %s101_s26 = int_to_ptr.vmem [resolvable:$true] %s100_s26  ;;  %s122_s29 = int_to_ptr.vmem [resolvable:$true] %s121_s29 }
  0x23   :  { %s17210_s3 = scalar_lea.vmem %s101_s26, 16  ;;  %s17214_s28 = scalar_lea.vmem %s101_s26, 32 }
  0x24   :  { %p17211_p10 = scmp.ne.s32.totalorder %s101_s26, %s17210_s3  ;;  %p17215_p11 = scmp.lt.s32.totalorder %s101_s26, %s101_s26 }
  0x25   :  { %p17216_p12 = scmp.lt.s32.totalorder %s17214_s28, %s17210_s3 }
  0x27   :  { %p17217_p13 = por %p17216_p12, %p17215_p11 }
  0x29   :  { %p17218_p0 = pnand %p17217_p13, %p17211_p10 }
  0x2b   :  { %17221 = shalt.err (!%p17218_p0)
}
  0x2c   :  { %103 = dma.hbm_to_vmem [thread:$0]  %s21214_s8, 16, %s101_s26, [#allocation12]  }
  0x2d   :  { %s17230_s1 = scalar_lea.vmem %s122_s29, 5120  ;;  %p17235_p2 = scmp.lt.s32.totalorder %s122_s29, %s122_s29 }
  0x2e   :  { %p17231_p1 = scmp.ne.s32.totalorder %s122_s29, %s17230_s1  ;;  %p17236_p3 = scmp.lt.s32.totalorder %s17230_s1, %s17230_s1 }
  0x30   :  { %p17237_p4 = por %p17236_p3, %p17235_p2 }
  0x32   :  { %p17238_p5 = pnand %p17237_p4, %p17231_p1 }
  0x34   :  { %17241 = shalt.err (!%p17238_p5)
}
  0x35   :  { %s17444_s6 = smov 640   ;;  %s17445_s30 = smov 40  }
  0x36   :  { %127 = dma.hbm_to_vmem [thread:$0]  %s21217_s11, 5120, %s122_s29, [#allocation15], %s17444_s6, %s17444_s6, %s17445_s30  }
  0x37   :  { %s17446_s22 = smov [#allocation17]   ;;  %s17447_s23 = smov [#allocation2]  }
  0x38   :  { %s146_s2 = sshll.u32 %s17446_s22, 4  ;;  %s41_s24 = sshll.u32 %s17447_s23, 4  ;;  %s147_s2 = int_to_ptr.vmem [resolvable:$true] %s146_s2  ;;  %s42_s24 = int_to_ptr.vmem [resolvable:$true] %s41_s24 }
  0x39   :  { %s17250_s8 = scalar_lea.vmem %s147_s2, 32  ;;  %p17255_p7 = scmp.lt.s32.totalorder %s147_s2, %s147_s2 }
  0x3a   :  { %p17251_p6 = scmp.ne.s32.totalorder %s147_s2, %s17250_s8  ;;  %p17256_p8 = scmp.lt.s32.totalorder %s17250_s8, %s17250_s8 }
  0x3c   :  { %p17257_p9 = por %p17256_p8, %p17255_p7 }
  0x3e   :  { %p17258_p10 = pnand %p17257_p9, %p17251_p6 }
  0x40   :  { %17261 = shalt.err (!%p17258_p10)
}
  0x41   :  { %149 = dma.hbm_to_vmem [thread:$0]  %s21219_s13, 32, %s147_s2, [#allocation18]  }
  0x42   :  { %s17270_s27 = scalar_lea.vmem %s42_s24, 2880  ;;  %p17275_p12 = scmp.lt.s32.totalorder %s42_s24, %s42_s24 }
  0x43   :  { %p17271_p11 = scmp.ne.s32.totalorder %s42_s24, %s17270_s27  ;;  %p17276_p13 = scmp.lt.s32.totalorder %s17270_s27, %s17270_s27 }
  0x45   :  { %p17277_p0 = por %p17276_p13, %p17275_p12 }
  0x47   :  { %p17278_p1 = pnand %p17277_p0, %p17271_p11 }
  0x49   :  { %17281 = shalt.err (!%p17278_p1)
}
  0x4a   :  { %s17448_s11 = smov 192   ;;  %s17449_s29 = smov 12  }
  0x4b   :  { %s21337_s0 = sld [smem:[#allocation111_spill]]  ;;  %s17450_s19 = smov [#allocation7]  }
  0x4c   :  { %s64_s1 = sshll.u32 %s17450_s19, 4  ;;  %s17451_s6 = smov [#allocation10]   ;;  %s65_s1 = int_to_ptr.vmem [resolvable:$true] %s64_s1 }
  0x4d   :  { %s87_s30 = sshll.u32 %s17451_s6, 4  ;;  %s17290_s13 = scalar_lea.vmem %s65_s1, 16  ;;  %s88_s30 = int_to_ptr.vmem [resolvable:$true] %s87_s30 }
  0x4e   :  { %p17291_p2 = scmp.ne.s32.totalorder %s65_s1, %s17290_s13  ;;  %s17294_s20 = scalar_lea.vmem %s65_s1, 32 }
  0x4f   :  { %p17295_p3 = scmp.lt.s32.totalorder %s65_s1, %s65_s1  ;;  %p17296_p4 = scmp.lt.s32.totalorder %s17294_s20, %s17290_s13 }
  0x51   :  { %47 = dma.hbm_to_vmem [thread:$0]  %s21337_s0, 2880, %s42_s24, [#allocation3], %s17448_s11, %s17448_s11, %s17449_s29  }
  0x52   :  { %p17297_p5 = por %p17296_p4, %p17295_p3 }
  0x54   :  { %p17298_p6 = pnand %p17297_p5, %p17291_p2 }
  0x56   :  { %17301 = shalt.err (!%p17298_p6)
}
  0x57   :  { %67 = dma.hbm_to_vmem [thread:$0]  %s21210_s4, 16, %s65_s1, [#allocation6]  }
  0x58   :  { %s17310_s2 = scalar_lea.vmem %s88_s30, 38400  ;;  %p17315_p8 = scmp.lt.s32.totalorder %s88_s30, %s88_s30 }
  0x59   :  { %p17311_p7 = scmp.ne.s32.totalorder %s88_s30, %s17310_s2  ;;  %p17316_p9 = scmp.lt.s32.totalorder %s17310_s2, %s17310_s2 }
  0x5b   :  { %p17317_p10 = por %p17316_p9, %p17315_p8 }
  0x5d   :  { %p17318_p11 = pnand %p17317_p10, %p17311_p7 }
  0x5f   :  { %17321 = shalt.err (!%p17318_p11)
}
  0x60   :  { %s17452_s23 = smov 320   ;;  %s17453_s24 = smov 20  }
  0x61   :  { %93 = dma.hbm_to_vmem [thread:$0]  %s21213_s7, 38400, %s88_s30, [#allocation9], %s17452_s23, %s17452_s23, %s17453_s24  }
  0x62   :  { %s17454_s26 = smov [#allocation13]   ;;  %s17455_s11 = smov [#allocation16]  }
  0x63   :  { %s110_s27 = sshll.u32 %s17454_s26, 4  ;;  %s133_s29 = sshll.u32 %s17455_s11, 4  ;;  %s111_s27 = int_to_ptr.vmem [resolvable:$true] %s110_s27  ;;  %s134_s29 = int_to_ptr.vmem [resolvable:$true] %s133_s29 }
  0x64   :  { %s17330_s4 = scalar_lea.vmem %s111_s27, 16  ;;  %s17334_s3 = scalar_lea.vmem %s111_s27, 32 }
  0x65   :  { %p17331_p12 = scmp.ne.s32.totalorder %s111_s27, %s17330_s4  ;;  %p17335_p13 = scmp.lt.s32.totalorder %s111_s27, %s111_s27 }
  0x66   :  { %p17336_p0 = scmp.lt.s32.totalorder %s17334_s3, %s17330_s4 }
  0x68   :  { %p17337_p1 = por %p17336_p0, %p17335_p13 }
  0x6a   :  { %p17338_p2 = pnand %p17337_p1, %p17331_p12 }
  0x6c   :  { %17341 = shalt.err (!%p17338_p2)
}
  0x6d   :  { %113 = dma.hbm_to_vmem [thread:$0]  %s21215_s9, 16, %s111_s27, [#allocation12]  }
  0x6e   :  { %s17350_s19 = scalar_lea.vmem %s134_s29, 102400  ;;  %p17355_p4 = scmp.lt.s32.totalorder %s134_s29, %s134_s29 }
  0x6f   :  { %p17351_p3 = scmp.ne.s32.totalorder %s134_s29, %s17350_s19  ;;  %p17356_p5 = scmp.lt.s32.totalorder %s17350_s19, %s17350_s19 }
  0x71   :  { %p17357_p6 = por %p17356_p5, %p17355_p4 }
  0x73   :  { %p17358_p7 = pnand %p17357_p6, %p17351_p3 }
  0x75   :  { %17361 = shalt.err (!%p17358_p7)
}
  0x76   :  { %s17456_s7 = smov 128   ;;  %s17457_s1 = smov 8  }
  0x77   :  { %139 = dma.hbm_to_vmem [thread:$0]  %s21218_s12, 102400, %s134_s29, [#allocation15], %s17456_s7, %s17456_s7, %s17457_s1  }
  0x78   :  { %s17458_s13 = smov [#allocation19]   ;;  %s17459_s21 = smov [#allocation20]  }
  0x79   :  { %s156_s20 = sshll.u32 %s17458_s13, 4  ;;  %s168_s22 = sshll.u32 %s17459_s21, 4  ;;  %s157_s20 = int_to_ptr.vmem [resolvable:$true] %s156_s20  ;;  %s169_s22 = int_to_ptr.vmem [resolvable:$true] %s168_s22 }
  0x7a   :  { %s17370_s9 = scalar_lea.vmem %s157_s20, 32  ;;  %p17375_p9 = scmp.lt.s32.totalorder %s157_s20, %s157_s20 }
  0x7b   :  { %p17371_p8 = scmp.ne.s32.totalorder %s157_s20, %s17370_s9  ;;  %p17376_p10 = scmp.lt.s32.totalorder %s17370_s9, %s17370_s9 }
  0x7d   :  { %p17377_p11 = por %p17376_p10, %p17375_p9 }
  0x7f   :  { %p17378_p12 = pnand %p17377_p11, %p17371_p8 }
  0x81   :  { %17381 = shalt.err (!%p17378_p12)
}
  0x82   :  { %159 = dma.hbm_to_vmem [thread:$0]  %s21220_s14, 32, %s157_s20, [#allocation18]  }
  0x83   :  { %s17390_s24 = scalar_lea.vmem %s169_s22, 16  ;;  %s17394_s12 = scalar_lea.vmem %s169_s22, 32 }
  0x84   :  { %p17391_p13 = scmp.ne.s32.totalorder %s169_s22, %s17390_s24  ;;  %p17395_p0 = scmp.lt.s32.totalorder %s169_s22, %s169_s22 }
  0x85   :  { %p17396_p1 = scmp.lt.s32.totalorder %s17394_s12, %s17390_s24 }
  0x87   :  { %p17397_p2 = por %p17396_p1, %p17395_p0 }
  0x89   :  { %p17398_p3 = pnand %p17397_p2, %p17391_p13 }
  0x8b   :  { %17401 = shalt.err (!%p17398_p3)
}
  0x8c   :  { %171 = dma.hbm_to_vmem [thread:$0]  %s21222_s16, 16, %s169_s22, [#allocation21]  }
  0x8d   :  { %17422 = dma.done.wait [#allocation3], 2880  }
  0x8e   :  { %17423 = vsyncadd [#allocation3], 4294964416 }
  0x8f   :  { %17424 = dma.done.wait [#allocation6], 32  }
  0x90   :  { %17425 = vsyncadd [#allocation6], 4294967264 }
  0x91   :  { %17426 = dma.done.wait [#allocation9], 39936  }
  0x92   :  { %17427 = vsyncadd [#allocation9], 4294927360 }
  0x93   :  { %17428 = dma.done.wait [#allocation12], 32  }
  0x94   :  { %17429 = vsyncadd [#allocation12], 4294967264 }
  0x95   :  { %17430 = dma.done.wait [#allocation15], 107520  }
  0x96   :  { %17431 = vsyncadd [#allocation15], 4294859776 }
  0x97   :  { %17432 = dma.done.wait [#allocation18], 64  }
  0x98   :  { %17433 = vsyncadd [#allocation18], 4294967232 }
  0x99   :  { %17434 = dma.done.wait [#allocation21], 16  }
  0x9a   :  { %17435 = vsyncadd [#allocation21], 4294967280  ;;  %v21227_v0 = vmov 0   ;;  %vm309_vm0 = vcmask 1043456   ;;  %v334_v1 = vld [vmem:[#allocation2 + $0x6c] sm:$0xff]  ;;  %s21338_s26 = sld [smem:[#allocation109_spill]] }
  0x9b   :  { %447 = vmatprep.mubr.bf16.mxu0 %v21227_v0  ;;  %487 = vmatprep.mubr.bf16.mxu1 %v21227_v0  ;;  %v13260_v2 = vcombine.high %v334_v1, %v334_v1  ;;  %v13259_v3 = vcombine.low %v334_v1, %v334_v1  ;;  %v15373_v4 = vld [vmem:[#allocation2 + $0x58] ss:$12 sps:$4 sm:$0xff]   ;;  %v15375_v5 = vld [vmem:[#allocation2 + $0x54] ss:$12 sps:$4 sm:$0xff]   ;;  %v15378_v14 = vld [vmem:[#allocation2 + $0x3c] ss:$12 sps:$4 sm:$0xff]  }
  0x9c   :  { %15369 = vset.pattern.permute.xlu0 %v21227_v0  ;;  %15370 = vset.pattern.permute.xlu1 %v21227_v0  ;;  %v15376_v7 = vld [vmem:[#allocation2 + $0x40] ss:$12 sps:$4 sm:$0xff]   ;;  %v323_v13 = vld [vmem:[#allocation2 + $0x30] sm:$0xff]  ;;  %vm390_vm1 = vcmask 326656   ;;  %v21229_v26 = vmov 0.0   ;;  %vm17462_vm2 = vmmov 0   ;;  %vm18839_vm5 = vmneg %vm309_vm0 }
  0x9d   :  { %13262 = vmatprep.subr.msk.bf16.mxu0 %vm309_vm0, %v13260_v2  ;;  %15336 = vmatprep.subr.msk.bf16.mxu1 %vm309_vm0, %v13260_v2  ;;  %v407_v6 = vsel %vm309_vm0, %v13259_v3, 0  ;;  %v13280_v20 = vcombine.high %v323_v13, %v323_v13  ;;  %v15384_v21 = vld [vmem:[#allocation2 + $0x74] ss:$0 sps:$4 sm:$0xff]   ;;  %v13279_v22 = vcombine.low %v323_v13, %v323_v13  ;;  %v15391_v29 = vld [vmem:[#allocation2 + $0x1c] ss:$12 sps:$4 sm:$0xff]   ;;  %s21339_s13 = sld [smem:[#allocation110_spill]] }
  0x9e   :  { %426 = vmatpush1.bf16.msra.mxu0 %v407_v6  ;;  %15339 = vmatpush1.bf16.msra.mxu1 %v407_v6  ;;  %v413_v27 = vsel %vm309_vm0, %v15384_v21, 0  ;;  %v15386_v30 = vld [vmem:[#allocation2 + $0x5c] ss:$12 sps:$4 sm:$0xff]   ;;  %v15389_v32 = vld [vmem:[#allocation2 + $0x18] ss:$12 sps:$4 sm:$0xff]   ;;  %v261_v6 = vld [vmem:[%s21211_s5 + $0xf0] sm:$0xff] }
  0x9f   :  { %427 = vmatprep.subr.bf16.mxu0 %v15373_v4  ;;  %15337 = vmatprep.subr.bf16.mxu1 %v15373_v4  ;;  %v626_v28 = vsel %vm309_vm0, %v13279_v22, 0  ;;  %v15396_v33 = vld [vmem:[#allocation2 + $0x4] ss:$12 sps:$4 sm:$0xff]   ;;  %v15392_v35 = vld [vmem:[#allocation2 + $0x38] ss:$0 sps:$4 sm:$0xff]   ;;  %v799_v36 = vld [vmem:[#allocation2 + $0xa8] sm:$0xff] }
  0xa0   :  { %v17606_v8 = vld [vmem:[%s21338_s26 + $0x4] sm:$0xff]   ;;  %v15379_v9 = vld [vmem:[%s21338_s26] ss:$0 sps:$4 sm:$0xff]   ;;  %v17632_v23 = vld [vmem:[%s21338_s26 + $0xc] sm:$0xff]   ;;  %v13300_v41 = vcombine.high %v799_v36, %v799_v36  ;;  %v632_v45 = vsel %vm309_vm0, %v15392_v35, 0  ;;  %v13299_v57 = vcombine.low %v799_v36, %v799_v36  ;;  %vm1148_vm3 = vcmask 523264  }
  0xa1   :  { %v17614_v10 = vld [vmem:[%s21338_s26 + $0x1c] sm:$0xff]   ;;  %v17617_v11 = vsel %vm309_vm0, 0, %v15379_v9  ;;  %v15382_v12 = vld [vmem:[%s21338_s26 + $0x24] ss:$0 sps:$4 sm:$0xff]   ;;  %v340_v16 = vrot.slane %v17606_v8, 4  ;;  %v342_v31 = vrot.slane %v17632_v23, 4 }
  0xa2   :  { %428 = vmatpush1.bf16.msra.mxu0 %v15375_v5  ;;  %15340 = vmatpush1.bf16.msra.mxu1 %v15375_v5  ;;  %v339_v15 = vrot.slane %v17617_v11, 4  ;;  %v17625_v17 = vsel %vm309_vm0, %v15382_v12, 0  ;;  %v346_v18 = vrot.slane %v17614_v10, 4  ;;  %v15388_v34 = vld [vmem:[#allocation2 + $0x44] ss:$12 sps:$4 sm:$0xff]   ;;  %v17656_v38 = vld [vmem:[%s21338_s26 + $0x14] sm:$0xff]  }
  0xa3   :  { %429 = vmatprep.subr.bf16.mxu0 %v15376_v7  ;;  %15338 = vmatprep.subr.bf16.mxu1 %v15376_v7  ;;  %v348_v19 = vrot.slane %v17625_v17, 4  ;;  %v343_v37 = vsel %vm309_vm0, %v340_v16, %v342_v31  ;;  %v15394_v39 = vld [vmem:[#allocation2] ss:$12 sps:$4 sm:$0xff]   ;;  %v344_v43 = vrot.slane %v17656_v38, 4  ;;  %v211_v44 = vld [vmem:[%s21339_s13 + $0x10] sm:$0xff]  ;;  %v212_v47 = vld [vmem:[%s21339_s13 + $0x18] sm:$0xff] }
  0xa4   :  { %v341_v24 = vsel %vm309_vm0, %v339_v15, %v340_v16  ;;  %v209_v40 = vld [vmem:[%s21339_s13] sm:$0xff]  ;;  %v210_v42 = vld [vmem:[%s21339_s13 + $0x8] sm:$0xff]  ;;  %1050 = vperm.xlu1 %15370, %v211_v44   ;;  %v215_v50 = vld [vmem:[%s21339_s13 + $0x30] sm:$0xff]  ;;  %v844_v59 = vsel %vm309_vm0, %v13299_v57, 0  ;;  %vm1555_vm4 = vcmask 261120   ;;  %vm13201_vm6 = vcmask 64512  }
  0xa5   :  { %v17638_v25 = vsel %vm309_vm0, %v346_v18, %v348_v19  ;;  %1040 = vperm.xlu0 %15369, %v209_v40   ;;  %v15397_v46 = vld [vmem:[#allocation2 + $0x20] ss:$12 sps:$4 sm:$0xff]   ;;  %v345_v49 = vsel %vm309_vm0, %v342_v31, %v344_v43  ;;  %v15400_v51 = vld [vmem:[#allocation2 + $0x8] ss:$12 sps:$4 sm:$0xff]   ;;  %v216_v54 = vld [vmem:[%s21339_s13 + $0x38] sm:$0xff]  ;;  %v347_v55 = vsel %vm309_vm0, %v344_v43, %v346_v18  ;;  %vm13220_vm7 = vcmask 7168  }
  0xa6   :  { %430 = vmatpush1.bf16.msra.mxu0 %v15378_v14  ;;  %15341 = vmatpush1.bf16.msra.mxu1 %v15378_v14  ;;  %v213_v48 = vld [vmem:[%s21339_s13 + $0x20] sm:$0xff]  ;;  %v214_v52 = vld [vmem:[%s21339_s13 + $0x28] sm:$0xff]  ;;  %v15401_v60 = vld [vmem:[#allocation2 + $0x90] ss:$12 sps:$4 sm:$0xff]   ;;  %s17464_s11 = smov [#allocation22]  }
  0xa7   :  { %15006 = vmatprep.subr.bf16.mxu1 %v21229_v26  ;;  %13282 = vmatprep.subr.msk.bf16.mxu0 %vm309_vm0, %v13280_v20  ;;  %v217_v53 = vld [vmem:[%s21339_s13 + $0x40] sm:$0xff]  ;;  %v218_v56 = vld [vmem:[%s21339_s13 + $0x48] sm:$0xff]  ;;  %v15404_v63 = vld [vmem:[#allocation2 + $0xb0] ss:$0 sps:$4 sm:$0xff]   ;;  %s13228_s29 = sshll.u32 %s17464_s11, 4  ;;  %s13229_s29 = int_to_ptr.vmem [resolvable:$true] %s13228_s29 }
  0xa8   :  { %1055 = vperm.xlu1 %15370, %v212_v47   ;;  %v15403_v58 = vld [vmem:[#allocation2 + $0x94] ss:$12 sps:$4 sm:$0xff]   ;;  %v15407_v61 = vld [vmem:[#allocation2 + $0x7c] ss:$12 sps:$4 sm:$0xff]   ;;  %v15405_v62 = vld [vmem:[#allocation2 + $0x78] ss:$12 sps:$4 sm:$0xff]   ;;  %p17407_p5 = scmp.lt.s32.totalorder %s13229_s29, %s13229_s29 }
  0xa9   :  { %13263 = vmatmul.mubr.msk.bf16.vlgmr.msra.gmra.mxu0 %vm390_vm1, %v341_v24  ;;  %13267 = vmatmul.mubr.msk.bf16.vlgmr.msra.gmra.mxu1 %vm390_vm1, %v17638_v25  ;;  %v850_v1 = vsel %vm309_vm0, %v15404_v63, 0  ;;  %v15408_v2 = vld [vmem:[#allocation2 + $0x98] ss:$12 sps:$4 sm:$0xff]   ;;  %v15409_v3 = vld [vmem:[#allocation2 + $0x80] ss:$12 sps:$4 sm:$0xff]   ;;  %v245_v7 = vld [vmem:[%s21211_s5 + $0x70] sm:$0xff] }
  0xaa   :  { %15007 = vmatpush3.bf16.msra.mxu1 %v413_v27  ;;  %645 = vmatpush1.bf16.msra.mxu0 %v626_v28  ;;  %v17799_v4 = vld [vmem:[%s21211_s5 + $0xf8] sm:$0xff]  ;;  %v244_v9 = vld [vmem:[%s21211_s5 + $0x68] sm:$0xff]  ;;  %v257_v14 = vld [vmem:[%s21211_s5 + $0xd0] sm:$0xff]  ;;  %s17402_s4 = scalar_lea.vmem %s13229_s29, 128 }
  0xab   :  { %15008 = vmatprep.subr.bf16.mxu1 %v21229_v26  ;;  %457 = vmatprep.mubr.bf16.mxu0 %v21227_v0  ;;  %v246_v5 = vld [vmem:[%s21211_s5 + $0x78] sm:$0xff]  ;;  %v241_v15 = vld [vmem:[%s21211_s5 + $0x50] sm:$0xff]  ;;  %v256_v16 = vld [vmem:[%s21211_s5 + $0xc8] sm:$0xff]  ;;  %p17403_p4 = scmp.ne.s32.totalorder %s13229_s29, %s17402_s4  ;;  %p17408_p6 = scmp.lt.s32.totalorder %s17402_s4, %s17402_s4 }
  0xac   :  { %15012 = vmatprep.mubr.msk.bf16.mxu1 %vm17462_vm2, %v21229_v26  ;;  %646 = vmatprep.subr.bf16.mxu0 %v15391_v29  ;;  %v258_v12 = vld [vmem:[%s21211_s5 + $0xd8] sm:$0xff]  ;;  %v255_v18 = vld [vmem:[%s21211_s5 + $0xc0] sm:$0xff]  ;;  %v253_v22 = vld [vmem:[%s21211_s5 + $0xb0] sm:$0xff] }
  0xad   :  { %1045 = vperm.xlu0 %15369, %v210_v42   ;;  %1065 = vperm.xlu1 %15370, %v214_v52   ;;  %v242_v13 = vld [vmem:[%s21211_s5 + $0x58] sm:$0xff]  ;;  %v239_v19 = vld [vmem:[%s21211_s5 + $0x40] sm:$0xff]  ;;  %v248_v35 = vld [vmem:[%s21211_s5 + $0x88] sm:$0xff]  ;;  %p17409_p7 = por %p17408_p6, %p17407_p5 }
  0xae   :  { %15009 = vmatpush3.bf16.msra.mxu1 %v15386_v30  ;;  %647 = vmatpush1.bf16.msra.mxu0 %v15389_v32  ;;  %v254_v20 = vld [vmem:[%s21211_s5 + $0xb8] sm:$0xff]  ;;  %v251_v27 = vld [vmem:[%s21211_s5 + $0xa0] sm:$0xff]  ;;  %v269_v32 = vld [vmem:[%s21211_s5 + $0x130] sm:$0xff] }
  0xaf   :  { %15010 = vmatprep.subr.bf16.mxu1 %v21229_v26  ;;  %648 = vmatprep.subr.bf16.mxu0 %v15396_v33  ;;  %v238_v21 = vld [vmem:[%s21211_s5 + $0x38] sm:$0xff]  ;;  %v235_v28 = vld [vmem:[%s21211_s5 + $0x20] sm:$0xff]  ;;  %v249_v33 = vld [vmem:[%s21211_s5 + $0x90] sm:$0xff]  ;;  %p17410_p8 = pnand %p17409_p7, %p17403_p4 }
  0xb0   :  { %v270_v29 = vld [vmem:[%s21211_s5 + $0x138] sm:$0xff]  ;;  %v247_v40 = vld [vmem:[%s21211_s5 + $0x80] sm:$0xff] }
  0xb1   :  { %13264 = vmatmul.mubr.msk.bf16.gmra.mxu0 %vm390_vm1, %v343_v37  ;;  %1060 = vperm.xlu0 %15369, %v213_v48   ;;  %v250_v30 = vld [vmem:[%s21211_s5 + $0x98] sm:$0xff]  ;;  %v231_v43 = vld [vmem:[%s21211_s5] sm:$0xff] }
  0xb2   :  { %15011 = vmatpush3.bf16.msra.mxu1 %v15388_v34  ;;  %467 = vmatprep.mubr.bf16.mxu0 %v21227_v0  ;;  %v234_v31 = vld [vmem:[%s21211_s5 + $0x18] sm:$0xff]  ;;  %v233_v34 = vld [vmem:[%s21211_s5 + $0x10] sm:$0xff] }
  0xb3   :  { %15032 = vmatprep.subr.bf16.mxu1 %v21229_v26  ;;  %649 = vmatpush1.bf16.msra.mxu0 %v15394_v39  ;;  %v232_v39 = vld [vmem:[%s21211_s5 + $0x8] sm:$0xff] }
  0xb4   :  { %13302 = vmatprep.subr.msk.bf16.mxu0 %vm309_vm0, %v13300_v41  ;;  %1075 = vperm.xlu1 %15370, %v216_v54  }
  0xb5   :  { %15013 = vmatmul.mubr.msk.bf16.vlgmr.msra.gmra.mxu1 %vm390_vm1, %v341_v24  ;;  %1070 = vperm.xlu0 %15369, %v215_v50   ;;  %v252_v24 = vld [vmem:[%s21211_s5 + $0xa8] sm:$0xff] }
  0xb6   :  { %15033 = vmatpush3.bf16.msra.mxu1 %v632_v45  ;;  %15016 = vmatprep.mubr.msk.bf16.mxu1 %vm17462_vm2, %v21229_v26  ;;  %v267_v45 = vld [vmem:[%s21211_s5 + $0x120] sm:$0xff] }
  0xb7   :  { %15034 = vmatprep.subr.bf16.mxu1 %v21229_v26 }
  0xb8   :  { %1085 = vperm.xlu1 %15370, %v218_v56  }
  0xb9   :  { %13265 = vmatmul.mubr.msk.bf16.gmra.mxu0 %vm390_vm1, %v345_v49  ;;  %1080 = vperm.xlu0 %15369, %v217_v53  }
  0xba   :  { %477 = vmatprep.mubr.bf16.mxu0 %v21227_v0  ;;  %15035 = vmatpush3.bf16.msra.mxu1 %v15397_v46 }
  0xbb   :  { %15036 = vmatprep.subr.bf16.mxu1 %v21229_v26 }
  0xbd   :  { %15017 = vmatmul.mubr.msk.bf16.gmra.mxu1 %vm390_vm1, %v343_v37 }
  0xbe   :  { %15020 = vmatprep.mubr.msk.bf16.mxu1 %vm17462_vm2, %v21229_v26  ;;  %15037 = vmatpush3.bf16.msra.mxu1 %v15400_v51 }
  0xbf   :  { %15058 = vmatprep.subr.bf16.mxu1 %v21229_v26 }
  0xc1   :  { %13266 = vmatmul.mubr.msk.bf16.gmra.mxu0 %vm390_vm1, %v347_v55 }
  0xc2   :  { %666 = vmatprep.mubr.bf16.mxu0 %v21227_v0 }
  0xc5   :  { %15021 = vmatmul.mubr.msk.bf16.gmra.mxu1 %vm390_vm1, %v345_v49 }
  0xc6   :  { %15024 = vmatprep.mubr.msk.bf16.mxu1 %vm17462_vm2, %v21229_v26 }
  0xc9   :  { %13283 = vmatmul.mubr.msk.bf16.vlgmr.msra.gmra.mxu0 %vm390_vm1, %v17617_v11 }
  0xca   :  { %863 = vmatpush1.bf16.msra.mxu0 %v844_v59  ;;  %676 = vmatprep.mubr.bf16.mxu0 %v21227_v0 }
  0xcb   :  { %864 = vmatprep.subr.bf16.mxu0 %v15403_v58  ;;  %v265_v58 = vld [vmem:[%s21211_s5 + $0x110] sm:$0xff] }
  0xcd   :  { %15025 = vmatmul.mubr.msk.bf16.gmra.mxu1 %vm390_vm1, %v347_v55  ;;  %v266_v55 = vld [vmem:[%s21211_s5 + $0x118] sm:$0xff] }
  0xce   :  { %15028 = vmatprep.mubr.msk.bf16.mxu1 %vm17462_vm2, %v21229_v26  ;;  %865 = vmatpush1.bf16.msra.mxu0 %v15401_v60 }
  0xcf   :  { %866 = vmatprep.subr.bf16.mxu0 %v15407_v61  ;;  %v264_v61 = vld [vmem:[%s21211_s5 + $0x108] sm:$0xff] }
  0xd1   :  { %13284 = vmatmul.mubr.msk.bf16.gmra.mxu0 %vm390_vm1, %v17606_v8 }
  0xd2   :  { %686 = vmatprep.mubr.bf16.mxu0 %v21227_v0  ;;  %867 = vmatpush1.bf16.msra.mxu0 %v15405_v62 }
  0xd3   :  { %14529 = vmatprep.subr.mxu0 %v17799_v4 }
  0xd5   :  { %15029 = vmatmul.mubr.msk.bf16.gmra.mxu1 %vm390_vm1, %v17638_v25  ;;  %v236_v25 = vld [vmem:[%s21211_s5 + $0x28] sm:$0xff] }
  0xd6   :  { %15038 = vmatprep.mubr.msk.bf16.mxu1 %vm17462_vm2, %v21229_v26 }
  0xd9   :  { %13285 = vmatmul.mubr.msk.bf16.gmra.mxu0 %vm390_vm1, %v17632_v23 }
  0xda   :  { %696 = vmatprep.mubr.bf16.mxu0 %v21227_v0 }
  0xdd   :  { %15039 = vmatmul.mubr.msk.bf16.vlgmr.msra.gmra.mxu1 %vm390_vm1, %v17617_v11  ;;  %v243_v11 = vld [vmem:[%s21211_s5 + $0x60] sm:$0xff] }
  0xde   :  { %15059 = vmatpush3.bf16.msra.mxu1 %v850_v1  ;;  %15042 = vmatprep.mubr.msk.bf16.mxu1 %vm17462_vm2, %v21229_v26  ;;  %v263_v1 = vld [vmem:[%s21211_s5 + $0x100] sm:$0xff] }
  0xdf   :  { %15060 = vmatprep.subr.bf16.mxu1 %v21229_v26 }
  0xe1   :  { %13286 = vmatmul.mubr.msk.bf16.gmra.mxu0 %vm390_vm1, %v17656_v38 }
  0xe2   :  { %706 = vmatprep.mubr.bf16.mxu0 %v21227_v0  ;;  %15061 = vmatpush3.bf16.msra.mxu1 %v15408_v2 }
  0xe3   :  { %15062 = vmatprep.subr.bf16.mxu1 %v21229_v26 }
  0xe5   :  { %15043 = vmatmul.mubr.msk.bf16.gmra.mxu1 %vm390_vm1, %v17606_v8 }
  0xe6   :  { %15046 = vmatprep.mubr.msk.bf16.mxu1 %vm17462_vm2, %v21229_v26  ;;  %15063 = vmatpush3.bf16.msra.mxu1 %v15409_v3 }
  0xe7   :  { %15084 = vmatprep.subr.mxu1 %v21229_v26 }
  0xe9   :  { %13287 = vmatmul.mubr.msk.bf16.gmra.mxu0 %vm390_vm1, %v17614_v10 }
  0xea   :  { %884 = vmatprep.mubr.bf16.mxu0 %v21227_v0 }
  0xed   :  { %15047 = vmatmul.mubr.msk.bf16.gmra.mxu1 %vm390_vm1, %v17632_v23 }
  0xee   :  { %15050 = vmatprep.mubr.msk.bf16.mxu1 %vm17462_vm2, %v21229_v26 }
  0xf1   :  { %13303 = vmatmul.mubr.msk.bf16.vlgmr.msra.gmra.mxu0 %vm390_vm1, %v17606_v8 }
  0xf2   :  { %894 = vmatprep.mubr.bf16.mxu0 %v21227_v0  ;;  %14530 = vmatpush3.msra.mxu0 %v246_v5 }
  0xf3   :  { %14531 = vmatprep.subr.mxu0 %v261_v6 }
  0xf4   :  { %14532 = vmatpush3.msra.mxu0 %v245_v7 }
  0xf5   :  { %15051 = vmatmul.mubr.msk.bf16.gmra.mxu1 %vm390_vm1, %v17656_v38 }
  0xf6   :  { %15054 = vmatprep.mubr.msk.bf16.mxu1 %vm17462_vm2, %v21229_v26 }
  0xf9   :  { %13304 = vmatmul.mubr.msk.bf16.gmra.mxu0 %vm390_vm1, %v17632_v23 }
  0xfa   :  { %904 = vmatprep.mubr.bf16.mxu0 %v21227_v0 }
  0xfd   :  { %15055 = vmatmul.mubr.msk.bf16.gmra.mxu1 %vm390_vm1, %v17614_v10 }
  0xfe   :  { %15064 = vmatprep.mubr.msk.bf16.mxu1 %vm17462_vm2, %v21229_v26 }
 0x101   :  { %13305 = vmatmul.mubr.msk.bf16.gmra.mxu0 %vm390_vm1, %v17656_v38 }
 0x102   :  { %914 = vmatprep.mubr.bf16.mxu0 %v21227_v0 }
 0x105   :  { %15065 = vmatmul.mubr.msk.bf16.vlgmr.msra.gmra.mxu1 %vm390_vm1, %v17606_v8  ;;  %v260_v8 = vld [vmem:[%s21211_s5 + $0xe8] sm:$0xff] }
 0x106   :  { %15068 = vmatprep.mubr.msk.bf16.mxu1 %vm17462_vm2, %v21229_v26  ;;  %14533 = vmatprep.subr.mxu0 %v260_v8 }
 0x107   :  { %14534 = vmatpush3.msra.mxu0 %v244_v9  ;;  %15085 = vmatpush3.msra.mxu1 %v270_v29 }
 0x108   :  { %15086 = vmatprep.subr.mxu1 %v21229_v26 }
 0x109   :  { %13306 = vmatmul.mubr.msk.bf16.gmra.mxu0 %vm390_vm1, %v17614_v10  ;;  %15087 = vmatpush3.msra.mxu1 %v269_v32 }
 0x10a   :  { %924 = vmatprep.mubr.bf16.mxu0 %v21227_v0  ;;  %15088 = vmatprep.subr.mxu1 %v21229_v26 }
 0x10d   :  { %15069 = vmatmul.mubr.msk.bf16.gmra.mxu1 %vm390_vm1, %v17632_v23  ;;  %v237_v23 = vld [vmem:[%s21211_s5 + $0x30] sm:$0xff] }
 0x10e   :  { %15072 = vmatprep.mubr.msk.bf16.mxu1 %vm17462_vm2, %v21229_v26 }
 0x111   :  { %13307 = vmatmul.mubr.msk.bf16.gmra.mxu0 %vm390_vm1, %v17625_v17 }
 0x115   :  { %15073 = vmatmul.mubr.msk.bf16.gmra.mxu1 %vm390_vm1, %v17656_v38  ;;  %v268_v38 = vld [vmem:[%s21211_s5 + $0x128] sm:$0xff] }
 0x116   :  { %15076 = vmatprep.mubr.msk.bf16.mxu1 %vm17462_vm2, %v21229_v26  ;;  %15089 = vmatpush3.msra.mxu1 %v268_v38 }
 0x117   :  { %15090 = vmatprep.subr.mxu1 %v21229_v26 }
 0x118   :  { %15091 = vmatpush3.msra.mxu1 %v267_v45 }
 0x119   :  { %15092 = vmatprep.subr.mxu1 %v21229_v26 }
 0x11a   :  { %15093 = vmatpush3.msra.mxu1 %v266_v55 }
 0x11b   :  { %15094 = vmatprep.subr.mxu1 %v21229_v26 }
 0x11c   :  { %15095 = vmatpush3.msra.mxu1 %v265_v58 }
 0x11d   :  { %15077 = vmatmul.mubr.msk.bf16.gmra.mxu1 %vm390_vm1, %v17614_v10  ;;  %v259_v10 = vld [vmem:[%s21211_s5 + $0xe0] sm:$0xff]  ;;  %15096 = vmatprep.subr.mxu1 %v21229_v26 }
 0x11e   :  { %15080 = vmatprep.mubr.msk.bf16.mxu1 %vm17462_vm2, %v21229_v26  ;;  %14535 = vmatprep.subr.mxu0 %v259_v10 }
 0x11f   :  { %14536 = vmatpush3.msra.mxu0 %v243_v11  ;;  %15097 = vmatpush3.msra.mxu1 %v264_v61 }
 0x120   :  { %14537 = vmatprep.subr.mxu0 %v258_v12  ;;  %15098 = vmatprep.subr.mxu1 %v21229_v26 }
 0x121   :  { %14538 = vmatpush3.msra.mxu0 %v242_v13  ;;  %15099 = vmatpush3.msra.mxu1 %v263_v1 }
 0x122   :  { %14539 = vmatprep.subr.mxu0 %v257_v14  ;;  %15103 = vmatprep.subr.mxu1 %v21229_v26 }
 0x123   :  { %14540 = vmatpush3.msra.mxu0 %v241_v15 }
 0x124   :  { %14541 = vmatprep.subr.mxu0 %v256_v16 }
 0x125   :  { %15081 = vmatmul.mubr.msk.bf16.gmra.mxu1 %vm390_vm1, %v17625_v17  ;;  %v240_v17 = vld [vmem:[%s21211_s5 + $0x48] sm:$0xff] }
 0x126   :  { %15100 = vmatprep.mubr.msk.f32.mxu1 %vm17462_vm2, %v21229_v26  ;;  %14542 = vmatpush3.msra.mxu0 %v240_v17 }
 0x127   :  { %14543 = vmatprep.subr.mxu0 %v255_v18 }
 0x128   :  { %14544 = vmatpush3.msra.mxu0 %v239_v19 }
 0x129   :  { %14545 = vmatprep.subr.mxu0 %v254_v20 }
 0x12a   :  { %14546 = vmatpush3.msra.mxu0 %v238_v21 }
 0x12b   :  { %14547 = vmatprep.subr.mxu0 %v253_v22 }
 0x12c   :  { %14548 = vmatpush3.msra.mxu0 %v237_v23 }
 0x12d   :  { %14549 = vmatprep.subr.mxu0 %v252_v24 }
 0x12e   :  { %14550 = vmatpush3.msra.mxu0 %v236_v25 }
 0x12f   :  { %14551 = vmatprep.subr.mxu0 %v251_v27 }
 0x130   :  { %14552 = vmatpush3.msra.mxu0 %v235_v28 }
 0x131   :  { %14553 = vmatprep.subr.mxu0 %v250_v30 }
 0x132   :  { %14554 = vmatpush3.msra.mxu0 %v234_v31 }
 0x133   :  { %14555 = vmatprep.subr.mxu0 %v249_v33 }
 0x134   :  { %14556 = vmatpush3.msra.mxu0 %v233_v34 }
 0x135   :  { %14557 = vmatprep.subr.mxu0 %v248_v35 }
 0x136   :  { %14558 = vmatpush3.msra.mxu0 %v232_v39 }
 0x137   :  { %14559 = vmatprep.subr.mxu0 %v247_v40 }
 0x138   :  { %14560 = vmatpush3.msra.mxu0 %v231_v43 }
 0x139   :  { %14573 = vmatprep.subr.mxu0 %v17799_v4 }
 0x169   :  { %v17894_v36 = vpop.f32.mrf.mxu0  ;;  %v17896_v37 = vpop.f32.mrf.mxu1 }
 0x16b   :  { %v17907_v41 = vpop.f32.mrf.mxu0  ;;  %v17909_v42 = vpop.f32.mrf.mxu1 }
 0x16d   :  { %v17915_v44 = vpop.f32.mrf.mxu0  ;;  %v17921_v46 = vpop.f32.mrf.mxu1 }
 0x16f   :  { %v17923_v47 = vpop.f32.mrf.mxu0  ;;  %v17928_v49 = vpop.f32.mrf.mxu1 }
 0x170   :  { %21340 = vst [vmem:[#allocation31_spill] sm:$0xff] %v17928_v49 }
 0x171   :  { %v17926_v48 = vpop.f32.mrf.mxu0 }
 0x173   :  { %v17930_v50 = vpop.f32.mrf.mxu0 }
 0x175   :  { %v17932_v51 = vpop.f32.mrf.mxu0  ;;  %v17934_v52 = vpop.f32.mrf.mxu1 }
 0x177   :  { %v17936_v53 = vpop.f32.mrf.mxu0  ;;  %v15014_v54 = vpop.f32.mrf.mxu1 }
 0x179   :  { %v17941_v56 = vpop.f32.mrf.mxu0  ;;  %v17943_v57 = vpop.f32.mrf.mxu1 }
 0x17b   :  { %v17949_v59 = vpop.f32.mrf.mxu0  ;;  %v15015_v60 = vpop.f32.mrf.mxu1 }
 0x17d   :  { %v17955_v62 = vpop.f32.mrf.mxu0  ;;  %v17957_v63 = vpop.f32.mrf.mxu1 }
 0x17f   :  { %v17963_v2 = vpop.f32.mrf.mxu0  ;;  %v15018_v3 = vpop.f32.mrf.mxu1 }
 0x181   :  { %v17966_v4 = vpop.f32.mrf.mxu0  ;;  %v17968_v5 = vpop.f32.mrf.mxu1 }
 0x183   :  { %v17970_v6 = vpop.f32.mrf.mxu0  ;;  %v15019_v7 = vpop.f32.mrf.mxu1 }
 0x185   :  { %v17972_v8 = vpop.f32.mrf.mxu0  ;;  %v17974_v9 = vpop.f32.mrf.mxu1 }
 0x186   :  { %21341 = vst [vmem:[#allocation32_spill] sm:$0xff] %v17974_v9 }
 0x187   :  { %v17976_v10 = vpop.f32.mrf.mxu0  ;;  %v15022_v11 = vpop.f32.mrf.mxu1 }
 0x189   :  { %v17978_v12 = vpop.f32.mrf.mxu1  ;;  %v668_v13 = vpop.f32.mrf.mxu0 }
 0x18a   :  { %21342 = vst [vmem:[#allocation33_spill] sm:$0xff] %v17978_v12 }
 0x18b   :  { %v15023_v14 = vpop.f32.mrf.mxu1  ;;  %v670_v15 = vpop.f32.mrf.mxu0 }
 0x18d   :  { %v17980_v16 = vpop.f32.mrf.mxu1  ;;  %v672_v17 = vpop.f32.mrf.mxu0 }
 0x18e   :  { %21343 = vst [vmem:[#allocation34_spill] sm:$0xff] %v17980_v16 }
 0x18f   :  { %v15026_v18 = vpop.f32.mrf.mxu1  ;;  %v674_v19 = vpop.f32.mrf.mxu0 }
 0x191   :  { %v17982_v20 = vpop.f32.mrf.mxu1  ;;  %v678_v21 = vpop.f32.mrf.mxu0 }
 0x192   :  { %21344 = vst [vmem:[#allocation35_spill] sm:$0xff] %v17982_v20 }
 0x193   :  { %v15027_v22 = vpop.f32.mrf.mxu1  ;;  %v680_v23 = vpop.f32.mrf.mxu0 }
 0x195   :  { %v17984_v24 = vpop.f32.mrf.mxu1  ;;  %v682_v25 = vpop.f32.mrf.mxu0 }
 0x196   :  { %21345 = vst [vmem:[#allocation36_spill] sm:$0xff] %v17984_v24  ;;  %v17996_v24 = vpop.permute.xlu0 %1040 }
 0x197   :  { %v15030_v27 = vpop.f32.mrf.mxu1  ;;  %v684_v28 = vpop.f32.mrf.mxu0  ;;  %21351 = vst [vmem:[#allocation42_spill] sm:$0xff] %v17996_v24 }
 0x199   :  { %v17986_v29 = vpop.f32.mrf.mxu1  ;;  %v688_v30 = vpop.f32.mrf.mxu0 }
 0x19a   :  { %21346 = vst [vmem:[#allocation37_spill] sm:$0xff] %v17986_v29 }
 0x19b   :  { %v15031_v31 = vpop.f32.mrf.mxu1  ;;  %v690_v32 = vpop.f32.mrf.mxu0 }
 0x19d   :  { %v692_v33 = vpop.f32.mrf.mxu0  ;;  %v751_v34 = vpop.f32.mrf.mxu1 }
 0x19f   :  { %v694_v35 = vpop.f32.mrf.mxu0  ;;  %v15040_v38 = vpop.f32.mrf.mxu1 }
 0x1a1   :  { %v698_v39 = vpop.f32.mrf.mxu0  ;;  %v754_v40 = vpop.f32.mrf.mxu1 }
 0x1a3   :  { %v700_v43 = vpop.f32.mrf.mxu0  ;;  %v15041_v45 = vpop.f32.mrf.mxu1 }
 0x1a5   :  { %v702_v54 = vpop.f32.mrf.mxu0  ;;  %v759_v55 = vpop.f32.mrf.mxu1 }
 0x1a7   :  { %v704_v58 = vpop.f32.mrf.mxu0  ;;  %v15044_v60 = vpop.f32.mrf.mxu1 }
 0x1a9   :  { %v708_v61 = vpop.f32.mrf.mxu0  ;;  %v762_v1 = vpop.f32.mrf.mxu1 }
 0x1ab   :  { %v710_v3 = vpop.f32.mrf.mxu0  ;;  %v15045_v7 = vpop.f32.mrf.mxu1 }
 0x1ad   :  { %v712_v11 = vpop.f32.mrf.mxu0  ;;  %v17988_v14 = vpop.f32.mrf.mxu1 }
 0x1ae   :  { %21347 = vst [vmem:[#allocation38_spill] sm:$0xff] %v17988_v14 }
 0x1af   :  { %v17990_v18 = vpop.f32.mrf.mxu0  ;;  %v15048_v22 = vpop.f32.mrf.mxu1 }
 0x1b0   :  { %21348 = vst [vmem:[#allocation39_spill] sm:$0xff] %v17990_v18  ;;  %v673_v18 = vadd.f32 %v672_v17, %v17915_v44  ;;  %v675_v22 = vadd.f32 %v674_v19, %v17923_v47  ;;  %v18014_v47 = vpop.permute.xlu0 %1045 }
 0x1b1   :  { %v17992_v27 = vpop.f32.mrf.mxu1  ;;  %v886_v31 = vpop.f32.mrf.mxu0  ;;  %21354 = vst [vmem:[#allocation45_spill] sm:$0xff] %v18014_v47 }
 0x1b2   :  { %21349 = vst [vmem:[#allocation40_spill] sm:$0xff] %v17992_v27  ;;  %v669_v27 = vadd.f32 %v668_v13, %v17894_v36  ;;  %v18016_v36 = vpop.permute.xlu1 %1050  ;;  %v18022_v13 = vadd.f32 %v751_v34, %v17934_v52 }
 0x1b3   :  { %v15049_v38 = vpop.f32.mrf.mxu1  ;;  %v888_v0 = vpop.f32.mrf.mxu0  ;;  %21355 = vst [vmem:[#allocation46_spill] sm:$0xff] %v18016_v36 }
 0x1b4   :  { %v671_v38 = vadd.f32 %v670_v15, %v17907_v41  ;;  %v689_v41 = vadd.f32 %v688_v30, %v17941_v56  ;;  %v18028_v17 = vadd.f32 %v886_v31, %v669_v27  ;;  %v18033_v56 = vadd.f32 %v754_v40, %v17943_v57 }
 0x1b5   :  { %v17994_v45 = vpop.f32.mrf.mxu1  ;;  %v890_v26 = vpop.f32.mrf.mxu0  ;;  %v18066_v30 = vadd.f32 %v710_v3, %v17909_v42  ;;  %v21359_v40 = vld [vmem:[#allocation38_spill] sm:$0xff]  ;;  %v21362_v3 = vld [vmem:[#allocation33_spill] sm:$0xff] }
 0x1b6   :  { %21350 = vst [vmem:[#allocation41_spill] sm:$0xff] %v17994_v45  ;;  %v679_v45 = vadd.f32 %v678_v21, %v17926_v48  ;;  %v18010_v9 = vadd.f32 %v890_v26, %v673_v18  ;;  %v691_v48 = vadd.f32 %v690_v32, %v17949_v59  ;;  %v695_v26 = vadd.f32 %v694_v35, %v17963_v2  ;;  %v21364_v18 = vld [vmem:[#allocation34_spill] sm:$0xff] }
 0x1b7   :  { %v15052_v29 = vpop.f32.mrf.mxu1  ;;  %v892_v60 = vpop.f32.mrf.mxu0  ;;  %v18030_v19 = vadd.f32 %v888_v0, %v671_v38  ;;  %v18036_v59 = vadd.f32 %v700_v43, %v17970_v6  ;;  %v18055_v6 = vadd.f32 %v704_v58, %v17976_v10  ;;  %v18069_v32 = vadd.f32 %v712_v11, %v17921_v46  ;;  %v21366_v38 = vld [vmem:[#allocation35_spill] sm:$0xff] }
 0x1b8   :  { %v681_v29 = vadd.f32 %v680_v23, %v17930_v50  ;;  %v18012_v44 = vadd.f32 %v892_v60, %v675_v22  ;;  %v693_v50 = vadd.f32 %v692_v33, %v17955_v62  ;;  %v18048_v23 = vadd.f32 %v759_v55, %v17957_v63  ;;  %v18073_v33 = vpop.permute.xlu1 %1055  ;;  %v21361_v55 = vld [vmem:[#allocation39_spill] sm:$0xff] }
 0x1b9   :  { %v17998_v20 = vpop.f32.mrf.mxu1  ;;  %v896_v7 = vpop.f32.mrf.mxu0  ;;  %v1091_v57 = vmul.f32 %v18014_v47, %v18010_v9  ;;  %v1089_v10 = vmul.f32 %v17996_v24, %v18030_v19  ;;  %21357 = vst [vmem:[#allocation48_spill] sm:$0xff] %v18073_v33  ;;  %v21363_v11 = vld [vmem:[#allocation40_spill] sm:$0xff] }
 0x1ba   :  { %21352 = vst [vmem:[#allocation43_spill] sm:$0xff] %v17998_v20  ;;  %v683_v20 = vadd.f32 %v682_v25, %v17932_v51  ;;  %21353 = vst [vmem:[#allocation44_spill] sm:$0xff] %v18012_v44  ;;  %v18038_v62 = vadd.f32 %v896_v7, %v679_v45  ;;  %v1092_v0 = vmul.f32 %v18014_v47, %v18012_v44 }
 0x1bb   :  { %v15053_v16 = vpop.f32.mrf.mxu1  ;;  %v898_v12 = vpop.f32.mrf.mxu0  ;;  %v18061_v25 = vadd.f32 %v762_v1, %v17968_v5  ;;  %v1320_v1 = vmul.f32 %v1091_v57, %v18010_v9 }
 0x1bc   :  { %v685_v16 = vadd.f32 %v684_v28, %v17936_v53  ;;  %v18026_v53 = vadd.f32 %v698_v39, %v17966_v4  ;;  %v18040_v52 = vadd.f32 %v898_v12, %v681_v29  ;;  %v18045_v4 = vadd.f32 %v702_v54, %v17972_v8  ;;  %v21358_v39 = vld [vmem:[#allocation32_spill] sm:$0xff]  ;;  %v21360_v54 = vld [vmem:[#allocation31_spill] sm:$0xff] }
 0x1bd   :  { %v18006_v49 = vpop.f32.mrf.mxu1  ;;  %v900_v14 = vpop.f32.mrf.mxu0  ;;  %v18058_v12 = vadd.f32 %v708_v61, %v17896_v37  ;;  %v1088_v37 = vmul.f32 %v17996_v24, %v18028_v17  ;;  %v1094_v42 = vmul.f32 %v18016_v36, %v18038_v62  ;;  %v18087_v43 = vadd.f32 %v21359_v40, %v21358_v39  ;;  %v21365_v27 = vld [vmem:[#allocation41_spill] sm:$0xff] }
 0x1be   :  { %21356 = vst [vmem:[#allocation47_spill] sm:$0xff] %v18040_v52  ;;  %v18063_v8 = vadd.f32 %v900_v14, %v683_v20  ;;  %v1095_v5 = vmul.f32 %v18016_v36, %v18040_v52  ;;  %v18091_v58 = vadd.f32 %v21361_v55, %v21360_v54  ;;  %v1321_v61 = vmul.f32 %v1092_v0, %v18012_v44 }
 0x1bf   :  { %v15056_v51 = vpop.f32.mrf.mxu1  ;;  %v902_v15 = vpop.f32.mrf.mxu0  ;;  %v18097_v14 = vadd.f32 %v21363_v11, %v21362_v3  ;;  %v18101_v31 = vadd.f32 %v21365_v27, %v21364_v18  ;;  %v1133_v55 = vadd.f32 %v1092_v0, %v1089_v10 }
 0x1c0   :  { %v18079_v20 = vadd.f32 %v902_v15, %v685_v16  ;;  %v1097_v45 = vmul.f32 %v18073_v33, %v18063_v8  ;;  %v18112_v51 = vpop.permute.xlu0 %1060  ;;  %v1118_v15 = vadd.f32 %v1091_v57, %v1088_v37  ;;  %v18121_v18 = vpop.permute.xlu1 %1065 }
 0x1c1   :  { %v18042_v21 = vpop.f32.mrf.mxu1  ;;  %v906_v2 = vpop.f32.mrf.mxu0  ;;  %v21367_v29 = vld [vmem:[#allocation43_spill] sm:$0xff]  ;;  %21368 = vst [vmem:[#allocation32_spill] sm:$0xff] %v18112_v51  ;;  %21369 = vst [vmem:[#allocation38_spill] sm:$0xff] %v18121_v18  ;;  %v1134_v0 = vadd.f32 %v1133_v55, %v1095_v5 }
 0x1c2   :  { %v18081_v34 = vadd.f32 %v906_v2, %v689_v41  ;;  %v18109_v16 = vadd.f32 %v21367_v29, %v21366_v38  ;;  %v1318_v41 = vmul.f32 %v1089_v10, %v18030_v19  ;;  %v1317_v2 = vmul.f32 %v1088_v37, %v18028_v17  ;;  %v21370_v37 = vld [vmem:[#allocation36_spill] sm:$0xff] }
 0x1c3   :  { %v15057_v28 = vpop.f32.mrf.mxu1  ;;  %v908_v63 = vpop.f32.mrf.mxu0  ;;  %v1098_v39 = vmul.f32 %v18073_v33, %v18079_v20  ;;  %v18127_v27 = vadd.f32 %v18006_v49, %v21370_v37  ;;  %v1119_v10 = vadd.f32 %v1118_v15, %v1094_v42 }
 0x1c4   :  { %v18105_v60 = vadd.f32 %v908_v63, %v691_v48  ;;  %v1324_v28 = vmul.f32 %v1095_v5, %v18040_v52  ;;  %v1100_v48 = vmul.f32 %v18112_v51, %v18081_v34  ;;  %v1323_v63 = vmul.f32 %v1094_v42, %v18038_v62  ;;  %v18146_v5 = vpop.permute.xlu0 %1070  ;;  %v18161_v55 = vpop.permute.xlu1 %1075 }
 0x1c5   :  { %v910_v46 = vpop.f32.mrf.mxu0  ;;  %v969_v35 = vpop.f32.mrf.mxu1  ;;  %v1362_v3 = vadd.f32 %v1321_v61, %v1318_v41  ;;  %v1347_v11 = vadd.f32 %v1320_v1, %v1317_v2  ;;  %v1327_v49 = vmul.f32 %v1098_v39, %v18079_v20  ;;  %21373 = vst [vmem:[#allocation39_spill] sm:$0xff] %v18146_v5  ;;  %21374 = vst [vmem:[#allocation33_spill] sm:$0xff] %v18161_v55 }
 0x1c6   :  { %v18123_v57 = vadd.f32 %v910_v46, %v693_v50  ;;  %v1101_v38 = vmul.f32 %v18112_v51, %v18105_v60  ;;  %v18135_v61 = vadd.f32 %v969_v35, %v18022_v13  ;;  %v1329_v1 = vmul.f32 %v1100_v48, %v18081_v34 }
 0x1c7   :  { %v912_v7 = vpop.f32.mrf.mxu0  ;;  %v15066_v22 = vpop.f32.mrf.mxu1  ;;  %v1363_v46 = vadd.f32 %v1362_v3, %v1324_v28  ;;  %v1348_v41 = vadd.f32 %v1347_v11, %v1323_v63  ;;  %v1135_v3 = vadd.f32 %v1134_v0, %v1098_v39 }
 0x1c8   :  { %v1326_v22 = vmul.f32 %v1097_v45, %v18063_v8  ;;  %v18132_v29 = vadd.f32 %v912_v7, %v695_v26  ;;  %21371 = vst [vmem:[#allocation31_spill] sm:$0xff] %v18135_v61  ;;  %v21372_v26 = vld [vmem:[#allocation37_spill] sm:$0xff]  ;;  %v1103_v13 = vmul.f32 %v18121_v18, %v18123_v57  ;;  %v1330_v35 = vmul.f32 %v1101_v38, %v18105_v60 }
 0x1c9   :  { %v916_v40 = vpop.f32.mrf.mxu0  ;;  %v972_v54 = vpop.f32.mrf.mxu1  ;;  %v18144_v7 = vadd.f32 %v18042_v21, %v21372_v26  ;;  %v1364_v11 = vadd.f32 %v1363_v46, %v1327_v49  ;;  %v1136_v39 = vadd.f32 %v1135_v3, %v1101_v38 }
 0x1ca   :  { %v18138_v50 = vadd.f32 %v916_v40, %v18026_v53  ;;  %v1349_v42 = vadd.f32 %v1348_v41, %v1326_v22  ;;  %v1104_v15 = vmul.f32 %v18121_v18, %v18132_v29  ;;  %v1090_v40 = vmul.f32 %v17996_v24, %v18135_v61 }
 0x1cb   :  { %v918_v52 = vpop.f32.mrf.mxu0  ;;  %v15067_v44 = vpop.f32.mrf.mxu1  ;;  %v1365_v0 = vadd.f32 %v1364_v11, %v1330_v35 }
 0x1cc   :  { %v1120_v44 = vadd.f32 %v1119_v10, %v1097_v45  ;;  %v18151_v53 = vadd.f32 %v918_v52, %v18036_v59  ;;  %v18165_v59 = vmul.f32 %v18146_v5, %v18138_v50  ;;  %v18170_v22 = vadd.f32 %v1349_v42, %v1329_v1  ;;  %v18190_v42 = vpop.permute.xlu0 %1080 }
 0x1cd   :  { %v920_v2 = vpop.f32.mrf.mxu0  ;;  %v977_v37 = vpop.f32.mrf.mxu1  ;;  %v1333_v46 = vmul.f32 %v1104_v15, %v18132_v29  ;;  %v1332_v1 = vmul.f32 %v1103_v13, %v18123_v57  ;;  %21377 = vst [vmem:[#allocation41_spill] sm:$0xff] %v18190_v42  ;;  %v1319_v38 = vmul.f32 %v1090_v40, %v18135_v61  ;;  %v1137_v35 = vadd.f32 %v1136_v39, %v1104_v15 }
 0x1ce   :  { %v18157_v28 = vadd.f32 %v920_v2, %v18045_v4  ;;  %v1121_v45 = vadd.f32 %v1120_v44, %v1100_v48  ;;  %v18173_v4 = vadd.f32 %v972_v54, %v18033_v56  ;;  %v1107_v2 = vmul.f32 %v18146_v5, %v18151_v53 }
 0x1cf   :  { %v922_v21 = vpop.f32.mrf.mxu0  ;;  %v15070_v63 = vpop.f32.mrf.mxu1  ;;  %v18186_v56 = vadd.f32 %v977_v37, %v18048_v23  ;;  %v1149_v44 = vsel %vm1148_vm3, %v1090_v40, 0.0  ;;  %v1366_v40 = vadd.f32 %v1365_v0, %v1333_v46 }
 0x1d0   :  { %v18168_v52 = vadd.f32 %v922_v21, %v18055_v6  ;;  %21375 = vst [vmem:[#allocation40_spill] sm:$0xff] %v18173_v4  ;;  %v1122_v41 = vadd.f32 %v1121_v45, %v1103_v13  ;;  %v18179_v26 = vmul.f32 %v18161_v55, %v18157_v28  ;;  %v1093_v23 = vmul.f32 %v18014_v47, %v18173_v4  ;;  %v18202_v45 = vpop.permute.xlu1 %1085 }
 0x1d1   :  { %v926_v48 = vpop.f32.mrf.mxu0  ;;  %v980_v10 = vpop.f32.mrf.mxu1  ;;  %21376 = vst [vmem:[#allocation34_spill] sm:$0xff] %v18186_v56  ;;  %21378 = vst [vmem:[#allocation35_spill] sm:$0xff] %v18202_v45  ;;  %v1336_v3 = vmul.f32 %v1107_v2, %v18151_v53  ;;  %v1096_v39 = vmul.f32 %v18016_v36, %v18186_v56 }
 0x1d2   :  { %v18182_v6 = vadd.f32 %v926_v48, %v18058_v12  ;;  %v1123_v21 = vadd.f32 %v1122_v41, %v18165_v59  ;;  %v1110_v12 = vmul.f32 %v18161_v55, %v18168_v52  ;;  %v1138_v41 = vadd.f32 %v1137_v35, %v1107_v2 }
 0x1d3   :  { %v928_v54 = vpop.f32.mrf.mxu0  ;;  %v15071_v49 = vpop.f32.mrf.mxu1  ;;  %v1322_v2 = vmul.f32 %v1093_v23, %v18173_v4 }
 0x1d4   :  { %v18200_v37 = vmul.f32 %v18190_v42, %v18182_v6  ;;  %v1124_v11 = vadd.f32 %v1123_v21, %v18179_v26  ;;  %v18207_v48 = vadd.f32 %v928_v54, %v18066_v30  ;;  %v18215_v49 = vadd.f32 %v980_v10, %v18061_v25 }
 0x1d5   :  { %v930_v13 = vpop.f32.mrf.mxu0  ;;  %v985_v63 = vpop.f32.mrf.mxu1  ;;  %v1339_v24 = vmul.f32 %v1110_v12, %v18168_v52  ;;  %v1139_v0 = vadd.f32 %v1138_v41, %v1110_v12  ;;  %v1150_v10 = vsel %vm1148_vm3, %v1093_v23, 0.0  ;;  %v1367_v54 = vadd.f32 %v1366_v40, %v1336_v3 }
 0x1d6   :  { %21379 = vst [vmem:[#allocation43_spill] sm:$0xff] %v18207_v48  ;;  %v18210_v15 = vadd.f32 %v930_v13, %v18069_v32  ;;  %v1125_v21 = vadd.f32 %v1124_v11, %v18200_v37  ;;  %v1113_v30 = vmul.f32 %v18190_v42, %v18207_v48  ;;  %v18227_v46 = vadd.f32 %v985_v63, %v18087_v43 }
 0x1d7   :  { %v932_v61 = vpop.f32.mrf.mxu0  ;;  %v15074_v47 = vpop.f32.mrf.mxu1  ;;  %v1325_v11 = vmul.f32 %v1096_v39, %v18186_v56  ;;  %v1099_v4 = vmul.f32 %v18073_v33, %v18215_v49  ;;  %v1151_v3 = vadd.f32 %v1150_v10, %v1149_v44  ;;  %v1378_v40 = vsel %vm1148_vm3, %v1322_v2, 0.0 }
 0x1d8   :  { %v18223_v32 = vmul.f32 %v18202_v45, %v18210_v15  ;;  %v18230_v25 = vadd.f32 %v932_v61, %v18091_v58  ;;  %v1342_v35 = vmul.f32 %v1113_v30, %v18207_v48  ;;  %v1140_v12 = vadd.f32 %v1139_v0, %v1113_v30 }
 0x1d9   :  { %v988_v47 = vpop.f32.mrf.mxu1  ;;  %v1377_v58 = vsel %vm1148_vm3, %v1319_v38, 0.0  ;;  %v1368_v61 = vadd.f32 %v1367_v54, %v1339_v24  ;;  %v1152_v30 = vsel %vm1148_vm3, %v1096_v39, 0.0  ;;  %v1380_v24 = vsel %vm1148_vm3, %v1325_v11, 0.0 }
 0x1da   :  { %v1126_v13 = vadd.f32 %v1125_v21, %v18223_v32  ;;  %v1116_v43 = vmul.f32 %v18202_v45, %v18230_v25  ;;  %v18242_v23 = vadd.f32 %v988_v47, %v18097_v14  ;;  %v1102_v21 = vmul.f32 %v18112_v51, %v18227_v46 }
 0x1db   :  { %v15075_v63 = vpop.f32.mrf.mxu1  ;;  %v1369_v0 = vadd.f32 %v1368_v61, %v1342_v35  ;;  %v1328_v38 = vmul.f32 %v1099_v4, %v18215_v49  ;;  %v1154_v47 = vsel %vm1148_vm3, %v1099_v4, 0.0  ;;  %v1351_v35 = vadd.f32 %v18170_v22, %v1332_v1 }
 0x1dc   :  { %v1127_v41 = vrot.slane %v1126_v13, 4  ;;  %v1141_v48 = vadd.f32 %v1140_v12, %v1116_v43  ;;  %v1345_v63 = vmul.f32 %v1116_v43, %v18230_v25  ;;  %v1105_v39 = vmul.f32 %v18121_v18, %v18242_v23 }
 0x1dd   :  { %v993_v56 = vpop.f32.mrf.mxu1  ;;  %v1153_v12 = vadd.f32 %v1152_v30, %v1151_v3  ;;  %v1156_v11 = vsel %vm1148_vm3, %v1102_v21, 0.0 }
 0x1de   :  { %v1128_v33 = vadd.f32 %v1127_v41, %v1126_v13  ;;  %v1142_v14 = vrot.slane %v1141_v48, 4  ;;  %v18252_v44 = vadd.f32 %v993_v56, %v18101_v31  ;;  %v1370_v54 = vadd.f32 %v1369_v0, %v1345_v63 }
 0x1df   :  { %v15078_v2 = vpop.f32.mrf.mxu1  ;;  %v1379_v13 = vadd.f32 %v1378_v40, %v1377_v58  ;;  %v1155_v0 = vadd.f32 %v1154_v47, %v1153_v12  ;;  %v1382_v63 = vsel %vm1148_vm3, %v1328_v38, 0.0  ;;  %v1158_v58 = vsel %vm1148_vm3, %v1105_v39, 0.0 }
 0x1e0   :  { %v1129_v10 = vrot.slane %v1128_v33, 2  ;;  %v1371_v61 = vrot.slane %v1370_v54, 4  ;;  %v1108_v31 = vmul.f32 %v18146_v5, %v18252_v44  ;;  %v1143_v4 = vadd.f32 %v1142_v14, %v1141_v48 }
 0x1e1   :  { %v996_v43 = vpop.f32.mrf.mxu1  ;;  %v1381_v41 = vadd.f32 %v1380_v24, %v1379_v13  ;;  %v1331_v2 = vmul.f32 %v1102_v21, %v18227_v46  ;;  %v1334_v3 = vmul.f32 %v1105_v39, %v18242_v23  ;;  %v1157_v30 = vadd.f32 %v1156_v11, %v1155_v0 }
 0x1e2   :  { %v18262_v56 = vadd.f32 %v996_v43, %v18109_v16  ;;  %v1130_v1 = vadd.f32 %v1129_v10, %v1128_v33  ;;  %v1335_v16 = vmul.f32 %v18165_v59, %v18138_v50  ;;  %v1144_v24 = vrot.slane %v1143_v4, 2 }
 0x1e3   :  { %v15079_v22 = vpop.f32.mrf.mxu1  ;;  %v1372_v14 = vadd.f32 %v1371_v61, %v1370_v54  ;;  %v1383_v47 = vadd.f32 %v1382_v63, %v1381_v41  ;;  %v1160_v38 = vsel %vm1148_vm3, %v1108_v31, 0.0  ;;  %v1337_v21 = vmul.f32 %v1108_v31, %v18252_v44 }
 0x1e4   :  { %v1111_v40 = vmul.f32 %v18161_v55, %v18262_v56  ;;  %v1384_v10 = vsel %vm1148_vm3, %v1331_v2, 0.0  ;;  %v1159_v39 = vadd.f32 %v1158_v58, %v1157_v30  ;;  %v1145_v12 = vadd.f32 %v1144_v24, %v1143_v4 }
 0x1e5   :  { %v1001_v48 = vpop.f32.mrf.mxu1  ;;  %v1373_v43 = vrot.slane %v1372_v14, 2  ;;  %v1131_v22 = vrot.slane %v1130_v1, 1  ;;  %v1386_v59 = vsel %vm1148_vm3, %v1334_v3, 0.0  ;;  %v1385_v63 = vadd.f32 %v1384_v10, %v1383_v47 }
 0x1e6   :  { %v18275_v33 = vadd.f32 %v1001_v48, %v18127_v27  ;;  %v1162_v11 = vsel %vm1148_vm3, %v1111_v40, 0.0  ;;  %v1161_v61 = vadd.f32 %v1160_v38, %v1159_v39  ;;  %v1340_v31 = vmul.f32 %v1111_v40, %v18262_v56 }
 0x1e7   :  { %v15082_v13 = vpop.f32.mrf.mxu1  ;;  %v1146_v27 = vrot.slane %v1145_v12, 1  ;;  %v1374_v0 = vadd.f32 %v1373_v43, %v1372_v14  ;;  %v1388_v2 = vsel %vm1148_vm3, %v1337_v21, 0.0  ;;  %v1338_v40 = vmul.f32 %v18179_v26, %v18157_v28 }
 0x1e8   :  { %v1114_v54 = vmul.f32 %v18190_v42, %v18275_v33  ;;  %v1163_v3 = vadd.f32 %v1162_v11, %v1161_v61  ;;  %v1387_v38 = vadd.f32 %v1386_v59, %v1385_v63  ;;  %v1132_v47 = vadd.f32 %v1131_v22, %v1130_v1  ;;  %v17061_v22 = vld [vmem:[%s21211_s5 + $0xf0] sm:$0xff] }
 0x1e9   :  { %v1004_v41 = vpop.f32.mrf.mxu1  ;;  %v1147_v48 = vadd.f32 %v1146_v27, %v1145_v12  ;;  %v1375_v13 = vrot.slane %v1374_v0, 1  ;;  %v1352_v21 = vadd.f32 %v1351_v35, %v1335_v16  ;;  %v1390_v10 = vsel %vm1148_vm3, %v1340_v31, 0.0  ;;  %v17060_v35 = vld [vmem:[%s21211_s5 + $0x78] sm:$0xff] }
 0x1ea   :  { %v1164_v4 = vsel %vm1148_vm3, %v1114_v54, 0.0  ;;  %v18286_v58 = vadd.f32 %v1004_v41, %v18144_v7  ;;  %v1343_v30 = vmul.f32 %v1114_v54, %v18275_v33  ;;  %v1341_v43 = vmul.f32 %v18200_v37, %v18182_v6  ;;  %v17062_v41 = vld [vmem:[%s21211_s5 + $0x70] sm:$0xff] }
 0x1eb   :  { %v15083_v24 = vpop.f32.mrf.mxu1  ;;  %v1165_v39 = vadd.f32 %v1164_v4, %v1163_v3  ;;  %1241 = vmatprep.mubr.f32.mxu0 %v1147_v48  ;;  %v1376_v7 = vadd.f32 %v1375_v13, %v1374_v0  ;;  %v1389_v12 = vadd.f32 %v1388_v2, %v1387_v38  ;;  %v1353_v1 = vadd.f32 %v1352_v21, %v1338_v40  ;;  %v17064_v2 = vld [vmem:[%s21211_s5 + $0x68] sm:$0xff]  ;;  %v17067_v13 = vld [vmem:[%s21211_s5 + $0xd8] sm:$0xff]  ;;  %v17069_v21 = vld [vmem:[%s21211_s5 + $0xd0] sm:$0xff] }
 0x1ec   :  { %v1117_v14 = vmul.f32 %v18202_v45, %v18286_v58  ;;  %1242 = vmatmul.mubr.f32.vlgmr.msra.gmra.mxu0 %v1132_v47  ;;  %v1392_v26 = vsel %vm1148_vm3, %v1343_v30, 0.0  ;;  %v1344_v16 = vmul.f32 %v18223_v32, %v18210_v15  ;;  %v17063_v32 = vld [vmem:[%s21211_s5 + $0xe8] sm:$0xff]  ;;  %v17065_v30 = vld [vmem:[%s21211_s5 + $0xe0] sm:$0xff]  ;;  %v17068_v38 = vld [vmem:[%s21211_s5 + $0x58] sm:$0xff] }
 0x1ed   :  { %14574 = vmatpush3.msra.mxu0 %v17060_v35  ;;  %1469 = vmatprep.mubr.f32.mxu0 %v1376_v7  ;;  %v1391_v37 = vadd.f32 %v1390_v10, %v1389_v12  ;;  %v1354_v27 = vadd.f32 %v1353_v1, %v1341_v43  ;;  %v17066_v24 = vld [vmem:[%s21211_s5 + $0x60] sm:$0xff]  ;;  %v17071_v7 = vld [vmem:[%s21211_s5 + $0xc8] sm:$0xff]  ;;  %v17075_v35 = vld [vmem:[%s21211_s5 + $0xb8] sm:$0xff] }
 0x1ee   :  { %v1166_v11 = vsel %vm1148_vm3, %v1117_v14, 0.0  ;;  %v1346_v54 = vmul.f32 %v1117_v14, %v18286_v58  ;;  %14575 = vmatprep.subr.mxu0 %v17061_v22  ;;  %v17072_v12 = vld [vmem:[%s21211_s5 + $0x48] sm:$0xff]  ;;  %v17076_v1 = vld [vmem:[%s21211_s5 + $0x138] sm:$0xff] }
 0x1ef   :  { %v1167_v59 = vadd.f32 %v1166_v11, %v1165_v39  ;;  %14576 = vmatpush3.msra.mxu0 %v17062_v41  ;;  %v1393_v0 = vadd.f32 %v1392_v26, %v1391_v37  ;;  %v1355_v4 = vadd.f32 %v1354_v27, %v1344_v16  ;;  %v17070_v39 = vld [vmem:[%s21211_s5 + $0x50] sm:$0xff]  ;;  %v17073_v26 = vld [vmem:[%s21211_s5 + $0xc0] sm:$0xff]  ;;  %v17077_v16 = vld [vmem:[%s21211_s5 + $0x38] sm:$0xff]  ;;  %v21380_v37 = vmov 0.0  }
 0x1f0   :  { %v1394_v31 = vsel %vm1148_vm3, %v1346_v54, 0.0  ;;  %14577 = vmatprep.subr.mxu0 %v17063_v32  ;;  %v17079_v41 = vld [vmem:[%s21211_s5 + $0x130] sm:$0xff]  ;;  %v17082_v32 = vld [vmem:[%s21211_s5 + $0x128] sm:$0xff] }
 0x1f1   :  { %v1168_v61 = vrot.slane %v1167_v59, 4  ;;  %14578 = vmatpush3.msra.mxu0 %v17064_v2  ;;  %v1395_v3 = vadd.f32 %v1394_v31, %v1393_v0  ;;  %v1356_v14 = vrot.slane %v1355_v4, 4  ;;  %v17078_v31 = vld [vmem:[%s21211_s5 + $0xb0] sm:$0xff]  ;;  %v17081_v0 = vld [vmem:[%s21211_s5 + $0xa8] sm:$0xff] }
 0x1f2   :  { %14579 = vmatprep.subr.mxu0 %v17065_v30  ;;  %v17080_v27 = vld [vmem:[%s21211_s5 + $0x30] sm:$0xff] }
 0x1f3   :  { %v1169_v63 = vadd.f32 %v1168_v61, %v1167_v59  ;;  %14580 = vmatpush3.msra.mxu0 %v17066_v24  ;;  %v1396_v47 = vrot.slane %v1395_v3, 4  ;;  %v1357_v11 = vadd.f32 %v1356_v14, %v1355_v4  ;;  %v17074_v59 = vld [vmem:[%s21211_s5 + $0x40] sm:$0xff]  ;;  %v17087_v24 = vld [vmem:[%s21211_s5 + $0x98] sm:$0xff]  ;;  %v17091_v14 = vld [vmem:[%s21211_s5 + $0x110] sm:$0xff] }
 0x1f4   :  { %14581 = vmatprep.subr.mxu0 %v17067_v13  ;;  %v17084_v4 = vld [vmem:[%s21211_s5 + $0xa0] sm:$0xff]  ;;  %v17088_v13 = vld [vmem:[%s21211_s5 + $0x118] sm:$0xff] }
 0x1f5   :  { %v1170_v48 = vrot.slane %v1169_v63, 2  ;;  %14582 = vmatpush3.msra.mxu0 %v17068_v38  ;;  %v1397_v54 = vadd.f32 %v1396_v47, %v1395_v3  ;;  %v1358_v22 = vrot.slane %v1357_v11, 2  ;;  %v17085_v3 = vld [vmem:[%s21211_s5 + $0x120] sm:$0xff]  ;;  %v17090_v38 = vld [vmem:[%s21211_s5 + $0x90] sm:$0xff] }
 0x1f6   :  { %14583 = vmatprep.subr.mxu0 %v17069_v21 }
 0x1f7   :  { %v1171_v40 = vadd.f32 %v1170_v48, %v1169_v63  ;;  %14584 = vmatpush3.msra.mxu0 %v17070_v39  ;;  %v1398_v61 = vrot.slane %v1397_v54, 2  ;;  %v17083_v63 = vld [vmem:[%s21211_s5 + $0x28] sm:$0xff]  ;;  %v1359_v30 = vadd.f32 %v1358_v22, %v1357_v11  ;;  %v17086_v48 = vld [vmem:[%s21211_s5 + $0x20] sm:$0xff] }
 0x1f8   :  { %14585 = vmatprep.subr.mxu0 %v17071_v7  ;;  %v17093_v39 = vld [vmem:[%s21211_s5 + $0x88] sm:$0xff] }
 0x1f9   :  { %v1172_v10 = vrot.slane %v1171_v40, 1  ;;  %14586 = vmatpush3.msra.mxu0 %v17072_v12  ;;  %v1399_v2 = vadd.f32 %v1398_v61, %v1397_v54  ;;  %v1360_v47 = vrot.slane %v1359_v30, 1  ;;  %v17094_v7 = vld [vmem:[%s21211_s5 + $0x108] sm:$0xff]  ;;  %v17096_v12 = vld [vmem:[%s21211_s5 + $0x80] sm:$0xff]  ;;  %v275_v61 = vld [vmem:[#allocation8 + $0x20] sm:$0xff] }
 0x1fa   :  { %14587 = vmatprep.subr.mxu0 %v17073_v26  ;;  %v17097_v54 = vld [vmem:[%s21211_s5 + $0x100] sm:$0xff]  ;;  %v277_v22 = vld [vmem:[#allocation8 + $0x30] sm:$0xff] }
 0x1fb   :  { %v1173_v43 = vadd.f32 %v1172_v10, %v1171_v40  ;;  %14588 = vmatpush3.msra.mxu0 %v17074_v59  ;;  %v17089_v40 = vld [vmem:[%s21211_s5 + $0x18] sm:$0xff]  ;;  %v1400_v21 = vrot.slane %v1399_v2, 1  ;;  %v17092_v10 = vld [vmem:[%s21211_s5 + $0x10] sm:$0xff]  ;;  %v1361_v11 = vadd.f32 %v1360_v47, %v1359_v30  ;;  %v17098_v59 = vld [vmem:[%s21211_s5] sm:$0xff] }
 0x1fc   :  { %14589 = vmatprep.subr.mxu0 %v17075_v35  ;;  %v281_v35 = vld [vmem:[#allocation8 + $0x50] sm:$0xff] }
 0x1fd   :  { %15101 = vmatmul.mubr.msk.f32.vlgmr.msra.gmra.mxu1 %vm1148_vm3, %v1173_v43  ;;  %14590 = vmatpush3.msra.mxu0 %v17077_v16  ;;  %v17095_v43 = vld [vmem:[%s21211_s5 + $0x8] sm:$0xff]  ;;  %v1401_v26 = vadd.f32 %v1400_v21, %v1399_v2  ;;  %v278_v16 = vld [vmem:[#allocation8 + $0x38] sm:$0xff] }
 0x1fe   :  { %15104 = vmatpush3.msra.mxu1 %v17076_v1  ;;  %14591 = vmatprep.subr.mxu0 %v17078_v31  ;;  %v280_v1 = vld [vmem:[#allocation8 + $0x48] sm:$0xff]  ;;  %v274_v31 = vld [vmem:[#allocation8 + $0x18] sm:$0xff] }
 0x1ff   :  { %15105 = vmatprep.subr.mxu1 %v21380_v37  ;;  %14592 = vmatpush3.msra.mxu0 %v17080_v27  ;;  %v271_v27 = vld [vmem:[#allocation8] sm:$0xff] }
 0x200   :  { %15106 = vmatpush3.msra.mxu1 %v17079_v41  ;;  %14593 = vmatprep.subr.mxu0 %v17081_v0  ;;  %v272_v41 = vld [vmem:[#allocation8 + $0x8] sm:$0xff]  ;;  %v15412_v0 = vld [vmem:[#allocation10 + $0x43c] ss:$20 sps:$4 sm:$0xff]  }
 0x201   :  { %15107 = vmatprep.subr.mxu1 %v21380_v37  ;;  %14594 = vmatpush3.msra.mxu0 %v17083_v63 }
 0x202   :  { %15108 = vmatpush3.msra.mxu1 %v17082_v32  ;;  %14595 = vmatprep.subr.mxu0 %v17084_v4 }
 0x203   :  { %15109 = vmatprep.subr.mxu1 %v21380_v37  ;;  %14596 = vmatpush3.msra.mxu0 %v17086_v48 }
 0x204   :  { %15110 = vmatpush3.msra.mxu1 %v17085_v3  ;;  %14597 = vmatprep.subr.mxu0 %v17087_v24 }
 0x205   :  { %15111 = vmatprep.subr.mxu1 %v21380_v37  ;;  %14598 = vmatpush3.msra.mxu0 %v17089_v40 }
 0x206   :  { %15112 = vmatpush3.msra.mxu1 %v17088_v13  ;;  %14599 = vmatprep.subr.mxu0 %v17090_v38 }
 0x207   :  { %15113 = vmatprep.subr.mxu1 %v21380_v37  ;;  %14600 = vmatpush3.msra.mxu0 %v17092_v10 }
 0x208   :  { %15114 = vmatpush3.msra.mxu1 %v17091_v14  ;;  %14601 = vmatprep.subr.mxu0 %v17093_v39 }
 0x209   :  { %15115 = vmatprep.subr.mxu1 %v21380_v37  ;;  %14602 = vmatpush3.msra.mxu0 %v17095_v43  ;;  %v229_v43 = vld [vmem:[#allocation5] sm:$0x1] }
 0x20a   :  { %15116 = vmatpush3.msra.mxu1 %v17094_v7  ;;  %14603 = vmatprep.subr.mxu0 %v17096_v12 }
 0x20b   :  { %15117 = vmatprep.subr.mxu1 %v21380_v37  ;;  %14604 = vmatpush3.msra.mxu0 %v17098_v59  ;;  %v279_v59 = vld [vmem:[#allocation8 + $0x40] sm:$0xff] }
 0x20c   :  { %15118 = vmatpush3.msra.mxu1 %v17097_v54  ;;  %15119 = vmatprep.mubr.msk.f32.mxu1 %vm17462_vm2, %v21380_v37  ;;  %v282_v54 = vld [vmem:[#allocation8 + $0x58] sm:$0xff] }
 0x20d   :  { %1470 = vmatmul.mubr.f32.vlgmr.msra.gmra.mxu0 %v1361_v11  ;;  %15120 = vmatmul.mubr.msk.f32.vlgmr.msra.gmra.mxu1 %vm1148_vm3, %v1401_v26  ;;  %v230_v26 = vld [vmem:[#allocation7] sm:$0x1] }
 0x20e   :  { %1623 = vmatprep.mubr.f32.mxu1 %v21380_v37  ;;  %1809 = vmatprep.mubr.f32.mxu0 %v21380_v37 }
 0x20f   :  { %1583 = vmatprep.subr.mxu1 %v281_v35  ;;  %1769 = vmatprep.subr.mxu0 %v281_v35 }
 0x210   :  { %1584 = vmatpush1.msra.mxu1 %v280_v1  ;;  %1770 = vmatpush1.msra.mxu0 %v280_v1  ;;  %v15410_v1 = vld [vmem:[#allocation10 + $0x438] ss:$20 sps:$4 sm:$0xff]  }
 0x211   :  { %1585 = vmatprep.subr.mxu1 %v278_v16  ;;  %1771 = vmatprep.subr.mxu0 %v278_v16  ;;  %v276_v16 = vld [vmem:[#allocation8 + $0x28] sm:$0xff] }
 0x212   :  { %1586 = vmatpush1.msra.mxu1 %v277_v22  ;;  %1772 = vmatpush1.msra.mxu0 %v277_v22 }
 0x213   :  { %1587 = vmatprep.subr.mxu1 %v275_v61  ;;  %1773 = vmatprep.subr.mxu0 %v275_v61  ;;  %v15415_v61 = vld [vmem:[#allocation10 + $0x414] ss:$20 sps:$4 sm:$0xff]  }
 0x214   :  { %1588 = vmatpush1.msra.mxu1 %v274_v31  ;;  %1774 = vmatpush1.msra.mxu0 %v274_v31  ;;  %v273_v31 = vld [vmem:[#allocation8 + $0x10] sm:$0xff] }
 0x215   :  { %1589 = vmatprep.subr.mxu1 %v272_v41  ;;  %1775 = vmatprep.subr.mxu0 %v272_v41  ;;  %v15413_v41 = vld [vmem:[#allocation10 + $0x410] ss:$20 sps:$4 sm:$0xff]  }
 0x216   :  { %1590 = vmatpush1.msra.mxu1 %v271_v27  ;;  %1776 = vmatpush1.msra.mxu0 %v271_v27  ;;  %v15418_v27 = vld [vmem:[#allocation10 + $0x3ec] ss:$20 sps:$4 sm:$0xff]  }
 0x217   :  { %15122 = vmatprep.subr.mxu1 %v21380_v37  ;;  %3016 = vmatprep.subr.bf16.mxu0 %v15412_v0  ;;  %v15416_v0 = vld [vmem:[#allocation10 + $0x3e8] ss:$20 sps:$4 sm:$0xff]  }
 0x2ac   :  { %v14561_v2 = vpop.f32.mrf.mxu0 }
 0x2ae   :  { %v14562_v4 = vpop.f32.mrf.mxu0 }
 0x2af   :  { %v14563_v3 = vadd.f32 %v14562_v4, %v14561_v2  ;;  %v15424_v2 = vld [vmem:[#allocation10 + $0x39c] ss:$20 sps:$4 sm:$0xff]   ;;  %v21381_v4 = vmov 0  }
 0x2bd   :  { %v1313_v32 = vpop.f32.mrf.mxu1 }
 0x2be   :  { %v1314_v30 = vadd.f32 %v14563_v3, %v1313_v32  ;;  %v15421_v32 = vld [vmem:[#allocation10 + $0x3c4] ss:$20 sps:$4 sm:$0xff]  }
 0x2bf   :  { %v15102_v63 = vpop.f32.mrf.mxu1  ;;  %v15422_v3 = vld [vmem:[#allocation10 + $0x398] ss:$20 sps:$4 sm:$0xff]  }
 0x2c0   :  { %v1546_v38 = vmul.f32 0.001953125, %v1314_v30  ;;  %v15419_v63 = vld [vmem:[#allocation10 + $0x3c0] ss:$20 sps:$4 sm:$0xff]  }
 0x2c1   :  { %v15427_v30 = vld [vmem:[#allocation10 + $0x374] ss:$20 sps:$4 sm:$0xff]  }
 0x2c2   :  { %v1548_v21 = vmul.f32 %v1546_v38, %v1546_v38 }
 0x2cd   :  { %v14605_v48 = vpop.f32.mrf.mxu0  ;;  %v1541_v24 = vpop.f32.mrf.mxu1 }
 0x2cf   :  { %v14606_v13 = vpop.f32.mrf.mxu0  ;;  %v15121_v40 = vpop.f32.mrf.mxu1 }
 0x2d0   :  { %v14607_v14 = vadd.f32 %v14606_v13, %v14605_v48  ;;  %v15425_v48 = vld [vmem:[#allocation10 + $0x370] ss:$20 sps:$4 sm:$0xff]   ;;  %v15428_v13 = vld [vmem:[#allocation10 + $0x348] ss:$20 sps:$4 sm:$0xff]  }
 0x2d1   :  { %v15433_v40 = vld [vmem:[#allocation10 + $0x324] ss:$20 sps:$4 sm:$0xff]  }
 0x2d2   :  { %v1542_v47 = vadd.f32 %v14607_v14, %v1541_v24  ;;  %v15430_v24 = vld [vmem:[#allocation10 + $0x34c] ss:$20 sps:$4 sm:$0xff]   ;;  %v15436_v14 = vld [vmem:[#allocation10 + $0x57c] ss:$20 sps:$4 sm:$0xff]  }
 0x2d4   :  { %v1547_v10 = vmul.f32 0.001953125, %v1542_v47  ;;  %v15434_v47 = vld [vmem:[#allocation10 + $0x578] ss:$20 sps:$4 sm:$0xff]  }
 0x2d6   :  { %v1549_v39 = vsub.f32 %v1547_v10, %v1548_v21  ;;  %v15439_v21 = vld [vmem:[#allocation10 + $0x554] ss:$20 sps:$4 sm:$0xff]   ;;  %v15437_v10 = vld [vmem:[#allocation10 + $0x550] ss:$20 sps:$4 sm:$0xff]  }
 0x2d8   :  { %v1550_v7 = vadd.f32 1e-05, %v1549_v39  ;;  %v15442_v39 = vld [vmem:[#allocation10 + $0x52c] ss:$20 sps:$4 sm:$0xff]  }
 0x2da   :  { %17046 = vrsqrt.f32 %v1550_v7  ;;  %v15440_v7 = vld [vmem:[#allocation10 + $0x528] ss:$20 sps:$4 sm:$0xff]  }
 0x2e7   :  { %v17047_v12 = vpop.eup %17046 }
 0x2e8   :  { %v1552_v11 = vmul.f32 %v17047_v12, %v229_v43  ;;  %v15445_v43 = vld [vmem:[#allocation10 + $0x504] ss:$20 sps:$4 sm:$0xff]   ;;  %v15443_v12 = vld [vmem:[#allocation10 + $0x500] ss:$20 sps:$4 sm:$0xff]  }
 0x2ea   :  { %13315 = vmatmul.mubr.msk.f32.vlgmr.msra.gmra.mxu1 %vm1555_vm4, %v1552_v11  ;;  %v1553_v35 = vmul.f32 %v1552_v11, %v1546_v38  ;;  %v15431_v38 = vld [vmem:[#allocation10 + $0x320] ss:$20 sps:$4 sm:$0xff]  }
 0x2eb   :  { %15123 = vmatpush3.msra.mxu1 %v282_v54  ;;  %15130 = vmatprep.mubr.msk.f32.mxu1 %vm17462_vm2, %v21380_v37 }
 0x2ec   :  { %15124 = vmatprep.subr.mxu1 %v21380_v37  ;;  %v1554_v22 = vsub.f32 %v230_v26, %v1553_v35  ;;  %v15449_v26 = vld [vmem:[#allocation10 + $0x4b0] ss:$20 sps:$4 sm:$0xff]  }
 0x2ed   :  { %15125 = vmatpush3.msra.mxu1 %v279_v59  ;;  %v15454_v35 = vld [vmem:[#allocation10 + $0x61c] ss:$20 sps:$4 sm:$0xff]  }
 0x2ee   :  { %15126 = vmatprep.subr.mxu1 %v21380_v37  ;;  %13317 = vmatmul.mubr.msk.f32.vlgmr.msra.gmra.mxu0 %vm1555_vm4, %v1554_v22 }
 0x2ef   :  { %15127 = vmatpush3.msra.mxu1 %v276_v16  ;;  %3017 = vmatpush1.bf16.msra.mxu0 %v15410_v1  ;;  %v15452_v1 = vld [vmem:[#allocation10 + $0x618] ss:$20 sps:$4 sm:$0xff]  }
 0x2f0   :  { %15128 = vmatprep.subr.mxu1 %v21380_v37  ;;  %3018 = vmatprep.subr.bf16.mxu0 %v15415_v61  ;;  %v15458_v61 = vld [vmem:[#allocation10 + $0x5f0] ss:$20 sps:$4 sm:$0xff]  }
 0x2f1   :  { %15129 = vmatpush3.msra.mxu1 %v273_v31 }
 0x2f2   :  { %15131 = vmatmul.mubr.msk.f32.vlgmr.msra.gmra.mxu1 %vm1555_vm4, %v1552_v11  ;;  %15133 = vmatprep.subr.mxu1 %v21380_v37  ;;  %v15448_v11 = vld [vmem:[#allocation10 + $0x4dc] ss:$20 sps:$4 sm:$0xff]  }
 0x2f3   :  { %15134 = vmatpush3.msra.mxu1 %v282_v54  ;;  %15141 = vmatprep.mubr.msk.f32.mxu1 %vm17462_vm2, %v21380_v37  ;;  %v15446_v54 = vld [vmem:[#allocation10 + $0x4d8] ss:$20 sps:$4 sm:$0xff]  }
 0x2f4   :  { %15135 = vmatprep.subr.mxu1 %v21380_v37  ;;  %3019 = vmatpush1.bf16.msra.mxu0 %v15413_v41  ;;  %v15461_v41 = vld [vmem:[#allocation10 + $0x460] ss:$20 sps:$4 sm:$0xff]  }
 0x2f5   :  { %15136 = vmatpush3.msra.mxu1 %v279_v59  ;;  %3020 = vmatprep.subr.bf16.mxu0 %v15418_v27  ;;  %v15451_v59 = vld [vmem:[#allocation10 + $0x4b4] ss:$20 sps:$4 sm:$0xff]   ;;  %v15463_v27 = vld [vmem:[#allocation10 + $0x464] ss:$20 sps:$4 sm:$0xff]  }
 0x2f6   :  { %15137 = vmatprep.subr.mxu1 %v21380_v37 }
 0x2f7   :  { %15138 = vmatpush3.msra.mxu1 %v276_v16  ;;  %v15457_v16 = vld [vmem:[#allocation10 + $0x48c] ss:$20 sps:$4 sm:$0xff]  }
 0x2f8   :  { %15139 = vmatprep.subr.mxu1 %v21380_v37  ;;  %3021 = vmatpush1.bf16.msra.mxu0 %v15416_v0  ;;  %v15466_v0 = vld [vmem:[#allocation10 + $0x5cc] ss:$20 sps:$4 sm:$0xff]  }
 0x2f9   :  { %15140 = vmatpush3.msra.mxu1 %v273_v31  ;;  %3022 = vmatprep.subr.bf16.mxu0 %v15421_v32  ;;  %v15460_v31 = vld [vmem:[#allocation10 + $0x5f4] ss:$20 sps:$4 sm:$0xff]  }
 0x2fa   :  { %15142 = vmatmul.mubr.msk.f32.vlgmr.msra.gmra.mxu1 %vm1555_vm4, %v1554_v22  ;;  %3107 = vmatprep.subr.bf16.mxu1 %v15454_v35  ;;  %v15455_v22 = vld [vmem:[#allocation10 + $0x488] ss:$20 sps:$4 sm:$0xff]  }
 0x2fb   :  { %3131 = vmatprep.mubr.bf16.mxu1 %v21381_v4  ;;  %3108 = vmatpush1.bf16.msra.mxu1 %v15452_v1  ;;  %v15464_v32 = vld [vmem:[#allocation10 + $0x5c8] ss:$20 sps:$4 sm:$0xff]  }
 0x2fc   :  { %3023 = vmatpush1.bf16.msra.mxu0 %v15419_v63  ;;  %3109 = vmatprep.subr.bf16.mxu1 %v15460_v31  ;;  %v15467_v63 = vld [vmem:[#allocation10 + $0x5a0] ss:$20 sps:$4 sm:$0xff]  }
 0x2fd   :  { %3024 = vmatprep.subr.bf16.mxu0 %v15424_v2  ;;  %v15469_v2 = vld [vmem:[#allocation10 + $0x5a4] ss:$20 sps:$4 sm:$0xff]  }
 0x2ff   :  { %3110 = vmatpush1.bf16.msra.mxu1 %v15458_v61 }
 0x300   :  { %3025 = vmatpush1.bf16.msra.mxu0 %v15422_v3  ;;  %3111 = vmatprep.subr.bf16.mxu1 %v15466_v0  ;;  %v15472_v3 = vld [vmem:[#allocation10 + $0x444] ss:$20 sps:$4 sm:$0xff]  }
 0x301   :  { %3026 = vmatprep.subr.bf16.mxu0 %v15427_v30  ;;  %v15487_v30 = vld [vmem:[#allocation10 + $0x624] ss:$20 sps:$4 sm:$0xff]  }
 0x303   :  { %3112 = vmatpush1.bf16.msra.mxu1 %v15464_v32 }
 0x304   :  { %3027 = vmatpush1.bf16.msra.mxu0 %v15425_v48  ;;  %3113 = vmatprep.subr.bf16.mxu1 %v15469_v2  ;;  %v1700_v48 = vlaneseq }
 0x305   :  { %3028 = vmatprep.subr.bf16.mxu0 %v15430_v24 }
 0x306   :  { %v18449_v24 = vshrl.u32 %v1700_v48, 7 }
 0x307   :  { %3114 = vmatpush1.bf16.msra.mxu1 %v15467_v63 }
 0x308   :  { %3029 = vmatpush1.bf16.msra.mxu0 %v15428_v13  ;;  %3182 = vmatprep.subr.bf16.mxu1 %v15472_v3  ;;  %21382 = vst [vmem:[#allocation36_spill] sm:$0xff] %v18449_v24  ;;  %v18452_v13 = vsub.s32 0, %v18449_v24 }
 0x309   :  { %3030 = vmatprep.subr.bf16.mxu0 %v15433_v40 }
 0x30a   :  { %21383 = vst [vmem:[#allocation37_spill] sm:$0xff] %v18452_v13 }
 0x30c   :  { %3031 = vmatpush1.bf16.msra.mxu0 %v15431_v38 }
 0x30d   :  { %3032 = vmatprep.subr.bf16.mxu0 %v15436_v14 }
 0x310   :  { %3033 = vmatpush2.bf16.msra.mxu0 %v15434_v47 }
 0x311   :  { %3034 = vmatprep.subr.bf16.mxu0 %v15439_v21 }
 0x314   :  { %3035 = vmatpush2.bf16.msra.mxu0 %v15437_v10 }
 0x315   :  { %3036 = vmatprep.subr.bf16.mxu0 %v15442_v39 }
 0x318   :  { %3037 = vmatpush2.bf16.msra.mxu0 %v15440_v7 }
 0x319   :  { %3038 = vmatprep.subr.bf16.mxu0 %v15445_v43 }
 0x31c   :  { %3039 = vmatpush2.bf16.msra.mxu0 %v15443_v12 }
 0x31d   :  { %3040 = vmatprep.subr.bf16.mxu0 %v15448_v11 }
 0x320   :  { %3041 = vmatpush2.bf16.msra.mxu0 %v15446_v54 }
 0x321   :  { %3042 = vmatprep.subr.bf16.mxu0 %v15451_v59 }
 0x324   :  { %3043 = vmatpush2.bf16.msra.mxu0 %v15449_v26 }
 0x325   :  { %3044 = vmatprep.subr.bf16.mxu0 %v15457_v16 }
 0x328   :  { %3045 = vmatpush2.bf16.msra.mxu0 %v15455_v22 }
 0x329   :  { %3046 = vmatprep.subr.bf16.mxu0 %v15463_v27 }
 0x32c   :  { %3047 = vmatpush2.bf16.msra.mxu0 %v15461_v41 }
 0x32d   :  { %3273 = vmatprep.subr.bf16.mxu0 %v15487_v30 }
 0x3aa   :  { %v1625_v40 = vpop.f32.mrf.mxu1 }
 0x3ab   :  { %v18455_v38 = vrot.slane %v1625_v40, %v18452_v13 }
 0x3ac   :  { %v1627_v14 = vpop.f32.mrf.mxu1 }
 0x3ad   :  { %v18458_v47 = vrot.slane %v1627_v14, %v18452_v13  ;;  %v1712_v21 = vmul.f32 %v18455_v38, %v18028_v17  ;;  %v1715_v10 = vmul.f32 %v18455_v38, %v18010_v9  ;;  %v1718_v39 = vmul.f32 %v18455_v38, %v18038_v62  ;;  %v21384_v62 = vld [vmem:[#allocation44_spill] sm:$0xff] }
 0x3ae   :  { %v1811_v7 = vpop.f32.mrf.mxu0  ;;  %v1721_v43 = vmul.f32 %v18455_v38, %v18063_v8  ;;  %v1724_v12 = vmul.f32 %v18455_v38, %v18081_v34  ;;  %v1727_v11 = vmul.f32 %v18455_v38, %v18123_v57  ;;  %v18474_v54 = vmul.f32 %v18455_v38, %v18138_v50  ;;  %v21385_v8 = vld [vmem:[#allocation47_spill] sm:$0xff] }
 0x3af   :  { %v18477_v17 = vrot.slane %v1811_v7, %v18452_v13  ;;  %v1713_v9 = vmul.f32 %v18458_v47, %v18030_v19  ;;  %v1716_v26 = vmul.f32 %v18458_v47, %v21384_v62  ;;  %v1719_v59 = vmul.f32 %v18458_v47, %v21385_v8  ;;  %v21388_v8 = vld [vmem:[#allocation48_spill] sm:$0xff] }
 0x3b0   :  { %v1813_v34 = vpop.f32.mrf.mxu0  ;;  %v1722_v57 = vmul.f32 %v18458_v47, %v18079_v20  ;;  %v1725_v50 = vmul.f32 %v18458_v47, %v18105_v60  ;;  %v1728_v35 = vmul.f32 %v18458_v47, %v18132_v29  ;;  %v18493_v1 = vmul.f32 %v18458_v47, %v18151_v53 }
 0x3b1   :  { %v18496_v19 = vrot.slane %v1813_v34, %v18452_v13  ;;  %v1898_v16 = vadd.f32 %v18477_v17, %v1712_v21  ;;  %v1901_v22 = vadd.f32 %v18477_v17, %v1715_v10  ;;  %v1904_v61 = vadd.f32 %v18477_v17, %v1718_v39  ;;  %v21386_v39 = vld [vmem:[#allocation42_spill] sm:$0xff] }
 0x3b2   :  { %v1696_v20 = vpop.f32.mrf.mxu1  ;;  %v1907_v31 = vadd.f32 %v18477_v17, %v1721_v43  ;;  %v1910_v60 = vadd.f32 %v18477_v17, %v1724_v12  ;;  %v1913_v29 = vadd.f32 %v18477_v17, %v1727_v11  ;;  %v18506_v53 = vmul.f32 %v18458_v47, %v18168_v52  ;;  %v21387_v43 = vld [vmem:[#allocation45_spill] sm:$0xff] }
 0x3b3   :  { %v18509_v41 = vrot.slane %v1696_v20, %v18452_v13  ;;  %v1899_v27 = vadd.f32 %v18496_v19, %v1713_v9  ;;  %v1902_v0 = vadd.f32 %v18496_v19, %v1716_v26  ;;  %v1905_v32 = vadd.f32 %v18496_v19, %v1719_v59 }
 0x3b4   :  { %v15132_v63 = vpop.f32.mrf.mxu1  ;;  %v1908_v2 = vadd.f32 %v18496_v19, %v1722_v57  ;;  %v1928_v3 = vmax.f32 %v1898_v16, 0.0  ;;  %v1931_v30 = vmax.f32 %v1901_v22, 0.0  ;;  %v1934_v48 = vmax.f32 %v1904_v61, 0.0 }
 0x3b5   :  { %v1929_v40 = vmax.f32 %v1899_v27, 0.0  ;;  %v1932_v14 = vmax.f32 %v1902_v0, 0.0  ;;  %v1935_v21 = vmax.f32 %v1905_v32, 0.0  ;;  %v1937_v52 = vmax.f32 %v1907_v31, 0.0 }
 0x3b6   :  { %v1938_v10 = vmax.f32 %v1908_v2, 0.0  ;;  %v1958_v7 = vmul.f32 %v1928_v3, %v21386_v39  ;;  %v1961_v12 = vmul.f32 %v1931_v30, %v21387_v43  ;;  %v1964_v11 = vmul.f32 %v1934_v48, %v18016_v36 }
 0x3b7   :  { %v1959_v9 = vmul.f32 %v1929_v40, %v21386_v39  ;;  %v1962_v62 = vmul.f32 %v1932_v14, %v21387_v43  ;;  %v1965_v26 = vmul.f32 %v1935_v21, %v18016_v36  ;;  %v1967_v59 = vmul.f32 %v1937_v52, %v21388_v8 }
 0x3b8   :  { %v1968_v34 = vmul.f32 %v1938_v10, %v21388_v8  ;;  %v1988_v57 = vpack.c.bf16 %v1961_v12, %v1958_v7  ;;  %v1911_v16 = vadd.f32 %v18496_v19, %v1725_v50  ;;  %v1914_v22 = vadd.f32 %v18496_v19, %v1728_v35 }
 0x3b9   :  { %v1989_v61 = vpack.c.bf16 %v1962_v62, %v1959_v9  ;;  %v1991_v20 = vpack.c.bf16 %v1967_v59, %v1964_v11  ;;  %v1940_v31 = vmax.f32 %v1910_v60, 0.0  ;;  %v1943_v27 = vmax.f32 %v1913_v29, 0.0 }
 0x3ba   :  { %v1882_v0 = vpop.f32.mrf.mxu1  ;;  %v1992_v32 = vpack.c.bf16 %v1968_v34, %v1965_v26  ;;  %v18525_v63 = vrot.slane %v1988_v57, 4  ;;  %v1941_v2 = vmax.f32 %v1911_v16, 0.0  ;;  %v1944_v3 = vmax.f32 %v1914_v22, 0.0  ;;  %v21390_v57 = vld [vmem:[#allocation31_spill] sm:$0xff]  ;;  %v21391_v22 = vld [vmem:[#allocation40_spill] sm:$0xff] }
 0x3bb   :  { %v18528_v30 = vrot.slane %v1882_v0, %v18452_v13  ;;  %v18530_v48 = vrot.slane %v1989_v61, 4  ;;  %v2143_v40 = vrot.slane %v1991_v20, 4  ;;  %v1970_v50 = vmul.f32 %v1940_v31, %v18112_v51 }
 0x3bc   :  { %v15143_v14 = vpop.f32.mrf.mxu1  ;;  %v2145_v35 = vrot.slane %v1992_v32, 4  ;;  %v2176_v60 = vsel %vm309_vm0, 0, %v18525_v63  ;;  %v1971_v29 = vmul.f32 %v1941_v2, %v18112_v51  ;;  %v1974_v21 = vmul.f32 %v1944_v3, %v18121_v18  ;;  %v15485_v2 = vld [vmem:[#allocation10 + $0x620] ss:$20 sps:$4 sm:$0xff]  }
 0x3bd   :  { %v2179_v52 = vsel %vm309_vm0, 0, %v18530_v48  ;;  %v18541_v10 = vsel %vm309_vm0, %v18525_v63, %v2143_v40  ;;  %v2438_v7 = vrot.slane %v2176_v60, 4  ;;  %v1973_v12 = vmul.f32 %v1943_v27, %v18121_v18  ;;  %v21392_v27 = vld [vmem:[#allocation34_spill] sm:$0xff] }
 0x3be   :  { %v18546_v11 = vsel %vm309_vm0, %v18530_v48, %v2145_v35  ;;  %v2441_v9 = vrot.slane %v2179_v52, 4  ;;  %v2439_v62 = vrot.slane %v18541_v10, 4  ;;  %v1995_v26 = vpack.c.bf16 %v1974_v21, %v1971_v29  ;;  %v15493_v29 = vld [vmem:[#allocation10 + $0x5fc] ss:$20 sps:$4 sm:$0xff]  }
 0x3bf   :  { %21389 = vst [vmem:[#allocation44_spill] sm:$0xff] %v18546_v11  ;;  %v2442_v59 = vrot.slane %v18546_v11, 4  ;;  %v1994_v34 = vpack.c.bf16 %v1973_v12, %v1970_v50  ;;  %v1714_v16 = vmul.f32 %v18509_v41, %v21390_v57  ;;  %v1717_v61 = vmul.f32 %v18509_v41, %v21391_v22 }
 0x3c0   :  { %v18555_v20 = vsel %vm309_vm0, %v2438_v7, %v2439_v62  ;;  %v18557_v31 = vrot.slane %v1995_v26, 4  ;;  %v1720_v0 = vmul.f32 %v18509_v41, %v21392_v27  ;;  %v1723_v32 = vmul.f32 %v18509_v41, %v18215_v49 }
 0x3c1   :  { %v18564_v3 = vsel %vm309_vm0, %v2441_v9, %v2442_v59  ;;  %v18566_v50 = vrot.slane %v1994_v34, 4  ;;  %v1900_v14 = vadd.f32 %v18528_v30, %v1714_v16  ;;  %v1903_v60 = vadd.f32 %v18528_v30, %v1717_v61  ;;  %v15491_v61 = vld [vmem:[#allocation10 + $0x5f8] ss:$20 sps:$4 sm:$0xff]  }
 0x3c2   :  { %3048 = vmatprep.mubr.bf16.mxu0 %v18564_v3  ;;  %v18573_v21 = vsel %vm309_vm0, %v2145_v35, %v18557_v31  ;;  %v1906_v52 = vadd.f32 %v18528_v30, %v1720_v0  ;;  %v1909_v49 = vadd.f32 %v18528_v30, %v1723_v32  ;;  %v1917_v7 = vadd.f32 %v18496_v19, %v18493_v1  ;;  %v15499_v32 = vld [vmem:[#allocation10 + $0x5d4] ss:$20 sps:$4 sm:$0xff]  }
 0x3c3   :  { %3049 = vmatmul.mubr.bf16.vlgmr.msra.gmra.mxu0 %v18555_v20  ;;  %v2449_v12 = vrot.slane %v18573_v21, 4  ;;  %v18583_v9 = vsel %vm309_vm0, %v2143_v40, %v18566_v50  ;;  %v1930_v26 = vmax.f32 %v1900_v14, 0.0  ;;  %v1933_v34 = vmax.f32 %v1903_v60, 0.0 }
 0x3c4   :  { %v2447_v35 = vrot.slane %v18583_v9, 4  ;;  %v1936_v57 = vmax.f32 %v1906_v52, 0.0  ;;  %v1939_v16 = vmax.f32 %v1909_v49, 0.0  ;;  %v1920_v22 = vadd.f32 %v18496_v19, %v18506_v53  ;;  %3274 = vmatpush1.bf16.msra.mxu0 %v15485_v2 }
 0x3c5   :  { %v18591_v1 = vsel %vm309_vm0, %v2442_v59, %v2449_v12  ;;  %v1960_v27 = vmul.f32 %v1930_v26, %v21386_v39  ;;  %v1963_v40 = vmul.f32 %v1933_v34, %v21387_v43  ;;  %v1947_v0 = vmax.f32 %v1917_v7, 0.0  ;;  %3275 = vmatprep.subr.bf16.mxu0 %v15493_v29  ;;  %v15722_v39 = vld [vmem:[#allocation10 + $0x6bc] ss:$20 sps:$4 sm:$0xff]  }
 0x3c6   :  { %3058 = vmatprep.mubr.bf16.mxu0 %v18591_v1  ;;  %v18599_v53 = vsel %vm309_vm0, %v2439_v62, %v2447_v35  ;;  %v1966_v2 = vmul.f32 %v1936_v57, %v18016_v36  ;;  %v1969_v14 = vmul.f32 %v1939_v16, %v21388_v8  ;;  %v1950_v59 = vmax.f32 %v1920_v22, 0.0  ;;  %v15497_v57 = vld [vmem:[#allocation10 + $0x5d0] ss:$20 sps:$4 sm:$0xff]   ;;  %v15714_v8 = vld [vmem:[#allocation10 + $0x6e0] ss:$20 sps:$4 sm:$0xff]  }
 0x3c7   :  { %v1990_v60 = vpack.c.bf16 %v1963_v40, %v1960_v27  ;;  %v1977_v52 = vmul.f32 %v1947_v0, %v18146_v5  ;;  %v1733_v49 = vmul.f32 %v18455_v38, %v18157_v28  ;;  %v1916_v29 = vadd.f32 %v18477_v17, %v18474_v54  ;;  %v21393_v40 = vld [vmem:[#allocation43_spill] sm:$0xff]  ;;  %v15505_v54 = vld [vmem:[#allocation10 + $0x5ac] ss:$20 sps:$4 sm:$0xff]  }
 0x3c8   :  { %v1993_v7 = vpack.c.bf16 %v1969_v14, %v1966_v2  ;;  %v1980_v26 = vmul.f32 %v1950_v59, %v18161_v55  ;;  %v1726_v62 = vmul.f32 %v18509_v41, %v18227_v46  ;;  %v1729_v34 = vmul.f32 %v18509_v41, %v18242_v23  ;;  %3276 = vmatpush1.bf16.msra.mxu0 %v15491_v61  ;;  %v15725_v36 = vld [vmem:[#allocation10 + $0x714] ss:$20 sps:$4 sm:$0xff]  }
 0x3c9   :  { %v2142_v16 = vrot.slane %v1990_v60, 4  ;;  %v1919_v22 = vadd.f32 %v18477_v17, %v1733_v49  ;;  %v1946_v27 = vmax.f32 %v1916_v29, 0.0  ;;  %v1737_v28 = vmul.f32 %v18458_v47, %v21393_v40  ;;  %3277 = vmatprep.subr.bf16.mxu0 %v15499_v32 }
 0x3ca   :  { %v2147_v0 = vrot.slane %v1993_v7, 4  ;;  %v1998_v2 = vpack.c.bf16 %v1980_v26, %v1977_v52  ;;  %v1912_v14 = vadd.f32 %v18528_v30, %v1726_v62  ;;  %v1915_v46 = vadd.f32 %v18528_v30, %v1729_v34  ;;  %v15503_v7 = vld [vmem:[#allocation10 + $0x5a8] ss:$20 sps:$4 sm:$0xff]   ;;  %v15470_v26 = vld [vmem:[#allocation10 + $0x440] ss:$20 sps:$4 sm:$0xff]  }
 0x3cb   :  { %3059 = vmatmul.mubr.bf16.gmra.mxu0 %v18599_v53  ;;  %v18620_v23 = vsel %vm309_vm0, 0, %v2142_v16  ;;  %v1949_v61 = vmax.f32 %v1919_v22, 0.0  ;;  %v1976_v59 = vmul.f32 %v1946_v27, %v18146_v5  ;;  %v1740_v60 = vmul.f32 %v18458_v47, %v18230_v25  ;;  %v15475_v47 = vld [vmem:[#allocation10 + $0x41c] ss:$20 sps:$4 sm:$0xff]  }
 0x3cc   :  { %v18626_v32 = vsel %vm309_vm0, %v2142_v16, %v2147_v0  ;;  %v2444_v52 = vrot.slane %v18620_v23, 4  ;;  %v18629_v49 = vrot.slane %v1998_v2, 4  ;;  %v1942_v29 = vmax.f32 %v1912_v14, 0.0  ;;  %3278 = vmatpush1.bf16.msra.mxu0 %v15497_v57 }
 0x3cd   :  { %v2445_v62 = vrot.slane %v18626_v32, 4  ;;  %v1979_v34 = vmul.f32 %v1949_v61, %v18161_v55  ;;  %v1945_v22 = vmax.f32 %v1915_v46, 0.0  ;;  %v1923_v27 = vadd.f32 %v18496_v19, %v1737_v28  ;;  %3279 = vmatprep.subr.bf16.mxu0 %v15505_v54 }
 0x3ce   :  { %v18637_v25 = vsel %vm309_vm0, %v18557_v31, %v18629_v49  ;;  %v1972_v16 = vmul.f32 %v1942_v29, %v18112_v51  ;;  %v1926_v57 = vadd.f32 %v18496_v19, %v1740_v60  ;;  %v1736_v40 = vmul.f32 %v18455_v38, %v18182_v6  ;;  %v15708_v51 = vld [vmem:[#allocation10 + $0x708] ss:$20 sps:$4 sm:$0xff]  }
 0x3cf   :  { %v18644_v2 = vsel %vm309_vm0, %v2444_v52, %v2445_v62  ;;  %v2455_v14 = vrot.slane %v18637_v25, 4  ;;  %v1997_v28 = vpack.c.bf16 %v1979_v34, %v1976_v59  ;;  %v1975_v54 = vmul.f32 %v1945_v22, %v18121_v18  ;;  %v15473_v59 = vld [vmem:[#allocation10 + $0x418] ss:$20 sps:$4 sm:$0xff]  }
 0x3d0   :  { %13419 = vmatmul.mubr.msk.bf16.vlgmr.msra.gmra.mxu1 %vm1148_vm3, %v18644_v2  ;;  %v1953_v31 = vmax.f32 %v1923_v27, 0.0  ;;  %v1956_v46 = vmax.f32 %v1926_v57, 0.0  ;;  %v1739_v61 = vmul.f32 %v18455_v38, %v18210_v15  ;;  %v1922_v19 = vadd.f32 %v18477_v17, %v1736_v40  ;;  %3280 = vmatpush1.bf16.msra.mxu0 %v15503_v7  ;;  %v15478_v15 = vld [vmem:[#allocation10 + $0x3f4] ss:$20 sps:$4 sm:$0xff]  }
 0x3d1   :  { %3183 = vmatpush1.bf16.msra.mxu1 %v15470_v26  ;;  %v18658_v6 = vsel %vm309_vm0, %v2449_v12, %v2455_v14  ;;  %3141 = vmatprep.mubr.bf16.mxu1 %v21381_v4  ;;  %v2155_v60 = vrot.slane %v1997_v28, 4  ;;  %v1996_v52 = vpack.c.bf16 %v1975_v54, %v1972_v16  ;;  %v1732_v29 = vmul.f32 %v18509_v41, %v18252_v44  ;;  %v15476_v54 = vld [vmem:[#allocation10 + $0x3f0] ss:$20 sps:$4 sm:$0xff]  }
 0x3d2   :  { %3068 = vmatprep.mubr.bf16.mxu0 %v18658_v6  ;;  %3184 = vmatprep.subr.bf16.mxu1 %v15475_v47  ;;  %v1983_v38 = vmul.f32 %v1953_v31, %v18190_v42  ;;  %v1986_v7 = vmul.f32 %v1956_v46, %v18202_v45  ;;  %v1925_v26 = vadd.f32 %v18477_v17, %v1739_v61  ;;  %v1952_v12 = vmax.f32 %v1922_v19, 0.0  ;;  %v15481_v19 = vld [vmem:[#allocation10 + $0x3cc] ss:$20 sps:$4 sm:$0xff]  }
 0x3d3   :  { %v18669_v34 = vsel %vm309_vm0, %v18566_v50, %v2155_v60  ;;  %v2153_v22 = vrot.slane %v1996_v52, 4  ;;  %v1735_v27 = vmul.f32 %v18509_v41, %v18262_v56  ;;  %v1918_v44 = vadd.f32 %v18528_v30, %v1732_v29  ;;  %15144 = vmatprep.subr.bf16.mxu0 %v21380_v37 }
 0x3d4   :  { %v2453_v47 = vrot.slane %v18669_v34, 4  ;;  %v2001_v16 = vpack.c.bf16 %v1986_v7, %v1983_v38  ;;  %v1955_v57 = vmax.f32 %v1925_v26, 0.0  ;;  %v1982_v40 = vmul.f32 %v1952_v12, %v18190_v42 }
 0x3d5   :  { %3185 = vmatpush1.bf16.msra.mxu1 %v15473_v59  ;;  %v18678_v17 = vsel %vm309_vm0, %v2147_v0, %v2153_v22  ;;  %v1921_v50 = vadd.f32 %v18528_v30, %v1735_v27  ;;  %v1948_v28 = vmax.f32 %v1918_v44, 0.0  ;;  %v1738_v56 = vmul.f32 %v18509_v41, %v18275_v33  ;;  %v15484_v44 = vld [vmem:[#allocation10 + $0x3a4] ss:$20 sps:$4 sm:$0xff]  }
 0x3d6   :  { %3186 = vmatprep.subr.bf16.mxu1 %v15478_v15  ;;  %v18686_v31 = vsel %vm309_vm0, %v2447_v35, %v2453_v47  ;;  %v2451_v46 = vrot.slane %v18678_v17, 4  ;;  %v18689_v61 = vrot.slane %v2001_v16, 4  ;;  %v1985_v0 = vmul.f32 %v1955_v57, %v18202_v45 }
 0x3d7   :  { %3069 = vmatmul.mubr.bf16.gmra.mxu0 %v18686_v31  ;;  %v1951_v59 = vmax.f32 %v1921_v50, 0.0  ;;  %v1978_v52 = vmul.f32 %v1948_v28, %v18146_v5  ;;  %v1741_v33 = vmul.f32 %v18509_v41, %v18286_v58  ;;  %v1924_v29 = vadd.f32 %v18528_v30, %v1738_v56 }
 0x3d8   :  { %v18698_v35 = vsel %vm309_vm0, %v2445_v62, %v2451_v46  ;;  %v18703_v15 = vsel %vm309_vm0, %v18629_v49, %v18689_v61  ;;  %v2000_v38 = vpack.c.bf16 %v1985_v0, %v1982_v40  ;;  %v2187_v58 = vsel %vm309_vm0, %v18689_v61, 0  ;;  %v15479_v62 = vld [vmem:[#allocation10 + $0x3c8] ss:$20 sps:$4 sm:$0xff]  }
 0x3d9   :  { %13420 = vmatmul.mubr.msk.bf16.gmra.mxu1 %vm1148_vm3, %v18698_v35  ;;  %v2461_v7 = vrot.slane %v18703_v15, 4  ;;  %v1981_v26 = vmul.f32 %v1951_v59, %v18161_v55  ;;  %v1927_v41 = vadd.f32 %v18528_v30, %v1741_v33  ;;  %v1954_v49 = vmax.f32 %v1924_v29, 0.0  ;;  %v15490_v59 = vld [vmem:[#allocation10 + $0x37c] ss:$20 sps:$4 sm:$0xff]   ;;  %v15684_v55 = vld [vmem:[#allocation10 + $0x1a0] ss:$20 sps:$4 sm:$0xff]  }
 0x3da   :  { %3187 = vmatpush1.bf16.msra.mxu1 %v15476_v54  ;;  %3151 = vmatprep.mubr.bf16.mxu1 %v21381_v4  ;;  %v18713_v12 = vrot.slane %v2000_v38, 4  ;;  %v2467_v40 = vrot.slane %v2187_v58, 4 }
 0x3db   :  { %v18718_v27 = vsel %vm309_vm0, %v2455_v14, %v2461_v7  ;;  %3188 = vmatprep.subr.bf16.mxu1 %v15481_v19  ;;  %v1999_v16 = vpack.c.bf16 %v1981_v26, %v1978_v52  ;;  %v1957_v57 = vmax.f32 %v1927_v41, 0.0  ;;  %v1984_v50 = vmul.f32 %v1954_v49, %v18190_v42  ;;  %v15482_v14 = vld [vmem:[#allocation10 + $0x3a0] ss:$20 sps:$4 sm:$0xff]   ;;  %v15494_v41 = vld [vmem:[#allocation10 + $0x350] ss:$20 sps:$4 sm:$0xff]  }
 0x3dc   :  { %3078 = vmatprep.mubr.bf16.mxu0 %v18718_v27  ;;  %v18723_v30 = vsel %vm309_vm0, %v2155_v60, %v18713_v12  ;;  %v18737_v33 = vsel %vm309_vm0, %v2461_v7, %v2467_v40  ;;  %v2184_v29 = vsel %vm309_vm0, %v18713_v12, 0  ;;  %v15496_v26 = vld [vmem:[#allocation10 + $0x354] ss:$20 sps:$4 sm:$0xff]   ;;  %v15502_v49 = vld [vmem:[#allocation10 + $0x32c] ss:$20 sps:$4 sm:$0xff]  }
 0x3dd   :  { %v2459_v28 = vrot.slane %v18723_v30, 4  ;;  %v2159_v56 = vrot.slane %v1999_v16, 4  ;;  %v1987_v54 = vmul.f32 %v1957_v57, %v18202_v45  ;;  %v2465_v58 = vrot.slane %v2184_v29, 4  ;;  %v15500_v16 = vld [vmem:[#allocation10 + $0x328] ss:$20 sps:$4 sm:$0xff]  }
 0x3de   :  { %3189 = vmatpush1.bf16.msra.mxu1 %v15479_v62  ;;  %v15508_v57 = vld [vmem:[#allocation10 + $0x584] ss:$20 sps:$4 sm:$0xff]  }
 0x3df   :  { %3190 = vmatprep.subr.bf16.mxu1 %v15484_v44  ;;  %v18729_v0 = vsel %vm309_vm0, %v2453_v47, %v2459_v28  ;;  %v18732_v19 = vsel %vm309_vm0, %v2153_v22, %v2159_v56  ;;  %v2002_v60 = vpack.c.bf16 %v1987_v54, %v1984_v50  ;;  %v15488_v22 = vld [vmem:[#allocation10 + $0x378] ss:$20 sps:$4 sm:$0xff]   ;;  %v15527_v50 = vld [vmem:[#allocation10 + $0x628] ss:$20 sps:$4 sm:$0xff]  }
 0x3e0   :  { %3079 = vmatmul.mubr.bf16.gmra.mxu0 %v18729_v0  ;;  %v2457_v52 = vrot.slane %v18732_v19, 4  ;;  %v15511_v54 = vld [vmem:[#allocation10 + $0x55c] ss:$20 sps:$4 sm:$0xff]   ;;  %v15534_v29 = vld [vmem:[#allocation10 + $0x5d8] ss:$20 sps:$4 sm:$0xff]  }
 0x3e1   :  { %3088 = vmatprep.mubr.bf16.mxu0 %v18737_v33  ;;  %v2165_v38 = vrot.slane %v2002_v60, 4  ;;  %v15509_v60 = vld [vmem:[#allocation10 + $0x558] ss:$20 sps:$4 sm:$0xff]  }
 0x3e2   :  { %v18743_v47 = vsel %vm309_vm0, %v2451_v46, %v2457_v52  ;;  %3191 = vmatpush1.bf16.msra.mxu1 %v15482_v14  ;;  %v18753_v46 = vsel %vm309_vm0, %v2459_v28, %v2465_v58  ;;  %v15506_v28 = vld [vmem:[#allocation10 + $0x580] ss:$20 sps:$4 sm:$0xff]   ;;  %v15515_v58 = vld [vmem:[#allocation10 + $0x508] ss:$20 sps:$4 sm:$0xff]  }
 0x3e3   :  { %13421 = vmatmul.mubr.msk.bf16.gmra.mxu1 %vm1148_vm3, %v18743_v47  ;;  %3192 = vmatprep.subr.bf16.mxu1 %v15490_v59  ;;  %v18748_v7 = vsel %vm309_vm0, %v2159_v56, %v2165_v38  ;;  %v18763_v40 = vsel %vm309_vm0, %v2165_v38, 0  ;;  %v15531_v14 = vld [vmem:[#allocation10 + $0x600] ss:$20 sps:$4 sm:$0xff]   ;;  %v15512_v38 = vld [vmem:[#allocation10 + $0x530] ss:$20 sps:$4 sm:$0xff]  }
 0x3e4   :  { %3161 = vmatprep.mubr.bf16.mxu1 %v21381_v4  ;;  %v2463_v62 = vrot.slane %v18748_v7, 4  ;;  %v2469_v56 = vrot.slane %v18763_v40, 4 }
 0x3e6   :  { %3193 = vmatpush1.bf16.msra.mxu1 %v15488_v22  ;;  %v18758_v44 = vsel %vm309_vm0, %v2457_v52, %v2463_v62  ;;  %v18771_v59 = vsel %vm309_vm0, %v2463_v62, %v2469_v56  ;;  %v15514_v52 = vld [vmem:[#allocation10 + $0x534] ss:$20 sps:$4 sm:$0xff]   ;;  %v15517_v22 = vld [vmem:[#allocation10 + $0x50c] ss:$20 sps:$4 sm:$0xff]   ;;  %v15520_v62 = vld [vmem:[#allocation10 + $0x4e4] ss:$20 sps:$4 sm:$0xff]  }
 0x3e7   :  { %3194 = vmatprep.subr.bf16.mxu1 %v15496_v26  ;;  %v15537_v26 = vld [vmem:[#allocation10 + $0x5b0] ss:$20 sps:$4 sm:$0xff]   ;;  %v15530_v56 = vld [vmem:[#allocation10 + $0x46c] ss:$20 sps:$4 sm:$0xff]  }
 0x3e8   :  { %3089 = vmatmul.mubr.bf16.gmra.mxu0 %v18753_v46 }
 0x3e9   :  { %3297 = vmatprep.mubr.bf16.mxu0 %v21381_v4 }
 0x3ea   :  { %3195 = vmatpush1.bf16.msra.mxu1 %v15494_v41  ;;  %v15550_v41 = vld [vmem:[#allocation10 + $0x2fc] ss:$20 sps:$4 sm:$0xff]  }
 0x3eb   :  { %13422 = vmatmul.mubr.msk.bf16.gmra.mxu1 %vm1148_vm3, %v18758_v44  ;;  %3196 = vmatprep.subr.bf16.mxu1 %v15502_v49  ;;  %v15518_v49 = vld [vmem:[#allocation10 + $0x4e0] ss:$20 sps:$4 sm:$0xff]  }
 0x3ec   :  { %3171 = vmatprep.mubr.bf16.mxu1 %v21381_v4 }
 0x3ee   :  { %3197 = vmatpush1.bf16.msra.mxu1 %v15500_v16  ;;  %v15523_v16 = vld [vmem:[#allocation10 + $0x4bc] ss:$20 sps:$4 sm:$0xff]  }
 0x3ef   :  { %3198 = vmatprep.subr.bf16.mxu1 %v15508_v57  ;;  %v15521_v57 = vld [vmem:[#allocation10 + $0x4b8] ss:$20 sps:$4 sm:$0xff]  }
 0x3f0   :  { %13424 = vmatmul.mubr.msk.bf16.vlgmr.msra.gmra.mxu0 %vm1148_vm3, %v18644_v2 }
 0x3f1   :  { %3307 = vmatprep.mubr.bf16.mxu0 %v21381_v4  ;;  %15145 = vmatpush3.bf16.msra.mxu0 %v15527_v50  ;;  %v15526_v50 = vld [vmem:[#allocation10 + $0x494] ss:$20 sps:$4 sm:$0xff]  }
 0x3f2   :  { %3199 = vmatpush2.bf16.msra.mxu1 %v15506_v28  ;;  %15146 = vmatprep.subr.bf16.mxu0 %v21380_v37  ;;  %v15524_v28 = vld [vmem:[#allocation10 + $0x490] ss:$20 sps:$4 sm:$0xff]  }
 0x3f3   :  { %13423 = vmatmul.mubr.msk.bf16.gmra.mxu1 %vm1148_vm3, %v18771_v59  ;;  %3200 = vmatprep.subr.bf16.mxu1 %v15511_v54  ;;  %v15528_v54 = vld [vmem:[#allocation10 + $0x468] ss:$20 sps:$4 sm:$0xff]  }
 0x3f4   :  { %3214 = vmatprep.mubr.bf16.mxu1 %v18564_v3 }
 0x3f5   :  { %15147 = vmatpush3.bf16.msra.mxu0 %v15531_v14  ;;  %v15532_v14 = vld [vmem:[#allocation10 + $0x588] ss:$20 sps:$4 sm:$0xff]  }
 0x3f6   :  { %3201 = vmatpush2.bf16.msra.mxu1 %v15509_v60  ;;  %15148 = vmatprep.subr.bf16.mxu0 %v21380_v37  ;;  %v15533_v60 = vld [vmem:[#allocation10 + $0x448] ss:$20 sps:$4 sm:$0xff]  }
 0x3f7   :  { %3202 = vmatprep.subr.bf16.mxu1 %v15514_v52  ;;  %v15535_v52 = vld [vmem:[#allocation10 + $0x560] ss:$20 sps:$4 sm:$0xff]  }
 0x3f8   :  { %13425 = vmatmul.mubr.msk.bf16.gmra.mxu0 %vm1148_vm3, %v18698_v35 }
 0x3f9   :  { %3317 = vmatprep.mubr.bf16.mxu0 %v21381_v4  ;;  %15149 = vmatpush3.bf16.msra.mxu0 %v15534_v29  ;;  %v15536_v29 = vld [vmem:[#allocation10 + $0x420] ss:$20 sps:$4 sm:$0xff]  }
 0x3fa   :  { %3203 = vmatpush2.bf16.msra.mxu1 %v15512_v38  ;;  %15150 = vmatprep.subr.bf16.mxu0 %v21380_v37  ;;  %v15538_v38 = vld [vmem:[#allocation10 + $0x538] ss:$20 sps:$4 sm:$0xff]  }
 0x3fb   :  { %3204 = vmatprep.subr.bf16.mxu1 %v15517_v22  ;;  %v15539_v22 = vld [vmem:[#allocation10 + $0x3f8] ss:$20 sps:$4 sm:$0xff]  }
 0x3fd   :  { %15151 = vmatpush3.bf16.msra.mxu0 %v15537_v26  ;;  %v15540_v26 = vld [vmem:[#allocation10 + $0x510] ss:$20 sps:$4 sm:$0xff]  }
 0x3fe   :  { %3205 = vmatpush2.bf16.msra.mxu1 %v15515_v58  ;;  %4119 = vmatprep.subr.bf16.mxu0 %v15550_v41  ;;  %v15548_v58 = vld [vmem:[#allocation10 + $0x2f8] ss:$20 sps:$4 sm:$0xff]   ;;  %v15555_v41 = vld [vmem:[#allocation10 + $0x2d4] ss:$20 sps:$4 sm:$0xff]  }
 0x3ff   :  { %3206 = vmatprep.subr.bf16.mxu1 %v15520_v62  ;;  %v15541_v62 = vld [vmem:[#allocation10 + $0x3d0] ss:$20 sps:$4 sm:$0xff]  }
 0x400   :  { %13426 = vmatmul.mubr.msk.bf16.gmra.mxu0 %vm1148_vm3, %v18743_v47 }
 0x401   :  { %3327 = vmatprep.mubr.bf16.mxu0 %v21381_v4 }
 0x402   :  { %3207 = vmatpush2.bf16.msra.mxu1 %v15518_v49  ;;  %v15542_v49 = vld [vmem:[#allocation10 + $0x4e8] ss:$20 sps:$4 sm:$0xff]  }
 0x403   :  { %3208 = vmatprep.subr.bf16.mxu1 %v15523_v16  ;;  %v15553_v16 = vld [vmem:[#allocation10 + $0x2d0] ss:$20 sps:$4 sm:$0xff]  }
 0x406   :  { %3209 = vmatpush2.bf16.msra.mxu1 %v15521_v57  ;;  %v15561_v57 = vld [vmem:[#allocation10 + $0x2ac] ss:$20 sps:$4 sm:$0xff]  }
 0x407   :  { %3210 = vmatprep.subr.bf16.mxu1 %v15526_v50  ;;  %v15543_v50 = vld [vmem:[#allocation10 + $0x3a8] ss:$20 sps:$4 sm:$0xff]  }
 0x408   :  { %13427 = vmatmul.mubr.msk.bf16.gmra.mxu0 %vm1148_vm3, %v18758_v44 }
 0x409   :  { %3337 = vmatprep.mubr.bf16.mxu0 %v21381_v4 }
 0x40a   :  { %3211 = vmatpush2.bf16.msra.mxu1 %v15524_v28  ;;  %v15559_v28 = vld [vmem:[#allocation10 + $0x2a8] ss:$20 sps:$4 sm:$0xff]  }
 0x40b   :  { %3212 = vmatprep.subr.bf16.mxu1 %v15530_v56  ;;  %v15567_v56 = vld [vmem:[#allocation10 + $0x284] ss:$20 sps:$4 sm:$0xff]  }
 0x40e   :  { %3213 = vmatpush2.bf16.msra.mxu1 %v15528_v54  ;;  %v15545_v54 = vld [vmem:[#allocation10 + $0x380] ss:$20 sps:$4 sm:$0xff]  }
 0x40f   :  { %14627 = vmatprep.subr.bf16.mxu1 %v15532_v14  ;;  %v15546_v14 = vld [vmem:[#allocation10 + $0x498] ss:$20 sps:$4 sm:$0xff]  }
 0x410   :  { %13428 = vmatmul.mubr.msk.bf16.gmra.mxu0 %vm1148_vm3, %v18771_v59 }
 0x411   :  { %3215 = vmatmul.mubr.bf16.vlgmr.msra.gmra.mxu1 %v18555_v20  ;;  %15152 = vmatprep.mubr.msk.bf16.mxu0 %vm17462_vm2, %v21380_v37 }
 0x412   :  { %3224 = vmatprep.mubr.bf16.mxu1 %v18591_v1  ;;  %14628 = vmatpush3.bf16.msra.mxu1 %v15533_v60  ;;  %v15565_v60 = vld [vmem:[#allocation10 + $0x280] ss:$20 sps:$4 sm:$0xff]  }
 0x413   :  { %14629 = vmatprep.subr.bf16.mxu1 %v15535_v52  ;;  %v15573_v52 = vld [vmem:[#allocation10 + $0x124] ss:$20 sps:$4 sm:$0xff]  }
 0x416   :  { %14630 = vmatpush3.bf16.msra.mxu1 %v15536_v29  ;;  %v15547_v29 = vld [vmem:[#allocation10 + $0x358] ss:$20 sps:$4 sm:$0xff]  }
 0x417   :  { %14631 = vmatprep.subr.bf16.mxu1 %v15538_v38  ;;  %v15552_v38 = vld [vmem:[#allocation10 + $0x330] ss:$20 sps:$4 sm:$0xff]  }
 0x418   :  { %15153 = vmatmul.mubr.msk.bf16.vlgmr.msra.gmra.mxu0 %vm1148_vm3, %v18644_v2  ;;  %v15544_v2 = vld [vmem:[#allocation10 + $0x4c0] ss:$20 sps:$4 sm:$0xff]  }
 0x419   :  { %3225 = vmatmul.mubr.bf16.gmra.mxu1 %v18599_v53  ;;  %15156 = vmatprep.mubr.msk.bf16.mxu0 %vm17462_vm2, %v21380_v37 }
 0x41a   :  { %3234 = vmatprep.mubr.bf16.mxu1 %v18658_v6  ;;  %14632 = vmatpush3.bf16.msra.mxu1 %v15539_v22  ;;  %v15558_v22 = vld [vmem:[#allocation10 + $0x11c] ss:$20 sps:$4 sm:$0xff]  }
 0x41b   :  { %14633 = vmatprep.subr.bf16.mxu1 %v15540_v26  ;;  %4120 = vmatpush1.bf16.msra.mxu0 %v15548_v58  ;;  %v15564_v26 = vld [vmem:[#allocation10 + $0xf4] ss:$20 sps:$4 sm:$0xff]   ;;  %v15570_v58 = vld [vmem:[#allocation10 + $0xcc] ss:$20 sps:$4 sm:$0xff]  }
 0x41c   :  { %4121 = vmatprep.subr.bf16.mxu0 %v15555_v41  ;;  %v15571_v41 = vld [vmem:[#allocation10 + $0x120] ss:$20 sps:$4 sm:$0xff]  }
 0x41e   :  { %14634 = vmatpush3.bf16.msra.mxu1 %v15541_v62  ;;  %v15568_v62 = vld [vmem:[#allocation10 + $0xc8] ss:$20 sps:$4 sm:$0xff]  }
 0x41f   :  { %14635 = vmatprep.subr.bf16.mxu1 %v15542_v49  ;;  %4122 = vmatpush1.bf16.msra.mxu0 %v15553_v16  ;;  %v15579_v49 = vld [vmem:[#allocation10 + $0xfc] ss:$20 sps:$4 sm:$0xff]  }
 0x420   :  { %15157 = vmatmul.mubr.msk.bf16.gmra.mxu0 %vm1148_vm3, %v18698_v35  ;;  %4123 = vmatprep.subr.bf16.mxu0 %v15561_v57  ;;  %v15551_v35 = vld [vmem:[#allocation10 + $0x470] ss:$20 sps:$4 sm:$0xff]  }
 0x421   :  { %3235 = vmatmul.mubr.bf16.gmra.mxu1 %v18686_v31  ;;  %15160 = vmatprep.mubr.msk.bf16.mxu0 %vm17462_vm2, %v21380_v37  ;;  %v15582_v16 = vld [vmem:[#allocation10 + $0x7c] ss:$20 sps:$4 sm:$0xff]  }
 0x422   :  { %3244 = vmatprep.mubr.bf16.mxu1 %v18718_v27  ;;  %14636 = vmatpush3.bf16.msra.mxu1 %v15543_v50  ;;  %v15583_v57 = vld [vmem:[#allocation10 + $0xd0] ss:$20 sps:$4 sm:$0xff]   ;;  %v15580_v50 = vld [vmem:[#allocation10 + $0x78] ss:$20 sps:$4 sm:$0xff]  }
 0x423   :  { %14637 = vmatprep.subr.bf16.mxu1 %v15544_v2  ;;  %4124 = vmatpush1.bf16.msra.mxu0 %v15559_v28  ;;  %v15588_v2 = vld [vmem:[#allocation10 + $0x54] ss:$20 sps:$4 sm:$0xff]   ;;  %v15586_v28 = vld [vmem:[#allocation10 + $0x50] ss:$20 sps:$4 sm:$0xff]  }
 0x424   :  { %4125 = vmatprep.subr.bf16.mxu0 %v15567_v56  ;;  %v15597_v56 = vld [vmem:[#allocation10 + $0x84] ss:$20 sps:$4 sm:$0xff]  }
 0x426   :  { %14638 = vmatpush3.bf16.msra.mxu1 %v15545_v54  ;;  %v15594_v54 = vld [vmem:[#allocation10 + $0x2c] ss:$20 sps:$4 sm:$0xff]  }
 0x427   :  { %14639 = vmatprep.subr.bf16.mxu1 %v15546_v14  ;;  %4126 = vmatpush1.bf16.msra.mxu0 %v15565_v60  ;;  %v15595_v14 = vld [vmem:[#allocation10 + $0x80] ss:$20 sps:$4 sm:$0xff]   ;;  %v15592_v60 = vld [vmem:[#allocation10 + $0x28] ss:$20 sps:$4 sm:$0xff]  }
 0x428   :  { %15161 = vmatmul.mubr.msk.bf16.gmra.mxu0 %vm1148_vm3, %v18743_v47  ;;  %4194 = vmatprep.subr.bf16.mxu0 %v15573_v52  ;;  %v15556_v47 = vld [vmem:[#allocation10 + $0x118] ss:$20 sps:$4 sm:$0xff]  }
 0x429   :  { %3245 = vmatmul.mubr.bf16.gmra.mxu1 %v18729_v0  ;;  %15164 = vmatprep.mubr.msk.bf16.mxu0 %vm17462_vm2, %v21380_v37  ;;  %v15600_v52 = vld [vmem:[#allocation10 + $0x4] ss:$20 sps:$4 sm:$0xff]  }
 0x42a   :  { %3254 = vmatprep.mubr.bf16.mxu1 %v18737_v33  ;;  %14640 = vmatpush3.bf16.msra.mxu1 %v15547_v29  ;;  %v15598_v29 = vld [vmem:[#allocation10] ss:$20 sps:$4 sm:$0xff]  }
 0x42b   :  { %14641 = vmatprep.subr.bf16.mxu1 %v15551_v35  ;;  %v15609_v35 = vld [vmem:[#allocation10 + $0x34] ss:$20 sps:$4 sm:$0xff]  }
 0x42e   :  { %14642 = vmatpush3.bf16.msra.mxu1 %v15552_v38  ;;  %v15606_v38 = vld [vmem:[#allocation10 + $0x25c] ss:$20 sps:$4 sm:$0xff]  }
 0x42f   :  { %4028 = vmatprep.subr.bf16.mxu1 %v15558_v22  ;;  %v15607_v22 = vld [vmem:[#allocation10 + $0x30] ss:$20 sps:$4 sm:$0xff]  }
 0x430   :  { %15165 = vmatmul.mubr.msk.bf16.gmra.mxu0 %vm1148_vm3, %v18758_v44  ;;  %v15562_v44 = vld [vmem:[#allocation10 + $0xf0] ss:$20 sps:$4 sm:$0xff]  }
 0x431   :  { %3255 = vmatmul.mubr.bf16.gmra.mxu1 %v18753_v46  ;;  %15168 = vmatprep.mubr.msk.bf16.mxu0 %vm17462_vm2, %v21380_v37 }
 0x432   :  { %3380 = vmatprep.mubr.bf16.mxu1 %v18564_v3  ;;  %v15576_v3 = vld [vmem:[#allocation10 + $0xa4] ss:$20 sps:$4 sm:$0xff]  }
 0x438   :  { %15169 = vmatmul.mubr.msk.bf16.gmra.mxu0 %vm1148_vm3, %v18771_v59  ;;  %v15585_v59 = vld [vmem:[#allocation10 + $0xd4] ss:$20 sps:$4 sm:$0xff]  }
 0x439   :  { %3381 = vmatmul.mubr.bf16.vlgmr.msra.gmra.mxu1 %v18555_v20  ;;  %4143 = vmatprep.mubr.bf16.mxu0 %v21381_v4  ;;  %v15577_v20 = vld [vmem:[#allocation10 + $0xf8] ss:$20 sps:$4 sm:$0xff]  }
 0x43a   :  { %4029 = vmatpush1.bf16.msra.mxu1 %v15556_v47  ;;  %3388 = vmatprep.mubr.bf16.mxu1 %v18591_v1  ;;  %v15574_v1 = vld [vmem:[#allocation10 + $0xa0] ss:$20 sps:$4 sm:$0xff]   ;;  %v15604_v47 = vld [vmem:[#allocation10 + $0x258] ss:$20 sps:$4 sm:$0xff]  }
 0x43b   :  { %4030 = vmatprep.subr.bf16.mxu1 %v15564_v26  ;;  %v15612_v26 = vld [vmem:[#allocation10 + $0x234] ss:$20 sps:$4 sm:$0xff]  }
 0x43e   :  { %4031 = vmatpush1.bf16.msra.mxu1 %v15562_v44  ;;  %v15613_v44 = vld [vmem:[#allocation10 + $0x8] ss:$20 sps:$4 sm:$0xff]  }
 0x43f   :  { %4032 = vmatprep.subr.bf16.mxu1 %v15570_v58  ;;  %v15610_v58 = vld [vmem:[#allocation10 + $0x230] ss:$20 sps:$4 sm:$0xff]  }
 0x440   :  { %13538 = vmatmul.mubr.msk.bf16.vlgmr.msra.gmra.mxu0 %vm1148_vm3, %v18620_v23 }
 0x441   :  { %3389 = vmatmul.mubr.bf16.gmra.mxu1 %v18599_v53  ;;  %4195 = vmatpush1.bf16.msra.mxu0 %v15571_v41  ;;  %v15591_v53 = vld [vmem:[#allocation10 + $0xac] ss:$20 sps:$4 sm:$0xff]   ;;  %v15621_v41 = vld [vmem:[#allocation10 + $0x264] ss:$20 sps:$4 sm:$0xff]  }
 0x442   :  { %4033 = vmatpush1.bf16.msra.mxu1 %v15568_v62  ;;  %3396 = vmatprep.mubr.bf16.mxu1 %v18658_v6  ;;  %v15589_v6 = vld [vmem:[#allocation10 + $0xa8] ss:$20 sps:$4 sm:$0xff]   ;;  %v15618_v62 = vld [vmem:[#allocation10 + $0x20c] ss:$20 sps:$4 sm:$0xff]  }
 0x443   :  { %4034 = vmatprep.subr.bf16.mxu1 %v15576_v3  ;;  %4196 = vmatprep.subr.bf16.mxu0 %v15579_v49  ;;  %v15619_v3 = vld [vmem:[#allocation10 + $0x260] ss:$20 sps:$4 sm:$0xff]   ;;  %v15616_v49 = vld [vmem:[#allocation10 + $0x208] ss:$20 sps:$4 sm:$0xff]  }
 0x444   :  { %4153 = vmatprep.mubr.bf16.mxu0 %v21381_v4 }
 0x445   :  { %4197 = vmatpush1.bf16.msra.mxu0 %v15577_v20  ;;  %v15624_v20 = vld [vmem:[#allocation10 + $0x1e4] ss:$20 sps:$4 sm:$0xff]  }
 0x446   :  { %4035 = vmatpush1.bf16.msra.mxu1 %v15574_v1  ;;  %4198 = vmatprep.subr.bf16.mxu0 %v15585_v59  ;;  %v15625_v1 = vld [vmem:[#allocation10 + $0x238] ss:$20 sps:$4 sm:$0xff]   ;;  %v15622_v59 = vld [vmem:[#allocation10 + $0x1e0] ss:$20 sps:$4 sm:$0xff]  }
 0x447   :  { %4036 = vmatprep.subr.bf16.mxu1 %v15582_v16  ;;  %v15633_v16 = vld [vmem:[#allocation10 + $0x214] ss:$20 sps:$4 sm:$0xff]  }
 0x448   :  { %13539 = vmatmul.mubr.msk.bf16.gmra.mxu0 %vm1148_vm3, %v18626_v32 }
 0x449   :  { %3397 = vmatmul.mubr.bf16.gmra.mxu1 %v18686_v31  ;;  %4199 = vmatpush1.bf16.msra.mxu0 %v15583_v57  ;;  %v15603_v31 = vld [vmem:[#allocation10 + $0x5c] ss:$20 sps:$4 sm:$0xff]  }
 0x44a   :  { %4037 = vmatpush1.bf16.msra.mxu1 %v15580_v50  ;;  %3404 = vmatprep.mubr.bf16.mxu1 %v18718_v27  ;;  %v15601_v27 = vld [vmem:[#allocation10 + $0x58] ss:$20 sps:$4 sm:$0xff]   ;;  %v15630_v57 = vld [vmem:[#allocation10 + $0x1bc] ss:$20 sps:$4 sm:$0xff]  }
 0x44b   :  { %4038 = vmatprep.subr.bf16.mxu1 %v15588_v2  ;;  %4200 = vmatprep.subr.bf16.mxu0 %v15591_v53  ;;  %v15631_v50 = vld [vmem:[#allocation10 + $0x210] ss:$20 sps:$4 sm:$0xff]   ;;  %v15628_v2 = vld [vmem:[#allocation10 + $0x1b8] ss:$20 sps:$4 sm:$0xff]  }
 0x44c   :  { %4163 = vmatprep.mubr.bf16.mxu0 %v21381_v4  ;;  %v15639_v53 = vld [vmem:[#allocation10 + $0x1ec] ss:$20 sps:$4 sm:$0xff]  }
 0x44d   :  { %4201 = vmatpush1.bf16.msra.mxu0 %v15589_v6  ;;  %v15636_v6 = vld [vmem:[#allocation10 + $0x194] ss:$20 sps:$4 sm:$0xff]  }
 0x44e   :  { %4039 = vmatpush1.bf16.msra.mxu1 %v15586_v28  ;;  %4202 = vmatprep.subr.bf16.mxu0 %v15597_v56  ;;  %v15637_v28 = vld [vmem:[#allocation10 + $0x1e8] ss:$20 sps:$4 sm:$0xff]   ;;  %v15634_v56 = vld [vmem:[#allocation10 + $0x190] ss:$20 sps:$4 sm:$0xff]  }
 0x44f   :  { %4040 = vmatprep.subr.bf16.mxu1 %v15594_v54  ;;  %v15645_v54 = vld [vmem:[#allocation10 + $0x1c4] ss:$20 sps:$4 sm:$0xff]  }
 0x450   :  { %13540 = vmatmul.mubr.msk.bf16.gmra.mxu0 %vm1148_vm3, %v18678_v17 }
 0x451   :  { %3405 = vmatmul.mubr.bf16.gmra.mxu1 %v18729_v0  ;;  %4203 = vmatpush1.bf16.msra.mxu0 %v15595_v14  ;;  %v15642_v14 = vld [vmem:[#allocation10 + $0x16c] ss:$20 sps:$4 sm:$0xff]   ;;  %v15719_v0 = vld [vmem:[#allocation10 + $0x73c] ss:$20 sps:$4 sm:$0xff]  }
 0x452   :  { %4041 = vmatpush1.bf16.msra.mxu1 %v15592_v60  ;;  %3412 = vmatprep.mubr.bf16.mxu1 %v18737_v33  ;;  %v15615_v33 = vld [vmem:[#allocation10 + $0xc] ss:$20 sps:$4 sm:$0xff]  }
 0x453   :  { %4042 = vmatprep.subr.bf16.mxu1 %v15600_v52  ;;  %4204 = vmatprep.subr.bf16.mxu0 %v15603_v31  ;;  %v15643_v60 = vld [vmem:[#allocation10 + $0x1c0] ss:$20 sps:$4 sm:$0xff]   ;;  %v15640_v52 = vld [vmem:[#allocation10 + $0x168] ss:$20 sps:$4 sm:$0xff]  }
 0x454   :  { %4173 = vmatprep.mubr.bf16.mxu0 %v21381_v4  ;;  %v15651_v31 = vld [vmem:[#allocation10 + $0x19c] ss:$20 sps:$4 sm:$0xff]  }
 0x455   :  { %4205 = vmatpush1.bf16.msra.mxu0 %v15601_v27  ;;  %v15648_v27 = vld [vmem:[#allocation10 + $0x144] ss:$20 sps:$4 sm:$0xff]  }
 0x456   :  { %4043 = vmatpush1.bf16.msra.mxu1 %v15598_v29  ;;  %4206 = vmatprep.subr.bf16.mxu0 %v15609_v35  ;;  %v15649_v29 = vld [vmem:[#allocation10 + $0x198] ss:$20 sps:$4 sm:$0xff]   ;;  %v15646_v35 = vld [vmem:[#allocation10 + $0x140] ss:$20 sps:$4 sm:$0xff]  }
 0x457   :  { %4044 = vmatprep.subr.bf16.mxu1 %v15606_v38  ;;  %v15657_v38 = vld [vmem:[#allocation10 + $0x174] ss:$20 sps:$4 sm:$0xff]  }
 0x458   :  { %13541 = vmatmul.mubr.msk.bf16.gmra.mxu0 %vm1148_vm3, %v18732_v19 }
 0x459   :  { %3413 = vmatmul.mubr.bf16.gmra.mxu1 %v18753_v46  ;;  %4207 = vmatpush1.bf16.msra.mxu0 %v15607_v22  ;;  %v15627_v46 = vld [vmem:[#allocation10 + $0x23c] ss:$20 sps:$4 sm:$0xff]   ;;  %v15654_v22 = vld [vmem:[#allocation10 + $0x304] ss:$20 sps:$4 sm:$0xff]  }
 0x45a   :  { %4045 = vmatpush2.bf16.msra.mxu1 %v15604_v47  ;;  %13535 = vmatprep.mubr.msk.bf16.mxu1 %vm18839_vm5, %v18530_v48  ;;  %v15655_v47 = vld [vmem:[#allocation10 + $0x170] ss:$20 sps:$4 sm:$0xff]  }
 0x45b   :  { %4046 = vmatprep.subr.bf16.mxu1 %v15612_v26  ;;  %4208 = vmatprep.subr.bf16.mxu0 %v15615_v33  ;;  %v15652_v26 = vld [vmem:[#allocation10 + $0x300] ss:$20 sps:$4 sm:$0xff]  }
 0x45c   :  { %4183 = vmatprep.mubr.bf16.mxu0 %v21381_v4  ;;  %v15660_v33 = vld [vmem:[#allocation10 + $0x14c] ss:$20 sps:$4 sm:$0xff]  }
 0x45d   :  { %4209 = vmatpush1.bf16.msra.mxu0 %v15613_v44  ;;  %v15663_v44 = vld [vmem:[#allocation10 + $0x2dc] ss:$20 sps:$4 sm:$0xff]  }
 0x45e   :  { %4047 = vmatpush2.bf16.msra.mxu1 %v15610_v58  ;;  %4210 = vmatprep.subr.bf16.mxu0 %v15621_v41  ;;  %v15658_v58 = vld [vmem:[#allocation10 + $0x148] ss:$20 sps:$4 sm:$0xff]   ;;  %v15661_v41 = vld [vmem:[#allocation10 + $0x2d8] ss:$20 sps:$4 sm:$0xff]  }
 0x45f   :  { %4048 = vmatprep.subr.bf16.mxu1 %v15618_v62  ;;  %v15666_v62 = vld [vmem:[#allocation10 + $0x2b4] ss:$20 sps:$4 sm:$0xff]  }
 0x460   :  { %13542 = vmatmul.mubr.msk.bf16.gmra.mxu0 %vm1148_vm3, %v18748_v7 }
 0x461   :  { %4211 = vmatpush2.bf16.msra.mxu0 %v15619_v3  ;;  %13544 = vmatprep.mubr.msk.bf16.mxu0 %vm18839_vm5, %v18530_v48  ;;  %v15664_v3 = vld [vmem:[#allocation10 + $0x2b0] ss:$20 sps:$4 sm:$0xff]  }
 0x462   :  { %4049 = vmatpush2.bf16.msra.mxu1 %v15616_v49  ;;  %4212 = vmatprep.subr.bf16.mxu0 %v15627_v46  ;;  %v15669_v49 = vld [vmem:[#allocation10 + $0x28c] ss:$20 sps:$4 sm:$0xff]   ;;  %v15670_v46 = vld [vmem:[#allocation10 + $0x308] ss:$20 sps:$4 sm:$0xff]  }
 0x463   :  { %4050 = vmatprep.subr.bf16.mxu1 %v15624_v20  ;;  %v15667_v20 = vld [vmem:[#allocation10 + $0x288] ss:$20 sps:$4 sm:$0xff]  }
 0x465   :  { %4213 = vmatpush2.bf16.msra.mxu0 %v15625_v1 }
 0x466   :  { %4051 = vmatpush2.bf16.msra.mxu1 %v15622_v59  ;;  %4214 = vmatprep.subr.bf16.mxu0 %v15633_v16  ;;  %v15671_v59 = vld [vmem:[#allocation10 + $0x2e0] ss:$20 sps:$4 sm:$0xff]   ;;  %v15672_v16 = vld [vmem:[#allocation10 + $0x268] ss:$20 sps:$4 sm:$0xff]  }
 0x467   :  { %4052 = vmatprep.subr.bf16.mxu1 %v15630_v57 }
 0x469   :  { %4215 = vmatpush2.bf16.msra.mxu0 %v15631_v50 }
 0x46a   :  { %4053 = vmatpush2.bf16.msra.mxu1 %v15628_v2  ;;  %4216 = vmatprep.subr.bf16.mxu0 %v15639_v53  ;;  %v15674_v2 = vld [vmem:[#allocation10 + $0x2b8] ss:$20 sps:$4 sm:$0xff]  }
 0x46b   :  { %4054 = vmatprep.subr.bf16.mxu1 %v15636_v6 }
 0x46d   :  { %4217 = vmatpush2.bf16.msra.mxu0 %v15637_v28  ;;  %v15677_v28 = vld [vmem:[#allocation10 + $0x290] ss:$20 sps:$4 sm:$0xff]  }
 0x46e   :  { %4055 = vmatpush2.bf16.msra.mxu1 %v15634_v56  ;;  %4218 = vmatprep.subr.bf16.mxu0 %v15645_v54  ;;  %v15690_v56 = vld [vmem:[#allocation10 + $0x93c] ss:$20 sps:$4 sm:$0xff]  }
 0x46f   :  { %4056 = vmatprep.subr.bf16.mxu1 %v15642_v14 }
 0x471   :  { %4219 = vmatpush2.bf16.msra.mxu0 %v15643_v60 }
 0x472   :  { %4057 = vmatpush2.bf16.msra.mxu1 %v15640_v52  ;;  %4220 = vmatprep.subr.bf16.mxu0 %v15651_v31 }
 0x473   :  { %4058 = vmatprep.subr.bf16.mxu1 %v15648_v27 }
 0x475   :  { %4221 = vmatpush2.bf16.msra.mxu0 %v15649_v29 }
 0x476   :  { %4059 = vmatpush2.bf16.msra.mxu1 %v15646_v35  ;;  %4222 = vmatprep.subr.bf16.mxu0 %v15657_v38 }
 0x477   :  { %4285 = vmatprep.subr.bf16.mxu1 %v15654_v22 }
 0x479   :  { %13537 = vmatmul.mubr.msk.bf16.vlgmr.msra.gmra.mxu1 %vm18839_vm5, %v18525_v63  ;;  %4223 = vmatpush2.bf16.msra.mxu0 %v15655_v47 }
 0x47a   :  { %4070 = vmatprep.mubr.bf16.mxu1 %v18546_v11  ;;  %4286 = vmatpush1.bf16.msra.mxu1 %v15652_v26 }
 0x47b   :  { %4224 = vmatprep.subr.bf16.mxu0 %v15660_v33  ;;  %4287 = vmatprep.subr.bf16.mxu1 %v15663_v44 }
 0x47d   :  { %4225 = vmatpush2.bf16.msra.mxu0 %v15658_v58 }
 0x47e   :  { %4288 = vmatpush1.bf16.msra.mxu1 %v15661_v41  ;;  %15172 = vmatprep.subr.bf16.mxu0 %v21380_v37 }
 0x47f   :  { %4289 = vmatprep.subr.bf16.mxu1 %v15666_v62 }
 0x480   :  { %13546 = vmatmul.mubr.msk.bf16.vlgmr.msra.gmra.mxu0 %vm18839_vm5, %v18525_v63 }
 0x481   :  { %4071 = vmatmul.mubr.bf16.gmra.mxu1 %v18541_v10  ;;  %4236 = vmatprep.mubr.bf16.mxu0 %v18546_v11 }
 0x482   :  { %4080 = vmatprep.mubr.bf16.mxu1 %v18573_v21  ;;  %4290 = vmatpush1.bf16.msra.mxu1 %v15664_v3 }
 0x483   :  { %v3050_v1 = vpop.f32.mrf.mxu0  ;;  %4291 = vmatprep.subr.bf16.mxu1 %v15669_v49  ;;  %15173 = vmatpush3.bf16.msra.mxu0 %v15670_v46 }
 0x484   :  { %15174 = vmatprep.subr.bf16.mxu0 %v21380_v37 }
 0x485   :  { %v3052_v57 = vpop.f32.mrf.mxu0 }
 0x486   :  { %4292 = vmatpush1.bf16.msra.mxu1 %v15667_v20  ;;  %v15673_v20 = vld [vmem:[#allocation10 + $0x128] ss:$20 sps:$4 sm:$0xff]  }
 0x487   :  { %v3054_v50 = vpop.f32.mrf.mxu0  ;;  %15175 = vmatpush3.bf16.msra.mxu0 %v15671_v59  ;;  %14682 = vmatprep.subr.bf16.mxu1 %v15672_v16  ;;  %v15675_v59 = vld [vmem:[#allocation10 + $0x240] ss:$20 sps:$4 sm:$0xff]  }
 0x488   :  { %4237 = vmatmul.mubr.bf16.gmra.mxu0 %v18541_v10  ;;  %15176 = vmatprep.subr.bf16.mxu0 %v21380_v37 }
 0x489   :  { %4081 = vmatmul.mubr.bf16.gmra.mxu1 %v18583_v9  ;;  %4246 = vmatprep.mubr.bf16.mxu0 %v18573_v21  ;;  %v18871_v53 = vpop.f32.mrf.mxu0 }
 0x48a   :  { %4090 = vmatprep.mubr.bf16.mxu1 %v18637_v25 }
 0x48b   :  { %v3060_v6 = vpop.f32.mrf.mxu0  ;;  %15177 = vmatpush3.bf16.msra.mxu0 %v15674_v2 }
 0x48c   :  { %15178 = vmatprep.subr.bf16.mxu0 %v21380_v37 }
 0x48d   :  { %v3062_v54 = vpop.f32.mrf.mxu0 }
 0x48f   :  { %v3064_v14 = vpop.f32.mrf.mxu0  ;;  %15179 = vmatpush3.bf16.msra.mxu0 %v15677_v28 }
 0x490   :  { %4247 = vmatmul.mubr.bf16.gmra.mxu0 %v18583_v9  ;;  %v3133_v60 = vpop.f32.mrf.mxu1  ;;  %5240 = vmatprep.subr.bf16.mxu0 %v15690_v56 }
 0x491   :  { %4091 = vmatmul.mubr.bf16.gmra.mxu1 %v18669_v34  ;;  %v18877_v52 = vadd.f32 %v3133_v60, %v3050_v1  ;;  %4256 = vmatprep.mubr.bf16.mxu0 %v18637_v25  ;;  %v18883_v29 = vpop.f32.mrf.mxu0 }
 0x492   :  { %4100 = vmatprep.mubr.bf16.mxu1 %v18703_v15  ;;  %v3135_v31 = vpop.f32.mrf.mxu1 }
 0x493   :  { %v18881_v27 = vadd.f32 %v3135_v31, %v3052_v57  ;;  %v15679_v31 = vld [vmem:[#allocation10 + $0xd8] ss:$20 sps:$4 sm:$0xff]  }
 0x494   :  { %v3137_v35 = vpop.f32.mrf.mxu1 }
 0x495   :  { %v18885_v38 = vadd.f32 %v3137_v35, %v3054_v50  ;;  %v15676_v50 = vld [vmem:[#allocation10 + $0x100] ss:$20 sps:$4 sm:$0xff]  }
 0x496   :  { %v18887_v22 = vpop.f32.mrf.mxu1 }
 0x497   :  { %v3070_v47 = vpop.f32.mrf.mxu0 }
 0x498   :  { %4257 = vmatmul.mubr.bf16.gmra.mxu0 %v18669_v34 }
 0x499   :  { %4101 = vmatmul.mubr.bf16.gmra.mxu1 %v18723_v30  ;;  %v3143_v26 = vpop.f32.mrf.mxu1  ;;  %4266 = vmatprep.mubr.bf16.mxu0 %v18703_v15  ;;  %v3072_v33 = vpop.f32.mrf.mxu0 }
 0x49a   :  { %v18892_v44 = vadd.f32 %v3143_v26, %v3060_v6  ;;  %4309 = vmatprep.mubr.bf16.mxu1 %v21381_v4  ;;  %v15678_v6 = vld [vmem:[#allocation10 + $0x218] ss:$20 sps:$4 sm:$0xff]   ;;  %v15680_v26 = vld [vmem:[#allocation10 + $0x1f0] ss:$20 sps:$4 sm:$0xff]  }
 0x49b   :  { %v3145_v58 = vpop.f32.mrf.mxu1  ;;  %v3074_v41 = vpop.f32.mrf.mxu0 }
 0x49c   :  { %v18895_v62 = vadd.f32 %v3145_v58, %v3062_v54  ;;  %v15688_v58 = vld [vmem:[#allocation10 + $0x938] ss:$20 sps:$4 sm:$0xff]  }
 0x49d   :  { %v3147_v3 = vpop.f32.mrf.mxu1  ;;  %v18897_v49 = vpop.f32.mrf.mxu0 }
 0x49e   :  { %21396 = vst [vmem:[#allocation47_spill] sm:$0xff] %v18897_v49  ;;  %v18899_v46 = vadd.f32 %v3147_v3, %v3064_v14 }
 0x49f   :  { %v18901_v1 = vpop.f32.mrf.mxu1 }
 0x4a0   :  { %4267 = vmatmul.mubr.bf16.gmra.mxu0 %v18723_v30  ;;  %v3080_v16 = vpop.f32.mrf.mxu0 }
 0x4a1   :  { %13547 = vmatmul.mubr.msk.bf16.vlgmr.msra.gmra.mxu1 %vm1148_vm3, %v18620_v23  ;;  %15180 = vmatprep.mubr.msk.bf16.mxu0 %vm17462_vm2, %v21380_v37 }
 0x4a2   :  { %14683 = vmatpush3.bf16.msra.mxu1 %v15673_v20  ;;  %v3082_v57 = vpop.f32.mrf.mxu0  ;;  %4319 = vmatprep.mubr.bf16.mxu1 %v21381_v4 }
 0x4a3   :  { %v3153_v2 = vpop.f32.mrf.mxu1  ;;  %14684 = vmatprep.subr.bf16.mxu1 %v15675_v59 }
 0x4a4   :  { %v18909_v28 = vadd.f32 %v3153_v2, %v3070_v47  ;;  %v3084_v56 = vpop.f32.mrf.mxu0  ;;  %v15695_v47 = vld [vmem:[#allocation10 + $0x914] ss:$20 sps:$4 sm:$0xff]  }
 0x4a5   :  { %v3155_v54 = vpop.f32.mrf.mxu1  ;;  %v15682_v2 = vld [vmem:[#allocation10 + $0x1c8] ss:$20 sps:$4 sm:$0xff]  }
 0x4a6   :  { %v18911_v14 = vadd.f32 %v3155_v54, %v3072_v33  ;;  %14685 = vmatpush3.bf16.msra.mxu1 %v15676_v50  ;;  %v18913_v60 = vpop.f32.mrf.mxu0  ;;  %v15681_v50 = vld [vmem:[#allocation10 + $0xb0] ss:$20 sps:$4 sm:$0xff]  }
 0x4a7   :  { %21398 = vst [vmem:[#allocation40_spill] sm:$0xff] %v18913_v60  ;;  %v3157_v35 = vpop.f32.mrf.mxu1  ;;  %14686 = vmatprep.subr.bf16.mxu1 %v15678_v6 }
 0x4a8   :  { %21397 = vst [vmem:[#allocation31_spill] sm:$0xff] %v18911_v14  ;;  %v18915_v3 = vadd.f32 %v3157_v35, %v3074_v41  ;;  %15181 = vmatmul.mubr.msk.bf16.vlgmr.msra.gmra.mxu0 %vm1148_vm3, %v18620_v23  ;;  %v3090_v20 = vpop.f32.mrf.mxu0  ;;  %v15693_v23 = vld [vmem:[#allocation10 + $0x910] ss:$20 sps:$4 sm:$0xff]   ;;  %v15701_v35 = vld [vmem:[#allocation10 + $0x8ec] ss:$20 sps:$4 sm:$0xff]  }
 0x4a9   :  { %v18919_v59 = vpop.f32.mrf.mxu1  ;;  %13548 = vmatmul.mubr.msk.bf16.gmra.mxu1 %vm1148_vm3, %v18626_v32  ;;  %15184 = vmatprep.mubr.msk.bf16.mxu0 %vm17462_vm2, %v21380_v37  ;;  %v15717_v14 = vld [vmem:[#allocation10 + $0x738] ss:$20 sps:$4 sm:$0xff]  }
 0x4aa   :  { %21399 = vst [vmem:[#allocation34_spill] sm:$0xff] %v18919_v59  ;;  %14687 = vmatpush3.bf16.msra.mxu1 %v15679_v31  ;;  %v3092_v33 = vpop.f32.mrf.mxu0  ;;  %4329 = vmatprep.mubr.bf16.mxu1 %v21381_v4  ;;  %v15683_v31 = vld [vmem:[#allocation10 + $0x88] ss:$20 sps:$4 sm:$0xff]  }
 0x4ab   :  { %v3163_v41 = vpop.f32.mrf.mxu1  ;;  %14688 = vmatprep.subr.bf16.mxu1 %v15680_v26  ;;  %5241 = vmatpush1.bf16.msra.mxu0 %v15688_v58  ;;  %v15699_v26 = vld [vmem:[#allocation10 + $0x8e8] ss:$20 sps:$4 sm:$0xff]   ;;  %v15707_v58 = vld [vmem:[#allocation10 + $0x8c4] ss:$20 sps:$4 sm:$0xff]  }
 0x4ac   :  { %v18926_v6 = vadd.f32 %v3163_v41, %v3080_v16  ;;  %v3094_v54 = vpop.f32.mrf.mxu0  ;;  %5242 = vmatprep.subr.bf16.mxu0 %v15695_v47  ;;  %v15686_v47 = vld [vmem:[#allocation10 + $0x178] ss:$20 sps:$4 sm:$0xff]  }
 0x4ad   :  { %v3165_v24 = vpop.f32.mrf.mxu1 }
 0x4ae   :  { %21400 = vst [vmem:[#allocation43_spill] sm:$0xff] %v18926_v6  ;;  %v18928_v13 = vadd.f32 %v3165_v24, %v3082_v57  ;;  %v18930_v45 = vpop.f32.mrf.mxu0  ;;  %14689 = vmatpush3.bf16.msra.mxu1 %v15681_v50  ;;  %v15705_v50 = vld [vmem:[#allocation10 + $0x8c0] ss:$20 sps:$4 sm:$0xff]  }
 0x4af   :  { %21402 = vst [vmem:[#allocation50_spill] sm:$0xff] %v18930_v45  ;;  %v3167_v42 = vpop.f32.mrf.mxu1  ;;  %14690 = vmatprep.subr.bf16.mxu1 %v15682_v2  ;;  %5243 = vmatpush1.bf16.msra.mxu0 %v15693_v23  ;;  %v15713_v23 = vld [vmem:[#allocation10 + $0x764] ss:$20 sps:$4 sm:$0xff]  }
 0x4b0   :  { %21401 = vst [vmem:[#allocation49_spill] sm:$0xff] %v18928_v13  ;;  %v18932_v5 = vadd.f32 %v3167_v42, %v3084_v56  ;;  %15185 = vmatmul.mubr.msk.bf16.gmra.mxu0 %vm1148_vm3, %v18626_v32  ;;  %v18936_v16 = vpop.f32.mrf.mxu0  ;;  %5244 = vmatprep.subr.bf16.mxu0 %v15701_v35  ;;  %v15685_v42 = vld [vmem:[#allocation10 + $0x60] ss:$20 sps:$4 sm:$0xff]   ;;  %v15691_v13 = vld [vmem:[#allocation10 + $0x150] ss:$20 sps:$4 sm:$0xff]  }
 0x4b1   :  { %v18938_v24 = vpop.f32.mrf.mxu1  ;;  %13549 = vmatmul.mubr.msk.bf16.gmra.mxu1 %vm1148_vm3, %v18678_v17  ;;  %15188 = vmatprep.mubr.msk.bf16.mxu0 %vm17462_vm2, %v21380_v37 }
 0x4b2   :  { %21403 = vst [vmem:[#allocation51_spill] sm:$0xff] %v18932_v5  ;;  %21404 = vst [vmem:[#allocation52_spill] sm:$0xff] %v18938_v24  ;;  %v18944_v57 = vpop.f32.mrf.mxu0  ;;  %14691 = vmatpush3.bf16.msra.mxu1 %v15683_v31  ;;  %4339 = vmatprep.mubr.bf16.mxu1 %v21381_v4  ;;  %v15687_v31 = vld [vmem:[#allocation10 + $0x38] ss:$20 sps:$4 sm:$0xff]  }
 0x4b3   :  { %v3173_v56 = vpop.f32.mrf.mxu1  ;;  %14692 = vmatprep.subr.bf16.mxu1 %v15684_v55  ;;  %5245 = vmatpush1.bf16.msra.mxu0 %v15699_v26  ;;  %v15692_v26 = vld [vmem:[#allocation10 + $0x10] ss:$20 sps:$4 sm:$0xff]  }
 0x4b4   :  { %v18947_v41 = vadd.f32 %v3173_v56, %v3090_v20  ;;  %v18949_v2 = vpop.f32.mrf.mxu0  ;;  %5246 = vmatprep.subr.bf16.mxu0 %v15707_v58 }
 0x4b5   :  { %v3175_v35 = vpop.f32.mrf.mxu1 }
 0x4b6   :  { %21405 = vst [vmem:[#allocation53_spill] sm:$0xff] %v18947_v41  ;;  %v18951_v18 = vadd.f32 %v3175_v35, %v3092_v33  ;;  %v18953_v24 = vpop.f32.mrf.mxu0  ;;  %14693 = vmatpush3.bf16.msra.mxu1 %v15685_v42 }
 0x4b7   :  { %v3177_v60 = vpop.f32.mrf.mxu1  ;;  %14694 = vmatprep.subr.bf16.mxu1 %v15686_v47  ;;  %5247 = vmatpush1.bf16.msra.mxu0 %v15705_v50  ;;  %v15696_v47 = vld [vmem:[#allocation10 + $0x758] ss:$20 sps:$4 sm:$0xff]  }
 0x4b8   :  { %21406 = vst [vmem:[#allocation54_spill] sm:$0xff] %v18951_v18  ;;  %v18955_v55 = vadd.f32 %v3177_v60, %v3094_v54  ;;  %15189 = vmatmul.mubr.msk.bf16.gmra.mxu0 %vm1148_vm3, %v18678_v17  ;;  %v18959_v20 = vpop.f32.mrf.mxu0  ;;  %5315 = vmatprep.subr.bf16.mxu0 %v15713_v23  ;;  %v15698_v60 = vld [vmem:[#allocation10 + $0x75c] ss:$20 sps:$4 sm:$0xff]   ;;  %v15704_v23 = vld [vmem:[#allocation10 + $0x734] ss:$20 sps:$4 sm:$0xff]  }
 0x4b9   :  { %13550 = vmatmul.mubr.msk.bf16.gmra.mxu1 %vm1148_vm3, %v18732_v19  ;;  %15192 = vmatprep.mubr.msk.bf16.mxu0 %vm17462_vm2, %v21380_v37  ;;  %v15711_v18 = vld [vmem:[#allocation10 + $0x760] ss:$20 sps:$4 sm:$0xff]   ;;  %v19004_v49 = vpop.f32.mrf.mxu1 }
 0x4ba   :  { %21407 = vst [vmem:[#allocation55_spill] sm:$0xff] %v18955_v55  ;;  %v18965_v33 = vpop.f32.mrf.mxu0  ;;  %4349 = vmatprep.mubr.bf16.mxu1 %v21381_v4  ;;  %14695 = vmatpush3.bf16.msra.mxu1 %v15687_v31  ;;  %21410 = vst [vmem:[#allocation58_spill] sm:$0xff] %v19004_v49 }
 0x4bb   :  { %14696 = vmatprep.subr.bf16.mxu1 %v15691_v13 }
 0x4bc   :  { %v18968_v54 = vpop.f32.mrf.mxu0 }
 0x4be   :  { %v18970_v58 = vpop.f32.mrf.mxu0  ;;  %14697 = vmatpush3.bf16.msra.mxu1 %v15692_v26  ;;  %v15710_v26 = vld [vmem:[#allocation10 + $0x70c] ss:$20 sps:$4 sm:$0xff]  }
 0x4bf   :  { %5149 = vmatprep.subr.bf16.mxu1 %v15698_v60 }
 0x4c0   :  { %15193 = vmatmul.mubr.msk.bf16.gmra.mxu0 %vm1148_vm3, %v18732_v19  ;;  %v18974_v42 = vpop.f32.mrf.mxu0 }
 0x4c1   :  { %13551 = vmatmul.mubr.msk.bf16.gmra.mxu1 %vm1148_vm3, %v18748_v7  ;;  %15196 = vmatprep.mubr.msk.bf16.mxu0 %vm17462_vm2, %v21380_v37 }
 0x4c2   :  { %13553 = vmatprep.mubr.msk.bf16.mxu1 %vm18839_vm5, %v18530_v48  ;;  %v18983_v13 = vpop.f32.mrf.mxu0  ;;  %v15702_v48 = vld [vmem:[#allocation10 + $0x730] ss:$20 sps:$4 sm:$0xff]  }
 0x4c4   :  { %v18985_v56 = vpop.f32.mrf.mxu0 }
 0x4c6   :  { %v18987_v50 = vpop.f32.mrf.mxu0 }
 0x4c7   :  { %21408 = vst [vmem:[#allocation56_spill] sm:$0xff] %v18987_v50 }
 0x4c8   :  { %15197 = vmatmul.mubr.msk.bf16.gmra.mxu0 %vm1148_vm3, %v18748_v7  ;;  %v18991_v35 = vpop.f32.mrf.mxu0 }
 0x4c9   :  { %13555 = vmatmul.mubr.msk.bf16.vlgmr.msra.gmra.mxu1 %vm18839_vm5, %v18525_v63  ;;  %5264 = vmatprep.mubr.bf16.mxu0 %v21381_v4  ;;  %v15716_v63 = vld [vmem:[#allocation10 + $0x6e4] ss:$20 sps:$4 sm:$0xff]  }
 0x4ca   :  { %5150 = vmatpush1.bf16.msra.mxu1 %v15696_v47  ;;  %4400 = vmatprep.mubr.bf16.mxu1 %v18546_v11  ;;  %v18998_v31 = vpop.f32.mrf.mxu0 }
 0x4cb   :  { %5151 = vmatprep.subr.bf16.mxu1 %v15704_v23 }
 0x4cc   :  { %v19000_v60 = vpop.f32.mrf.mxu0 }
 0x4ce   :  { %5152 = vmatpush1.bf16.msra.mxu1 %v15702_v48  ;;  %v19002_v59 = vpop.f32.mrf.mxu0 }
 0x4cf   :  { %21409 = vst [vmem:[#allocation57_spill] sm:$0xff] %v19002_v59  ;;  %5153 = vmatprep.subr.bf16.mxu1 %v15710_v26 }
 0x4d0   :  { %13663 = vmatmul.mubr.msk.bf16.vlgmr.msra.gmra.mxu0 %vm1148_vm3, %v18626_v32  ;;  %v19008_v47 = vpop.f32.mrf.mxu0 }
 0x4d1   :  { %4401 = vmatmul.mubr.bf16.gmra.mxu1 %v18541_v10  ;;  %v3216_v23 = vpop.f32.mrf.mxu1  ;;  %5316 = vmatpush1.bf16.msra.mxu0 %v15711_v18  ;;  %v15723_v18 = vld [vmem:[#allocation10 + $0x710] ss:$20 sps:$4 sm:$0xff]  }
 0x4d2   :  { %5154 = vmatpush1.bf16.msra.mxu1 %v15708_v51  ;;  %v19012_v48 = vadd.f32 %v18936_v16, %v3216_v23  ;;  %4408 = vmatprep.mubr.bf16.mxu1 %v18573_v21  ;;  %v19015_v26 = vpop.f32.mrf.mxu0  ;;  %v15720_v23 = vld [vmem:[#allocation10 + $0x6b8] ss:$20 sps:$4 sm:$0xff]  }
 0x4d3   :  { %v3218_v43 = vpop.f32.mrf.mxu1  ;;  %5155 = vmatprep.subr.bf16.mxu1 %v15716_v63  ;;  %5317 = vmatprep.subr.bf16.mxu0 %v15719_v0 }
 0x4d4   :  { %v19018_v59 = vadd.f32 %v18944_v57, %v3218_v43  ;;  %v19020_v50 = vpop.f32.mrf.mxu0  ;;  %5274 = vmatprep.mubr.bf16.mxu0 %v21381_v4  ;;  %v15728_v43 = vld [vmem:[#allocation10 + $0x694] ss:$20 sps:$4 sm:$0xff]   ;;  %v15731_v57 = vld [vmem:[#allocation10 + $0x6ec] ss:$20 sps:$4 sm:$0xff]  }
 0x4d5   :  { %v3220_v51 = vpop.f32.mrf.mxu1  ;;  %5318 = vmatpush1.bf16.msra.mxu0 %v15717_v14  ;;  %v15729_v14 = vld [vmem:[#allocation10 + $0x6e8] ss:$20 sps:$4 sm:$0xff]  }
 0x4d6   :  { %21411 = vst [vmem:[#allocation59_spill] sm:$0xff] %v19018_v59  ;;  %5156 = vmatpush1.bf16.msra.mxu1 %v15714_v8  ;;  %v19024_v16 = vadd.f32 %v18949_v2, %v3220_v51  ;;  %v19026_v55 = vpop.f32.mrf.mxu0  ;;  %5319 = vmatprep.subr.bf16.mxu0 %v15725_v36  ;;  %v15726_v36 = vld [vmem:[#allocation10 + $0x690] ss:$20 sps:$4 sm:$0xff]  }
 0x4d7   :  { %21412 = vst [vmem:[#allocation60_spill] sm:$0xff] %v19026_v55  ;;  %v19028_v63 = vpop.f32.mrf.mxu1  ;;  %5157 = vmatprep.subr.bf16.mxu1 %v15722_v39  ;;  %v15737_v51 = vld [vmem:[#allocation10 + $0x6c4] ss:$20 sps:$4 sm:$0xff]   ;;  %v15734_v55 = vld [vmem:[#allocation10 + $0x66c] ss:$20 sps:$4 sm:$0xff]  }
 0x4d8   :  { %13664 = vmatmul.mubr.msk.bf16.gmra.mxu0 %vm1148_vm3, %v18678_v17  ;;  %v19032_v0 = vpop.f32.mrf.mxu0 }
 0x4d9   :  { %4409 = vmatmul.mubr.bf16.gmra.mxu1 %v18583_v9  ;;  %v3226_v8 = vpop.f32.mrf.mxu1  ;;  %5320 = vmatpush1.bf16.msra.mxu0 %v15723_v18 }
 0x4da   :  { %5158 = vmatpush1.bf16.msra.mxu1 %v15720_v23  ;;  %v19036_v2 = vadd.f32 %v18959_v20, %v3226_v8  ;;  %4416 = vmatprep.mubr.bf16.mxu1 %v18637_v25  ;;  %v15154_v39 = vpop.f32.mrf.mxu0  ;;  %v15735_v20 = vld [vmem:[#allocation10 + $0x6c0] ss:$20 sps:$4 sm:$0xff]   ;;  %v15732_v8 = vld [vmem:[#allocation10 + $0x668] ss:$20 sps:$4 sm:$0xff]  }
 0x4db   :  { %v3228_v59 = vpop.f32.mrf.mxu1  ;;  %5159 = vmatprep.subr.bf16.mxu1 %v15728_v43  ;;  %5321 = vmatprep.subr.bf16.mxu0 %v15731_v57  ;;  %v15740_v57 = vld [vmem:[#allocation10 + $0x644] ss:$20 sps:$4 sm:$0xff]  }
 0x4dc   :  { %v19040_v49 = vadd.f32 %v18965_v33, %v3228_v59  ;;  %v19042_v45 = vpop.f32.mrf.mxu0  ;;  %5284 = vmatprep.mubr.bf16.mxu0 %v21381_v4  ;;  %v15743_v59 = vld [vmem:[#allocation10 + $0x69c] ss:$20 sps:$4 sm:$0xff]  }
 0x4dd   :  { %v3230_v18 = vpop.f32.mrf.mxu1  ;;  %5322 = vmatpush1.bf16.msra.mxu0 %v15729_v14 }
 0x4de   :  { %21413 = vst [vmem:[#allocation61_spill] sm:$0xff] %v19040_v49  ;;  %5160 = vmatpush1.bf16.msra.mxu1 %v15726_v36  ;;  %v19046_v23 = vadd.f32 %v18968_v54, %v3230_v18  ;;  %v15155_v39 = vpop.f32.mrf.mxu0  ;;  %5323 = vmatprep.subr.bf16.mxu0 %v15737_v51  ;;  %v15741_v36 = vld [vmem:[#allocation10 + $0x698] ss:$20 sps:$4 sm:$0xff]   ;;  %v15738_v51 = vld [vmem:[#allocation10 + $0x640] ss:$20 sps:$4 sm:$0xff]  }
 0x4df   :  { %v19048_v43 = vpop.f32.mrf.mxu1  ;;  %5161 = vmatprep.subr.bf16.mxu1 %v15734_v55  ;;  %v15749_v18 = vld [vmem:[#allocation10 + $0x674] ss:$20 sps:$4 sm:$0xff]   ;;  %v15746_v49 = vld [vmem:[#allocation10 + $0x89c] ss:$20 sps:$4 sm:$0xff]  }
 0x4e0   :  { %13665 = vmatmul.mubr.msk.bf16.gmra.mxu0 %vm1148_vm3, %v18732_v19  ;;  %v19052_v33 = vpop.f32.mrf.mxu0 }
 0x4e1   :  { %4417 = vmatmul.mubr.bf16.gmra.mxu1 %v18669_v34  ;;  %v3236_v14 = vpop.f32.mrf.mxu1  ;;  %5324 = vmatpush1.bf16.msra.mxu0 %v15735_v20 }
 0x4e2   :  { %5162 = vmatpush1.bf16.msra.mxu1 %v15732_v8  ;;  %v19056_v54 = vadd.f32 %v18974_v42, %v3236_v14  ;;  %4424 = vmatprep.mubr.bf16.mxu1 %v18703_v15  ;;  %v15158_v55 = vpop.f32.mrf.mxu0  ;;  %v15747_v42 = vld [vmem:[#allocation10 + $0x670] ss:$20 sps:$4 sm:$0xff]   ;;  %v15744_v14 = vld [vmem:[#allocation10 + $0x898] ss:$20 sps:$4 sm:$0xff]  }
 0x4e3   :  { %v3238_v39 = vpop.f32.mrf.mxu1  ;;  %5163 = vmatprep.subr.bf16.mxu1 %v15740_v57  ;;  %5325 = vmatprep.subr.bf16.mxu0 %v15743_v59  ;;  %v15752_v59 = vld [vmem:[#allocation10 + $0x874] ss:$20 sps:$4 sm:$0xff]  }
 0x4e4   :  { %21414 = vst [vmem:[#allocation62_spill] sm:$0xff] %v19056_v54  ;;  %v19060_v41 = vadd.f32 %v18983_v13, %v3238_v39  ;;  %v19062_v5 = vpop.f32.mrf.mxu0  ;;  %5294 = vmatprep.mubr.bf16.mxu0 %v21381_v4  ;;  %v15755_v13 = vld [vmem:[#allocation10 + $0x64c] ss:$20 sps:$4 sm:$0xff]  }
 0x4e5   :  { %v3240_v20 = vpop.f32.mrf.mxu1  ;;  %5326 = vmatpush1.bf16.msra.mxu0 %v15741_v36 }
 0x4e6   :  { %21415 = vst [vmem:[#allocation63_spill] sm:$0xff] %v19060_v41  ;;  %5164 = vmatpush1.bf16.msra.mxu1 %v15738_v51  ;;  %v19066_v8 = vadd.f32 %v18985_v56, %v3240_v20  ;;  %v15159_v55 = vpop.f32.mrf.mxu0  ;;  %5327 = vmatprep.subr.bf16.mxu0 %v15749_v18  ;;  %v15753_v51 = vld [vmem:[#allocation10 + $0x648] ss:$20 sps:$4 sm:$0xff]   ;;  %v15750_v18 = vld [vmem:[#allocation10 + $0x870] ss:$20 sps:$4 sm:$0xff]  }
 0x4e7   :  { %v19068_v57 = vpop.f32.mrf.mxu1  ;;  %5165 = vmatprep.subr.bf16.mxu1 %v15746_v49  ;;  %v15761_v20 = vld [vmem:[#allocation10 + $0x8a4] ss:$20 sps:$4 sm:$0xff]   ;;  %v15758_v41 = vld [vmem:[#allocation10 + $0x84c] ss:$20 sps:$4 sm:$0xff]  }
 0x4e8   :  { %21416 = vst [vmem:[#allocation64_spill] sm:$0xff] %v19066_v8  ;;  %21417 = vst [vmem:[#allocation65_spill] sm:$0xff] %v19068_v57  ;;  %13666 = vmatmul.mubr.msk.bf16.gmra.mxu0 %vm1148_vm3, %v18748_v7  ;;  %v19072_v39 = vpop.f32.mrf.mxu0 }
 0x4e9   :  { %4425 = vmatmul.mubr.bf16.gmra.mxu1 %v18723_v30  ;;  %v3246_v36 = vpop.f32.mrf.mxu1  ;;  %5328 = vmatpush1.bf16.msra.mxu0 %v15747_v42 }
 0x4ea   :  { %5166 = vmatpush2.bf16.msra.mxu1 %v15744_v14  ;;  %v19076_v56 = vadd.f32 %v18991_v35, %v3246_v36  ;;  %5181 = vmatprep.mubr.bf16.mxu1 %v18546_v11  ;;  %v15162_v49 = vpop.f32.mrf.mxu0  ;;  %v15759_v35 = vld [vmem:[#allocation10 + $0x8a0] ss:$20 sps:$4 sm:$0xff]   ;;  %v15756_v36 = vld [vmem:[#allocation10 + $0x848] ss:$20 sps:$4 sm:$0xff]  }
 0x4eb   :  { %v3248_v55 = vpop.f32.mrf.mxu1  ;;  %5167 = vmatprep.subr.bf16.mxu1 %v15752_v59  ;;  %5329 = vmatprep.subr.bf16.mxu0 %v15755_v13  ;;  %v15767_v59 = vld [vmem:[#allocation10 + $0x87c] ss:$20 sps:$4 sm:$0xff]  }
 0x4ec   :  { %21418 = vst [vmem:[#allocation66_spill] sm:$0xff] %v19076_v56  ;;  %v19080_v57 = vadd.f32 %v18998_v31, %v3248_v55  ;;  %v19082_v8 = vpop.f32.mrf.mxu0  ;;  %5304 = vmatprep.mubr.bf16.mxu0 %v21381_v4  ;;  %v15764_v31 = vld [vmem:[#allocation10 + $0x824] ss:$20 sps:$4 sm:$0xff]  }
 0x4ed   :  { %v3250_v42 = vpop.f32.mrf.mxu1  ;;  %5330 = vmatpush1.bf16.msra.mxu0 %v15753_v51  ;;  %v15765_v51 = vld [vmem:[#allocation10 + $0x878] ss:$20 sps:$4 sm:$0xff]   ;;  %v15771_v56 = vld [vmem:[#allocation10 + $0x850] ss:$20 sps:$4 sm:$0xff]  }
 0x4ee   :  { %21419 = vst [vmem:[#allocation67_spill] sm:$0xff] %v19080_v57  ;;  %5168 = vmatpush2.bf16.msra.mxu1 %v15750_v18  ;;  %v19086_v14 = vadd.f32 %v19000_v60, %v3250_v42  ;;  %v15163_v49 = vpop.f32.mrf.mxu0  ;;  %5331 = vmatprep.subr.bf16.mxu0 %v15761_v20  ;;  %v15762_v18 = vld [vmem:[#allocation10 + $0x820] ss:$20 sps:$4 sm:$0xff]  }
 0x4ef   :  { %v19088_v13 = vpop.f32.mrf.mxu1  ;;  %5169 = vmatprep.subr.bf16.mxu1 %v15758_v41  ;;  %v15773_v42 = vld [vmem:[#allocation10 + $0x854] ss:$20 sps:$4 sm:$0xff]   ;;  %v15770_v49 = vld [vmem:[#allocation10 + $0x7fc] ss:$20 sps:$4 sm:$0xff]  }
 0x4f0   :  { %21420 = vst [vmem:[#allocation68_spill] sm:$0xff] %v19086_v14  ;;  %21421 = vst [vmem:[#allocation69_spill] sm:$0xff] %v19088_v13  ;;  %13667 = vmatmul.mubr.msk.bf16.gmra.mxu0 %vm1148_vm3, %v18763_v40  ;;  %v19092_v55 = vpop.f32.mrf.mxu0 }
 0x4f1   :  { %v3256_v57 = vpop.f32.mrf.mxu1  ;;  %5332 = vmatpush2.bf16.msra.mxu0 %v15759_v35  ;;  %5347 = vmatprep.mubr.bf16.mxu0 %v18546_v11 }
 0x4f2   :  { %5170 = vmatpush2.bf16.msra.mxu1 %v15756_v36  ;;  %v19096_v60 = vadd.f32 %v19008_v47, %v3256_v57  ;;  %v15166_v20 = vpop.f32.mrf.mxu0  ;;  %5333 = vmatprep.subr.bf16.mxu0 %v15767_v59  ;;  %v15768_v47 = vld [vmem:[#allocation10 + $0x7f8] ss:$20 sps:$4 sm:$0xff]  }
 0x4f3   :  { %v3258_v41 = vpop.f32.mrf.mxu1  ;;  %5171 = vmatprep.subr.bf16.mxu1 %v15764_v31  ;;  %v15779_v59 = vld [vmem:[#allocation10 + $0x82c] ss:$20 sps:$4 sm:$0xff]   ;;  %v15776_v31 = vld [vmem:[#allocation10 + $0x7d4] ss:$20 sps:$4 sm:$0xff]  }
 0x4f4   :  { %21422 = vst [vmem:[#allocation70_spill] sm:$0xff] %v19096_v60  ;;  %v19099_v13 = vadd.f32 %v19015_v26, %v3258_v41  ;;  %v19101_v14 = vpop.f32.mrf.mxu0  ;;  %v15777_v41 = vld [vmem:[#allocation10 + $0x828] ss:$20 sps:$4 sm:$0xff]  }
 0x4f5   :  { %v3260_v35 = vpop.f32.mrf.mxu1  ;;  %5334 = vmatpush2.bf16.msra.mxu0 %v15765_v51  ;;  %v15774_v51 = vld [vmem:[#allocation10 + $0x7d0] ss:$20 sps:$4 sm:$0xff]  }
 0x4f6   :  { %21423 = vst [vmem:[#allocation71_spill] sm:$0xff] %v19099_v13  ;;  %5172 = vmatpush2.bf16.msra.mxu1 %v15762_v18  ;;  %v19104_v36 = vadd.f32 %v19020_v50, %v3260_v35  ;;  %v15167_v57 = vpop.f32.mrf.mxu0  ;;  %5335 = vmatprep.subr.bf16.mxu0 %v15773_v42  ;;  %v15785_v18 = vld [vmem:[#allocation10 + $0x804] ss:$20 sps:$4 sm:$0xff]   ;;  %v15782_v35 = vld [vmem:[#allocation10 + $0x7ac] ss:$20 sps:$4 sm:$0xff]  }
 0x4f7   :  { %v19106_v20 = vpop.f32.mrf.mxu1  ;;  %5173 = vmatprep.subr.bf16.mxu1 %v15770_v49  ;;  %v15783_v49 = vld [vmem:[#allocation10 + $0x800] ss:$20 sps:$4 sm:$0xff]  }
 0x4f8   :  { %21424 = vst [vmem:[#allocation72_spill] sm:$0xff] %v19104_v36  ;;  %21425 = vst [vmem:[#allocation73_spill] sm:$0xff] %v19106_v20  ;;  %v19108_v60 = vpop.f32.mrf.mxu0 }
 0x4f9   :  { %v14643_v26 = vpop.f32.mrf.mxu1  ;;  %5336 = vmatpush2.bf16.msra.mxu0 %v15771_v56  ;;  %v15780_v56 = vld [vmem:[#allocation10 + $0x7a8] ss:$20 sps:$4 sm:$0xff]  }
 0x4fa   :  { %5174 = vmatpush2.bf16.msra.mxu1 %v15768_v47  ;;  %v15170_v13 = vpop.f32.mrf.mxu0  ;;  %5337 = vmatprep.subr.bf16.mxu0 %v15779_v59  ;;  %v15791_v47 = vld [vmem:[#allocation10 + $0x7dc] ss:$20 sps:$4 sm:$0xff]   ;;  %v15788_v59 = vld [vmem:[#allocation10 + $0x784] ss:$20 sps:$4 sm:$0xff]  }
 0x4fb   :  { %v14644_v50 = vpop.f32.mrf.mxu1  ;;  %5175 = vmatprep.subr.bf16.mxu1 %v15776_v31 }
 0x4fc   :  { %v14645_v57 = vadd.f32 %v14644_v50, %v14643_v26  ;;  %v19110_v42 = vpop.f32.mrf.mxu0  ;;  %v15789_v50 = vld [vmem:[#allocation10 + $0x7d8] ss:$20 sps:$4 sm:$0xff]  }
 0x4fd   :  { %v14646_v36 = vpop.f32.mrf.mxu1  ;;  %5338 = vmatpush2.bf16.msra.mxu0 %v15777_v41 }
 0x4fe   :  { %v19113_v20 = vadd.f32 %v14645_v57, %v19032_v0  ;;  %5176 = vmatpush2.bf16.msra.mxu1 %v15774_v51  ;;  %v15171_v11 = vpop.f32.mrf.mxu0  ;;  %5339 = vmatprep.subr.bf16.mxu0 %v15785_v18  ;;  %v15786_v0 = vld [vmem:[#allocation10 + $0x780] ss:$20 sps:$4 sm:$0xff]   ;;  %v15794_v18 = vld [vmem:[#allocation10 + $0x944] ss:$20 sps:$4 sm:$0xff]  }
 0x4ff   :  { %v14647_v13 = vpop.f32.mrf.mxu1  ;;  %5177 = vmatprep.subr.bf16.mxu1 %v15782_v35  ;;  %v15797_v11 = vld [vmem:[#allocation10 + $0x7b4] ss:$20 sps:$4 sm:$0xff]  }
 0x500   :  { %21426 = vst [vmem:[#allocation74_spill] sm:$0xff] %v19113_v20  ;;  %v14648_v6 = vadd.f32 %v14647_v13, %v14646_v36  ;;  %v19115_v31 = vpop.f32.mrf.mxu0  ;;  %v15795_v13 = vld [vmem:[#allocation10 + $0x7b0] ss:$20 sps:$4 sm:$0xff]  }
 0x501   :  { %v14649_v26 = vpop.f32.mrf.mxu1  ;;  %5340 = vmatpush2.bf16.msra.mxu0 %v15783_v49 }
 0x502   :  { %v19118_v41 = vadd.f32 %v14648_v6, %v19042_v45  ;;  %5178 = vmatpush2.bf16.msra.mxu1 %v15780_v56  ;;  %v19120_v57 = vpop.f32.mrf.mxu0  ;;  %5341 = vmatprep.subr.bf16.mxu0 %v15791_v47  ;;  %v15792_v45 = vld [vmem:[#allocation10 + $0x940] ss:$20 sps:$4 sm:$0xff]  }
 0x503   :  { %v14650_v51 = vpop.f32.mrf.mxu1  ;;  %5179 = vmatprep.subr.bf16.mxu1 %v15788_v59  ;;  %v15800_v47 = vld [vmem:[#allocation10 + $0x78c] ss:$20 sps:$4 sm:$0xff]  }
 0x504   :  { %21427 = vst [vmem:[#allocation75_spill] sm:$0xff] %v19118_v41  ;;  %v14651_v35 = vadd.f32 %v14650_v51, %v14649_v26  ;;  %v19122_v20 = vpop.f32.mrf.mxu0  ;;  %v15803_v41 = vld [vmem:[#allocation10 + $0x91c] ss:$20 sps:$4 sm:$0xff]  }
 0x505   :  { %v14652_v36 = vpop.f32.mrf.mxu1  ;;  %5342 = vmatpush2.bf16.msra.mxu0 %v15789_v50  ;;  %v15798_v50 = vld [vmem:[#allocation10 + $0x788] ss:$20 sps:$4 sm:$0xff]  }
 0x506   :  { %v19125_v49 = vadd.f32 %v14651_v35, %v19052_v33  ;;  %5180 = vmatpush2.bf16.msra.mxu1 %v15786_v0  ;;  %v19127_v6 = vpop.f32.mrf.mxu0  ;;  %5343 = vmatprep.subr.bf16.mxu0 %v15797_v11  ;;  %v15801_v11 = vld [vmem:[#allocation10 + $0x918] ss:$20 sps:$4 sm:$0xff]  }
 0x507   :  { %21428 = vst [vmem:[#allocation76_spill] sm:$0xff] %v19127_v6  ;;  %v14653_v56 = vpop.f32.mrf.mxu1  ;;  %5406 = vmatprep.subr.bf16.mxu1 %v15794_v18  ;;  %v15806_v18 = vld [vmem:[#allocation10 + $0x8f4] ss:$20 sps:$4 sm:$0xff]   ;;  %v15809_v6 = vld [vmem:[#allocation10 + $0x8cc] ss:$20 sps:$4 sm:$0xff]  }
 0x508   :  { %v14654_v59 = vadd.f32 %v14653_v56, %v14652_v36  ;;  %v19129_v54 = vpop.f32.mrf.mxu0 }
 0x509   :  { %5182 = vmatmul.mubr.bf16.vlgmr.msra.gmra.mxu1 %v18541_v10  ;;  %v14655_v26 = vpop.f32.mrf.mxu1  ;;  %5344 = vmatpush2.bf16.msra.mxu0 %v15795_v13 }
 0x50a   :  { %v19133_v33 = vadd.f32 %v14654_v59, %v19062_v5  ;;  %5191 = vmatprep.mubr.bf16.mxu1 %v18573_v21  ;;  %5407 = vmatpush1.bf16.msra.mxu1 %v15792_v45  ;;  %v19136_v0 = vpop.f32.mrf.mxu0  ;;  %v15804_v59 = vld [vmem:[#allocation10 + $0x8f0] ss:$20 sps:$4 sm:$0xff]  }
 0x50b   :  { %v14656_v51 = vpop.f32.mrf.mxu1  ;;  %5345 = vmatprep.subr.bf16.mxu0 %v15800_v47  ;;  %5408 = vmatprep.subr.bf16.mxu1 %v15803_v41  ;;  %v15810_v47 = vld [vmem:[#allocation10 + $0x948] ss:$20 sps:$4 sm:$0xff]  }
 0x50c   :  { %v14657_v35 = vadd.f32 %v14656_v51, %v14655_v26  ;;  %v19138_v36 = vpop.f32.mrf.mxu0 }
 0x50d   :  { %v14658_v56 = vpop.f32.mrf.mxu1  ;;  %5346 = vmatpush2.bf16.msra.mxu0 %v15798_v50 }
 0x50e   :  { %v19141_v13 = vadd.f32 %v14657_v35, %v19072_v39  ;;  %v19143_v5 = vpop.f32.mrf.mxu0  ;;  %5409 = vmatpush1.bf16.msra.mxu1 %v15801_v11  ;;  %15200 = vmatprep.subr.bf16.mxu0 %v21380_v37  ;;  %v15807_v11 = vld [vmem:[#allocation10 + $0x8c8] ss:$20 sps:$4 sm:$0xff]  }
 0x50f   :  { %21429 = vst [vmem:[#allocation77_spill] sm:$0xff] %v19143_v5  ;;  %v14659_v45 = vpop.f32.mrf.mxu1  ;;  %5410 = vmatprep.subr.bf16.mxu1 %v15806_v18  ;;  %v15811_v18 = vld [vmem:[#allocation10 + $0x920] ss:$20 sps:$4 sm:$0xff]   ;;  %v15812_v35 = vld [vmem:[#allocation10 + $0x8a8] ss:$20 sps:$4 sm:$0xff]  }
 0x510   :  { %v14660_v41 = vadd.f32 %v14659_v45, %v14658_v56  ;;  %5348 = vmatmul.mubr.bf16.vlgmr.msra.gmra.mxu0 %v18541_v10  ;;  %v19153_v50 = vpop.f32.mrf.mxu0 }
 0x511   :  { %5192 = vmatmul.mubr.bf16.gmra.mxu1 %v18583_v9  ;;  %v14661_v26 = vpop.f32.mrf.mxu1  ;;  %5357 = vmatprep.mubr.bf16.mxu0 %v18573_v21 }
 0x512   :  { %v19150_v39 = vadd.f32 %v14660_v41, %v19082_v8  ;;  %5201 = vmatprep.mubr.bf16.mxu1 %v18637_v25  ;;  %5411 = vmatpush1.bf16.msra.mxu1 %v15804_v59  ;;  %v19159_v8 = vpop.f32.mrf.mxu0  ;;  %v15814_v59 = vld [vmem:[#allocation10 + $0x8f8] ss:$20 sps:$4 sm:$0xff]  }
 0x513   :  { %v14662_v51 = vpop.f32.mrf.mxu1  ;;  %5412 = vmatprep.subr.bf16.mxu1 %v15809_v6  ;;  %15201 = vmatpush3.bf16.msra.mxu0 %v15810_v47  ;;  %21431 = vst [vmem:[#allocation79_spill] sm:$0xff] %v19159_v8 }
 0x514   :  { %21430 = vst [vmem:[#allocation78_spill] sm:$0xff] %v19150_v39  ;;  %v14663_v56 = vadd.f32 %v14662_v51, %v14661_v26  ;;  %15202 = vmatprep.subr.bf16.mxu0 %v21380_v37  ;;  %v19165_v47 = vpop.f32.mrf.mxu0 }
 0x515   :  { %v14664_v45 = vpop.f32.mrf.mxu1 }
 0x516   :  { %v19157_v5 = vadd.f32 %v14663_v56, %v19092_v55  ;;  %5413 = vmatpush1.bf16.msra.mxu1 %v15807_v11  ;;  %v15817_v11 = vld [vmem:[#allocation10 + $0x8d0] ss:$20 sps:$4 sm:$0xff]  }
 0x517   :  { %v14665_v41 = vpop.f32.mrf.mxu1  ;;  %15203 = vmatpush3.bf16.msra.mxu0 %v15811_v18  ;;  %14737 = vmatprep.subr.bf16.mxu1 %v15812_v35  ;;  %v19172_v35 = vpop.f32.mrf.mxu0 }
 0x518   :  { %v14666_v39 = vadd.f32 %v14665_v41, %v14664_v45  ;;  %5358 = vmatmul.mubr.bf16.gmra.mxu0 %v18583_v9  ;;  %15204 = vmatprep.subr.bf16.mxu0 %v21380_v37  ;;  %21433 = vst [vmem:[#allocation81_spill] sm:$0xff] %v19172_v35 }
 0x519   :  { %5202 = vmatmul.mubr.bf16.gmra.mxu1 %v18669_v34  ;;  %v14667_v6 = vpop.f32.mrf.mxu1  ;;  %5367 = vmatprep.mubr.bf16.mxu0 %v18637_v25 }
 0x51a   :  { %v19168_v55 = vadd.f32 %v14666_v39, %v19101_v14  ;;  %5211 = vmatprep.mubr.bf16.mxu1 %v18703_v15  ;;  %v19180_v14 = vpop.f32.mrf.mxu0 }
 0x51b   :  { %v14668_v26 = vpop.f32.mrf.mxu1  ;;  %15205 = vmatpush3.bf16.msra.mxu0 %v15814_v59 }
 0x51c   :  { %21432 = vst [vmem:[#allocation80_spill] sm:$0xff] %v19168_v55  ;;  %v14669_v51 = vadd.f32 %v14668_v26, %v14667_v6  ;;  %15206 = vmatprep.subr.bf16.mxu0 %v21380_v37  ;;  %v19187_v59 = vpop.f32.mrf.mxu0  ;;  %v15815_v26 = vld [vmem:[#allocation10 + $0x880] ss:$20 sps:$4 sm:$0xff]  }
 0x51d   :  { %v14670_v18 = vpop.f32.mrf.mxu1  ;;  %21436 = vst [vmem:[#allocation84_spill] sm:$0xff] %v19187_v59  ;;  %v15824_v55 = vld [vmem:[#allocation10 + $0x7e0] ss:$20 sps:$4 sm:$0xff]  }
 0x51e   :  { %v19175_v56 = vadd.f32 %v14669_v51, %v19108_v60  ;;  %v19194_v60 = vpop.f32.mrf.mxu0  ;;  %v15816_v51 = vld [vmem:[#allocation10 + $0x740] ss:$20 sps:$4 sm:$0xff]  }
 0x51f   :  { %v14671_v45 = vpop.f32.mrf.mxu1  ;;  %15207 = vmatpush3.bf16.msra.mxu0 %v15817_v11 }
 0x520   :  { %21434 = vst [vmem:[#allocation82_spill] sm:$0xff] %v19175_v56  ;;  %v14672_v41 = vadd.f32 %v14671_v45, %v14670_v18  ;;  %5368 = vmatmul.mubr.bf16.gmra.mxu0 %v18669_v34  ;;  %v19197_v6 = vpop.f32.mrf.mxu0  ;;  %v15818_v18 = vld [vmem:[#allocation10 + $0x858] ss:$20 sps:$4 sm:$0xff]  }
 0x521   :  { %5212 = vmatmul.mubr.bf16.gmra.mxu1 %v18723_v30  ;;  %5377 = vmatprep.mubr.bf16.mxu0 %v18703_v15  ;;  %21437 = vst [vmem:[#allocation85_spill] sm:$0xff] %v19197_v6  ;;  %v15820_v6 = vld [vmem:[#allocation10 + $0x830] ss:$20 sps:$4 sm:$0xff]  }
 0x522   :  { %v19183_v39 = vadd.f32 %v14672_v41, %v19110_v42  ;;  %13661 = vmatprep.mubr.msk.bf16.mxu1 %vm309_vm0, %v18689_v61  ;;  %v15813_v42 = vld [vmem:[#allocation10 + $0x768] ss:$20 sps:$4 sm:$0xff]   ;;  %v19205_v11 = vpop.f32.mrf.mxu0  ;;  %v15819_v41 = vld [vmem:[#allocation10 + $0x718] ss:$20 sps:$4 sm:$0xff]  }
 0x524   :  { %21435 = vst [vmem:[#allocation83_spill] sm:$0xff] %v19183_v39  ;;  %v19208_v45 = vpop.f32.mrf.mxu0  ;;  %v3140_v39 = vadd.f32 %v18887_v22, %v18871_v53 }
 0x525   :  { %21438 = vst [vmem:[#allocation86_spill] sm:$0xff] %v19208_v45  ;;  %v15822_v45 = vld [vmem:[#allocation10 + $0x808] ss:$20 sps:$4 sm:$0xff]  }
 0x528   :  { %5378 = vmatmul.mubr.bf16.gmra.mxu0 %v18723_v30 }
 0x529   :  { %13662 = vmatmul.mubr.msk.bf16.gmra.mxu1 %vm309_vm0, %v18713_v12  ;;  %13668 = vmatprep.mubr.msk.bf16.mxu0 %vm309_vm0, %v18689_v61 }
 0x52a   :  { %5430 = vmatprep.mubr.bf16.mxu1 %v21381_v4 }
 0x530   :  { %13669 = vmatmul.mubr.msk.bf16.gmra.mxu0 %vm309_vm0, %v18713_v12 }
 0x531   :  { %13670 = vmatmul.mubr.msk.bf16.vlgmr.msra.gmra.mxu1 %vm1148_vm3, %v18626_v32  ;;  %15208 = vmatprep.mubr.msk.bf16.mxu0 %vm17462_vm2, %v21380_v37 }
 0x532   :  { %14738 = vmatpush3.bf16.msra.mxu1 %v15813_v42  ;;  %5440 = vmatprep.mubr.bf16.mxu1 %v21381_v4  ;;  %v19216_v42 = vpop.f32.mrf.mxu0 }
 0x533   :  { %14739 = vmatprep.subr.bf16.mxu1 %v15815_v26 }
 0x534   :  { %v19226_v56 = vpop.f32.mrf.mxu0 }
 0x536   :  { %14740 = vmatpush3.bf16.msra.mxu1 %v15816_v51  ;;  %v15821_v51 = vld [vmem:[#allocation10 + $0x6f0] ss:$20 sps:$4 sm:$0xff]  }
 0x537   :  { %14741 = vmatprep.subr.bf16.mxu1 %v15818_v18 }
 0x538   :  { %15209 = vmatmul.mubr.msk.bf16.vlgmr.msra.gmra.mxu0 %vm1148_vm3, %v18626_v32 }
 0x539   :  { %13671 = vmatmul.mubr.msk.bf16.gmra.mxu1 %vm1148_vm3, %v18678_v17  ;;  %v4062_v59 = vpop.f32.mrf.mxu1  ;;  %15212 = vmatprep.mubr.msk.bf16.mxu0 %vm17462_vm2, %v21380_v37 }
 0x53a   :  { %v4063_v26 = vadd.f32 %v4062_v59, %v18877_v52  ;;  %14742 = vmatpush3.bf16.msra.mxu1 %v15819_v41  ;;  %5450 = vmatprep.mubr.bf16.mxu1 %v21381_v4  ;;  %v15823_v41 = vld [vmem:[#allocation10 + $0x6c8] ss:$20 sps:$4 sm:$0xff]  }
 0x53b   :  { %v4064_v18 = vpop.f32.mrf.mxu1  ;;  %14743 = vmatprep.subr.bf16.mxu1 %v15820_v6 }
 0x53c   :  { %v19221_v32 = vadd.f32 %v19115_v31, %v4063_v26  ;;  %v4065_v35 = vadd.f32 %v4064_v18, %v18881_v27  ;;  %v3306_v26 = vadd.f32 %v18953_v24, %v19028_v63  ;;  %v3150_v18 = vadd.f32 %v18901_v1, %v18883_v29  ;;  %v15828_v24 = vld [vmem:[#allocation10 + $0x790] ss:$20 sps:$4 sm:$0xff]  }
 0x53d   :  { %v4066_v8 = vpop.f32.mrf.mxu1 }
 0x53e   :  { %v19229_v52 = vadd.f32 %v19120_v57, %v4065_v35  ;;  %v4067_v59 = vadd.f32 %v4066_v8, %v18885_v38  ;;  %14744 = vmatpush3.bf16.msra.mxu1 %v15821_v51  ;;  %v15825_v8 = vld [vmem:[#allocation10 + $0x6a0] ss:$20 sps:$4 sm:$0xff]   ;;  %v15826_v35 = vld [vmem:[#allocation10 + $0x7b8] ss:$20 sps:$4 sm:$0xff]  }
 0x53f   :  { %v4068_v6 = vpop.f32.mrf.mxu1  ;;  %14745 = vmatprep.subr.bf16.mxu1 %v15822_v45 }
 0x540   :  { %v19233_v31 = vadd.f32 %v19122_v20, %v4067_v59  ;;  %v19235_v27 = vadd.f32 %v4068_v6, %v3140_v39  ;;  %15213 = vmatmul.mubr.msk.bf16.gmra.mxu0 %vm1148_vm3, %v18678_v17  ;;  %v4228_v53 = vpop.f32.mrf.mxu0 }
 0x541   :  { %13672 = vmatmul.mubr.msk.bf16.gmra.mxu1 %vm1148_vm3, %v18732_v19  ;;  %v4072_v22 = vpop.f32.mrf.mxu1  ;;  %v19242_v38 = vadd.f32 %v4228_v53, %v19012_v48  ;;  %15216 = vmatprep.mubr.msk.bf16.mxu0 %vm17462_vm2, %v21380_v37  ;;  %v15829_v53 = vld [vmem:[#allocation10 + $0x650] ss:$20 sps:$4 sm:$0xff]  }
 0x542   :  { %v4073_v57 = vadd.f32 %v4072_v22, %v18892_v44  ;;  %v19247_v20 = vpop.f32.mrf.mxu0  ;;  %14746 = vmatpush3.bf16.msra.mxu1 %v15823_v41  ;;  %5460 = vmatprep.mubr.bf16.mxu1 %v21381_v4  ;;  %v15827_v41 = vld [vmem:[#allocation10 + $0x678] ss:$20 sps:$4 sm:$0xff]  }
 0x543   :  { %v4074_v17 = vpop.f32.mrf.mxu1  ;;  %14747 = vmatprep.subr.bf16.mxu1 %v15824_v55 }
 0x544   :  { %v19251_v39 = vadd.f32 %v19129_v54, %v4073_v57  ;;  %v4075_v48 = vadd.f32 %v4074_v17, %v18895_v62  ;;  %v4232_v45 = vpop.f32.mrf.mxu0 }
 0x545   :  { %v4076_v51 = vpop.f32.mrf.mxu1  ;;  %v19257_v44 = vadd.f32 %v4232_v45, %v19024_v16 }
 0x546   :  { %v19262_v59 = vadd.f32 %v19136_v0, %v4075_v48  ;;  %v4077_v55 = vadd.f32 %v4076_v51, %v18899_v46  ;;  %v4234_v54 = vpop.f32.mrf.mxu0  ;;  %14748 = vmatpush3.bf16.msra.mxu1 %v15825_v8  ;;  %v21442_v51 = vld [vmem:[#allocation44_spill] sm:$0xff] }
 0x547   :  { %v4078_v62 = vpop.f32.mrf.mxu1  ;;  %v19265_v6 = vadd.f32 %v4234_v54, %v3306_v26  ;;  %14749 = vmatprep.subr.bf16.mxu1 %v15826_v35 }
 0x548   :  { %v19268_v63 = vadd.f32 %v19138_v36, %v4077_v55  ;;  %v19270_v16 = vadd.f32 %v4078_v62, %v3150_v18  ;;  %15217 = vmatmul.mubr.msk.bf16.gmra.mxu0 %vm1148_vm3, %v18732_v19  ;;  %v4238_v29 = vpop.f32.mrf.mxu0 }
 0x549   :  { %13673 = vmatmul.mubr.msk.bf16.gmra.mxu1 %vm1148_vm3, %v18748_v7  ;;  %v4082_v46 = vpop.f32.mrf.mxu1  ;;  %v19277_v1 = vadd.f32 %v4238_v29, %v19036_v2  ;;  %15220 = vmatprep.mubr.msk.bf16.mxu0 %vm17462_vm2, %v21380_v37  ;;  %v3316_v2 = vadd.f32 %v18970_v58, %v19048_v43 }
 0x54a   :  { %v4083_v0 = vadd.f32 %v4082_v46, %v18909_v28  ;;  %v19282_v36 = vpop.f32.mrf.mxu0  ;;  %5470 = vmatprep.mubr.bf16.mxu1 %v21381_v4  ;;  %14750 = vmatpush3.bf16.msra.mxu1 %v15827_v41  ;;  %v21444_v41 = vld [vmem:[#allocation64_spill] sm:$0xff] }
 0x54b   :  { %21439 = vst [vmem:[#allocation87_spill] sm:$0xff] %v19282_v36  ;;  %v19285_v19 = vpop.f32.mrf.mxu1  ;;  %14751 = vmatprep.subr.bf16.mxu1 %v15828_v24  ;;  %v21445_v24 = vld [vmem:[#allocation51_spill] sm:$0xff] }
 0x54c   :  { %v19288_v22 = vadd.f32 %v19153_v50, %v4083_v0  ;;  %v4242_v57 = vpop.f32.mrf.mxu0  ;;  %v21507_v36 = vld [vmem:[#allocation31_spill] sm:$0xff] }
 0x54d   :  { %v4086_v8 = vpop.f32.mrf.mxu1  ;;  %v19293_v17 = vadd.f32 %v4242_v57, %v19046_v23  ;;  %v21440_v23 = vld [vmem:[#allocation62_spill] sm:$0xff] }
 0x54e   :  { %v4087_v28 = vadd.f32 %v4086_v8, %v18915_v3  ;;  %v4244_v35 = vpop.f32.mrf.mxu0  ;;  %14752 = vmatpush3.bf16.msra.mxu1 %v15829_v53  ;;  %v21441_v3 = vld [vmem:[#allocation43_spill] sm:$0xff] }
 0x54f   :  { %v19296_v4 = vpop.f32.mrf.mxu1  ;;  %v19298_v48 = vadd.f32 %v4244_v35, %v3316_v2  ;;  %v21446_v2 = vld [vmem:[#allocation66_spill] sm:$0xff] }
 0x550   :  { %v19301_v45 = vadd.f32 %v19165_v47, %v4087_v28  ;;  %15221 = vmatmul.mubr.msk.bf16.gmra.mxu0 %vm1148_vm3, %v18748_v7  ;;  %v4248_v50 = vpop.f32.mrf.mxu0  ;;  %v21447_v28 = vld [vmem:[#allocation53_spill] sm:$0xff] }
 0x551   :  { %13674 = vmatmul.mubr.msk.bf16.gmra.mxu1 %vm1148_vm3, %v18763_v40  ;;  %v4092_v58 = vpop.f32.mrf.mxu1  ;;  %v19308_v43 = vadd.f32 %v4248_v50, %v21440_v23  ;;  %15224 = vmatprep.mubr.msk.bf16.mxu0 %vm17462_vm2, %v21380_v37 }
 0x552   :  { %v4093_v26 = vadd.f32 %v4092_v58, %v21441_v3  ;;  %5513 = vmatprep.mubr.bf16.mxu1 %v21442_v51  ;;  %v19314_v47 = vpop.f32.mrf.mxu0  ;;  %v21449_v3 = vld [vmem:[#allocation68_spill] sm:$0xff]  ;;  %v21451_v51 = vld [vmem:[#allocation58_spill] sm:$0xff] }
 0x553   :  { %21443 = vst [vmem:[#allocation62_spill] sm:$0xff] %v19314_v47  ;;  %v19316_v18 = vpop.f32.mrf.mxu1 }
 0x554   :  { %v19319_v7 = vadd.f32 %v19180_v14, %v4093_v26  ;;  %v4252_v55 = vpop.f32.mrf.mxu0 }
 0x555   :  { %v4096_v54 = vpop.f32.mrf.mxu1  ;;  %v19322_v62 = vadd.f32 %v4252_v55, %v21444_v41 }
 0x556   :  { %v4097_v29 = vadd.f32 %v4096_v54, %v21445_v24  ;;  %v19325_v46 = vpop.f32.mrf.mxu0  ;;  %v21452_v54 = vld [vmem:[#allocation55_spill] sm:$0xff] }
 0x557   :  { %v19327_v0 = vpop.f32.mrf.mxu1 }
 0x558   :  { %v19330_v53 = vadd.f32 %v19194_v60, %v4097_v29  ;;  %15225 = vmatmul.mubr.msk.bf16.gmra.mxu0 %vm1148_vm3, %v18763_v40  ;;  %v4258_v57 = vpop.f32.mrf.mxu0 }
 0x559   :  { %5514 = vmatmul.mubr.bf16.vlgmr.msra.gmra.mxu1 %v18541_v10  ;;  %v4102_v14 = vpop.f32.mrf.mxu1  ;;  %v19336_v8 = vadd.f32 %v4258_v57, %v21446_v2  ;;  %v21450_v10 = vld [vmem:[#allocation50_spill] sm:$0xff] }
 0x55a   :  { %v4103_v35 = vadd.f32 %v4102_v14, %v21447_v28  ;;  %5521 = vmatprep.mubr.bf16.mxu1 %v18573_v21  ;;  %v19340_v50 = vpop.f32.mrf.mxu0  ;;  %v3180_v55 = vadd.f32 %v21451_v51, %v21450_v10  ;;  %v21453_v2 = vld [vmem:[#allocation70_spill] sm:$0xff]  ;;  %v21456_v51 = vld [vmem:[#allocation72_spill] sm:$0xff] }
 0x55b   :  { %21448 = vst [vmem:[#allocation43_spill] sm:$0xff] %v19340_v50  ;;  %v19342_v58 = vpop.f32.mrf.mxu1 }
 0x55c   :  { %v19345_v60 = vadd.f32 %v19205_v11, %v4103_v35  ;;  %v4262_v23 = vpop.f32.mrf.mxu0 }
 0x55d   :  { %v4106_v40 = vpop.f32.mrf.mxu1  ;;  %v19348_v26 = vadd.f32 %v4262_v23, %v21449_v3 }
 0x55e   :  { %v4107_v41 = vadd.f32 %v4106_v40, %v21452_v54  ;;  %v19353_v24 = vpop.f32.mrf.mxu0 }
 0x55f   :  { %v4108_v21 = vpop.f32.mrf.mxu1 }
 0x560   :  { %v19356_v29 = vadd.f32 %v19216_v42, %v4107_v41  ;;  %v4109_v57 = vadd.f32 %v4108_v21, %v3180_v55  ;;  %v4268_v14 = vpop.f32.mrf.mxu0 }
 0x561   :  { %5522 = vmatmul.mubr.bf16.gmra.mxu1 %v18583_v9  ;;  %v4311_v11 = vpop.f32.mrf.mxu1  ;;  %v19360_v28 = vadd.f32 %v4268_v14, %v21453_v2 }
 0x562   :  { %v19363_v35 = vadd.f32 %v19226_v56, %v4109_v57  ;;  %v19366_v23 = vadd.f32 %v4311_v11, %v19242_v38  ;;  %5529 = vmatprep.mubr.bf16.mxu1 %v18637_v25  ;;  %v19369_v40 = vpop.f32.mrf.mxu0 }
 0x563   :  { %21454 = vst [vmem:[#allocation44_spill] sm:$0xff] %v19369_v40  ;;  %v19371_v42 = vpop.f32.mrf.mxu1 }
 0x564   :  { %21455 = vst [vmem:[#allocation64_spill] sm:$0xff] %v19371_v42  ;;  %v4272_v3 = vpop.f32.mrf.mxu0 }
 0x565   :  { %v4315_v10 = vpop.f32.mrf.mxu1  ;;  %v19374_v9 = vadd.f32 %v4272_v3, %v21456_v51  ;;  %v2035_v51 = vld [vmem:[%s21216_s10 + $0xf0] sm:$0xff] }
 0x566   :  { %v19377_v55 = vadd.f32 %v4315_v10, %v19257_v44  ;;  %v19379_v54 = vpop.f32.mrf.mxu0 }
 0x567   :  { %v4317_v56 = vpop.f32.mrf.mxu1 }
 0x568   :  { %v19382_v38 = vadd.f32 %v4317_v56, %v19265_v6  ;;  %v19384_v41 = vpop.f32.mrf.mxu0  ;;  %v2019_v56 = vld [vmem:[%s21216_s10 + $0x70] sm:$0xff] }
 0x569   :  { %5530 = vmatmul.mubr.bf16.gmra.mxu1 %v18669_v34  ;;  %v4321_v25 = vpop.f32.mrf.mxu1  ;;  %v19401_v34 = vld [vmem:[%s21216_s10 + $0xf8] sm:$0xff] }
 0x56a   :  { %21457 = vst [vmem:[#allocation51_spill] sm:$0xff] %v19382_v38  ;;  %v19388_v21 = vadd.f32 %v4321_v25, %v19277_v1  ;;  %5537 = vmatprep.mubr.bf16.mxu1 %v18703_v15  ;;  %v15182_v57 = vpop.f32.mrf.mxu0  ;;  %v2020_v1 = vld [vmem:[%s21216_s10 + $0x78] sm:$0xff]  ;;  %14792 = vmatprep.subr.mxu1 %v19401_v34 }
 0x56b   :  { %v19391_v14 = vpop.f32.mrf.mxu1  ;;  %14793 = vmatpush3.msra.mxu1 %v2020_v1  ;;  %v21465_v1 = vld [vmem:[#allocation56_spill] sm:$0xff] }
 0x56c   :  { %21458 = vst [vmem:[#allocation66_spill] sm:$0xff] %v19388_v21  ;;  %21459 = vst [vmem:[#allocation53_spill] sm:$0xff] %v19391_v14  ;;  %v19393_v44 = vpop.f32.mrf.mxu0  ;;  %14794 = vmatprep.subr.mxu1 %v2035_v51  ;;  %v21502_v14 = vld [vmem:[#allocation46_spill] sm:$0xff] }
 0x56d   :  { %v4325_v11 = vpop.f32.mrf.mxu1  ;;  %14795 = vmatpush3.msra.mxu1 %v2019_v56 }
 0x56e   :  { %v19396_v2 = vadd.f32 %v4325_v11, %v19293_v17  ;;  %v15183_v6 = vpop.f32.mrf.mxu0  ;;  %v2018_v11 = vld [vmem:[%s21216_s10 + $0x68] sm:$0xff] }
 0x56f   :  { %v4327_v15 = vpop.f32.mrf.mxu1  ;;  %v21464_v6 = vld [vmem:[#allocation65_spill] sm:$0xff] }
 0x570   :  { %21460 = vst [vmem:[#allocation68_spill] sm:$0xff] %v19396_v2  ;;  %v19408_v3 = vadd.f32 %v4327_v15, %v19298_v48  ;;  %v19410_v10 = vpop.f32.mrf.mxu0 }
 0x571   :  { %5538 = vmatmul.mubr.bf16.gmra.mxu1 %v18723_v30  ;;  %v4331_v17 = vpop.f32.mrf.mxu1  ;;  %v2034_v30 = vld [vmem:[%s21216_s10 + $0xe8] sm:$0xff] }
 0x572   :  { %21461 = vst [vmem:[#allocation50_spill] sm:$0xff] %v19408_v3  ;;  %v19420_v25 = vadd.f32 %v4331_v17, %v19308_v43  ;;  %13675 = vmatprep.mubr.msk.bf16.mxu1 %vm309_vm0, %v18689_v61  ;;  %v15186_v48 = vpop.f32.mrf.mxu0  ;;  %v3326_v43 = vadd.f32 %v21465_v1, %v21464_v6  ;;  %14796 = vmatprep.subr.mxu1 %v2034_v30  ;;  %v2033_v61 = vld [vmem:[%s21216_s10 + $0xe0] sm:$0xff] }
 0x573   :  { %v19424_v57 = vpop.f32.mrf.mxu1  ;;  %v2017_v17 = vld [vmem:[%s21216_s10 + $0x60] sm:$0xff]  ;;  %14797 = vmatpush3.msra.mxu1 %v2018_v11 }
 0x574   :  { %21462 = vst [vmem:[#allocation58_spill] sm:$0xff] %v19420_v25  ;;  %21463 = vst [vmem:[#allocation55_spill] sm:$0xff] %v19424_v57  ;;  %v19434_v15 = vpop.f32.mrf.mxu0  ;;  %v4255_v56 = vadd.f32 %v19325_v46, %v3326_v43  ;;  %14798 = vmatprep.subr.mxu1 %v2033_v61  ;;  %v21471_v43 = vld [vmem:[#allocation57_spill] sm:$0xff] }
 0x575   :  { %v4335_v51 = vpop.f32.mrf.mxu1  ;;  %14799 = vmatpush3.msra.mxu1 %v2017_v17 }
 0x576   :  { %v19444_v48 = vadd.f32 %v4335_v51, %v19322_v62  ;;  %v15187_v40 = vpop.f32.mrf.mxu0  ;;  %v21470_v62 = vld [vmem:[#allocation69_spill] sm:$0xff] }
 0x577   :  { %v4337_v6 = vpop.f32.mrf.mxu1  ;;  %v3336_v40 = vadd.f32 %v21471_v43, %v21470_v62  ;;  %v2015_v62 = vld [vmem:[%s21216_s10 + $0x50] sm:$0xff] }
 0x578   :  { %21466 = vst [vmem:[#allocation70_spill] sm:$0xff] %v19444_v48  ;;  %v19446_v30 = vadd.f32 %v4337_v6, %v4255_v56  ;;  %v19448_v1 = vpop.f32.mrf.mxu0 }
 0x579   :  { %13676 = vmatmul.mubr.msk.bf16.gmra.mxu1 %vm309_vm0, %v18713_v12  ;;  %v4341_v3 = vpop.f32.mrf.mxu1  ;;  %v4265_v51 = vadd.f32 %v19353_v24, %v3336_v40  ;;  %v2031_v24 = vld [vmem:[%s21216_s10 + $0xd0] sm:$0xff] }
 0x57a   :  { %21467 = vst [vmem:[#allocation72_spill] sm:$0xff] %v19446_v30  ;;  %v19453_v57 = vadd.f32 %v4341_v3, %v19336_v8  ;;  %v15190_v11 = vpop.f32.mrf.mxu0  ;;  %v2032_v3 = vld [vmem:[%s21216_s10 + $0xd8] sm:$0xff] }
 0x57b   :  { %v19455_v46 = vpop.f32.mrf.mxu1  ;;  %v2016_v11 = vld [vmem:[%s21216_s10 + $0x58] sm:$0xff]  ;;  %14800 = vmatprep.subr.mxu1 %v2032_v3 }
 0x57c   :  { %21468 = vst [vmem:[#allocation65_spill] sm:$0xff] %v19453_v57  ;;  %21469 = vst [vmem:[#allocation56_spill] sm:$0xff] %v19455_v46  ;;  %v19459_v61 = vpop.f32.mrf.mxu0  ;;  %14801 = vmatpush3.msra.mxu1 %v2016_v11  ;;  %v21477_v3 = vld [vmem:[#allocation60_spill] sm:$0xff] }
 0x57d   :  { %v4345_v17 = vpop.f32.mrf.mxu1  ;;  %14802 = vmatprep.subr.mxu1 %v2031_v24  ;;  %v2013_v24 = vld [vmem:[%s21216_s10 + $0x40] sm:$0xff] }
 0x57e   :  { %v19463_v56 = vadd.f32 %v4345_v17, %v19348_v26  ;;  %v15191_v6 = vpop.f32.mrf.mxu0  ;;  %v2030_v17 = vld [vmem:[%s21216_s10 + $0xc8] sm:$0xff]  ;;  %14803 = vmatpush3.msra.mxu1 %v2015_v62  ;;  %v2028_v62 = vld [vmem:[%s21216_s10 + $0xb8] sm:$0xff] }
 0x57f   :  { %v4347_v12 = vpop.f32.mrf.mxu1  ;;  %v2014_v6 = vld [vmem:[%s21216_s10 + $0x48] sm:$0xff]  ;;  %14804 = vmatprep.subr.mxu1 %v2030_v17  ;;  %v2012_v17 = vld [vmem:[%s21216_s10 + $0x38] sm:$0xff] }
 0x580   :  { %21472 = vst [vmem:[#allocation69_spill] sm:$0xff] %v19463_v56  ;;  %v19465_v30 = vadd.f32 %v4347_v12, %v4265_v51  ;;  %v19467_v8 = vpop.f32.mrf.mxu0  ;;  %v21476_v12 = vld [vmem:[#allocation73_spill] sm:$0xff]  ;;  %14805 = vmatpush3.msra.mxu1 %v2014_v6  ;;  %v2026_v6 = vld [vmem:[%s21216_s10 + $0xa8] sm:$0xff] }
 0x581   :  { %v4351_v26 = vpop.f32.mrf.mxu1 }
 0x582   :  { %21473 = vst [vmem:[#allocation57_spill] sm:$0xff] %v19465_v30  ;;  %v19482_v43 = vadd.f32 %v4351_v26, %v19360_v28  ;;  %v15194_v40 = vpop.f32.mrf.mxu0  ;;  %v3346_v30 = vadd.f32 %v21477_v3, %v21476_v12  ;;  %v2029_v28 = vld [vmem:[%s21216_s10 + $0xc0] sm:$0xff] }
 0x583   :  { %v19487_v51 = vpop.f32.mrf.mxu1  ;;  %14806 = vmatprep.subr.mxu1 %v2029_v28 }
 0x584   :  { %21474 = vst [vmem:[#allocation88_spill] sm:$0xff] %v19482_v43  ;;  %21475 = vst [vmem:[#allocation89_spill] sm:$0xff] %v19487_v51  ;;  %v19494_v56 = vpop.f32.mrf.mxu0  ;;  %v4275_v26 = vadd.f32 %v19379_v54, %v3346_v30  ;;  %14807 = vmatpush3.msra.mxu1 %v2013_v24  ;;  %v2011_v30 = vld [vmem:[%s21216_s10 + $0x30] sm:$0xff] }
 0x585   :  { %v4355_v11 = vpop.f32.mrf.mxu1  ;;  %14808 = vmatprep.subr.mxu1 %v2028_v62  ;;  %v2025_v62 = vld [vmem:[%s21216_s10 + $0xa0] sm:$0xff] }
 0x586   :  { %v19504_v40 = vadd.f32 %v4355_v11, %v19374_v9  ;;  %v15195_v43 = vpop.f32.mrf.mxu0  ;;  %v2027_v9 = vld [vmem:[%s21216_s10 + $0xb0] sm:$0xff]  ;;  %14809 = vmatpush3.msra.mxu1 %v2012_v17  ;;  %v2010_v11 = vld [vmem:[%s21216_s10 + $0x28] sm:$0xff]  ;;  %v2009_v17 = vld [vmem:[%s21216_s10 + $0x20] sm:$0xff] }
 0x587   :  { %v4357_v12 = vpop.f32.mrf.mxu1  ;;  %14810 = vmatprep.subr.mxu1 %v2027_v9 }
 0x588   :  { %21478 = vst [vmem:[#allocation73_spill] sm:$0xff] %v19504_v40  ;;  %v19512_v3 = vadd.f32 %v4357_v12, %v4275_v26  ;;  %v19514_v51 = vpop.f32.mrf.mxu0  ;;  %14811 = vmatpush3.msra.mxu1 %v2011_v30  ;;  %v2008_v30 = vld [vmem:[%s21216_s10 + $0x18] sm:$0xff] }
 0x589   :  { %v14698_v54 = vpop.f32.mrf.mxu1  ;;  %14812 = vmatprep.subr.mxu1 %v2026_v6 }
 0x58a   :  { %21479 = vst [vmem:[#allocation60_spill] sm:$0xff] %v19512_v3  ;;  %v15198_v43 = vpop.f32.mrf.mxu0  ;;  %14813 = vmatpush3.msra.mxu1 %v2010_v11 }
 0x58b   :  { %v14699_v28 = vpop.f32.mrf.mxu1  ;;  %v21480_v43 = vld [vmem:[#allocation74_spill] sm:$0xff]  ;;  %14814 = vmatprep.subr.mxu1 %v2025_v62  ;;  %v21482_v62 = vld [vmem:[#allocation75_spill] sm:$0xff] }
 0x58c   :  { %v14700_v24 = vadd.f32 %v14699_v28, %v14698_v54  ;;  %v19528_v26 = vpop.f32.mrf.mxu0  ;;  %v2024_v54 = vld [vmem:[%s21216_s10 + $0x98] sm:$0xff]  ;;  %14815 = vmatpush3.msra.mxu1 %v2009_v17  ;;  %v2006_v17 = vld [vmem:[%s21216_s10 + $0x8] sm:$0xff] }
 0x58d   :  { %v14701_v12 = vpop.f32.mrf.mxu1  ;;  %14816 = vmatprep.subr.mxu1 %v2024_v54 }
 0x58e   :  { %v4395_v9 = vadd.f32 %v14700_v24, %v21480_v43  ;;  %v15199_v3 = vpop.f32.mrf.mxu0  ;;  %v2007_v24 = vld [vmem:[%s21216_s10 + $0x10] sm:$0xff]  ;;  %14817 = vmatpush3.msra.mxu1 %v2008_v30  ;;  %v2068_v30 = vld [vmem:[%s21216_s10 + $0x1f8] sm:$0xff] }
 0x58f   :  { %v14702_v28 = vpop.f32.mrf.mxu1  ;;  %v2023_v3 = vld [vmem:[%s21216_s10 + $0x90] sm:$0xff]  ;;  %14827 = vmatprep.subr.mxu0 %v2068_v30 }
 0x590   :  { %v19544_v6 = vadd.f32 %v19384_v41, %v4395_v9  ;;  %v14703_v40 = vadd.f32 %v14702_v28, %v14701_v12  ;;  %v19546_v57 = vpop.f32.mrf.mxu0  ;;  %v2022_v41 = vld [vmem:[%s21216_s10 + $0x88] sm:$0xff]  ;;  %14818 = vmatprep.subr.mxu1 %v2023_v3 }
 0x591   :  { %v14704_v11 = vpop.f32.mrf.mxu1  ;;  %14819 = vmatpush3.msra.mxu1 %v2007_v24  ;;  %v2052_v24 = vld [vmem:[%s21216_s10 + $0x178] sm:$0xff] }
 0x592   :  { %21481 = vst [vmem:[#allocation74_spill] sm:$0xff] %v19544_v6  ;;  %v4398_v43 = vadd.f32 %v14703_v40, %v21482_v62  ;;  %v19555_v48 = vpop.f32.mrf.mxu0  ;;  %v2021_v40 = vld [vmem:[%s21216_s10 + $0x80] sm:$0xff]  ;;  %14820 = vmatprep.subr.mxu1 %v2022_v41  ;;  %14828 = vmatpush3.msra.mxu0 %v2052_v24 }
 0x593   :  { %v14705_v12 = vpop.f32.mrf.mxu1  ;;  %v2005_v62 = vld [vmem:[%s21216_s10] sm:$0xff]  ;;  %14821 = vmatpush3.msra.mxu1 %v2006_v17  ;;  %v2051_v17 = vld [vmem:[%s21216_s10 + $0x170] sm:$0xff] }
 0x594   :  { %v19564_v9 = vadd.f32 %v19393_v44, %v4398_v43  ;;  %v14706_v54 = vadd.f32 %v14705_v12, %v14704_v11  ;;  %v19566_v28 = vpop.f32.mrf.mxu0  ;;  %v2067_v43 = vld [vmem:[%s21216_s10 + $0x1f0] sm:$0xff]  ;;  %14822 = vmatprep.subr.mxu1 %v2021_v40 }
 0x595   :  { %v14707_v3 = vpop.f32.mrf.mxu1  ;;  %14823 = vmatpush3.msra.mxu1 %v2005_v62  ;;  %14829 = vmatprep.subr.mxu0 %v2067_v43  ;;  %v2050_v62 = vld [vmem:[%s21216_s10 + $0x168] sm:$0xff] }
 0x596   :  { %21483 = vst [vmem:[#allocation75_spill] sm:$0xff] %v19564_v9  ;;  %v4403_v44 = vadd.f32 %v14706_v54, %v19125_v49  ;;  %v19578_v11 = vpop.f32.mrf.mxu0  ;;  %v2066_v54 = vld [vmem:[%s21216_s10 + $0x1e8] sm:$0xff]  ;;  %15228 = vmatprep.subr.mxu1 %v21380_v37  ;;  %14830 = vmatpush3.msra.mxu0 %v2051_v17 }
 0x597   :  { %v14708_v12 = vpop.f32.mrf.mxu1  ;;  %14831 = vmatprep.subr.mxu0 %v2066_v54 }
 0x598   :  { %v19587_v41 = vadd.f32 %v19410_v10, %v4403_v44  ;;  %v14709_v30 = vadd.f32 %v14708_v12, %v14707_v3  ;;  %v19589_v6 = vpop.f32.mrf.mxu0  ;;  %v2065_v44 = vld [vmem:[%s21216_s10 + $0x1e0] sm:$0xff]  ;;  %14832 = vmatpush3.msra.mxu0 %v2050_v62 }
 0x599   :  { %v14710_v49 = vpop.f32.mrf.mxu1  ;;  %14833 = vmatprep.subr.mxu0 %v2065_v44  ;;  %v21487_v62 = vld [vmem:[#allocation78_spill] sm:$0xff] }
 0x59a   :  { %21484 = vst [vmem:[#allocation90_spill] sm:$0xff] %v19587_v41  ;;  %v4406_v40 = vadd.f32 %v14709_v30, %v19133_v33  ;;  %v19599_v10 = vpop.f32.mrf.mxu0  ;;  %v2049_v33 = vld [vmem:[%s21216_s10 + $0x160] sm:$0xff]  ;;  %v2064_v30 = vld [vmem:[%s21216_s10 + $0x1d8] sm:$0xff] }
 0x59b   :  { %v14711_v3 = vpop.f32.mrf.mxu1  ;;  %14834 = vmatpush3.msra.mxu0 %v2049_v33 }
 0x59c   :  { %v19608_v24 = vadd.f32 %v19434_v15, %v4406_v40  ;;  %v14712_v43 = vadd.f32 %v14711_v3, %v14710_v49  ;;  %v19610_v12 = vpop.f32.mrf.mxu0  ;;  %14835 = vmatprep.subr.mxu0 %v2064_v30 }
 0x59d   :  { %v14713_v17 = vpop.f32.mrf.mxu1 }
 0x59e   :  { %21485 = vst [vmem:[#allocation91_spill] sm:$0xff] %v19608_v24  ;;  %v4411_v54 = vadd.f32 %v14712_v43, %v19141_v13  ;;  %v19619_v41 = vpop.f32.mrf.mxu0 }
 0x59f   :  { %v14714_v15 = vpop.f32.mrf.mxu1 }
 0x5a0   :  { %v19622_v49 = vadd.f32 %v19448_v1, %v4411_v54  ;;  %v14715_v40 = vadd.f32 %v14714_v15, %v14713_v17  ;;  %v19625_v9 = vpop.f32.mrf.mxu0  ;;  %v2048_v54 = vld [vmem:[%s21216_s10 + $0x158] sm:$0xff] }
 0x5a1   :  { %v14716_v3 = vpop.f32.mrf.mxu1  ;;  %14836 = vmatpush3.msra.mxu0 %v2048_v54  ;;  %v21490_v15 = vld [vmem:[#allocation80_spill] sm:$0xff] }
 0x5a2   :  { %21486 = vst [vmem:[#allocation92_spill] sm:$0xff] %v19622_v49  ;;  %v4414_v24 = vadd.f32 %v14715_v40, %v21487_v62  ;;  %v19631_v33 = vpop.f32.mrf.mxu0  ;;  %v2060_v54 = vld [vmem:[%s21216_s10 + $0x1b8] sm:$0xff] }
 0x5a3   :  { %v14717_v37 = vpop.f32.mrf.mxu1 }
 0x5a4   :  { %v19628_v46 = vadd.f32 %v19459_v61, %v4414_v24  ;;  %v14718_v44 = vadd.f32 %v14717_v37, %v14716_v3  ;;  %v2063_v61 = vld [vmem:[%s21216_s10 + $0x1d0] sm:$0xff]  ;;  %v19648_v24 = vpop.f32.mrf.mxu0  ;;  %v2046_v3 = vld [vmem:[%s21216_s10 + $0x148] sm:$0xff] }
 0x5a5   :  { %v14719_v13 = vpop.f32.mrf.mxu1  ;;  %v2047_v37 = vld [vmem:[%s21216_s10 + $0x150] sm:$0xff]  ;;  %14837 = vmatprep.subr.mxu0 %v2063_v61 }
 0x5a6   :  { %21488 = vst [vmem:[#allocation78_spill] sm:$0xff] %v19628_v46  ;;  %v4419_v43 = vadd.f32 %v14718_v44, %v19157_v5  ;;  %14838 = vmatpush3.msra.mxu0 %v2047_v37  ;;  %v2061_v44 = vld [vmem:[%s21216_s10 + $0x1c0] sm:$0xff]  ;;  %v19666_v61 = vpop.f32.mrf.mxu0 }
 0x5a7   :  { %v14720_v30 = vpop.f32.mrf.mxu1  ;;  %v21492_v37 = vld [vmem:[#allocation82_spill] sm:$0xff] }
 0x5a8   :  { %v19634_v1 = vadd.f32 %v19467_v8, %v4419_v43  ;;  %v14721_v17 = vadd.f32 %v14720_v30, %v14719_v13  ;;  %v2062_v8 = vld [vmem:[%s21216_s10 + $0x1c8] sm:$0xff]  ;;  %v2045_v30 = vld [vmem:[%s21216_s10 + $0x140] sm:$0xff] }
 0x5a9   :  { %v14722_v5 = vpop.f32.mrf.mxu1  ;;  %14839 = vmatprep.subr.mxu0 %v2062_v8  ;;  %v2059_v8 = vld [vmem:[%s21216_s10 + $0x1b0] sm:$0xff] }
 0x5aa   :  { %21489 = vst [vmem:[#allocation93_spill] sm:$0xff] %v19634_v1  ;;  %v4422_v40 = vadd.f32 %v14721_v17, %v21490_v15  ;;  %14840 = vmatpush3.msra.mxu0 %v2046_v3 }
 0x5ab   :  { %v14723_v62 = vpop.f32.mrf.mxu1  ;;  %14841 = vmatprep.subr.mxu0 %v2061_v44  ;;  %v2058_v44 = vld [vmem:[%s21216_s10 + $0x1a8] sm:$0xff] }
 0x5ac   :  { %v19658_v13 = vadd.f32 %v19494_v56, %v4422_v40  ;;  %v14724_v43 = vadd.f32 %v14723_v62, %v14722_v5  ;;  %v2044_v56 = vld [vmem:[%s21216_s10 + $0x138] sm:$0xff]  ;;  %14842 = vmatpush3.msra.mxu0 %v2045_v30  ;;  %v2043_v62 = vld [vmem:[%s21216_s10 + $0x130] sm:$0xff] }
 0x5ad   :  { %v14725_v17 = vpop.f32.mrf.mxu1  ;;  %14843 = vmatprep.subr.mxu0 %v2060_v54  ;;  %v21494_v30 = vld [vmem:[#allocation83_spill] sm:$0xff] }
 0x5ae   :  { %21491 = vst [vmem:[#allocation80_spill] sm:$0xff] %v19658_v13  ;;  %v4427_v15 = vadd.f32 %v14724_v43, %v21492_v37  ;;  %14844 = vmatpush3.msra.mxu0 %v2044_v56  ;;  %v19684_v43 = vpop.f32.mrf.mxu0  ;;  %v2056_v56 = vld [vmem:[%s21216_s10 + $0x198] sm:$0xff] }
 0x5af   :  { %v14726_v5 = vpop.f32.mrf.mxu1  ;;  %14845 = vmatprep.subr.mxu0 %v2059_v8  ;;  %v2040_v8 = vld [vmem:[%s21216_s10 + $0x118] sm:$0xff] }
 0x5b0   :  { %v19676_v40 = vadd.f32 %v19514_v51, %v4427_v15  ;;  %v14727_v3 = vadd.f32 %v14726_v5, %v14725_v17  ;;  %v2042_v51 = vld [vmem:[%s21216_s10 + $0x128] sm:$0xff]  ;;  %14846 = vmatpush3.msra.mxu0 %v2043_v62  ;;  %v2057_v17 = vld [vmem:[%s21216_s10 + $0x1a0] sm:$0xff]  ;;  %v19702_v5 = vpop.f32.mrf.mxu0 }
 0x5b1   :  { %14847 = vmatprep.subr.mxu0 %v2058_v44  ;;  %v2041_v15 = vld [vmem:[%s21216_s10 + $0x120] sm:$0xff]  ;;  %v2054_v62 = vld [vmem:[%s21216_s10 + $0x188] sm:$0xff] }
 0x5b2   :  { %21493 = vst [vmem:[#allocation82_spill] sm:$0xff] %v19676_v40  ;;  %v4430_v37 = vadd.f32 %v14727_v3, %v21494_v30  ;;  %14848 = vmatpush3.msra.mxu0 %v2042_v51  ;;  %v2039_v3 = vld [vmem:[%s21216_s10 + $0x110] sm:$0xff]  ;;  %v19716_v44 = vpop.f32.mrf.mxu0  ;;  %v2038_v30 = vld [vmem:[%s21216_s10 + $0x108] sm:$0xff]  ;;  %v2037_v51 = vld [vmem:[%s21216_s10 + $0x100] sm:$0xff] }
 0x5b3   :  { %14849 = vmatprep.subr.mxu0 %v2057_v17 }
 0x5b4   :  { %v19694_v54 = vadd.f32 %v19528_v26, %v4430_v37  ;;  %14850 = vmatpush3.msra.mxu0 %v2041_v15  ;;  %v2055_v26 = vld [vmem:[%s21216_s10 + $0x190] sm:$0xff]  ;;  %v2053_v37 = vld [vmem:[%s21216_s10 + $0x180] sm:$0xff]  ;;  %v19727_v17 = vpop.f32.mrf.mxu0 }
 0x5b5   :  { %14851 = vmatprep.subr.mxu0 %v2056_v56 }
 0x5b6   :  { %21495 = vst [vmem:[#allocation83_spill] sm:$0xff] %v19694_v54  ;;  %14852 = vmatpush3.msra.mxu0 %v2040_v8  ;;  %v19730_v15 = vpop.f32.mrf.mxu0 }
 0x5b7   :  { %14853 = vmatprep.subr.mxu0 %v2055_v26 }
 0x5b8   :  { %14854 = vmatpush3.msra.mxu0 %v2039_v3  ;;  %v19732_v56 = vpop.f32.mrf.mxu0 }
 0x5b9   :  { %14855 = vmatprep.subr.mxu0 %v2054_v62 }
 0x5ba   :  { %14856 = vmatpush3.msra.mxu0 %v2038_v30  ;;  %v19734_v26 = vpop.f32.mrf.mxu0 }
 0x5bb   :  { %14857 = vmatprep.subr.mxu0 %v2053_v37 }
 0x5bc   :  { %14858 = vmatpush3.msra.mxu0 %v2037_v51  ;;  %v19740_v40 = vpop.f32.mrf.mxu0 }
 0x5bd   :  { %14879 = vmatprep.subr.mxu0 %v19401_v34  ;;  %v21497_v34 = vld [vmem:[#allocation42_spill] sm:$0xff] }
 0x5c9   :  { %v5183_v8 = vpop.f32.mrf.mxu1 }
 0x5ca   :  { %v5267_v3 = vadd.f32 %v19546_v57, %v5183_v8  ;;  %v21499_v8 = vld [vmem:[#allocation45_spill] sm:$0xff] }
 0x5cb   :  { %v5185_v62 = vpop.f32.mrf.mxu1 }
 0x5cc   :  { %v19738_v54 = vadd.f32 %v5267_v3, %v19221_v32 }
 0x5cd   :  { %v5187_v30 = vpop.f32.mrf.mxu1 }
 0x5ce   :  { %21496 = vst [vmem:[#allocation94_spill] sm:$0xff] %v19738_v54  ;;  %v5271_v37 = vadd.f32 %v19566_v28, %v5187_v30  ;;  %v19745_v13 = vmul.f32 %v19738_v54, %v21497_v34 }
 0x5cf   :  { %v5189_v51 = vpop.f32.mrf.mxu1 }
 0x5d0   :  { %v19748_v1 = vadd.f32 %v5271_v37, %v19233_v31  ;;  %v19750_v46 = vpop.f32.mrf.mxu0  ;;  %v6012_v30 = vmul.f32 %v19745_v13, %v19738_v54  ;;  %v5273_v54 = vadd.f32 %v19578_v11, %v5189_v51  ;;  %v21506_v11 = vld [vmem:[#allocation48_spill] sm:$0xff] }
 0x5d1   :  { %v5193_v57 = vpop.f32.mrf.mxu1 }
 0x5d2   :  { %21498 = vst [vmem:[#allocation42_spill] sm:$0xff] %v19748_v1  ;;  %v19754_v32 = vmul.f32 %v19748_v1, %v21499_v8  ;;  %v5277_v3 = vadd.f32 %v19589_v6, %v5193_v57  ;;  %v19757_v49 = vpop.f32.mrf.mxu0 }
 0x5d3   :  { %21500 = vst [vmem:[#allocation45_spill] sm:$0xff] %v19757_v49  ;;  %v5195_v28 = vpop.f32.mrf.mxu1 }
 0x5d4   :  { %v6017_v25 = vmul.f32 %v19754_v32, %v19748_v1  ;;  %v19764_v31 = vadd.f32 %v5277_v3, %v19251_v39  ;;  %v19766_v37 = vpop.f32.mrf.mxu0  ;;  %v5269_v39 = vadd.f32 %v19555_v48, %v5185_v62  ;;  %v4085_v48 = vadd.f32 %v19285_v19, %v21507_v36  ;;  %v21513_v36 = vld [vmem:[#allocation77_spill] sm:$0xff] }
 0x5d5   :  { %v5197_v38 = vpop.f32.mrf.mxu1  ;;  %v4162_v19 = vadd.f32 %v21513_v36, %v19270_v16  ;;  %v21517_v16 = vld [vmem:[#allocation79_spill] sm:$0xff] }
 0x5d6   :  { %21501 = vst [vmem:[#allocation95_spill] sm:$0xff] %v19764_v31  ;;  %v6062_v2 = vadd.f32 %v6017_v25, %v6012_v30  ;;  %v5687_v42 = vmul.f32 %v19764_v31, %v21502_v14  ;;  %v19770_v6 = vpop.f32.mrf.mxu0  ;;  %v5281_v57 = vadd.f32 %v19610_v12, %v5197_v38  ;;  %v21505_v30 = vld [vmem:[#allocation76_spill] sm:$0xff]  ;;  %v4168_v36 = vadd.f32 %v21517_v16, %v4085_v48  ;;  %v21524_v16 = vld [vmem:[#allocation81_spill] sm:$0xff] }
 0x5d7   :  { %21503 = vst [vmem:[#allocation46_spill] sm:$0xff] %v19770_v6  ;;  %v5199_v49 = vpop.f32.mrf.mxu1  ;;  %v4152_v47 = vadd.f32 %v21505_v30, %v19235_v27  ;;  %v5279_v6 = vadd.f32 %v19599_v10, %v5195_v28  ;;  %v19802_v28 = vadd.f32 %v5269_v39, %v19229_v52  ;;  %v21516_v52 = vld [vmem:[#allocation49_spill] sm:$0xff] }
 0x5d8   :  { %v6022_v50 = vmul.f32 %v5687_v42, %v19764_v31  ;;  %v19775_v1 = vpop.f32.mrf.mxu0  ;;  %v19779_v3 = vadd.f32 %v5281_v57, %v19268_v63  ;;  %v5283_v62 = vadd.f32 %v19619_v41, %v5199_v49  ;;  %v21515_v41 = vld [vmem:[#allocation32_spill] sm:$0xff]  ;;  %v4095_v39 = vadd.f32 %v19316_v18, %v21516_v52 }
 0x5d9   :  { %v5203_v25 = vpop.f32.mrf.mxu1  ;;  %v19791_v63 = vadd.f32 %v5273_v54, %v4152_v47  ;;  %21512 = vst [vmem:[#allocation31_spill] sm:$0xff] %v19802_v28  ;;  %v19808_v47 = vadd.f32 %v5279_v6, %v19262_v59  ;;  %v19833_v18 = vmul.f32 %v19802_v28, %v21497_v34 }
 0x5da   :  { %21504 = vst [vmem:[#allocation96_spill] sm:$0xff] %v19779_v3  ;;  %v6063_v21 = vadd.f32 %v6062_v2, %v6022_v50  ;;  %v5287_v38 = vadd.f32 %v19625_v9, %v5203_v25  ;;  %v19785_v12 = vpop.f32.mrf.mxu0  ;;  %v5692_v51 = vmul.f32 %v19779_v3, %v21506_v11  ;;  %v21510_v2 = vld [vmem:[#allocation47_spill] sm:$0xff]  ;;  %v21511_v9 = vld [vmem:[#allocation34_spill] sm:$0xff]  ;;  %v19824_v6 = vadd.f32 %v5283_v62, %v4162_v19 }
 0x5db   :  { %v5205_v31 = vpop.f32.mrf.mxu1  ;;  %21508 = vst [vmem:[#allocation76_spill] sm:$0xff] %v19791_v63  ;;  %v3160_v10 = vadd.f32 %v21511_v9, %v21510_v2  ;;  %21514 = vst [vmem:[#allocation47_spill] sm:$0xff] %v19808_v47  ;;  %v19822_v59 = vmul.f32 %v19791_v63, %v21499_v8  ;;  %v19841_v62 = vmul.f32 %v19808_v47, %v21502_v14 }
 0x5dc   :  { %v19795_v27 = vadd.f32 %v5287_v38, %v19288_v22  ;;  %v19797_v50 = vpop.f32.mrf.mxu0  ;;  %v6027_v57 = vmul.f32 %v5692_v51, %v19779_v3  ;;  %v5289_v49 = vadd.f32 %v19631_v33, %v5205_v31  ;;  %21518 = vst [vmem:[#allocation34_spill] sm:$0xff] %v19824_v6 }
 0x5dd   :  { %v5207_v25 = vpop.f32.mrf.mxu1  ;;  %v4089_v30 = vadd.f32 %v19296_v4, %v3160_v10  ;;  %v21519_v4 = vld [vmem:[#allocation40_spill] sm:$0xff] }
 0x5de   :  { %21509 = vst [vmem:[#allocation48_spill] sm:$0xff] %v19795_v27  ;;  %v5697_v22 = vmul.f32 %v19795_v27, %v21515_v41  ;;  %v19813_v54 = vpop.f32.mrf.mxu0  ;;  %v6064_v38 = vadd.f32 %v6063_v21, %v6027_v57  ;;  %v5291_v2 = vadd.f32 %v19648_v24, %v5207_v25  ;;  %v21520_v10 = vld [vmem:[#allocation52_spill] sm:$0xff]  ;;  %v19843_v25 = vadd.f32 %v5289_v49, %v4168_v36 }
 0x5df   :  { %v5209_v9 = vpop.f32.mrf.mxu1  ;;  %v3170_v3 = vadd.f32 %v21520_v10, %v21519_v4  ;;  %v4172_v4 = vadd.f32 %v21524_v16, %v4089_v30  ;;  %v21525_v10 = vld [vmem:[#allocation84_spill] sm:$0xff]  ;;  %v19858_v49 = vmul.f32 %v19824_v6, %v21506_v11 }
 0x5e0   :  { %v6032_v33 = vmul.f32 %v5697_v22, %v19795_v27  ;;  %v19827_v31 = vpop.f32.mrf.mxu0  ;;  %v19836_v21 = vadd.f32 %v5291_v2, %v19301_v45  ;;  %v5293_v24 = vadd.f32 %v19666_v61, %v5209_v9  ;;  %21522 = vst [vmem:[#allocation49_spill] sm:$0xff] %v19843_v25  ;;  %v4178_v27 = vadd.f32 %v21525_v10, %v4095_v39  ;;  %v21526_v61 = vld [vmem:[#allocation38_spill] sm:$0xff] }
 0x5e1   :  { %v5213_v48 = vpop.f32.mrf.mxu1  ;;  %v5727_v45 = vadd.f32 %v19754_v32, %v19745_v13  ;;  %v4099_v13 = vadd.f32 %v19327_v0, %v3170_v3  ;;  %v19873_v10 = vmul.f32 %v19843_v25, %v21515_v41 }
 0x5e2   :  { %21521 = vst [vmem:[#allocation77_spill] sm:$0xff] %v19836_v21  ;;  %v6065_v57 = vadd.f32 %v6064_v38, %v6032_v33  ;;  %v5297_v19 = vadd.f32 %v19684_v43, %v5213_v48  ;;  %v19846_v52 = vpop.f32.mrf.mxu0  ;;  %v5702_v2 = vmul.f32 %v19836_v21, %v21526_v61  ;;  %v5742_v38 = vadd.f32 %v19822_v59, %v19833_v18 }
 0x5e3   :  { %21523 = vst [vmem:[#allocation79_spill] sm:$0xff] %v19846_v52  ;;  %v5215_v9 = vpop.f32.mrf.mxu1  ;;  %v5728_v32 = vadd.f32 %v5727_v45, %v5687_v42  ;;  %v19868_v33 = vadd.f32 %v5293_v24, %v4172_v4  ;;  %v21533_v4 = vld [vmem:[#allocation54_spill] sm:$0xff] }
 0x5e4   :  { %v19861_v43 = vadd.f32 %v5297_v19, %v19319_v7  ;;  %v5299_v30 = vadd.f32 %v19702_v5, %v5215_v9  ;;  %v19864_v39 = vpop.f32.mrf.mxu0  ;;  %v6037_v36 = vmul.f32 %v5702_v2, %v19836_v21  ;;  %v5743_v16 = vadd.f32 %v5742_v38, %v19841_v62  ;;  %v21530_v7 = vld [vmem:[#allocation39_spill] sm:$0xff] }
 0x5e5   :  { %21528 = vst [vmem:[#allocation52_spill] sm:$0xff] %v19864_v39  ;;  %21529 = vst [vmem:[#allocation81_spill] sm:$0xff] %v19868_v33  ;;  %v5217_v48 = vpop.f32.mrf.mxu1  ;;  %v5729_v0 = vadd.f32 %v5728_v32, %v5692_v51  ;;  %v4105_v45 = vadd.f32 %v19342_v58, %v21533_v4  ;;  %v19894_v51 = vmul.f32 %v19868_v33, %v21526_v61  ;;  %v21536_v32 = vld [vmem:[#allocation33_spill] sm:$0xff] }
 0x5e6   :  { %21527 = vst [vmem:[#allocation40_spill] sm:$0xff] %v19861_v43  ;;  %v5707_v19 = vmul.f32 %v19861_v43, %v21530_v7  ;;  %v5301_v5 = vadd.f32 %v19716_v44, %v5217_v48  ;;  %v19878_v9 = vpop.f32.mrf.mxu0  ;;  %v6066_v42 = vadd.f32 %v6065_v57, %v6037_v36  ;;  %v19880_v3 = vadd.f32 %v5299_v30, %v4178_v27  ;;  %v21535_v44 = vld [vmem:[#allocation85_spill] sm:$0xff] }
 0x5e7   :  { %21531 = vst [vmem:[#allocation84_spill] sm:$0xff] %v19878_v9  ;;  %v5219_v24 = vpop.f32.mrf.mxu1  ;;  %v5744_v38 = vadd.f32 %v5743_v16, %v19858_v49  ;;  %v4182_v48 = vadd.f32 %v21535_v44, %v4099_v13  ;;  %v5730_v9 = vadd.f32 %v5729_v0, %v5697_v22 }
 0x5e8   :  { %21532 = vst [vmem:[#allocation97_spill] sm:$0xff] %v19880_v3  ;;  %v6042_v21 = vmul.f32 %v5707_v19, %v19861_v43  ;;  %v19887_v39 = vadd.f32 %v5301_v5, %v19330_v53  ;;  %v19889_v52 = vpop.f32.mrf.mxu0  ;;  %v5303_v27 = vadd.f32 %v19727_v17, %v5219_v24  ;;  %v19904_v13 = vmul.f32 %v19880_v3, %v21530_v7  ;;  %v21538_v17 = vld [vmem:[#allocation86_spill] sm:$0xff] }
 0x5e9   :  { %v5223_v57 = vpop.f32.mrf.mxu1  ;;  %v5745_v58 = vadd.f32 %v5744_v38, %v19873_v10  ;;  %v5731_v16 = vadd.f32 %v5730_v9, %v5702_v2  ;;  %v4188_v24 = vadd.f32 %v21538_v17, %v4105_v45 }
 0x5ea   :  { %21534 = vst [vmem:[#allocation54_spill] sm:$0xff] %v19887_v39  ;;  %v6067_v30 = vadd.f32 %v6066_v42, %v6042_v21  ;;  %v5712_v36 = vmul.f32 %v19887_v39, %v21536_v32  ;;  %v19900_v53 = vpop.f32.mrf.mxu0  ;;  %v19906_v22 = vadd.f32 %v5303_v27, %v4182_v48  ;;  %v5307_v5 = vadd.f32 %v19730_v15, %v5223_v57 }
 0x5eb   :  { %v5225_v0 = vpop.f32.mrf.mxu1  ;;  %v5746_v38 = vadd.f32 %v5745_v58, %v19894_v51  ;;  %v5732_v2 = vadd.f32 %v5731_v16, %v5707_v19 }
 0x5ec   :  { %21537 = vst [vmem:[#allocation85_spill] sm:$0xff] %v19906_v22  ;;  %v6047_v4 = vmul.f32 %v5712_v36, %v19887_v39  ;;  %v5309_v21 = vadd.f32 %v19732_v56, %v5225_v0  ;;  %v19912_v42 = vpop.f32.mrf.mxu0  ;;  %v19916_v9 = vadd.f32 %v5307_v5, %v19345_v60  ;;  %v19920_v15 = vmul.f32 %v19906_v22, %v21536_v32  ;;  %v21541_v0 = vld [vmem:[#allocation41_spill] sm:$0xff] }
 0x5ed   :  { %v5227_v44 = vpop.f32.mrf.mxu1  ;;  %v5747_v56 = vadd.f32 %v5746_v38, %v19904_v13  ;;  %v5733_v60 = vadd.f32 %v5732_v2, %v5712_v36  ;;  %v21544_v38 = vld [vmem:[#allocation35_spill] sm:$0xff] }
 0x5ee   :  { %21539 = vst [vmem:[#allocation86_spill] sm:$0xff] %v19916_v9  ;;  %v6068_v48 = vadd.f32 %v6067_v30, %v6047_v4  ;;  %v19922_v27 = vadd.f32 %v5309_v21, %v4188_v24  ;;  %v5311_v45 = vadd.f32 %v19734_v26, %v5227_v44  ;;  %v19925_v57 = vpop.f32.mrf.mxu0  ;;  %v5717_v19 = vmul.f32 %v19916_v9, %v21541_v0 }
 0x5ef   :  { %v5229_v58 = vpop.f32.mrf.mxu1  ;;  %v5748_v4 = vadd.f32 %v5747_v56, %v19920_v15 }
 0x5f0   :  { %21540 = vst [vmem:[#allocation98_spill] sm:$0xff] %v19922_v27  ;;  %v19932_v30 = vmul.f32 %v19922_v27, %v21541_v0  ;;  %v19935_v16 = vadd.f32 %v5311_v45, %v19356_v29  ;;  %v5313_v5 = vadd.f32 %v19740_v40, %v5229_v58  ;;  %v19938_v17 = vpop.f32.mrf.mxu0  ;;  %v6052_v26 = vmul.f32 %v5717_v19, %v19916_v9  ;;  %v21562_v0 = vld [vmem:[#allocation43_spill] sm:$0xff] }
 0x5f1   :  { %21543 = vst [vmem:[#allocation100_spill] sm:$0xff] %v19938_v17  ;;  %v5432_v24 = vpop.f32.mrf.mxu1  ;;  %v5734_v21 = vadd.f32 %v5733_v60, %v5717_v19  ;;  %v21565_v17 = vld [vmem:[#allocation46_spill] sm:$0xff] }
 0x5f2   :  { %21542 = vst [vmem:[#allocation99_spill] sm:$0xff] %v19935_v16  ;;  %v5722_v36 = vmul.f32 %v19935_v16, %v21544_v38  ;;  %v19945_v2 = vadd.f32 %v5313_v5, %v19363_v35  ;;  %v19947_v44 = vpop.f32.mrf.mxu0  ;;  %v6069_v29 = vadd.f32 %v6068_v48, %v6052_v26  ;;  %v5433_v45 = vadd.f32 %v5432_v24, %v19750_v46 }
 0x5f3   :  { %21546 = vst [vmem:[#allocation102_spill] sm:$0xff] %v19947_v44  ;;  %v5434_v40 = vpop.f32.mrf.mxu1  ;;  %v5749_v58 = vadd.f32 %v5748_v4, %v19932_v30  ;;  %v21564_v44 = vld [vmem:[#allocation53_spill] sm:$0xff] }
 0x5f4   :  { %21545 = vst [vmem:[#allocation101_spill] sm:$0xff] %v19945_v2  ;;  %v5735_v39 = vadd.f32 %v5734_v21, %v5722_v36  ;;  %v6057_v9 = vmul.f32 %v5722_v36, %v19935_v16  ;;  %v19954_v56 = vmul.f32 %v19945_v2, %v21544_v38  ;;  %v19956_v19 = vpop.f32.mrf.mxu0  ;;  %v19959_v35 = vadd.f32 %v5433_v45, %v19366_v23 }
 0x5f5   :  { %21547 = vst [vmem:[#allocation103_spill] sm:$0xff] %v19956_v19  ;;  %v5436_v60 = vpop.f32.mrf.mxu1 }
 0x5f6   :  { %21548 = vst [vmem:[#allocation104_spill] sm:$0xff] %v19959_v35  ;;  %v5736_v5 = vrot.slane %v5735_v39, 4  ;;  %v19961_v48 = vadd.f32 %v6069_v29, %v6057_v9  ;;  %v5750_v46 = vadd.f32 %v5749_v58, %v19954_v56  ;;  %v19964_v26 = vpop.f32.mrf.mxu0  ;;  %v5437_v24 = vadd.f32 %v5436_v60, %v19766_v37  ;;  %v21553_v60 = vld [vmem:[#allocation59_spill] sm:$0xff] }
 0x5f7   :  { %21550 = vst [vmem:[#allocation106_spill] sm:$0xff] %v19964_v26  ;;  %v5438_v4 = vpop.f32.mrf.mxu1  ;;  %v19971_v16 = vmul.f32 %v19959_v35, %v21497_v34  ;;  %v6018_v29 = vmul.f32 %v19822_v59, %v19791_v63  ;;  %v6013_v26 = vmul.f32 %v19833_v18, %v19802_v28  ;;  %v6023_v59 = vmul.f32 %v19841_v62, %v19808_v47  ;;  %v21560_v63 = vld [vmem:[#allocation62_spill] sm:$0xff]  ;;  %v21561_v28 = vld [vmem:[#allocation67_spill] sm:$0xff]  ;;  %v21563_v47 = vld [vmem:[#allocation64_spill] sm:$0xff] }
 0x5f8   :  { %21549 = vst [vmem:[#allocation105_spill] sm:$0xff] %v19961_v48  ;;  %v5737_v21 = vadd.f32 %v5736_v5, %v5735_v39  ;;  %v19967_v36 = vpop.f32.mrf.mxu0  ;;  %v19974_v23 = vadd.f32 %v5437_v24, %v19377_v55  ;;  %v5751_v9 = vrot.slane %v5750_v46, 4  ;;  %v4231_v39 = vadd.f32 %v19247_v20, %v21553_v60  ;;  %v21554_v55 = vld [vmem:[#allocation61_spill] sm:$0xff]  ;;  %v21555_v24 = vld [vmem:[#allocation87_spill] sm:$0xff] }
 0x5f9   :  { %21551 = vst [vmem:[#allocation107_spill] sm:$0xff] %v19967_v36  ;;  %v5442_v45 = vpop.f32.mrf.mxu1  ;;  %v4241_v38 = vadd.f32 %v21555_v24, %v21554_v55  ;;  %v6014_v60 = vmul.f32 %v19971_v16, %v19959_v35  ;;  %v21559_v24 = vld [vmem:[#allocation63_spill] sm:$0xff]  ;;  %v4261_v62 = vadd.f32 %v21562_v0, %v21561_v28  ;;  %v5439_v28 = vadd.f32 %v5438_v4, %v21565_v17 }
 0x5fa   :  { %21552 = vst [vmem:[#allocation108_spill] sm:$0xff] %v19974_v23  ;;  %v5738_v58 = vrot.slane %v5737_v21, 2  ;;  %v5443_v43 = vadd.f32 %v5442_v45, %v19775_v1  ;;  %v15210_v37 = vpop.f32.mrf.mxu0  ;;  %v19983_v5 = vmul.f32 %v19974_v23, %v21499_v8  ;;  %v5752_v36 = vadd.f32 %v5751_v9, %v5750_v46  ;;  %v21556_v1 = vld [vmem:[#allocation66_spill] sm:$0xff] }
 0x5fb   :  { %v5444_v48 = vpop.f32.mrf.mxu1  ;;  %v4251_v18 = vadd.f32 %v21560_v63, %v21559_v24  ;;  %v4324_v63 = vadd.f32 %v21564_v44, %v4241_v38 }
 0x5fc   :  { %v19992_v45 = vadd.f32 %v5443_v43, %v21556_v1  ;;  %v19994_v37 = vpop.f32.mrf.mxu0  ;;  %v5739_v20 = vadd.f32 %v5738_v58, %v5737_v21  ;;  %v6019_v46 = vmul.f32 %v19983_v5, %v19974_v23  ;;  %v5753_v55 = vrot.slane %v5752_v36, 2 }
 0x5fd   :  { %21558 = vst [vmem:[#allocation61_spill] sm:$0xff] %v19994_v37  ;;  %v5446_v9 = vpop.f32.mrf.mxu1  ;;  %v4314_v43 = vadd.f32 %v21563_v47, %v4231_v39  ;;  %v6077_v1 = vadd.f32 %v6018_v29, %v6013_v26  ;;  %v6028_v21 = vmul.f32 %v19858_v49, %v19824_v6  ;;  %v21566_v26 = vld [vmem:[#allocation45_spill] sm:$0xff]  ;;  %v21567_v39 = vld [vmem:[#allocation68_spill] sm:$0xff]  ;;  %v5445_v38 = vadd.f32 %v5444_v48, %v19785_v12  ;;  %v21570_v12 = vld [vmem:[#allocation58_spill] sm:$0xff] }
 0x5fe   :  { %21557 = vst [vmem:[#allocation59_spill] sm:$0xff] %v19992_v45  ;;  %v15211_v19 = vpop.f32.mrf.mxu0  ;;  %v6092_v58 = vadd.f32 %v6019_v46, %v6014_v60  ;;  %v20009_v35 = vmul.f32 %v19992_v45, %v21502_v14  ;;  %v5447_v23 = vadd.f32 %v5446_v9, %v19797_v50  ;;  %v5754_v47 = vadd.f32 %v5753_v55, %v5752_v36  ;;  %v21569_v55 = vld [vmem:[#allocation51_spill] sm:$0xff] }
 0x5ff   :  { %v5448_v37 = vpop.f32.mrf.mxu1  ;;  %v6078_v24 = vadd.f32 %v6077_v1, %v6023_v59  ;;  %v5740_v19 = vrot.slane %v5739_v20, 1  ;;  %v5435_v29 = vadd.f32 %v5434_v40, %v21566_v26  ;;  %v6033_v50 = vmul.f32 %v19873_v10, %v19843_v25 }
 0x600   :  { %v20014_v0 = vpop.f32.mrf.mxu0  ;;  %v6024_v49 = vmul.f32 %v20009_v35, %v19992_v45  ;;  %v20020_v60 = vadd.f32 %v5447_v23, %v21567_v39  ;;  %v5755_v4 = vrot.slane %v5754_v47, 1  ;;  %v6038_v40 = vmul.f32 %v19894_v51, %v19868_v33  ;;  %v21592_v33 = vld [vmem:[#allocation69_spill] sm:$0xff] }
 0x601   :  { %v5452_v46 = vpop.f32.mrf.mxu1  ;;  %v6079_v36 = vadd.f32 %v6078_v24, %v6028_v21  ;;  %v20033_v1 = vadd.f32 %v5439_v28, %v21569_v55  ;;  %v5449_v10 = vadd.f32 %v5448_v37, %v19813_v54  ;;  %v21572_v21 = vld [vmem:[#allocation55_spill] sm:$0xff]  ;;  %v5741_v51 = vadd.f32 %v5740_v19, %v5739_v20  ;;  %v20049_v28 = vld [vmem:[%s21216_s10 + $0x278] sm:$0xff] }
 0x602   :  { %21568 = vst [vmem:[#allocation87_spill] sm:$0xff] %v20020_v60  ;;  %v5453_v17 = vadd.f32 %v5452_v46, %v19827_v31  ;;  %v15214_v44 = vpop.f32.mrf.mxu0  ;;  %v6093_v59 = vadd.f32 %v6092_v58, %v6024_v49  ;;  %v20030_v9 = vmul.f32 %v20020_v60, %v21506_v11  ;;  %v5756_v31 = vadd.f32 %v5755_v4, %v5754_v47  ;;  %v21575_v19 = vld [vmem:[#allocation56_spill] sm:$0xff] }
 0x603   :  { %v5454_v23 = vpop.f32.mrf.mxu1  ;;  %v4334_v24 = vadd.f32 %v21572_v21, %v4251_v18  ;;  %v20042_v58 = vadd.f32 %v5435_v29, %v4314_v43  ;;  %21573 = vst [vmem:[#allocation63_spill] sm:$0xff] %v20049_v28  ;;  %v6080_v54 = vadd.f32 %v6079_v36, %v6033_v50  ;;  %v20051_v37 = vadd.f32 %v5445_v38, %v4324_v63  ;;  %v21574_v18 = vld [vmem:[#allocation79_spill] sm:$0xff]  ;;  %v21576_v44 = vld [vmem:[#allocation52_spill] sm:$0xff] }
 0x604   :  { %v20037_v48 = vadd.f32 %v5453_v17, %v21570_v12  ;;  %v20039_v26 = vpop.f32.mrf.mxu0  ;;  %v6029_v49 = vmul.f32 %v20030_v9, %v20020_v60  ;;  %v5455_v20 = vadd.f32 %v5454_v23, %v21574_v18  ;;  %5866 = vmatprep.mubr.f32.mxu1 %v5756_v31  ;;  %v4344_v29 = vadd.f32 %v21575_v19, %v4261_v62  ;;  %v20065_v63 = vld [vmem:[%s21216_s10 + $0x270] sm:$0xff]  ;;  %v21578_v23 = vld [vmem:[#allocation50_spill] sm:$0xff] }
 0x605   :  { %v5456_v39 = vpop.f32.mrf.mxu1  ;;  %v6043_v46 = vmul.f32 %v19904_v13, %v19880_v3  ;;  %5867 = vmatmul.mubr.f32.vlgmr.msra.gmra.mxu1 %v5741_v51  ;;  %21577 = vst [vmem:[#allocation62_spill] sm:$0xff] %v20065_v63  ;;  %v6081_v38 = vadd.f32 %v6080_v54, %v6038_v40  ;;  %v20069_v36 = vmul.f32 %v20033_v1, %v21499_v8  ;;  %v21579_v12 = vld [vmem:[#allocation70_spill] sm:$0xff]  ;;  %v21581_v31 = vld [vmem:[#allocation84_spill] sm:$0xff] }
 0x606   :  { %21571 = vst [vmem:[#allocation66_spill] sm:$0xff] %v20037_v48  ;;  %v20055_v47 = vmul.f32 %v20037_v48, %v21515_v41  ;;  %v15215_v43 = vpop.f32.mrf.mxu0  ;;  %v6094_v17 = vadd.f32 %v6093_v59, %v6029_v49  ;;  %v5457_v4 = vadd.f32 %v5456_v39, %v21576_v44  ;;  %v20072_v62 = vadd.f32 %v5449_v10, %v21578_v23  ;;  %v20091_v10 = vld [vmem:[%s21216_s10 + $0x268] sm:$0xff]  ;;  %v20159_v3 = vld [vmem:[%s21216_s10 + $0x250] sm:$0xff] }
 0x607   :  { %v5458_v50 = vpop.f32.mrf.mxu1  ;;  %15229 = vmatpush3.msra.mxu1 %v20049_v28  ;;  %v20081_v55 = vmul.f32 %v20042_v58, %v21497_v34  ;;  %v21582_v49 = vmov 0.0   ;;  %21583 = vst [vmem:[#allocation43_spill] sm:$0xff] %v20091_v10  ;;  %v20097_v39 = vmul.f32 %v20051_v37, %v21502_v14  ;;  %v20099_v18 = vadd.f32 %v5455_v20, %v4334_v24  ;;  %v21585_v20 = vld [vmem:[#allocation65_spill] sm:$0xff]  ;;  %21591 = vst [vmem:[#allocation45_spill] sm:$0xff] %v20159_v3 }
 0x608   :  { %v6034_v13 = vmul.f32 %v20055_v47, %v20037_v48  ;;  %v20076_v59 = vpop.f32.mrf.mxu0  ;;  %v20084_v40 = vadd.f32 %v5457_v4, %v21579_v12  ;;  %v5459_v21 = vadd.f32 %v5458_v50, %v21581_v31  ;;  %15230 = vmatprep.subr.mxu1 %v21582_v49  ;;  %15260 = vmatprep.mubr.msk.f32.mxu1 %vm17462_vm2, %v21582_v49  ;;  %v21587_v31 = vld [vmem:[#allocation72_spill] sm:$0xff] }
 0x609   :  { %v5462_v51 = vpop.f32.mrf.mxu1  ;;  %15231 = vmatpush3.msra.mxu1 %v20065_v63  ;;  %v6082_v44 = vadd.f32 %v6081_v38, %v6043_v46  ;;  %v6048_v4 = vmul.f32 %v19920_v15, %v19906_v22  ;;  %v5757_v50 = vadd.f32 %v19983_v5, %v19971_v16  ;;  %v5772_v24 = vadd.f32 %v20069_v36, %v20081_v55 }
 0x60a   :  { %21580 = vst [vmem:[#allocation67_spill] sm:$0xff] %v20084_v40  ;;  %v6095_v54 = vadd.f32 %v6094_v17, %v6034_v13  ;;  %v5463_v43 = vadd.f32 %v5462_v51, %v19889_v52  ;;  %v15218_v19 = vpop.f32.mrf.mxu0  ;;  %v5704_v23 = vmul.f32 %v20084_v40, %v21526_v61  ;;  %15232 = vmatprep.subr.mxu1 %v21582_v49  ;;  %v20113_v52 = vld [vmem:[%s21216_s10 + $0x260] sm:$0xff] }
 0x60b   :  { %v5464_v12 = vpop.f32.mrf.mxu1  ;;  %21584 = vst [vmem:[#allocation64_spill] sm:$0xff] %v20113_v52  ;;  %v20119_v15 = vmul.f32 %v20072_v62, %v21506_v11  ;;  %15233 = vmatpush3.msra.mxu1 %v20091_v10  ;;  %v6053_v17 = vmul.f32 %v19932_v30, %v19922_v27  ;;  %v5758_v38 = vadd.f32 %v5757_v50, %v20009_v35 }
 0x60c   :  { %v20122_v16 = vadd.f32 %v5463_v43, %v21585_v20  ;;  %v5465_v5 = vadd.f32 %v5464_v12, %v19900_v53  ;;  %v20125_v46 = vpop.f32.mrf.mxu0  ;;  %v6039_v13 = vmul.f32 %v5704_v23, %v20084_v40  ;;  %v20133_v51 = vadd.f32 %v5459_v21, %v21587_v31  ;;  %15234 = vmatprep.subr.mxu1 %v21582_v49  ;;  %v20139_v53 = vld [vmem:[%s21216_s10 + $0x258] sm:$0xff]  ;;  %v21589_v12 = vld [vmem:[#allocation71_spill] sm:$0xff] }
 0x60d   :  { %v5466_v19 = vpop.f32.mrf.mxu1  ;;  %21588 = vst [vmem:[#allocation46_spill] sm:$0xff] %v20139_v53  ;;  %v5773_v43 = vadd.f32 %v5772_v24, %v20097_v39  ;;  %v20144_v30 = vmul.f32 %v20099_v18, %v21515_v41  ;;  %15235 = vmatpush3.msra.mxu1 %v20113_v52  ;;  %v21590_v20 = vld [vmem:[#allocation44_spill] sm:$0xff]  ;;  %v5759_v6 = vadd.f32 %v5758_v38, %v20030_v9 }
 0x60e   :  { %21586 = vst [vmem:[#allocation53_spill] sm:$0xff] %v20122_v16  ;;  %v5709_v35 = vmul.f32 %v20122_v16, %v21530_v7  ;;  %v5467_v21 = vadd.f32 %v5466_v19, %v19912_v42  ;;  %v15219_v50 = vpop.f32.mrf.mxu0  ;;  %v4271_v31 = vadd.f32 %v21590_v20, %v21589_v12  ;;  %v6096_v27 = vadd.f32 %v6095_v54, %v6039_v13 }
 0x60f   :  { %v20153_v22 = vadd.f32 %v5465_v5, %v4344_v29  ;;  %v5468_v24 = vpop.f32.mrf.mxu1  ;;  %15236 = vmatprep.subr.mxu1 %v21582_v49  ;;  %v6083_v42 = vadd.f32 %v6082_v44, %v6048_v4  ;;  %v5774_v19 = vadd.f32 %v5773_v43, %v20119_v15  ;;  %v6058_v29 = vmul.f32 %v19954_v56, %v19945_v2 }
 0x610   :  { %v6044_v50 = vmul.f32 %v5709_v35, %v20122_v16  ;;  %v20164_v12 = vadd.f32 %v5467_v21, %v21592_v33  ;;  %v20166_v9 = vpop.f32.mrf.mxu0  ;;  %15237 = vmatpush3.msra.mxu1 %v20139_v53  ;;  %v5760_v54 = vadd.f32 %v5759_v6, %v20055_v47  ;;  %v20174_v5 = vmul.f32 %v20133_v51, %v21526_v61  ;;  %v20181_v33 = vld [vmem:[%s21216_s10 + $0x248] sm:$0xff]  ;;  %v21595_v21 = vld [vmem:[#allocation57_spill] sm:$0xff] }
 0x611   :  { %v5469_v44 = vadd.f32 %v5468_v24, %v19925_v57  ;;  %v5472_v4 = vpop.f32.mrf.mxu1  ;;  %15238 = vmatprep.subr.mxu1 %v21582_v49  ;;  %21594 = vst [vmem:[#allocation51_spill] sm:$0xff] %v20181_v33  ;;  %v6084_v38 = vadd.f32 %v6083_v42, %v6053_v17  ;;  %v5775_v13 = vadd.f32 %v5774_v19, %v20144_v30  ;;  %v21596_v24 = vld [vmem:[#allocation100_spill] sm:$0xff]  ;;  %v21598_v42 = vld [vmem:[#allocation89_spill] sm:$0xff] }
 0x612   :  { %21593 = vst [vmem:[#allocation68_spill] sm:$0xff] %v20164_v12  ;;  %v6097_v56 = vadd.f32 %v6096_v27, %v6044_v50  ;;  %v5714_v6 = vmul.f32 %v20164_v12, %v21536_v32  ;;  %v15222_v47 = vpop.f32.mrf.mxu0  ;;  %15239 = vmatpush3.msra.mxu1 %v20159_v3  ;;  %v5761_v43 = vadd.f32 %v5760_v54, %v5704_v23  ;;  %v20199_v27 = vld [vmem:[%s21216_s10 + $0x240] sm:$0xff] }
 0x613   :  { %v20189_v57 = vmul.f32 %v20153_v22, %v21530_v7  ;;  %v20192_v20 = vadd.f32 %v5469_v44, %v21595_v21  ;;  %v5473_v2 = vadd.f32 %v5472_v4, %v21596_v24  ;;  %v5474_v17 = vpop.f32.mrf.mxu1  ;;  %15240 = vmatprep.subr.mxu1 %v21582_v49  ;;  %21597 = vst [vmem:[#allocation58_spill] sm:$0xff] %v20199_v27  ;;  %v21599_v50 = vld [vmem:[#allocation102_spill] sm:$0xff]  ;;  %v21600_v24 = vld [vmem:[#allocation88_spill] sm:$0xff] }
 0x614   :  { %v4354_v19 = vadd.f32 %v21598_v42, %v4271_v31  ;;  %v6049_v23 = vmul.f32 %v5714_v6, %v20164_v12  ;;  %v5475_v54 = vadd.f32 %v5474_v17, %v21599_v50  ;;  %v20204_v47 = vpop.f32.mrf.mxu0  ;;  %15241 = vmatpush3.msra.mxu1 %v20181_v33  ;;  %v6085_v44 = vadd.f32 %v6084_v38, %v6058_v29  ;;  %v20215_v31 = vld [vmem:[%s21216_s10 + $0x238] sm:$0xff]  ;;  %v21604_v38 = vld [vmem:[#allocation103_spill] sm:$0xff] }
 0x615   :  { %v5776_v4 = vadd.f32 %v5775_v13, %v20174_v5  ;;  %v5762_v21 = vadd.f32 %v5761_v43, %v5709_v35  ;;  %v20209_v16 = vadd.f32 %v5473_v2, %v21600_v24  ;;  %v5476_v25 = vpop.f32.mrf.mxu1  ;;  %15242 = vmatprep.subr.mxu1 %v21582_v49  ;;  %21602 = vst [vmem:[#allocation79_spill] sm:$0xff] %v20215_v31  ;;  %v21605_v43 = vld [vmem:[#allocation41_spill] sm:$0xff] }
 0x616   :  { %v6098_v17 = vadd.f32 %v6097_v56, %v6049_v23  ;;  %v20219_v42 = vmul.f32 %v20192_v20, %v21536_v32  ;;  %v20221_v29 = vadd.f32 %v5475_v54, %v4354_v19  ;;  %v5477_v35 = vadd.f32 %v5476_v25, %v21604_v38  ;;  %v15223_v13 = vpop.f32.mrf.mxu0  ;;  %15243 = vmatpush3.msra.mxu1 %v20199_v27  ;;  %v20232_v56 = vld [vmem:[%s21216_s10 + $0x230] sm:$0xff]  ;;  %v21607_v23 = vld [vmem:[#allocation73_spill] sm:$0xff] }
 0x617   :  { %21601 = vst [vmem:[#allocation55_spill] sm:$0xff] %v20209_v16  ;;  %v5777_v2 = vadd.f32 %v5776_v4, %v20189_v57  ;;  %v5719_v50 = vmul.f32 %v20209_v16, %v21605_v43  ;;  %v5478_v24 = vpop.f32.mrf.mxu1  ;;  %15244 = vmatprep.subr.mxu1 %v21582_v49  ;;  %21606 = vst [vmem:[#allocation52_spill] sm:$0xff] %v20232_v56  ;;  %v5763_v19 = vadd.f32 %v5762_v21, %v5714_v6  ;;  %v21609_v4 = vld [vmem:[#allocation106_spill] sm:$0xff] }
 0x618   :  { %21603 = vst [vmem:[#allocation56_spill] sm:$0xff] %v20221_v29  ;;  %v20236_v25 = vmul.f32 %v20221_v29, %v21605_v43  ;;  %v20239_v54 = vadd.f32 %v5477_v35, %v21607_v23  ;;  %v5479_v38 = vadd.f32 %v5478_v24, %v21609_v4  ;;  %v20242_v13 = vpop.f32.mrf.mxu0  ;;  %15245 = vmatpush3.msra.mxu1 %v20215_v31  ;;  %v6086_v48 = vrot.slane %v6085_v44, 4  ;;  %v20250_v6 = vld [vmem:[%s21216_s10 + $0x228] sm:$0xff]  ;;  %v21612_v4 = vld [vmem:[#allocation60_spill] sm:$0xff]  ;;  %v20263_v27 = vld [vmem:[%s21216_s10 + $0x220] sm:$0xff] }
 0x619   :  { %v6054_v12 = vmul.f32 %v5719_v50, %v20209_v16  ;;  %v14753_v40 = vpop.f32.mrf.mxu1  ;;  %15246 = vmatprep.subr.mxu1 %v21582_v49  ;;  %21610 = vst [vmem:[#allocation70_spill] sm:$0xff] %v20250_v6  ;;  %v5778_v21 = vadd.f32 %v5777_v2, %v20219_v42  ;;  %v5764_v35 = vadd.f32 %v5763_v19, %v5719_v50  ;;  %v21611_v23 = vld [vmem:[#allocation35_spill] sm:$0xff]  ;;  %21614 = vst [vmem:[#allocation65_spill] sm:$0xff] %v20263_v27 }
 0x61a   :  { %21608 = vst [vmem:[#allocation50_spill] sm:$0xff] %v20239_v54  ;;  %v5724_v24 = vmul.f32 %v20239_v54, %v21611_v23  ;;  %v20256_v60 = vadd.f32 %v5479_v38, %v21612_v4  ;;  %v15226_v45 = vpop.f32.mrf.mxu0  ;;  %15247 = vmatpush3.msra.mxu1 %v20232_v56  ;;  %v20278_v4 = vld [vmem:[%s21216_s10 + $0x218] sm:$0xff] }
 0x61b   :  { %v6099_v16 = vadd.f32 %v6098_v17, %v6054_v12  ;;  %v14754_v31 = vpop.f32.mrf.mxu1  ;;  %15248 = vmatprep.subr.mxu1 %v21582_v49  ;;  %v5779_v2 = vadd.f32 %v5778_v21, %v20236_v25  ;;  %v6087_v17 = vadd.f32 %v6086_v48, %v6085_v44  ;;  %21615 = vst [vmem:[#allocation72_spill] sm:$0xff] %v20278_v4  ;;  %v20288_v48 = vld [vmem:[%s21216_s10 + $0x210] sm:$0xff] }
 0x61c   :  { %21613 = vst [vmem:[#allocation84_spill] sm:$0xff] %v20256_v60  ;;  %v5765_v50 = vadd.f32 %v5764_v35, %v5724_v24  ;;  %v6059_v19 = vmul.f32 %v5724_v24, %v20239_v54  ;;  %v20269_v38 = vmul.f32 %v20256_v60, %v21611_v23  ;;  %v20271_v45 = vpop.f32.mrf.mxu0  ;;  %15249 = vmatpush3.msra.mxu1 %v20250_v6  ;;  %21617 = vst [vmem:[#allocation44_spill] sm:$0xff] %v20288_v48 }
 0x61d   :  { %v14756_v12 = vpop.f32.mrf.mxu1  ;;  %15250 = vmatprep.subr.mxu1 %v21582_v49  ;;  %v6015_v23 = vmul.f32 %v20081_v55, %v20042_v58  ;;  %v17100_v55 = vld [vmem:[%s21216_s10 + $0x78] sm:$0xff] }
 0x61e   :  { %v5766_v21 = vrot.slane %v5765_v50, 4  ;;  %v20280_v35 = vadd.f32 %v6099_v16, %v6059_v19  ;;  %v5780_v24 = vadd.f32 %v5779_v2, %v20269_v38  ;;  %v15227_v54 = vpop.f32.mrf.mxu0  ;;  %15251 = vmatpush3.msra.mxu1 %v20263_v27  ;;  %v6088_v16 = vrot.slane %v6087_v17, 2 }
 0x61f   :  { %v14757_v56 = vpop.f32.mrf.mxu1  ;;  %15252 = vmatprep.subr.mxu1 %v21582_v49  ;;  %v20295_v54 = vld [vmem:[%s21216_s10 + $0x208] sm:$0xff] }
 0x620   :  { %21616 = vst [vmem:[#allocation71_spill] sm:$0xff] %v20280_v35  ;;  %v5767_v44 = vadd.f32 %v5766_v21, %v5765_v50  ;;  %15253 = vmatpush3.msra.mxu1 %v20278_v4  ;;  %v5781_v33 = vrot.slane %v5780_v24, 4  ;;  %21618 = vst [vmem:[#allocation69_spill] sm:$0xff] %v20295_v54  ;;  %v20302_v50 = vld [vmem:[%s21216_s10 + $0x200] sm:$0xff]  ;;  %v6089_v3 = vadd.f32 %v6088_v16, %v6087_v17 }
 0x621   :  { %v14759_v6 = vpop.f32.mrf.mxu1  ;;  %15254 = vmatprep.subr.mxu1 %v21582_v49  ;;  %21619 = vst [vmem:[#allocation57_spill] sm:$0xff] %v20302_v50  ;;  %v14758_v52 = vadd.f32 %v14757_v56, %v14756_v12  ;;  %v6020_v17 = vmul.f32 %v20069_v36, %v20033_v1  ;;  %v6025_v56 = vmul.f32 %v20097_v39, %v20051_v37 }
 0x622   :  { %v5768_v2 = vrot.slane %v5767_v44, 2  ;;  %15255 = vmatpush3.msra.mxu1 %v20288_v48  ;;  %v5782_v27 = vadd.f32 %v5781_v33, %v5780_v24  ;;  %v17099_v33 = vld [vmem:[%s21216_s10 + $0x1f8] sm:$0xff] }
 0x623   :  { %v14760_v19 = vpop.f32.mrf.mxu1  ;;  %15256 = vmatprep.subr.mxu1 %v21582_v49 }
 0x624   :  { %v5769_v21 = vadd.f32 %v5768_v2, %v5767_v44  ;;  %15257 = vmatpush3.msra.mxu1 %v20295_v54  ;;  %v5783_v35 = vrot.slane %v5782_v27, 2  ;;  %v6090_v2 = vrot.slane %v6089_v3, 1  ;;  %v14755_v54 = vadd.f32 %v14754_v31, %v14753_v40  ;;  %v21621_v40 = vld [vmem:[#allocation107_spill] sm:$0xff] }
 0x625   :  { %v14762_v4 = vpop.f32.mrf.mxu1  ;;  %15258 = vmatprep.subr.mxu1 %v21582_v49  ;;  %v14761_v63 = vadd.f32 %v14760_v19, %v14759_v6  ;;  %v21620_v49 = vld [vmem:[#allocation61_spill] sm:$0xff] }
 0x626   :  { %15259 = vmatpush3.msra.mxu1 %v20302_v50  ;;  %v5784_v53 = vadd.f32 %v5783_v35, %v5782_v27  ;;  %v5770_v24 = vrot.slane %v5769_v21, 1  ;;  %v5592_v27 = vadd.f32 %v14758_v52, %v21620_v49  ;;  %v5589_v31 = vadd.f32 %v14755_v54, %v21621_v40 }
 0x627   :  { %v14763_v48 = vpop.f32.mrf.mxu1  ;;  %14914 = vmatprep.subr.mxu1 %v17099_v33  ;;  %v6091_v33 = vadd.f32 %v6090_v2, %v6089_v3  ;;  %v5597_v6 = vadd.f32 %v14761_v63, %v20014_v0  ;;  %v6030_v49 = vmul.f32 %v20119_v15, %v20072_v62  ;;  %v17101_v0 = vld [vmem:[%s21216_s10 + $0xf0] sm:$0xff]  ;;  %v6035_v15 = vmul.f32 %v20144_v30, %v20099_v18 }
 0x628   :  { %v5785_v44 = vrot.slane %v5784_v53, 1  ;;  %v5771_v50 = vadd.f32 %v5770_v24, %v5769_v21  ;;  %v14764_v35 = vadd.f32 %v14763_v48, %v14762_v4  ;;  %v21624_v48 = vld [vmem:[#allocation74_spill] sm:$0xff]  ;;  %v6040_v24 = vmul.f32 %v20174_v5, %v20133_v51 }
 0x629   :  { %v14765_v10 = vpop.f32.mrf.mxu1  ;;  %v20337_v54 = vadd.f32 %v5589_v31, %v21624_v48  ;;  %v17103_v21 = vld [vmem:[%s21216_s10 + $0xe8] sm:$0xff]  ;;  %v6055_v48 = vmul.f32 %v20236_v25, %v20221_v29 }
 0x62a   :  { %v5786_v28 = vadd.f32 %v5785_v44, %v5784_v53  ;;  %v6107_v53 = vadd.f32 %v6020_v17, %v6015_v23  ;;  %v5600_v3 = vadd.f32 %v14764_v35, %v20039_v26  ;;  %v17102_v23 = vld [vmem:[%s21216_s10 + $0x70] sm:$0xff]  ;;  %v21626_v26 = vld [vmem:[#allocation90_spill] sm:$0xff] }
 0x62b   :  { %v14766_v16 = vpop.f32.mrf.mxu1  ;;  %21625 = vst [vmem:[#allocation89_spill] sm:$0xff] %v20337_v54  ;;  %v20340_v19 = vadd.f32 %v5597_v6, %v21626_v26  ;;  %v17104_v44 = vld [vmem:[%s21216_s10 + $0x68] sm:$0xff]  ;;  %v17105_v35 = vld [vmem:[%s21216_s10 + $0xe0] sm:$0xff]  ;;  %v5681_v31 = vmul.f32 %v20337_v54, %v21497_v34  ;;  %v21630_v6 = vld [vmem:[#allocation92_spill] sm:$0xff] }
 0x62c   :  { %5936 = vmatprep.mubr.f32.mxu0 %v5786_v28  ;;  %v14767_v36 = vadd.f32 %v14766_v16, %v14765_v10  ;;  %v21622_v28 = vld [vmem:[#allocation75_spill] sm:$0xff]  ;;  %v6108_v10 = vadd.f32 %v6107_v53, %v6025_v56 }
 0x62d   :  { %v14768_v12 = vpop.f32.mrf.mxu1  ;;  %5937 = vmatmul.mubr.f32.vlgmr.msra.gmra.mxu0 %v5771_v50  ;;  %v20325_v52 = vadd.f32 %v5592_v27, %v21622_v28  ;;  %21627 = vst [vmem:[#allocation102_spill] sm:$0xff] %v20340_v19  ;;  %v6050_v28 = vmul.f32 %v20219_v42, %v20192_v20  ;;  %v17110_v26 = vld [vmem:[%s21216_s10 + $0x50] sm:$0xff]  ;;  %v17111_v25 = vld [vmem:[%s21216_s10 + $0xc8] sm:$0xff] }
 0x62e   :  { %14880 = vmatpush3.msra.mxu0 %v17100_v55  ;;  %6201 = vmatprep.mubr.f32.mxu0 %v6091_v33  ;;  %v5605_v50 = vadd.f32 %v14767_v36, %v20076_v59  ;;  %v6109_v30 = vadd.f32 %v6108_v10, %v6030_v49  ;;  %v21628_v59 = vld [vmem:[#allocation91_spill] sm:$0xff]  ;;  %v17106_v33 = vld [vmem:[%s21216_s10 + $0x60] sm:$0xff] }
 0x62f   :  { %v14769_v39 = vpop.f32.mrf.mxu1  ;;  %21623 = vst [vmem:[#allocation100_spill] sm:$0xff] %v20325_v52  ;;  %14881 = vmatprep.subr.mxu0 %v17101_v0  ;;  %v20353_v17 = vmul.f32 %v20325_v52, %v21499_v8  ;;  %v20356_v16 = vadd.f32 %v5600_v3, %v21628_v59  ;;  %v21632_v49 = vld [vmem:[#allocation105_spill] sm:$0xff]  ;;  %v21633_v10 = vld [vmem:[#allocation78_spill] sm:$0xff] }
 0x630   :  { %v14770_v63 = vadd.f32 %v14769_v39, %v14768_v12  ;;  %14882 = vmatpush3.msra.mxu0 %v17102_v23  ;;  %v6110_v56 = vadd.f32 %v6109_v30, %v6035_v15  ;;  %v6045_v12 = vmul.f32 %v20189_v57, %v20153_v22  ;;  %v20374_v36 = vadd.f32 %v5605_v50, %v21630_v6  ;;  %v17107_v57 = vld [vmem:[%s21216_s10 + $0xd8] sm:$0xff]  ;;  %v17109_v23 = vld [vmem:[%s21216_s10 + $0xd0] sm:$0xff]  ;;  %v17113_v6 = vld [vmem:[%s21216_s10 + $0xc0] sm:$0xff] }
 0x631   :  { %v14771_v4 = vpop.f32.mrf.mxu1  ;;  %14883 = vmatprep.subr.mxu0 %v17103_v21  ;;  %21629 = vst [vmem:[#allocation88_spill] sm:$0xff] %v20356_v16  ;;  %v6071_v55 = vrot.slane %v21632_v49, 4  ;;  %v17108_v3 = vld [vmem:[%s21216_s10 + $0x58] sm:$0xff] }
 0x632   :  { %14884 = vmatpush3.msra.mxu0 %v17104_v44  ;;  %v5608_v27 = vadd.f32 %v14770_v63, %v20125_v46  ;;  %v20371_v46 = vmul.f32 %v20340_v19, %v21502_v14  ;;  %21631 = vst [vmem:[#allocation103_spill] sm:$0xff] %v20374_v36  ;;  %v6111_v39 = vadd.f32 %v6110_v56, %v6040_v24  ;;  %v21635_v24 = vld [vmem:[#allocation93_spill] sm:$0xff] }
 0x633   :  { %v14772_v2 = vpop.f32.mrf.mxu1  ;;  %14885 = vmatprep.subr.mxu0 %v17105_v35  ;;  %v5787_v63 = vadd.f32 %v20353_v17, %v5681_v31  ;;  %v5701_v30 = vmul.f32 %v20374_v36, %v21515_v41  ;;  %v6072_v59 = vadd.f32 %v6071_v55, %v21632_v49  ;;  %v6060_v35 = vmul.f32 %v20269_v38, %v20256_v60 }
 0x634   :  { %v14773_v5 = vadd.f32 %v14772_v2, %v14771_v4  ;;  %14886 = vmatpush3.msra.mxu0 %v17106_v33  ;;  %v20392_v15 = vadd.f32 %v5608_v27, %v21633_v10  ;;  %v6112_v4 = vadd.f32 %v6111_v39, %v6045_v12  ;;  %v21637_v33 = vld [vmem:[#allocation80_spill] sm:$0xff]  ;;  %v6021_v10 = vmul.f32 %v20353_v17, %v20325_v52 }
 0x635   :  { %v14774_v40 = vpop.f32.mrf.mxu1  ;;  %14887 = vmatprep.subr.mxu0 %v17107_v57  ;;  %v5788_v21 = vadd.f32 %v5787_v63, %v20371_v46  ;;  %v17114_v57 = vld [vmem:[%s21216_s10 + $0x40] sm:$0xff]  ;;  %v6016_v17 = vmul.f32 %v5681_v31, %v20337_v54 }
 0x636   :  { %v5613_v53 = vadd.f32 %v14773_v5, %v20166_v9  ;;  %14888 = vmatpush3.msra.mxu0 %v17108_v3  ;;  %v20389_v9 = vmul.f32 %v20356_v16, %v21506_v11  ;;  %21634 = vst [vmem:[#allocation73_spill] sm:$0xff] %v20392_v15  ;;  %v6113_v27 = vadd.f32 %v6112_v4, %v6050_v28  ;;  %v17112_v5 = vld [vmem:[%s21216_s10 + $0x48] sm:$0xff]  ;;  %v17115_v3 = vld [vmem:[%s21216_s10 + $0xb8] sm:$0xff] }
 0x637   :  { %v14775_v0 = vpop.f32.mrf.mxu1  ;;  %14889 = vmatprep.subr.mxu0 %v17109_v23  ;;  %v17116_v23 = vld [vmem:[%s21216_s10 + $0x38] sm:$0xff] }
 0x638   :  { %v14776_v42 = vadd.f32 %v14775_v0, %v14774_v40  ;;  %14890 = vmatpush3.msra.mxu0 %v17110_v26  ;;  %v20406_v44 = vadd.f32 %v5613_v53, %v21635_v24  ;;  %v5789_v12 = vadd.f32 %v5788_v21, %v20389_v9  ;;  %v6114_v53 = vadd.f32 %v6113_v27, %v6055_v48  ;;  %v21639_v48 = vld [vmem:[#allocation82_spill] sm:$0xff]  ;;  %v17118_v24 = vld [vmem:[%s21216_s10 + $0x30] sm:$0xff] }
 0x639   :  { %v14777_v50 = vpop.f32.mrf.mxu1  ;;  %14891 = vmatprep.subr.mxu0 %v17111_v25  ;;  %v6073_v0 = vrot.slane %v6072_v59, 2 }
 0x63a   :  { %21636 = vst [vmem:[#allocation106_spill] sm:$0xff] %v20406_v44  ;;  %v5616_v2 = vadd.f32 %v14776_v42, %v20204_v47  ;;  %14892 = vmatpush3.msra.mxu0 %v17112_v5  ;;  %v5706_v47 = vmul.f32 %v20392_v15, %v21526_v61  ;;  %v5790_v55 = vadd.f32 %v5789_v12, %v5701_v30  ;;  %v17119_v5 = vld [vmem:[%s21216_s10 + $0xa8] sm:$0xff] }
 0x63b   :  { %v14778_v56 = vpop.f32.mrf.mxu1  ;;  %14893 = vmatprep.subr.mxu0 %v17113_v6  ;;  %v5711_v39 = vmul.f32 %v20406_v44, %v21530_v7  ;;  %v6115_v63 = vadd.f32 %v6114_v53, %v6060_v35  ;;  %v6074_v31 = vadd.f32 %v6073_v0, %v6072_v59  ;;  %v17122_v59 = vld [vmem:[%s21216_s10 + $0x20] sm:$0xff]  ;;  %v17124_v0 = vld [vmem:[%s21216_s10 + $0x18] sm:$0xff] }
 0x63c   :  { %v20422_v40 = vadd.f32 %v5616_v2, %v21637_v33  ;;  %v14779_v38 = vadd.f32 %v14778_v56, %v14777_v50  ;;  %14894 = vmatpush3.msra.mxu0 %v17114_v57  ;;  %v5791_v4 = vadd.f32 %v5790_v55, %v5706_v47  ;;  %v17117_v50 = vld [vmem:[%s21216_s10 + $0xb0] sm:$0xff]  ;;  %v6026_v2 = vmul.f32 %v20371_v46, %v20340_v19  ;;  %v17120_v56 = vld [vmem:[%s21216_s10 + $0x28] sm:$0xff]  ;;  %v2003_v19 = vld [vmem:[#allocation11] sm:$0x1] }
 0x63d   :  { %v14780_v49 = vpop.f32.mrf.mxu1  ;;  %14895 = vmatprep.subr.mxu0 %v17115_v3  ;;  %v6116_v12 = vrot.slane %v6115_v63, 4  ;;  %v6122_v33 = vadd.f32 %v6021_v10, %v6016_v17  ;;  %v6031_v46 = vmul.f32 %v20389_v9, %v20356_v16  ;;  %v17123_v3 = vld [vmem:[%s21216_s10 + $0x98] sm:$0xff]  ;;  %v6046_v17 = vmul.f32 %v5711_v39, %v20406_v44 }
 0x63e   :  { %21638 = vst [vmem:[#allocation60_spill] sm:$0xff] %v20422_v40  ;;  %v5621_v28 = vadd.f32 %v14779_v38, %v20242_v13  ;;  %14896 = vmatpush3.msra.mxu0 %v17116_v23  ;;  %v5716_v13 = vmul.f32 %v20422_v40, %v21536_v32  ;;  %v5792_v25 = vadd.f32 %v5791_v4, %v5711_v39  ;;  %v21641_v38 = vld [vmem:[#allocation83_spill] sm:$0xff]  ;;  %v17129_v39 = vld [vmem:[%s21216_s10 + $0x80] sm:$0xff] }
 0x63f   :  { %v14781_v42 = vpop.f32.mrf.mxu1  ;;  %14897 = vmatprep.subr.mxu0 %v17117_v50  ;;  %v6123_v57 = vadd.f32 %v6122_v33, %v6026_v2  ;;  %v6117_v10 = vadd.f32 %v6116_v12, %v6115_v63  ;;  %v17126_v50 = vld [vmem:[%s21216_s10 + $0x10] sm:$0xff]  ;;  %v17128_v63 = vld [vmem:[%s21216_s10 + $0x8] sm:$0xff]  ;;  %v17130_v12 = vld [vmem:[%s21216_s10] sm:$0xff] }
 0x640   :  { %v20444_v26 = vadd.f32 %v5621_v28, %v21639_v48  ;;  %v14782_v21 = vadd.f32 %v14781_v42, %v14780_v49  ;;  %14898 = vmatpush3.msra.mxu0 %v17118_v24  ;;  %v5793_v6 = vadd.f32 %v5792_v25, %v5716_v13  ;;  %v6036_v49 = vmul.f32 %v5701_v30, %v20374_v36  ;;  %v21643_v28 = vld [vmem:[#allocation35_spill] sm:$0xff] }
 0x641   :  { %14899 = vmatprep.subr.mxu0 %v17119_v5  ;;  %v6124_v23 = vadd.f32 %v6123_v57, %v6031_v46  ;;  %v6041_v42 = vmul.f32 %v5706_v47, %v20392_v15  ;;  %v17125_v30 = vld [vmem:[%s21216_s10 + $0x90] sm:$0xff]  ;;  %v6075_v48 = vrot.slane %v6074_v31, 1  ;;  %v17127_v47 = vld [vmem:[%s21216_s10 + $0x88] sm:$0xff]  ;;  %v6118_v2 = vrot.slane %v6117_v10, 2 }
 0x642   :  { %21640 = vst [vmem:[#allocation61_spill] sm:$0xff] %v20444_v26  ;;  %v5721_v27 = vmul.f32 %v20444_v26, %v21605_v43  ;;  %v5624_v35 = vadd.f32 %v14782_v21, %v20271_v45  ;;  %14900 = vmatpush3.msra.mxu0 %v17120_v56  ;;  %v17121_v45 = vld [vmem:[%s21216_s10 + $0xa0] sm:$0xff] }
 0x643   :  { %14901 = vmatprep.subr.mxu0 %v17121_v45  ;;  %v6125_v21 = vadd.f32 %v6124_v23, %v6036_v49  ;;  %v6076_v56 = vadd.f32 %v6075_v48, %v6074_v31  ;;  %v6119_v45 = vadd.f32 %v6118_v2, %v6117_v10  ;;  %v21646_v49 = vld [vmem:[#allocation62_spill] sm:$0xff] }
 0x644   :  { %v20467_v53 = vadd.f32 %v5624_v35, %v21641_v38  ;;  %14902 = vmatpush3.msra.mxu0 %v17122_v59  ;;  %v5794_v55 = vadd.f32 %v5793_v6, %v5721_v27  ;;  %v6051_v35 = vmul.f32 %v5716_v13, %v20422_v40  ;;  %v6056_v46 = vmul.f32 %v5721_v27, %v20444_v26  ;;  %v21645_v13 = vld [vmem:[#allocation63_spill] sm:$0xff] }
 0x645   :  { %14903 = vmatprep.subr.mxu0 %v17123_v3  ;;  %v6126_v25 = vadd.f32 %v6125_v21, %v6041_v42  ;;  %v21644_v38 = vmov 0.0   ;;  %v21647_v3 = vld [vmem:[#allocation43_spill] sm:$0xff]  ;;  %v21648_v42 = vld [vmem:[#allocation64_spill] sm:$0xff]  ;;  %v21650_v21 = vld [vmem:[#allocation45_spill] sm:$0xff] }
 0x646   :  { %21642 = vst [vmem:[#allocation107_spill] sm:$0xff] %v20467_v53  ;;  %v5726_v9 = vmul.f32 %v20467_v53, %v21643_v28  ;;  %14904 = vmatpush3.msra.mxu0 %v17124_v0  ;;  %v6120_v0 = vrot.slane %v6119_v45, 1  ;;  %v17135_v2 = vld [vmem:[%s21216_s10 + $0x168] sm:$0xff] }
 0x647   :  { %14905 = vmatprep.subr.mxu0 %v17125_v30  ;;  %v6127_v33 = vadd.f32 %v6126_v25, %v6046_v17  ;;  %v17133_v17 = vld [vmem:[%s21216_s10 + $0x170] sm:$0xff]  ;;  %v17136_v25 = vld [vmem:[%s21216_s10 + $0x1e0] sm:$0xff] }
 0x648   :  { %v5795_v4 = vadd.f32 %v5794_v55, %v5726_v9  ;;  %14906 = vmatpush3.msra.mxu0 %v17126_v50  ;;  %v6061_v31 = vmul.f32 %v5726_v9, %v20467_v53  ;;  %v21649_v9 = vld [vmem:[#allocation46_spill] sm:$0xff]  ;;  %v6121_v30 = vadd.f32 %v6120_v0, %v6119_v45  ;;  %v17132_v50 = vld [vmem:[%s21216_s10 + $0x1f0] sm:$0xff]  ;;  %v21657_v0 = vld [vmem:[#allocation65_spill] sm:$0xff] }
 0x649   :  { %14907 = vmatprep.subr.mxu0 %v17127_v47  ;;  %v6128_v59 = vadd.f32 %v6127_v33, %v6051_v35  ;;  %v21651_v47 = vld [vmem:[#allocation51_spill] sm:$0xff]  ;;  %v21652_v35 = vld [vmem:[#allocation58_spill] sm:$0xff]  ;;  %v17139_v33 = vld [vmem:[%s21216_s10 + $0x158] sm:$0xff] }
 0x64a   :  { %v5796_v24 = vrot.slane %v5795_v4, 4  ;;  %14908 = vmatpush3.msra.mxu0 %v17128_v63  ;;  %v21655_v45 = vld [vmem:[#allocation52_spill] sm:$0xff] }
 0x64b   :  { %14909 = vmatprep.subr.mxu0 %v17129_v39  ;;  %v6129_v55 = vadd.f32 %v6128_v59, %v6056_v46  ;;  %v17138_v39 = vld [vmem:[%s21216_s10 + $0x1d8] sm:$0xff]  ;;  %v21654_v46 = vld [vmem:[#allocation71_spill] sm:$0xff] }
 0x64c   :  { %v5797_v5 = vadd.f32 %v5796_v24, %v5795_v4  ;;  %14910 = vmatpush3.msra.mxu0 %v17130_v12  ;;  %v17131_v4 = vld [vmem:[%s21216_s10 + $0x178] sm:$0xff]  ;;  %v17134_v24 = vld [vmem:[%s21216_s10 + $0x1e8] sm:$0xff]  ;;  %v17141_v59 = vld [vmem:[%s21216_s10 + $0x150] sm:$0xff] }
 0x64d   :  { %6202 = vmatmul.mubr.f32.vlgmr.msra.gmra.mxu0 %v6076_v56  ;;  %15263 = vmatprep.subr.mxu0 %v21644_v38  ;;  %v6130_v23 = vadd.f32 %v6129_v55, %v6061_v31  ;;  %v21653_v56 = vld [vmem:[#allocation79_spill] sm:$0xff] }
 0x64e   :  { %v5798_v6 = vrot.slane %v5797_v5, 2  ;;  %15264 = vmatpush3.msra.mxu0 %v21645_v13  ;;  %15295 = vmatprep.mubr.msk.f32.mxu0 %vm17462_vm2, %v21644_v38  ;;  %v17140_v13 = vld [vmem:[%s21216_s10 + $0x1d0] sm:$0xff]  ;;  %v17142_v31 = vld [vmem:[%s21216_s10 + $0x1c8] sm:$0xff] }
 0x64f   :  { %15265 = vmatprep.subr.mxu0 %v21644_v38  ;;  %v6131_v48 = vrot.slane %v6130_v23, 4 }
 0x650   :  { %v5799_v57 = vadd.f32 %v5798_v6, %v5797_v5  ;;  %15266 = vmatpush3.msra.mxu0 %v21646_v49  ;;  %v17137_v5 = vld [vmem:[%s21216_s10 + $0x160] sm:$0xff]  ;;  %v6101_v6 = vrot.slane %v21654_v46, 4  ;;  %v17143_v49 = vld [vmem:[%s21216_s10 + $0x148] sm:$0xff] }
 0x651   :  { %15267 = vmatprep.subr.mxu0 %v21644_v38  ;;  %v6132_v63 = vadd.f32 %v6131_v48, %v6130_v23  ;;  %v17145_v23 = vld [vmem:[%s21216_s10 + $0x140] sm:$0xff]  ;;  %v17148_v48 = vld [vmem:[%s21216_s10 + $0x1b0] sm:$0xff] }
 0x652   :  { %v5800_v27 = vrot.slane %v5799_v57, 1  ;;  %15268 = vmatpush3.msra.mxu0 %v21647_v3  ;;  %v17144_v3 = vld [vmem:[%s21216_s10 + $0x1c0] sm:$0xff] }
 0x653   :  { %15269 = vmatprep.subr.mxu0 %v21644_v38  ;;  %v6133_v12 = vrot.slane %v6132_v63, 2 }
 0x654   :  { %v5801_v10 = vadd.f32 %v5800_v27, %v5799_v57  ;;  %15270 = vmatpush3.msra.mxu0 %v21648_v42  ;;  %v21656_v57 = vld [vmem:[#allocation70_spill] sm:$0xff]  ;;  %v6102_v27 = vadd.f32 %v6101_v6, %v21654_v46  ;;  %v21658_v42 = vld [vmem:[#allocation72_spill] sm:$0xff] }
 0x655   :  { %15271 = vmatprep.subr.mxu0 %v21644_v38  ;;  %v6134_v55 = vadd.f32 %v6133_v12, %v6132_v63  ;;  %v17156_v12 = vld [vmem:[%s21216_s10 + $0x190] sm:$0xff]  ;;  %v17158_v6 = vld [vmem:[%s21216_s10 + $0x188] sm:$0xff] }
 0x656   :  { %15261 = vmatmul.mubr.f32.vlgmr.msra.gmra.mxu1 %v5801_v10  ;;  %15272 = vmatpush3.msra.mxu0 %v21649_v9  ;;  %v17146_v10 = vld [vmem:[%s21216_s10 + $0x1b8] sm:$0xff]  ;;  %v17157_v46 = vld [vmem:[%s21216_s10 + $0x110] sm:$0xff] }
 0x657   :  { %14915 = vmatpush3.msra.mxu1 %v17131_v4  ;;  %15273 = vmatprep.subr.mxu0 %v21644_v38  ;;  %v17147_v9 = vld [vmem:[%s21216_s10 + $0x138] sm:$0xff]  ;;  %v6135_v4 = vrot.slane %v6134_v55, 1 }
 0x658   :  { %14916 = vmatprep.subr.mxu1 %v17132_v50  ;;  %6271 = vmatprep.mubr.f32.mxu1 %v6121_v30  ;;  %v6103_v30 = vrot.slane %v6102_v27, 2  ;;  %v21659_v50 = vld [vmem:[#allocation44_spill] sm:$0xff] }
 0x659   :  { %15274 = vmatpush3.msra.mxu0 %v21650_v21  ;;  %14917 = vmatpush3.msra.mxu1 %v17133_v17  ;;  %v17149_v21 = vld [vmem:[%s21216_s10 + $0x130] sm:$0xff]  ;;  %v17150_v17 = vld [vmem:[%s21216_s10 + $0x1a8] sm:$0xff]  ;;  %v6136_v63 = vadd.f32 %v6135_v4, %v6134_v55  ;;  %v20668_v4 = vld [vmem:[#allocation14 + $0xc0] sm:$0xff] }
 0x65a   :  { %15275 = vmatprep.subr.mxu0 %v21644_v38  ;;  %14918 = vmatprep.subr.mxu1 %v17134_v24  ;;  %v21660_v24 = vld [vmem:[#allocation69_spill] sm:$0xff] }
 0x65b   :  { %15276 = vmatpush3.msra.mxu0 %v21651_v47  ;;  %14919 = vmatpush3.msra.mxu1 %v17135_v2  ;;  %v17151_v47 = vld [vmem:[%s21216_s10 + $0x128] sm:$0xff]  ;;  %v6104_v2 = vadd.f32 %v6103_v30, %v6102_v27  ;;  %v20644_v55 = vld [vmem:[#allocation14 + $0x138] sm:$0xff]  ;;  %v20672_v30 = vld [vmem:[#allocation14 + $0xa0] sm:$0xff] }
 0x65c   :  { %15277 = vmatprep.subr.mxu0 %v21644_v38  ;;  %14920 = vmatprep.subr.mxu1 %v17136_v25  ;;  %v17152_v25 = vld [vmem:[%s21216_s10 + $0x1a0] sm:$0xff]  ;;  %v20648_v27 = vld [vmem:[#allocation14 + $0xf8] sm:$0xff] }
 0x65d   :  { %15278 = vmatpush3.msra.mxu0 %v21652_v35  ;;  %14921 = vmatpush3.msra.mxu1 %v17137_v5  ;;  %v21661_v35 = vld [vmem:[#allocation57_spill] sm:$0xff] }
 0x65e   :  { %15279 = vmatprep.subr.mxu0 %v21644_v38  ;;  %14922 = vmatprep.subr.mxu1 %v17138_v39  ;;  %v17153_v5 = vld [vmem:[%s21216_s10 + $0x120] sm:$0xff]  ;;  %v17154_v39 = vld [vmem:[%s21216_s10 + $0x198] sm:$0xff] }
 0x65f   :  { %15280 = vmatpush3.msra.mxu0 %v21653_v56  ;;  %14923 = vmatpush3.msra.mxu1 %v17139_v33  ;;  %v17155_v56 = vld [vmem:[%s21216_s10 + $0x118] sm:$0xff]  ;;  %v6105_v33 = vrot.slane %v6104_v2, 1 }
 0x660   :  { %15281 = vmatprep.subr.mxu0 %v21644_v38  ;;  %14924 = vmatprep.subr.mxu1 %v17140_v13  ;;  %v17159_v13 = vld [vmem:[%s21216_s10 + $0x108] sm:$0xff] }
 0x661   :  { %15282 = vmatpush3.msra.mxu0 %v21655_v45  ;;  %14925 = vmatpush3.msra.mxu1 %v17141_v59  ;;  %v17160_v45 = vld [vmem:[%s21216_s10 + $0x180] sm:$0xff]  ;;  %v6106_v59 = vadd.f32 %v6105_v33, %v6104_v2 }
 0x662   :  { %15283 = vmatprep.subr.mxu0 %v21644_v38  ;;  %14926 = vmatprep.subr.mxu1 %v17142_v31  ;;  %v17161_v31 = vld [vmem:[%s21216_s10 + $0x100] sm:$0xff] }
 0x663   :  { %15284 = vmatpush3.msra.mxu0 %v21656_v57  ;;  %14927 = vmatpush3.msra.mxu1 %v17143_v49  ;;  %v20640_v57 = vld [vmem:[#allocation14 + $0x120] sm:$0xff]  ;;  %v20642_v49 = vld [vmem:[#allocation14 + $0x118] sm:$0xff]  ;;  %v20698_v2 = vld [vmem:[#allocation14 + $0x48] sm:$0xff] }
 0x664   :  { %15285 = vmatprep.subr.mxu0 %v21644_v38  ;;  %14928 = vmatprep.subr.mxu1 %v17144_v3  ;;  %v20650_v3 = vld [vmem:[#allocation14 + $0xf0] sm:$0xff] }
 0x665   :  { %15286 = vmatpush3.msra.mxu0 %v21657_v0  ;;  %14929 = vmatpush3.msra.mxu1 %v17145_v23  ;;  %v20652_v0 = vld [vmem:[#allocation14 + $0x110] sm:$0xff] }
 0x666   :  { %15287 = vmatprep.subr.mxu0 %v21644_v38  ;;  %14930 = vmatprep.subr.mxu1 %v17146_v10  ;;  %v20656_v23 = vld [vmem:[#allocation14 + $0xd0] sm:$0xff]  ;;  %v20658_v10 = vld [vmem:[#allocation14 + $0xe8] sm:$0xff] }
 0x667   :  { %15288 = vmatpush3.msra.mxu0 %v21658_v42  ;;  %14931 = vmatpush3.msra.mxu1 %v17147_v9  ;;  %v20662_v42 = vld [vmem:[#allocation14 + $0xc8] sm:$0xff] }
 0x668   :  { %15289 = vmatprep.subr.mxu0 %v21644_v38  ;;  %14932 = vmatprep.subr.mxu1 %v17148_v48  ;;  %v20666_v9 = vld [vmem:[#allocation14 + $0xa8] sm:$0xff]  ;;  %v20676_v48 = vld [vmem:[#allocation14 + $0x80] sm:$0xff] }
 0x669   :  { %15290 = vmatpush3.msra.mxu0 %v21659_v50  ;;  %14933 = vmatpush3.msra.mxu1 %v17149_v21  ;;  %v20678_v50 = vld [vmem:[#allocation14 + $0x98] sm:$0xff] }
 0x66a   :  { %15291 = vmatprep.subr.mxu0 %v21644_v38  ;;  %14934 = vmatprep.subr.mxu1 %v17150_v17  ;;  %v20682_v21 = vld [vmem:[#allocation14 + $0x78] sm:$0xff] }
 0x66b   :  { %15292 = vmatpush3.msra.mxu0 %v21660_v24  ;;  %14935 = vmatpush3.msra.mxu1 %v17151_v47  ;;  %v20686_v17 = vld [vmem:[#allocation14 + $0x58] sm:$0xff]  ;;  %v20688_v24 = vld [vmem:[#allocation14 + $0x70] sm:$0xff] }
 0x66c   :  { %15293 = vmatprep.subr.mxu0 %v21644_v38  ;;  %14936 = vmatprep.subr.mxu1 %v17152_v25  ;;  %v20692_v47 = vld [vmem:[#allocation14 + $0x50] sm:$0xff]  ;;  %v20702_v25 = vld [vmem:[#allocation14 + $0x28] sm:$0xff] }
 0x66d   :  { %15294 = vmatpush3.msra.mxu0 %v21661_v35  ;;  %14937 = vmatpush3.msra.mxu1 %v17153_v5  ;;  %v20706_v35 = vld [vmem:[#allocation14 + $0x8] sm:$0xff]  ;;  %v20708_v5 = vld [vmem:[#allocation14 + $0x20] sm:$0xff] }
 0x66e   :  { %15296 = vmatmul.mubr.f32.vlgmr.msra.gmra.mxu0 %v6136_v63  ;;  %14938 = vmatprep.subr.mxu1 %v17154_v39  ;;  %v20696_v63 = vld [vmem:[#allocation14 + $0x30] sm:$0xff]  ;;  %v20712_v39 = vld [vmem:[#allocation14] sm:$0xff] }
 0x66f   :  { %15298 = vmatprep.subr.mxu0 %v21644_v38  ;;  %14939 = vmatpush3.msra.mxu1 %v17155_v56  ;;  %v2123_v56 = vld [vmem:[#allocation14 + $0x130] sm:$0xff] }
 0x670   :  { %15314 = vmatprep.mubr.msk.f32.mxu0 %vm17462_vm2, %v21644_v38  ;;  %14940 = vmatprep.subr.mxu1 %v17156_v12 }
 0x671   :  { %14941 = vmatpush3.msra.mxu1 %v17157_v46  ;;  %15299 = vmatpush3.msra.mxu0 %v20644_v55 }
 0x672   :  { %14942 = vmatprep.subr.mxu1 %v17158_v6  ;;  %15300 = vmatprep.subr.mxu0 %v21644_v38 }
 0x673   :  { %14943 = vmatpush3.msra.mxu1 %v17159_v13  ;;  %15301 = vmatpush3.msra.mxu0 %v20652_v0 }
 0x674   :  { %14944 = vmatprep.subr.mxu1 %v17160_v45  ;;  %15302 = vmatprep.subr.mxu0 %v21644_v38 }
 0x675   :  { %14945 = vmatpush3.msra.mxu1 %v17161_v31  ;;  %15303 = vmatpush3.msra.mxu0 %v20658_v10 }
 0x676   :  { %6272 = vmatmul.mubr.f32.vlgmr.msra.gmra.mxu1 %v6106_v59  ;;  %6375 = vmatprep.subr.mxu1 %v20640_v57 }
 0x677   :  { %6423 = vmatprep.mubr.f32.mxu1 %v21644_v38  ;;  %6376 = vmatpush1.msra.mxu1 %v20642_v49 }
 0x678   :  { %6377 = vmatprep.subr.mxu1 %v20648_v27  ;;  %15304 = vmatprep.subr.mxu0 %v21644_v38 }
 0x679   :  { %6378 = vmatpush1.msra.mxu1 %v20650_v3  ;;  %15305 = vmatpush3.msra.mxu0 %v20668_v4 }
 0x67a   :  { %6379 = vmatprep.subr.mxu1 %v20656_v23  ;;  %15306 = vmatprep.subr.mxu0 %v21644_v38 }
 0x67b   :  { %6380 = vmatpush1.msra.mxu1 %v20662_v42  ;;  %15307 = vmatpush3.msra.mxu0 %v20678_v50 }
 0x67c   :  { %6381 = vmatprep.subr.mxu1 %v20666_v9  ;;  %15308 = vmatprep.subr.mxu0 %v21644_v38 }
 0x67d   :  { %6382 = vmatpush1.msra.mxu1 %v20672_v30  ;;  %15309 = vmatpush3.msra.mxu0 %v20688_v24 }
 0x67e   :  { %6383 = vmatprep.subr.mxu1 %v20676_v48  ;;  %15310 = vmatprep.subr.mxu0 %v21644_v38 }
 0x67f   :  { %6384 = vmatpush1.msra.mxu1 %v20682_v21  ;;  %15311 = vmatpush3.msra.mxu0 %v20698_v2 }
 0x680   :  { %6385 = vmatprep.subr.mxu1 %v20686_v17  ;;  %15312 = vmatprep.subr.mxu0 %v21644_v38 }
 0x681   :  { %6386 = vmatpush1.msra.mxu1 %v20692_v47  ;;  %15313 = vmatpush3.msra.mxu0 %v20708_v5 }
 0x682   :  { %6387 = vmatprep.subr.mxu1 %v20696_v63  ;;  %6731 = vmatprep.subr.mxu0 %v2123_v56 }
 0x683   :  { %6388 = vmatpush1.msra.mxu1 %v20702_v25 }
 0x684   :  { %6389 = vmatprep.subr.mxu1 %v20706_v35 }
 0x685   :  { %6390 = vmatpush1.msra.mxu1 %v20712_v39 }
 0x686   :  { %6446 = vmatprep.subr.mxu1 %v2123_v56 }
 0x6c5   :  { %v14824_v12 = vpop.f32.mrf.mxu1 }
 0x6c7   :  { %v14825_v33 = vpop.f32.mrf.mxu1 }
 0x6c8   :  { %v14826_v28 = vadd.f32 %v14825_v33, %v14824_v12  ;;  %v15844_v33 = vld [vmem:[#allocation16 + $0x74] ss:$8 sps:$4 sm:$0xff]  }
 0x6ed   :  { %v14859_v13 = vpop.f32.mrf.mxu0 }
 0x6ef   :  { %v14860_v45 = vpop.f32.mrf.mxu0 }
 0x6f0   :  { %v14861_v53 = vadd.f32 %v14860_v45, %v14859_v13  ;;  %v2118_v13 = vld [vmem:[#allocation14 + $0x108] sm:$0xff] }
 0x6f1   :  { %v15848_v45 = vld [vmem:[#allocation16 + $0x60] ss:$8 sps:$4 sm:$0xff]  }
 0x6f2   :  { %v5939_v43 = vadd.f32 %v14861_v53, %v14826_v28  ;;  %v2004_v28 = vld [vmem:[#allocation13] sm:$0x1] }
 0x70d   :  { %v14911_v59 = vpop.f32.mrf.mxu0 }
 0x70f   :  { %v14912_v31 = vpop.f32.mrf.mxu0 }
 0x710   :  { %v14913_v40 = vadd.f32 %v14912_v31, %v14911_v59  ;;  %v15884_v59 = vld [vmem:[#allocation16] ss:$8 sps:$4 sm:$0xff]   ;;  %v15892_v31 = vld [vmem:[#allocation16 + $0xf4] ss:$8 sps:$4 sm:$0xff]  }
 0x716   :  { %v6008_v46 = vpop.f32.mrf.mxu1 }
 0x717   :  { %v6009_v60 = vadd.f32 %v6008_v46, %v5939_v43  ;;  %v2117_v43 = vld [vmem:[#allocation14 + $0x100] sm:$0xff]  ;;  %v15842_v46 = vld [vmem:[#allocation16 + $0x70] ss:$8 sps:$4 sm:$0xff]  }
 0x718   :  { %v15262_v6 = vpop.f32.mrf.mxu1 }
 0x719   :  { %v6347_v32 = vmul.f32 0.001953125, %v6009_v60  ;;  %v2113_v60 = vld [vmem:[#allocation14 + $0xe0] sm:$0xff] }
 0x71b   :  { %v6349_v36 = vmul.f32 %v6347_v32, %v6347_v32 }
 0x72e   :  { %v6343_v52 = vpop.f32.mrf.mxu0 }
 0x730   :  { %v15297_v54 = vpop.f32.mrf.mxu0 }
 0x731   :  { %v2122_v54 = vld [vmem:[#allocation14 + $0x128] sm:$0xff] }
 0x736   :  { %v14946_v26 = vpop.f32.mrf.mxu1 }
 0x738   :  { %v14947_v29 = vpop.f32.mrf.mxu1 }
 0x739   :  { %v14948_v44 = vadd.f32 %v14947_v29, %v14946_v26  ;;  %v2112_v29 = vld [vmem:[#allocation14 + $0xd8] sm:$0xff]  ;;  %v2087_v26 = vld [vmem:[#allocation14 + $0x10] sm:$0xff] }
 0x73b   :  { %v6274_v56 = vadd.f32 %v14948_v44, %v14913_v40  ;;  %v2092_v44 = vld [vmem:[#allocation14 + $0x38] sm:$0xff] }
 0x73c   :  { %v2088_v40 = vld [vmem:[#allocation14 + $0x18] sm:$0xff] }
 0x73d   :  { %v6344_v15 = vadd.f32 %v6343_v52, %v6274_v56  ;;  %v2107_v52 = vld [vmem:[#allocation14 + $0xb0] sm:$0xff]  ;;  %v15863_v56 = vld [vmem:[#allocation16 + $0x100] ss:$8 sps:$4 sm:$0xff]  }
 0x73f   :  { %v6348_v7 = vmul.f32 0.001953125, %v6344_v15  ;;  %v2093_v15 = vld [vmem:[#allocation14 + $0x40] sm:$0xff] }
 0x741   :  { %v6350_v6 = vsub.f32 %v6348_v7, %v6349_v36  ;;  %v2108_v7 = vld [vmem:[#allocation14 + $0xb8] sm:$0xff]  ;;  %v2097_v36 = vld [vmem:[#allocation14 + $0x60] sm:$0xff] }
 0x743   :  { %v6351_v16 = vadd.f32 1e-05, %v6350_v6  ;;  %v15871_v6 = vld [vmem:[#allocation16 + $0x1f4] ss:$8 sps:$4 sm:$0xff]  }
 0x745   :  { %17048 = vrsqrt.f32 %v6351_v16  ;;  %v2098_v16 = vld [vmem:[#allocation14 + $0x68] sm:$0xff] }
 0x752   :  { %v17049_v61 = vpop.eup %17048 }
 0x753   :  { %v6353_v41 = vmul.f32 %v17049_v61, %v2003_v19  ;;  %v2103_v61 = vld [vmem:[#allocation14 + $0x90] sm:$0xff]  ;;  %v2102_v19 = vld [vmem:[#allocation14 + $0x88] sm:$0xff] }
 0x755   :  { %13682 = vmatmul.mubr.msk.f32.vlgmr.msra.gmra.mxu1 %vm1148_vm3, %v6353_v41  ;;  %15315 = vmatmul.mubr.msk.f32.vlgmr.msra.gmra.mxu0 %vm1148_vm3, %v6353_v41  ;;  %v6354_v53 = vmul.f32 %v6353_v41, %v6347_v32  ;;  %v15850_v32 = vld [vmem:[#allocation16 + $0x64] ss:$8 sps:$4 sm:$0xff]  }
 0x756   :  { %6447 = vmatpush1.msra.mxu1 %v2122_v54  ;;  %6732 = vmatpush1.msra.mxu0 %v2122_v54  ;;  %v15890_v54 = vld [vmem:[#allocation16 + $0xf0] ss:$8 sps:$4 sm:$0xff]  }
 0x757   :  { %6448 = vmatprep.subr.mxu1 %v2118_v13  ;;  %6733 = vmatprep.subr.mxu0 %v2118_v13  ;;  %v6355_v12 = vsub.f32 %v2004_v28, %v6354_v53  ;;  %v15869_v13 = vld [vmem:[#allocation16 + $0x1f0] ss:$8 sps:$4 sm:$0xff]   ;;  %v15916_v53 = vld [vmem:[#allocation16 + $0xb4] ss:$8 sps:$4 sm:$0xff]  }
 0x758   :  { %6449 = vmatpush1.msra.mxu1 %v2117_v43  ;;  %6734 = vmatpush1.msra.mxu0 %v2117_v43  ;;  %v15877_v43 = vld [vmem:[#allocation16 + $0x1e4] ss:$8 sps:$4 sm:$0xff]   ;;  %v15893_v28 = vld [vmem:[#allocation16 + $0x1b0] ss:$8 sps:$4 sm:$0xff]  }
 0x759   :  { %6450 = vmatprep.subr.mxu1 %v2113_v60  ;;  %6735 = vmatprep.subr.mxu0 %v2113_v60  ;;  %v15875_v60 = vld [vmem:[#allocation16 + $0x1e0] ss:$8 sps:$4 sm:$0xff]  }
 0x75a   :  { %6451 = vmatpush1.msra.mxu1 %v2112_v29  ;;  %6736 = vmatpush1.msra.mxu0 %v2112_v29  ;;  %v15883_v29 = vld [vmem:[#allocation16 + $0x1d4] ss:$8 sps:$4 sm:$0xff]  }
 0x75b   :  { %6452 = vmatprep.subr.mxu1 %v2108_v7  ;;  %6737 = vmatprep.subr.mxu0 %v2108_v7  ;;  %v15896_v7 = vld [vmem:[#allocation16 + $0xe0] ss:$8 sps:$4 sm:$0xff]  }
 0x75c   :  { %6453 = vmatpush1.msra.mxu1 %v2107_v52  ;;  %6738 = vmatpush1.msra.mxu0 %v2107_v52  ;;  %v15898_v52 = vld [vmem:[#allocation16 + $0xe4] ss:$8 sps:$4 sm:$0xff]  }
 0x75d   :  { %6454 = vmatprep.subr.mxu1 %v2103_v61  ;;  %6739 = vmatprep.subr.mxu0 %v2103_v61  ;;  %v15881_v61 = vld [vmem:[#allocation16 + $0x1d0] ss:$8 sps:$4 sm:$0xff]  }
 0x75e   :  { %6455 = vmatpush1.msra.mxu1 %v2102_v19  ;;  %6740 = vmatpush1.msra.mxu0 %v2102_v19  ;;  %v15902_v19 = vld [vmem:[#allocation16 + $0xd0] ss:$8 sps:$4 sm:$0xff]  }
 0x75f   :  { %6456 = vmatprep.subr.mxu1 %v2098_v16  ;;  %6741 = vmatprep.subr.mxu0 %v2098_v16  ;;  %v15904_v16 = vld [vmem:[#allocation16 + $0xd4] ss:$8 sps:$4 sm:$0xff]  }
 0x760   :  { %6457 = vmatpush1.msra.mxu1 %v2097_v36  ;;  %6742 = vmatpush1.msra.mxu0 %v2097_v36  ;;  %v15889_v36 = vld [vmem:[#allocation16 + $0x1c4] ss:$8 sps:$4 sm:$0xff]  }
 0x761   :  { %6458 = vmatprep.subr.mxu1 %v2093_v15  ;;  %6743 = vmatprep.subr.mxu0 %v2093_v15  ;;  %v15910_v15 = vld [vmem:[#allocation16 + $0xc4] ss:$8 sps:$4 sm:$0xff]  }
 0x762   :  { %6459 = vmatpush1.msra.mxu1 %v2092_v44  ;;  %6744 = vmatpush1.msra.mxu0 %v2092_v44  ;;  %v15887_v44 = vld [vmem:[#allocation16 + $0x1c0] ss:$8 sps:$4 sm:$0xff]  }
 0x763   :  { %6460 = vmatprep.subr.mxu1 %v2088_v40  ;;  %6745 = vmatprep.subr.mxu0 %v2088_v40  ;;  %v15908_v40 = vld [vmem:[#allocation16 + $0xc0] ss:$8 sps:$4 sm:$0xff]  }
 0x764   :  { %6461 = vmatpush1.msra.mxu1 %v2087_v26  ;;  %6494 = vmatprep.mubr.f32.mxu1 %v21644_v38 }
 0x765   :  { %6746 = vmatpush1.msra.mxu0 %v2087_v26  ;;  %6779 = vmatprep.mubr.f32.mxu0 %v21644_v38  ;;  %v15895_v26 = vld [vmem:[#allocation16 + $0x1b4] ss:$8 sps:$4 sm:$0xff]  }
 0x766   :  { %13683 = vmatmul.mubr.msk.f32.vlgmr.msra.gmra.mxu1 %vm1148_vm3, %v6353_v41  ;;  %6660 = vmatprep.subr.mxu1 %v20640_v57  ;;  %v15856_v41 = vld [vmem:[#allocation16 + $0x54] ss:$8 sps:$4 sm:$0xff]   ;;  %v15854_v57 = vld [vmem:[#allocation16 + $0x50] ss:$8 sps:$4 sm:$0xff]  }
 0x767   :  { %13686 = vmatmul.mubr.msk.f32.vlgmr.msra.gmra.mxu0 %vm1148_vm3, %v6355_v12  ;;  %6661 = vmatpush1.msra.mxu1 %v20642_v49  ;;  %v15862_v49 = vld [vmem:[#allocation16 + $0x44] ss:$8 sps:$4 sm:$0xff]  }
 0x768   :  { %6662 = vmatprep.subr.mxu1 %v20648_v27  ;;  %6708 = vmatprep.mubr.f32.mxu1 %v21644_v38  ;;  %v15860_v27 = vld [vmem:[#allocation16 + $0x40] ss:$8 sps:$4 sm:$0xff]  }
 0x769   :  { %6663 = vmatpush1.msra.mxu1 %v20650_v3  ;;  %11926 = vmatprep.subr.bf16.mxu0 %v15844_v33  ;;  %v15868_v3 = vld [vmem:[#allocation16 + $0x34] ss:$8 sps:$4 sm:$0xff]   ;;  %v15901_v33 = vld [vmem:[#allocation16 + $0x1a4] ss:$8 sps:$4 sm:$0xff]  }
 0x76a   :  { %6664 = vmatprep.subr.mxu1 %v20656_v23  ;;  %11927 = vmatpush1.bf16.msra.mxu0 %v15842_v46  ;;  %v15866_v23 = vld [vmem:[#allocation16 + $0x30] ss:$8 sps:$4 sm:$0xff]   ;;  %v15899_v46 = vld [vmem:[#allocation16 + $0x1a0] ss:$8 sps:$4 sm:$0xff]  }
 0x76b   :  { %6665 = vmatpush1.msra.mxu1 %v20662_v42  ;;  %11928 = vmatprep.subr.bf16.mxu0 %v15850_v32  ;;  %v15833_v42 = vld [vmem:[#allocation16 + $0x160] ss:$8 sps:$4 sm:$0xff]  }
 0x76c   :  { %6666 = vmatprep.subr.mxu1 %v20666_v9  ;;  %v15838_v9 = vld [vmem:[#allocation16 + $0x154] ss:$8 sps:$4 sm:$0xff]   ;;  %v15920_v32 = vld [vmem:[#allocation16 + $0xa0] ss:$8 sps:$4 sm:$0xff]  }
 0x76d   :  { %6667 = vmatpush1.msra.mxu1 %v20672_v30  ;;  %v15841_v30 = vld [vmem:[#allocation16 + $0x144] ss:$8 sps:$4 sm:$0xff]  }
 0x76e   :  { %6668 = vmatprep.subr.mxu1 %v20676_v48  ;;  %11929 = vmatpush1.bf16.msra.mxu0 %v15848_v45  ;;  %v15839_v48 = vld [vmem:[#allocation16 + $0x140] ss:$8 sps:$4 sm:$0xff]   ;;  %v15922_v45 = vld [vmem:[#allocation16 + $0xa4] ss:$8 sps:$4 sm:$0xff]  }
 0x76f   :  { %6669 = vmatpush1.msra.mxu1 %v20682_v21  ;;  %11930 = vmatprep.subr.bf16.mxu0 %v15856_v41  ;;  %v15853_v21 = vld [vmem:[#allocation16 + $0x124] ss:$8 sps:$4 sm:$0xff]   ;;  %v15907_v41 = vld [vmem:[#allocation16 + $0x194] ss:$8 sps:$4 sm:$0xff]  }
 0x770   :  { %6670 = vmatprep.subr.mxu1 %v20686_v17  ;;  %v15872_v17 = vld [vmem:[#allocation16 + $0x20] ss:$8 sps:$4 sm:$0xff]  }
 0x771   :  { %6671 = vmatpush1.msra.mxu1 %v20692_v47  ;;  %v15851_v47 = vld [vmem:[#allocation16 + $0x120] ss:$8 sps:$4 sm:$0xff]  }
 0x772   :  { %6672 = vmatprep.subr.mxu1 %v20696_v63  ;;  %11931 = vmatpush1.bf16.msra.mxu0 %v15854_v57  ;;  %v15859_v63 = vld [vmem:[#allocation16 + $0x114] ss:$8 sps:$4 sm:$0xff]   ;;  %v15905_v57 = vld [vmem:[#allocation16 + $0x190] ss:$8 sps:$4 sm:$0xff]  }
 0x773   :  { %6673 = vmatpush1.msra.mxu1 %v20702_v25  ;;  %11932 = vmatprep.subr.bf16.mxu0 %v15862_v49  ;;  %v15880_v25 = vld [vmem:[#allocation16 + $0x14] ss:$8 sps:$4 sm:$0xff]   ;;  %v15926_v49 = vld [vmem:[#allocation16 + $0x90] ss:$8 sps:$4 sm:$0xff]  }
 0x774   :  { %6674 = vmatprep.subr.mxu1 %v20706_v35  ;;  %v15886_v35 = vld [vmem:[#allocation16 + $0x4] ss:$8 sps:$4 sm:$0xff]  }
 0x775   :  { %6675 = vmatpush1.msra.mxu1 %v20712_v39  ;;  %v15865_v39 = vld [vmem:[#allocation16 + $0x104] ss:$8 sps:$4 sm:$0xff]  }
 0x776   :  { %13685 = vmatmul.mubr.msk.f32.vlgmr.msra.gmra.mxu1 %vm1148_vm3, %v6355_v12  ;;  %15317 = vmatprep.subr.mxu1 %v21644_v38 }
 0x777   :  { %15318 = vmatpush3.msra.mxu1 %v20644_v55  ;;  %15333 = vmatprep.mubr.msk.f32.mxu1 %vm17462_vm2, %v21644_v38  ;;  %v15832_v55 = vld [vmem:[#allocation16 + $0x174] ss:$8 sps:$4 sm:$0xff]  }
 0x778   :  { %15319 = vmatprep.subr.mxu1 %v21644_v38  ;;  %11933 = vmatpush1.bf16.msra.mxu0 %v15860_v27  ;;  %v15928_v27 = vld [vmem:[#allocation16 + $0x94] ss:$8 sps:$4 sm:$0xff]  }
 0x779   :  { %15320 = vmatpush3.msra.mxu1 %v20652_v0  ;;  %11934 = vmatprep.subr.bf16.mxu0 %v15868_v3  ;;  %v15830_v0 = vld [vmem:[#allocation16 + $0x170] ss:$8 sps:$4 sm:$0xff]   ;;  %v15913_v3 = vld [vmem:[#allocation16 + $0x184] ss:$8 sps:$4 sm:$0xff]  }
 0x77a   :  { %15321 = vmatprep.subr.mxu1 %v21644_v38 }
 0x77b   :  { %15322 = vmatpush3.msra.mxu1 %v20658_v10  ;;  %v15835_v10 = vld [vmem:[#allocation16 + $0x164] ss:$8 sps:$4 sm:$0xff]  }
 0x77c   :  { %15323 = vmatprep.subr.mxu1 %v21644_v38  ;;  %11935 = vmatpush1.bf16.msra.mxu0 %v15866_v23  ;;  %v15911_v23 = vld [vmem:[#allocation16 + $0x180] ss:$8 sps:$4 sm:$0xff]  }
 0x77d   :  { %15324 = vmatpush3.msra.mxu1 %v20668_v4  ;;  %v15836_v4 = vld [vmem:[#allocation16 + $0x150] ss:$8 sps:$4 sm:$0xff]  }
 0x77e   :  { %15325 = vmatprep.subr.mxu1 %v21644_v38 }
 0x77f   :  { %15326 = vmatpush3.msra.mxu1 %v20678_v50  ;;  %v15847_v50 = vld [vmem:[#allocation16 + $0x134] ss:$8 sps:$4 sm:$0xff]  }
 0x780   :  { %15327 = vmatprep.subr.mxu1 %v21644_v38 }
 0x781   :  { %15328 = vmatpush3.msra.mxu1 %v20688_v24  ;;  %v15874_v24 = vld [vmem:[#allocation16 + $0x24] ss:$8 sps:$4 sm:$0xff]  }
 0x782   :  { %15329 = vmatprep.subr.mxu1 %v21644_v38  ;;  %11936 = vmatprep.subr.bf16.mxu0 %v15874_v24 }
 0x783   :  { %15330 = vmatpush3.msra.mxu1 %v20698_v2  ;;  %11937 = vmatpush1.bf16.msra.mxu0 %v15872_v17  ;;  %v15878_v2 = vld [vmem:[#allocation16 + $0x10] ss:$8 sps:$4 sm:$0xff]  }
 0x784   :  { %15331 = vmatprep.subr.mxu1 %v21644_v38  ;;  %v15845_v38 = vld [vmem:[#allocation16 + $0x130] ss:$8 sps:$4 sm:$0xff]   ;;  %11938 = vmatprep.subr.bf16.mxu0 %v15880_v25  ;;  %v21663_v25 = vld [vmem:[#allocation94_spill] sm:$0xff] }
 0x785   :  { %15332 = vmatpush3.msra.mxu1 %v20708_v5  ;;  %v15857_v5 = vld [vmem:[#allocation16 + $0x110] ss:$8 sps:$4 sm:$0xff]  }
 0x786   :  { %15334 = vmatmul.mubr.msk.f32.vlgmr.msra.gmra.mxu1 %vm1148_vm3, %v6355_v12  ;;  %11967 = vmatprep.subr.bf16.mxu1 %v15832_v55  ;;  %v15914_v12 = vld [vmem:[#allocation16 + $0xb0] ss:$8 sps:$4 sm:$0xff]   ;;  %v15932_v55 = vld [vmem:[#allocation16 + $0x80] ss:$8 sps:$4 sm:$0xff]  }
 0x787   :  { %11968 = vmatpush1.bf16.msra.mxu1 %v15830_v0  ;;  %11939 = vmatpush1.bf16.msra.mxu0 %v15878_v2  ;;  %v15934_v0 = vld [vmem:[#allocation16 + $0x84] ss:$8 sps:$4 sm:$0xff]  }
 0x788   :  { %11969 = vmatprep.subr.bf16.mxu1 %v15835_v10  ;;  %11940 = vmatprep.subr.bf16.mxu0 %v15886_v35  ;;  %v15919_v10 = vld [vmem:[#allocation16 + $0x374] ss:$8 sps:$4 sm:$0xff]  }
 0x78b   :  { %11970 = vmatpush1.bf16.msra.mxu1 %v15833_v42  ;;  %11941 = vmatpush1.bf16.msra.mxu0 %v15884_v59  ;;  %v15940_v42 = vld [vmem:[#allocation16 + $0x274] ss:$8 sps:$4 sm:$0xff]  }
 0x78c   :  { %11971 = vmatprep.subr.bf16.mxu1 %v15838_v9  ;;  %11942 = vmatprep.subr.bf16.mxu0 %v15892_v31  ;;  %v21664_v59 = vld [vmem:[#allocation104_spill] sm:$0xff] }
 0x78f   :  { %11972 = vmatpush1.bf16.msra.mxu1 %v15836_v4  ;;  %11943 = vmatpush2.bf16.msra.mxu0 %v15890_v54  ;;  %v21666_v54 = vld [vmem:[#allocation59_spill] sm:$0xff] }
 0x790   :  { %11973 = vmatprep.subr.bf16.mxu1 %v15841_v30  ;;  %11944 = vmatprep.subr.bf16.mxu0 %v15898_v52 }
 0x793   :  { %11974 = vmatpush1.bf16.msra.mxu1 %v15839_v48  ;;  %11945 = vmatpush2.bf16.msra.mxu0 %v15896_v7  ;;  %v21662_v48 = vld [vmem:[#allocation37_spill] sm:$0xff]  ;;  %v21668_v7 = vld [vmem:[#allocation66_spill] sm:$0xff] }
 0x794   :  { %11975 = vmatprep.subr.bf16.mxu1 %v15847_v50  ;;  %11946 = vmatprep.subr.bf16.mxu0 %v15904_v16 }
 0x797   :  { %11976 = vmatpush1.bf16.msra.mxu1 %v15845_v38  ;;  %11947 = vmatpush2.bf16.msra.mxu0 %v15902_v19 }
 0x798   :  { %11977 = vmatprep.subr.bf16.mxu1 %v15853_v21  ;;  %11948 = vmatprep.subr.bf16.mxu0 %v15910_v15 }
 0x79b   :  { %11978 = vmatpush1.bf16.msra.mxu1 %v15851_v47  ;;  %11949 = vmatpush2.bf16.msra.mxu0 %v15908_v40 }
 0x79c   :  { %11979 = vmatprep.subr.bf16.mxu1 %v15859_v63  ;;  %11950 = vmatprep.subr.bf16.mxu0 %v15916_v53 }
 0x79f   :  { %11980 = vmatpush1.bf16.msra.mxu1 %v15857_v5  ;;  %11951 = vmatpush2.bf16.msra.mxu0 %v15914_v12 }
 0x7a0   :  { %11981 = vmatprep.subr.bf16.mxu1 %v15865_v39  ;;  %11952 = vmatprep.subr.bf16.mxu0 %v15922_v45 }
 0x7a3   :  { %11982 = vmatpush1.bf16.msra.mxu1 %v15863_v56  ;;  %11953 = vmatpush2.bf16.msra.mxu0 %v15920_v32  ;;  %v21665_v56 = vld [vmem:[#allocation108_spill] sm:$0xff] }
 0x7a4   :  { %11983 = vmatprep.subr.bf16.mxu1 %v15871_v6  ;;  %11954 = vmatprep.subr.bf16.mxu0 %v15928_v27 }
 0x7a7   :  { %11984 = vmatpush2.bf16.msra.mxu1 %v15869_v13  ;;  %11955 = vmatpush2.bf16.msra.mxu0 %v15926_v49 }
 0x7a8   :  { %11985 = vmatprep.subr.bf16.mxu1 %v15877_v43  ;;  %11956 = vmatprep.subr.bf16.mxu0 %v15934_v0 }
 0x7ab   :  { %11986 = vmatpush2.bf16.msra.mxu1 %v15875_v60  ;;  %11957 = vmatpush2.bf16.msra.mxu0 %v15932_v55  ;;  %v21667_v60 = vld [vmem:[#allocation87_spill] sm:$0xff] }
 0x7ac   :  { %11987 = vmatprep.subr.bf16.mxu1 %v15883_v29  ;;  %12008 = vmatprep.subr.bf16.mxu0 %v15940_v42 }
 0x7af   :  { %11988 = vmatpush2.bf16.msra.mxu1 %v15881_v61  ;;  %v21669_v61 = vld [vmem:[#allocation67_spill] sm:$0xff] }
 0x7b0   :  { %11989 = vmatprep.subr.bf16.mxu1 %v15889_v36 }
 0x7b3   :  { %11990 = vmatpush2.bf16.msra.mxu1 %v15887_v44 }
 0x7b4   :  { %11991 = vmatprep.subr.bf16.mxu1 %v15895_v26 }
 0x7b7   :  { %11992 = vmatpush2.bf16.msra.mxu1 %v15893_v28 }
 0x7b8   :  { %11993 = vmatprep.subr.bf16.mxu1 %v15901_v33 }
 0x7bb   :  { %11994 = vmatpush2.bf16.msra.mxu1 %v15899_v46 }
 0x7bc   :  { %11995 = vmatprep.subr.bf16.mxu1 %v15907_v41 }
 0x7bf   :  { %11996 = vmatpush2.bf16.msra.mxu1 %v15905_v57 }
 0x7c0   :  { %11997 = vmatprep.subr.bf16.mxu1 %v15913_v3 }
 0x7c3   :  { %11998 = vmatpush2.bf16.msra.mxu1 %v15911_v23 }
 0x7c4   :  { %12049 = vmatprep.subr.bf16.mxu1 %v15919_v10 }
 0x815   :  { %v20762_v9 = vpop.f32.mrf.mxu0  ;;  %v6425_v30 = vpop.f32.mrf.mxu1 }
 0x816   :  { %v20765_v50 = vrot.slane %v6425_v30, %v21662_v48 }
 0x817   :  { %v15316_v4 = vpop.f32.mrf.mxu0  ;;  %v6427_v38 = vpop.f32.mrf.mxu1 }
 0x818   :  { %v20771_v47 = vrot.slane %v6427_v38, %v21662_v48  ;;  %v20778_v35 = vmul.f32 %v20765_v50, %v21663_v25  ;;  %v15917_v25 = vld [vmem:[#allocation16 + $0x370] ss:$8 sps:$4 sm:$0xff]  }
 0x826   :  { %v6496_v21 = vpop.f32.mrf.mxu1 }
 0x827   :  { %v20768_v17 = vrot.slane %v6496_v21, %v21662_v48  ;;  %v6781_v24 = vpop.f32.mrf.mxu0 }
 0x828   :  { %v20774_v63 = vrot.slane %v6781_v24, %v21662_v48  ;;  %v6498_v2 = vpop.f32.mrf.mxu1 }
 0x829   :  { %v20781_v5 = vrot.slane %v6498_v2, %v21662_v48  ;;  %v6783_v39 = vpop.f32.mrf.mxu0  ;;  %v6593_v31 = vmul.f32 %v20768_v17, %v21664_v59  ;;  %v6598_v6 = vmul.f32 %v20768_v17, %v21665_v56  ;;  %v6603_v13 = vmul.f32 %v20768_v17, %v21666_v54 }
 0x82a   :  { %v20790_v43 = vrot.slane %v6783_v39, %v21662_v48  ;;  %v6608_v29 = vmul.f32 %v20768_v17, %v21667_v60  ;;  %v6613_v52 = vmul.f32 %v20768_v17, %v21668_v7  ;;  %v6618_v19 = vmul.f32 %v20768_v17, %v21669_v61  ;;  %v21670_v39 = vld [vmem:[#allocation42_spill] sm:$0xff]  ;;  %v21672_v7 = vld [vmem:[#allocation96_spill] sm:$0xff] }
 0x82b   :  { %v6594_v16 = vmul.f32 %v20781_v5, %v20042_v58  ;;  %v6599_v36 = vmul.f32 %v20781_v5, %v20033_v1  ;;  %v6878_v15 = vadd.f32 %v20774_v63, %v6593_v31  ;;  %v6883_v44 = vadd.f32 %v20774_v63, %v6598_v6  ;;  %v21671_v6 = vld [vmem:[#allocation95_spill] sm:$0xff] }
 0x82c   :  { %v6604_v40 = vmul.f32 %v20781_v5, %v20051_v37  ;;  %v6609_v26 = vmul.f32 %v20781_v5, %v20072_v62  ;;  %v6888_v53 = vadd.f32 %v20774_v63, %v6603_v13  ;;  %v6893_v28 = vadd.f32 %v20774_v63, %v6608_v29 }
 0x82d   :  { %v6879_v12 = vadd.f32 %v20790_v43, %v6594_v16  ;;  %v6884_v58 = vadd.f32 %v20790_v43, %v6599_v36  ;;  %v6928_v33 = vmax.f32 %v6878_v15, 0.0  ;;  %v6933_v1 = vmax.f32 %v6883_v44, 0.0  ;;  %v21673_v15 = vld [vmem:[#allocation31_spill] sm:$0xff] }
 0x82e   :  { %v6889_v46 = vadd.f32 %v20790_v43, %v6604_v40  ;;  %v6894_v32 = vadd.f32 %v20790_v43, %v6609_v26  ;;  %v6938_v45 = vmax.f32 %v6888_v53, 0.0  ;;  %v6943_v41 = vmax.f32 %v6893_v28, 0.0  ;;  %v21674_v40 = vld [vmem:[#allocation76_spill] sm:$0xff] }
 0x82f   :  { %v6929_v37 = vmax.f32 %v6879_v12, 0.0  ;;  %v6934_v57 = vmax.f32 %v6884_v58, 0.0  ;;  %v6978_v62 = vmul.f32 %v6928_v33, %v21497_v34  ;;  %v6983_v49 = vmul.f32 %v6933_v1, %v21499_v8  ;;  %v15923_v12 = vld [vmem:[#allocation16 + $0x360] ss:$8 sps:$4 sm:$0xff]   ;;  %v21675_v58 = vld [vmem:[#allocation32_spill] sm:$0xff] }
 0x830   :  { %v6939_v27 = vmax.f32 %v6889_v46, 0.0  ;;  %v6944_v3 = vmax.f32 %v6894_v32, 0.0  ;;  %v6988_v23 = vmul.f32 %v6938_v45, %v21502_v14  ;;  %v6993_v55 = vmul.f32 %v6943_v41, %v21506_v11  ;;  %v21676_v1 = vld [vmem:[#allocation48_spill] sm:$0xff]  ;;  %v21677_v41 = vld [vmem:[#allocation38_spill] sm:$0xff] }
 0x831   :  { %v6979_v0 = vmul.f32 %v6929_v37, %v21497_v34  ;;  %v6984_v10 = vmul.f32 %v6934_v57, %v21499_v8  ;;  %v7028_v42 = vpack.c.bf16 %v6983_v49, %v6978_v62  ;;  %v6614_v4 = vmul.f32 %v20781_v5, %v20099_v18  ;;  %v15925_v18 = vld [vmem:[#allocation16 + $0x364] ss:$8 sps:$4 sm:$0xff]   ;;  %v15931_v45 = vld [vmem:[#allocation16 + $0x354] ss:$8 sps:$4 sm:$0xff]  }
 0x832   :  { %v6989_v30 = vmul.f32 %v6939_v27, %v21502_v14  ;;  %v6994_v38 = vmul.f32 %v6944_v3, %v21506_v11  ;;  %v20824_v21 = vpack.c.bf16 %v6993_v55, %v6988_v23  ;;  %v6619_v24 = vmul.f32 %v20781_v5, %v20133_v51 }
 0x833   :  { %v20828_v2 = vpack.c.bf16 %v6984_v10, %v6979_v0  ;;  %v6596_v59 = vmul.f32 %v20765_v50, %v21670_v39  ;;  %v6899_v31 = vadd.f32 %v20790_v43, %v6614_v4  ;;  %v6898_v56 = vadd.f32 %v20774_v63, %v6613_v52  ;;  %v15929_v4 = vld [vmem:[#allocation16 + $0x350] ss:$8 sps:$4 sm:$0xff]  }
 0x834   :  { %v6601_v54 = vmul.f32 %v20765_v50, %v21671_v6  ;;  %v20836_v13 = vpack.c.bf16 %v6994_v38, %v6989_v30  ;;  %v6904_v60 = vadd.f32 %v20790_v43, %v6619_v24  ;;  %v6903_v51 = vadd.f32 %v20774_v63, %v6618_v19 }
 0x835   :  { %11999 = vmatprep.mubr.bf16.mxu1 %v20828_v2  ;;  %v7058_v29 = vrot.slane %v7028_v42, 4  ;;  %v6606_v61 = vmul.f32 %v20765_v50, %v21672_v7  ;;  %v6949_v16 = vmax.f32 %v6899_v31, 0.0  ;;  %v6624_v52 = vmul.f32 %v20781_v5, %v20153_v22 }
 0x836   :  { %v6710_v36 = vpop.f32.mrf.mxu1  ;;  %12000 = vmatmul.mubr.bf16.vlgmr.msra.gmra.mxu1 %v7028_v42  ;;  %v6592_v44 = vmul.f32 %v20771_v47, %v21673_v15  ;;  %v6597_v26 = vmul.f32 %v20771_v47, %v21674_v40  ;;  %v6954_v53 = vmax.f32 %v6904_v60, 0.0  ;;  %v6629_v19 = vmul.f32 %v20781_v5, %v20192_v20  ;;  %v21679_v15 = vld [vmem:[#allocation81_spill] sm:$0xff] }
 0x837   :  { %v20852_v28 = vrot.slane %v6710_v36, %v21662_v48  ;;  %12050 = vmatpush1.bf16.msra.mxu1 %v15917_v25  ;;  %12081 = vmatprep.mubr.bf16.mxu1 %v7058_v29  ;;  %v6999_v22 = vmul.f32 %v6949_v16, %v21675_v58  ;;  %v6948_v33 = vmax.f32 %v6898_v56, 0.0  ;;  %v6611_v46 = vmul.f32 %v20765_v50, %v21676_v1  ;;  %v15937_v25 = vld [vmem:[#allocation16 + $0x344] ss:$8 sps:$4 sm:$0xff]   ;;  %v15943_v40 = vld [vmem:[#allocation16 + $0x334] ss:$8 sps:$4 sm:$0xff]  }
 0x838   :  { %v6712_v32 = vpop.f32.mrf.mxu1  ;;  %12051 = vmatprep.subr.bf16.mxu1 %v15925_v18  ;;  %v7004_v37 = vmul.f32 %v6954_v53, %v21677_v41  ;;  %v6953_v57 = vmax.f32 %v6903_v51, 0.0  ;;  %v20859_v20 = vadd.f32 %v20790_v43, %v6624_v52  ;;  %v20862_v62 = vadd.f32 %v20790_v43, %v6629_v19  ;;  %v21678_v29 = vld [vmem:[#allocation49_spill] sm:$0xff]  ;;  %v21681_v1 = vld [vmem:[#allocation102_spill] sm:$0xff] }
 0x839   :  { %v20865_v49 = vrot.slane %v6712_v32, %v21662_v48  ;;  %v6876_v27 = vadd.f32 %v20852_v28, %v20778_v35  ;;  %v6881_v3 = vadd.f32 %v20852_v28, %v6596_v59  ;;  %v6886_v23 = vadd.f32 %v20852_v28, %v6601_v54  ;;  %v21680_v19 = vld [vmem:[#allocation77_spill] sm:$0xff] }
 0x83a   :  { %v20873_v55 = vrot.slane %v20762_v9, %v21662_v48  ;;  %v6891_v0 = vadd.f32 %v20852_v28, %v6606_v61  ;;  %v20876_v10 = vpack.c.bf16 %v7004_v37, %v6999_v22  ;;  %v6896_v42 = vadd.f32 %v20852_v28, %v6611_v46  ;;  %v15935_v61 = vld [vmem:[#allocation16 + $0x340] ss:$8 sps:$4 sm:$0xff]   ;;  %v15946_v37 = vld [vmem:[#allocation16 + $0x264] ss:$8 sps:$4 sm:$0xff]  }
 0x83b   :  { %12052 = vmatpush1.bf16.msra.mxu1 %v15923_v12  ;;  %v6877_v30 = vadd.f32 %v20865_v49, %v6592_v44  ;;  %v6882_v35 = vadd.f32 %v20865_v49, %v6597_v26  ;;  %v6926_v38 = vmax.f32 %v6876_v27, 0.0  ;;  %v6931_v24 = vmax.f32 %v6881_v3, 0.0  ;;  %v21682_v3 = vld [vmem:[#allocation97_spill] sm:$0xff] }
 0x83c   :  { %12053 = vmatprep.subr.bf16.mxu1 %v15931_v45  ;;  %v6936_v39 = vmax.f32 %v6886_v23, 0.0  ;;  %v6941_v59 = vmax.f32 %v6891_v0, 0.0  ;;  %v6998_v9 = vmul.f32 %v6948_v33, %v21675_v58  ;;  %v7003_v31 = vmul.f32 %v6953_v57, %v21677_v41  ;;  %v15938_v33 = vld [vmem:[#allocation16 + $0x270] ss:$8 sps:$4 sm:$0xff]   ;;  %v21683_v0 = vld [vmem:[#allocation85_spill] sm:$0xff] }
 0x83d   :  { %v6927_v56 = vmax.f32 %v6877_v30, 0.0  ;;  %v6932_v18 = vmax.f32 %v6882_v35, 0.0  ;;  %v6976_v6 = vmul.f32 %v6926_v38, %v21497_v34  ;;  %v6981_v54 = vmul.f32 %v6931_v24, %v21499_v8  ;;  %v15941_v35 = vld [vmem:[#allocation16 + $0x330] ss:$8 sps:$4 sm:$0xff]  }
 0x83e   :  { %v6986_v60 = vmul.f32 %v6936_v39, %v21502_v14  ;;  %v6991_v51 = vmul.f32 %v6941_v59, %v21506_v11  ;;  %v6612_v7 = vmul.f32 %v20771_v47, %v21678_v29  ;;  %v6617_v44 = vmul.f32 %v20771_v47, %v21679_v15  ;;  %v15949_v59 = vld [vmem:[#allocation16 + $0x324] ss:$8 sps:$4 sm:$0xff]  }
 0x83f   :  { %12054 = vmatpush1.bf16.msra.mxu1 %v15929_v4  ;;  %v6977_v16 = vmul.f32 %v6927_v56, %v21497_v34  ;;  %v6982_v52 = vmul.f32 %v6932_v18, %v21499_v8  ;;  %v7026_v36 = vpack.c.bf16 %v6981_v54, %v6976_v6  ;;  %v6616_v12 = vmul.f32 %v20765_v50, %v21680_v19  ;;  %v21685_v18 = vld [vmem:[#allocation54_spill] sm:$0xff] }
 0x840   :  { %12055 = vmatprep.subr.bf16.mxu1 %v15937_v25  ;;  %v20893_v26 = vpack.c.bf16 %v6991_v51, %v6986_v60  ;;  %v6897_v53 = vadd.f32 %v20865_v49, %v6612_v7  ;;  %v6605_v46 = vmul.f32 %v20873_v55, %v21681_v1  ;;  %v6902_v32 = vadd.f32 %v20865_v49, %v6617_v44  ;;  %v21684_v25 = vld [vmem:[#allocation40_spill] sm:$0xff]  ;;  %v15944_v54 = vld [vmem:[#allocation16 + $0x260] ss:$8 sps:$4 sm:$0xff]  }
 0x841   :  { %v20898_v22 = vpack.c.bf16 %v6982_v52, %v6977_v16  ;;  %v20903_v45 = vpack.c.bf16 %v7003_v31, %v6998_v9  ;;  %v6901_v27 = vadd.f32 %v20852_v28, %v6616_v12  ;;  %v6622_v23 = vmul.f32 %v20771_v47, %v21682_v3  ;;  %v15952_v7 = vld [vmem:[#allocation16 + $0x254] ss:$8 sps:$4 sm:$0xff]   ;;  %v15947_v44 = vld [vmem:[#allocation16 + $0x320] ss:$8 sps:$4 sm:$0xff]  }
 0x842   :  { %v6947_v57 = vmax.f32 %v6897_v53, 0.0  ;;  %v6627_v4 = vmul.f32 %v20771_v47, %v21683_v0  ;;  %v7056_v30 = vrot.slane %v7026_v36, 4  ;;  %v6952_v38 = vmax.f32 %v6902_v32, 0.0  ;;  %v15955_v1 = vld [vmem:[#allocation16 + $0x314] ss:$8 sps:$4 sm:$0xff]  }
 0x843   :  { %12056 = vmatpush1.bf16.msra.mxu1 %v15935_v61  ;;  %11958 = vmatprep.mubr.bf16.mxu0 %v20898_v22  ;;  %v6946_v24 = vmax.f32 %v6896_v42, 0.0  ;;  %v6621_v39 = vmul.f32 %v20765_v50, %v21684_v25  ;;  %v6951_v31 = vmax.f32 %v6901_v27, 0.0  ;;  %v6907_v56 = vadd.f32 %v20865_v49, %v6622_v23  ;;  %v21688_v27 = vld [vmem:[#allocation103_spill] sm:$0xff] }
 0x844   :  { %11959 = vmatmul.mubr.bf16.vlgmr.msra.gmra.mxu0 %v7026_v36  ;;  %12057 = vmatprep.subr.bf16.mxu1 %v15943_v40  ;;  %v6997_v9 = vmul.f32 %v6947_v57, %v21675_v58  ;;  %v6626_v6 = vmul.f32 %v20765_v50, %v21685_v18  ;;  %v7002_v60 = vmul.f32 %v6952_v38, %v21677_v41  ;;  %v21686_v40 = vld [vmem:[#allocation88_spill] sm:$0xff]  ;;  %v15958_v25 = vld [vmem:[#allocation16 + $0x244] ss:$8 sps:$4 sm:$0xff]  }
 0x845   :  { %12009 = vmatpush1.bf16.msra.mxu0 %v15938_v33  ;;  %12040 = vmatprep.mubr.bf16.mxu0 %v7056_v30  ;;  %v6996_v42 = vmul.f32 %v6946_v24, %v21675_v58  ;;  %v6912_v51 = vadd.f32 %v20865_v49, %v6627_v4  ;;  %v7001_v61 = vmul.f32 %v6951_v31, %v21677_v41  ;;  %v6957_v16 = vmax.f32 %v6907_v56, 0.0  ;;  %v15950_v0 = vld [vmem:[#allocation16 + $0x250] ss:$8 sps:$4 sm:$0xff]  }
 0x846   :  { %v6852_v29 = vpop.f32.mrf.mxu1  ;;  %12010 = vmatprep.subr.bf16.mxu0 %v15946_v37  ;;  %v6906_v52 = vadd.f32 %v20852_v28, %v6621_v39  ;;  %v6911_v36 = vadd.f32 %v20852_v28, %v6626_v6  ;;  %v6610_v53 = vmul.f32 %v20873_v55, %v21686_v40  ;;  %v20928_v19 = vpack.c.bf16 %v7002_v60, %v6997_v9  ;;  %v21687_v37 = vld [vmem:[#allocation39_spill] sm:$0xff]  ;;  %v21690_v39 = vld [vmem:[#allocation33_spill] sm:$0xff] }
 0x847   :  { %v20924_v15 = vrot.slane %v6852_v29, %v21662_v48  ;;  %12058 = vmatpush1.bf16.msra.mxu1 %v15941_v35  ;;  %v6962_v12 = vmax.f32 %v6912_v51, 0.0  ;;  %v20930_v32 = vpack.c.bf16 %v7001_v61, %v6996_v42  ;;  %v7007_v57 = vmul.f32 %v6957_v16, %v21687_v37  ;;  %v21689_v35 = vld [vmem:[#allocation73_spill] sm:$0xff]  ;;  %v15953_v31 = vld [vmem:[#allocation16 + $0x310] ss:$8 sps:$4 sm:$0xff]  }
 0x848   :  { %v15335_v33 = vpop.f32.mrf.mxu1  ;;  %12059 = vmatprep.subr.bf16.mxu1 %v15949_v59  ;;  %v6615_v3 = vmul.f32 %v20873_v55, %v21688_v27  ;;  %v6956_v23 = vmax.f32 %v6906_v52, 0.0  ;;  %v6620_v38 = vmul.f32 %v20873_v55, %v21689_v35  ;;  %v6961_v24 = vmax.f32 %v6911_v36, 0.0  ;;  %v21691_v52 = vld [vmem:[#allocation106_spill] sm:$0xff] }
 0x849   :  { %12011 = vmatpush1.bf16.msra.mxu0 %v15944_v54  ;;  %v6890_v4 = vadd.f32 %v20924_v15, %v6605_v46  ;;  %v6895_v30 = vadd.f32 %v20924_v15, %v6610_v53  ;;  %v7012_v59 = vmul.f32 %v6962_v12, %v21690_v39  ;;  %v6959_v46 = vmax.f32 %v20859_v20, 0.0  ;;  %v15961_v54 = vld [vmem:[#allocation16 + $0x304] ss:$8 sps:$4 sm:$0xff]   ;;  %v21693_v33 = vld [vmem:[#allocation60_spill] sm:$0xff] }
 0x84a   :  { %12012 = vmatprep.subr.bf16.mxu0 %v15952_v7  ;;  %v6900_v9 = vadd.f32 %v20924_v15, %v6615_v3  ;;  %v6905_v56 = vadd.f32 %v20924_v15, %v6620_v38  ;;  %v7006_v18 = vmul.f32 %v6956_v23, %v21687_v37  ;;  %v6964_v6 = vmax.f32 %v20862_v62, 0.0  ;;  %v15956_v7 = vld [vmem:[#allocation16 + $0x240] ss:$8 sps:$4 sm:$0xff]   ;;  %v15964_v62 = vld [vmem:[#allocation16 + $0x234] ss:$8 sps:$4 sm:$0xff]  }
 0x84b   :  { %12060 = vmatpush1.bf16.msra.mxu1 %v15947_v44  ;;  %v6940_v60 = vmax.f32 %v6890_v4, 0.0  ;;  %v6945_v42 = vmax.f32 %v6895_v30, 0.0  ;;  %v20945_v51 = vpack.c.bf16 %v7012_v59, %v7007_v57  ;;  %v7011_v16 = vmul.f32 %v6961_v24, %v21690_v39  ;;  %v21692_v44 = vld [vmem:[#allocation53_spill] sm:$0xff] }
 0x84c   :  { %12061 = vmatprep.subr.bf16.mxu1 %v15955_v1  ;;  %v6950_v29 = vmax.f32 %v6900_v9, 0.0  ;;  %v6955_v61 = vmax.f32 %v6905_v56, 0.0  ;;  %v6625_v36 = vmul.f32 %v20873_v55, %v21691_v52  ;;  %v6623_v20 = vmul.f32 %v20768_v17, %v21692_v44  ;;  %v15959_v57 = vld [vmem:[#allocation16 + $0x300] ss:$8 sps:$4 sm:$0xff]   ;;  %v15967_v30 = vld [vmem:[#allocation16 + $0x3f4] ss:$8 sps:$4 sm:$0xff]  }
 0x84d   :  { %12013 = vmatpush1.bf16.msra.mxu0 %v15950_v0  ;;  %v6990_v40 = vmul.f32 %v6940_v60, %v21502_v14  ;;  %v6995_v53 = vmul.f32 %v6945_v42, %v21506_v11  ;;  %v6630_v1 = vmul.f32 %v20873_v55, %v21693_v33  ;;  %v20958_v3 = vpack.c.bf16 %v7011_v16, %v7006_v18  ;;  %v21694_v0 = vld [vmem:[#allocation68_spill] sm:$0xff]  ;;  %v21695_v9 = vld [vmem:[#allocation98_spill] sm:$0xff] }
 0x84e   :  { %12014 = vmatprep.subr.bf16.mxu0 %v15958_v25  ;;  %v7000_v12 = vmul.f32 %v6950_v29, %v21675_v58  ;;  %v7005_v27 = vmul.f32 %v6955_v61, %v21677_v41  ;;  %v7009_v23 = vmul.f32 %v6959_v46, %v21687_v37  ;;  %v6628_v4 = vmul.f32 %v20768_v17, %v21694_v0  ;;  %v15962_v25 = vld [vmem:[#allocation16 + $0x230] ss:$8 sps:$4 sm:$0xff]   ;;  %v15970_v56 = vld [vmem:[#allocation16 + $0x224] ss:$8 sps:$4 sm:$0xff]  }
 0x84f   :  { %12062 = vmatpush1.bf16.msra.mxu1 %v15953_v31  ;;  %v20963_v35 = vpack.c.bf16 %v6995_v53, %v6990_v40  ;;  %v7014_v58 = vmul.f32 %v6964_v6, %v21690_v39  ;;  %v6910_v38 = vadd.f32 %v20924_v15, %v6625_v36  ;;  %v6915_v24 = vadd.f32 %v20924_v15, %v6630_v1  ;;  %v21696_v6 = vld [vmem:[#allocation101_spill] sm:$0xff]  ;;  %v15965_v42 = vld [vmem:[#allocation16 + $0x3f0] ss:$8 sps:$4 sm:$0xff]   ;;  %v21698_v52 = vld [vmem:[#allocation86_spill] sm:$0xff] }
 0x850   :  { %12063 = vmatprep.subr.bf16.mxu1 %v15961_v54  ;;  %v20968_v41 = vpack.c.bf16 %v7005_v27, %v7000_v12  ;;  %v6908_v59 = vadd.f32 %v20774_v63, %v6623_v20  ;;  %v6632_v31 = vmul.f32 %v20771_v47, %v21695_v9  ;;  %v6637_v60 = vmul.f32 %v20771_v47, %v21696_v6  ;;  %v21697_v61 = vld [vmem:[#allocation56_spill] sm:$0xff]  ;;  %v15973_v44 = vld [vmem:[#allocation16 + $0x3e4] ss:$8 sps:$4 sm:$0xff]   ;;  %v15968_v1 = vld [vmem:[#allocation16 + $0x220] ss:$8 sps:$4 sm:$0xff]  }
 0x851   :  { %12015 = vmatpush1.bf16.msra.mxu0 %v15956_v7  ;;  %v20973_v18 = vpack.c.bf16 %v7014_v58, %v7009_v23  ;;  %v6960_v46 = vmax.f32 %v6910_v38, 0.0  ;;  %v6965_v54 = vmax.f32 %v6915_v24, 0.0  ;;  %v6913_v29 = vadd.f32 %v20774_v63, %v6628_v4  ;;  %v21699_v40 = vld [vmem:[#allocation84_spill] sm:$0xff]  ;;  %v21700_v12 = vld [vmem:[#allocation99_spill] sm:$0xff]  ;;  %v15971_v24 = vld [vmem:[#allocation16 + $0x3e0] ss:$8 sps:$4 sm:$0xff]  }
 0x852   :  { %12016 = vmatprep.subr.bf16.mxu0 %v15964_v62  ;;  %v6958_v7 = vmax.f32 %v6908_v59, 0.0  ;;  %v6634_v16 = vmul.f32 %v20781_v5, %v21697_v61  ;;  %v6631_v36 = vmul.f32 %v20765_v50, %v21698_v52  ;;  %v6639_v53 = vmul.f32 %v20781_v5, %v21699_v40  ;;  %v15976_v4 = vld [vmem:[#allocation16 + $0x214] ss:$8 sps:$4 sm:$0xff]   ;;  %v21702_v9 = vld [vmem:[#allocation50_spill] sm:$0xff] }
 0x853   :  { %12064 = vmatpush1.bf16.msra.mxu1 %v15959_v57  ;;  %v7010_v20 = vmul.f32 %v6960_v46, %v21687_v37  ;;  %v7015_v62 = vmul.f32 %v6965_v54, %v21690_v39  ;;  %v6636_v33 = vmul.f32 %v20765_v50, %v21700_v12  ;;  %v6963_v57 = vmax.f32 %v6913_v29, 0.0  ;;  %v21701_v38 = vld [vmem:[#allocation55_spill] sm:$0xff]  ;;  %v21703_v6 = vld [vmem:[#allocation61_spill] sm:$0xff] }
 0x854   :  { %12065 = vmatprep.subr.bf16.mxu1 %v15967_v30  ;;  %v7008_v27 = vmul.f32 %v6958_v7, %v21687_v37  ;;  %v6919_v23 = vadd.f32 %v20790_v43, %v6634_v16  ;;  %v6917_v0 = vadd.f32 %v20865_v49, %v6632_v31  ;;  %v6924_v58 = vadd.f32 %v20790_v43, %v6639_v53  ;;  %v15974_v29 = vld [vmem:[#allocation16 + $0x210] ss:$8 sps:$4 sm:$0xff]   ;;  %v21704_v7 = vld [vmem:[#allocation41_spill] sm:$0xff] }
 0x855   :  { %12017 = vmatpush1.bf16.msra.mxu0 %v15962_v25  ;;  %v20991_v30 = vpack.c.bf16 %v7015_v62, %v7010_v20  ;;  %v6922_v5 = vadd.f32 %v20865_v49, %v6637_v60  ;;  %v6633_v50 = vmul.f32 %v20768_v17, %v21701_v38  ;;  %v7013_v25 = vmul.f32 %v6963_v57, %v21690_v39  ;;  %v21705_v52 = vld [vmem:[#allocation35_spill] sm:$0xff] }
 0x856   :  { %12018 = vmatprep.subr.bf16.mxu0 %v15970_v56  ;;  %v6969_v37 = vmax.f32 %v6919_v23, 0.0  ;;  %v6967_v59 = vmax.f32 %v6917_v0, 0.0  ;;  %v6638_v31 = vmul.f32 %v20768_v17, %v21702_v9  ;;  %v15979_v56 = vld [vmem:[#allocation16 + $0x3d4] ss:$8 sps:$4 sm:$0xff]   ;;  %v6974_v46 = vmax.f32 %v6924_v58, 0.0 }
 0x857   :  { %12066 = vmatpush2.bf16.msra.mxu1 %v15965_v42  ;;  %v6972_v54 = vmax.f32 %v6922_v5, 0.0  ;;  %v6918_v43 = vadd.f32 %v20774_v63, %v6633_v50  ;;  %v6635_v60 = vmul.f32 %v20873_v55, %v21703_v6  ;;  %v21003_v42 = vpack.c.bf16 %v7013_v25, %v7008_v27  ;;  %v15982_v17 = vld [vmem:[#allocation16 + $0x204] ss:$8 sps:$4 sm:$0xff]   ;;  %v15977_v53 = vld [vmem:[#allocation16 + $0x3d0] ss:$8 sps:$4 sm:$0xff]  }
 0x858   :  { %12067 = vmatprep.subr.bf16.mxu1 %v15973_v44  ;;  %v7019_v39 = vmul.f32 %v6969_v37, %v21704_v7  ;;  %v7017_v61 = vmul.f32 %v6967_v59, %v21704_v7  ;;  %v6923_v16 = vadd.f32 %v20774_v63, %v6638_v31  ;;  %v7024_v44 = vmul.f32 %v6974_v46, %v21705_v52  ;;  %v21706_v57 = vld [vmem:[#allocation107_spill] sm:$0xff]  ;;  %v15983_v37 = vld [vmem:[#allocation16 + $0x3c0] ss:$8 sps:$4 sm:$0xff]  }
 0x859   :  { %12019 = vmatpush1.bf16.msra.mxu0 %v15968_v1  ;;  %v7022_v20 = vmul.f32 %v6972_v54, %v21705_v52  ;;  %v6968_v62 = vmax.f32 %v6918_v43, 0.0  ;;  %v6916_v40 = vadd.f32 %v20852_v28, %v6631_v36  ;;  %v6921_v1 = vadd.f32 %v20852_v28, %v6636_v33  ;;  %v15985_v63 = vld [vmem:[#allocation16 + $0x3c4] ss:$8 sps:$4 sm:$0xff]   ;;  %v15980_v36 = vld [vmem:[#allocation16 + $0x200] ss:$8 sps:$4 sm:$0xff]  }
 0x85a   :  { %12020 = vmatprep.subr.bf16.mxu0 %v15976_v4  ;;  %v6973_v12 = vmax.f32 %v6923_v16, 0.0  ;;  %v6640_v27 = vmul.f32 %v20873_v55, %v21706_v57  ;;  %v6920_v23 = vadd.f32 %v20924_v15, %v6635_v60  ;;  %v21015_v0 = vpack.c.bf16 %v7024_v44, %v7019_v39  ;;  %v15991_v46 = vld [vmem:[#allocation16 + $0x3b4] ss:$8 sps:$4 sm:$0xff]   ;;  %v15986_v54 = vld [vmem:[#allocation16 + $0x2f0] ss:$8 sps:$4 sm:$0xff]  }
 0x85b   :  { %12068 = vmatpush2.bf16.msra.mxu1 %v15971_v24  ;;  %v21017_v4 = vpack.c.bf16 %v7022_v20, %v7017_v61  ;;  %v7018_v58 = vmul.f32 %v6968_v62, %v21704_v7  ;;  %v6966_v5 = vmax.f32 %v6916_v40, 0.0  ;;  %v6971_v50 = vmax.f32 %v6921_v1, 0.0  ;;  %v15988_v24 = vld [vmem:[#allocation16 + $0x2f4] ss:$8 sps:$4 sm:$0xff]   ;;  %v15994_v60 = vld [vmem:[#allocation16 + $0x2e4] ss:$8 sps:$4 sm:$0xff]  }
 0x85c   :  { %12069 = vmatprep.subr.bf16.mxu1 %v15979_v56  ;;  %v7023_v38 = vmul.f32 %v6973_v12, %v21705_v52  ;;  %v6925_v28 = vadd.f32 %v20924_v15, %v6640_v27  ;;  %v6970_v33 = vmax.f32 %v6920_v23, 0.0  ;;  %v15997_v61 = vld [vmem:[#allocation16 + $0x3a4] ss:$8 sps:$4 sm:$0xff]   ;;  %v15992_v16 = vld [vmem:[#allocation16 + $0x2e0] ss:$8 sps:$4 sm:$0xff]  }
 0x85d   :  { %12021 = vmatpush1.bf16.msra.mxu0 %v15974_v29  ;;  %v7016_v25 = vmul.f32 %v6966_v5, %v21704_v7  ;;  %v7021_v9 = vmul.f32 %v6971_v50, %v21705_v52  ;;  %v15989_v29 = vld [vmem:[#allocation16 + $0x3b0] ss:$8 sps:$4 sm:$0xff]   ;;  %v21708_v62 = vld [vmem:[#allocation34_spill] sm:$0xff]  ;;  %v16003_v40 = vld [vmem:[#allocation16 + $0x394] ss:$8 sps:$4 sm:$0xff]  }
 0x85e   :  { %12022 = vmatprep.subr.bf16.mxu0 %v15982_v17  ;;  %v21023_v59 = vpack.c.bf16 %v7023_v38, %v7018_v58  ;;  %v6975_v31 = vmax.f32 %v6925_v28, 0.0  ;;  %v7020_v56 = vmul.f32 %v6970_v33, %v21704_v7  ;;  %v16000_v7 = vld [vmem:[#allocation16 + $0x2d4] ss:$8 sps:$4 sm:$0xff]   ;;  %v15995_v17 = vld [vmem:[#allocation16 + $0x3a0] ss:$8 sps:$4 sm:$0xff]  }
 0x85f   :  { %12070 = vmatpush2.bf16.msra.mxu1 %v15977_v53  ;;  %v21027_v43 = vpack.c.bf16 %v7021_v9, %v7016_v25  ;;  %v21707_v44 = vld [vmem:[#allocation47_spill] sm:$0xff]  ;;  %v21709_v33 = vld [vmem:[#allocation89_spill] sm:$0xff]  ;;  %v21710_v25 = vld [vmem:[#allocation100_spill] sm:$0xff] }
 0x860   :  { %12071 = vmatprep.subr.bf16.mxu1 %v15985_v63  ;;  %v7025_v6 = vmul.f32 %v6975_v31, %v21705_v52  ;;  %v6602_v20 = vmul.f32 %v20771_v47, %v21707_v44  ;;  %v6607_v52 = vmul.f32 %v20771_v47, %v21708_v62  ;;  %v15998_v53 = vld [vmem:[#allocation16 + $0x2d0] ss:$8 sps:$4 sm:$0xff]   ;;  %v16006_v57 = vld [vmem:[#allocation16 + $0x2c4] ss:$8 sps:$4 sm:$0xff]   ;;  %v16004_v63 = vld [vmem:[#allocation16 + $0x2c0] ss:$8 sps:$4 sm:$0xff]  }
 0x861   :  { %12023 = vmatpush1.bf16.msra.mxu0 %v15980_v36  ;;  %v16001_v27 = vld [vmem:[#allocation16 + $0x390] ss:$8 sps:$4 sm:$0xff]   ;;  %v16009_v23 = vld [vmem:[#allocation16 + $0x384] ss:$8 sps:$4 sm:$0xff]   ;;  %v16012_v47 = vld [vmem:[#allocation16 + $0x2b4] ss:$8 sps:$4 sm:$0xff]  }
 0x862   :  { %12024 = vmatprep.subr.bf16.mxu0 %v15988_v24  ;;  %v21030_v39 = vpack.c.bf16 %v7025_v6, %v7020_v56  ;;  %v6887_v12 = vadd.f32 %v20865_v49, %v6602_v20  ;;  %v6892_v1 = vadd.f32 %v20865_v49, %v6607_v52  ;;  %v16007_v36 = vld [vmem:[#allocation16 + $0x380] ss:$8 sps:$4 sm:$0xff]   ;;  %v16015_v38 = vld [vmem:[#allocation16 + $0x574] ss:$8 sps:$4 sm:$0xff]   ;;  %v16010_v50 = vld [vmem:[#allocation16 + $0x2b0] ss:$8 sps:$4 sm:$0xff]   ;;  %v6595_v24 = vmul.f32 %v20873_v55, %v21709_v33 }
 0x863   :  { %12072 = vmatpush2.bf16.msra.mxu1 %v15983_v37  ;;  %v6600_v37 = vmul.f32 %v20873_v55, %v21710_v25  ;;  %v16018_v9 = vld [vmem:[#allocation16 + $0x2a4] ss:$8 sps:$4 sm:$0xff]   ;;  %v16013_v31 = vld [vmem:[#allocation16 + $0x570] ss:$8 sps:$4 sm:$0xff]   ;;  %v16016_v6 = vld [vmem:[#allocation16 + $0x2a0] ss:$8 sps:$4 sm:$0xff]  }
 0x864   :  { %12073 = vmatprep.subr.bf16.mxu1 %v15991_v46  ;;  %v6937_v58 = vmax.f32 %v6887_v12, 0.0  ;;  %v6942_v5 = vmax.f32 %v6892_v1, 0.0  ;;  %v6880_v56 = vadd.f32 %v20924_v15, %v6595_v24  ;;  %v16019_v55 = vld [vmem:[#allocation16 + $0x560] ss:$8 sps:$4 sm:$0xff]   ;;  %v16033_v20 = vld [vmem:[#allocation16 + $0x544] ss:$8 sps:$4 sm:$0xff]  }
 0x865   :  { %12025 = vmatpush2.bf16.msra.mxu0 %v15986_v54  ;;  %v6885_v46 = vadd.f32 %v20924_v15, %v6600_v37  ;;  %v7057_v54 = vrot.slane %v20898_v22, 4  ;;  %v16022_v15 = vld [vmem:[#allocation16 + $0x290] ss:$8 sps:$4 sm:$0xff]   ;;  %v16030_v22 = vld [vmem:[#allocation16 + $0x284] ss:$8 sps:$4 sm:$0xff]  }
 0x866   :  { %12026 = vmatprep.subr.bf16.mxu0 %v15994_v60  ;;  %v6987_v49 = vmul.f32 %v6937_v58, %v21502_v14  ;;  %v6992_v28 = vmul.f32 %v6942_v5, %v21506_v11  ;;  %v16021_v14 = vld [vmem:[#allocation16 + $0x564] ss:$8 sps:$4 sm:$0xff]   ;;  %v16024_v60 = vld [vmem:[#allocation16 + $0x294] ss:$8 sps:$4 sm:$0xff]   ;;  %v16028_v62 = vld [vmem:[#allocation16 + $0x280] ss:$8 sps:$4 sm:$0xff]  }
 0x867   :  { %12074 = vmatpush2.bf16.msra.mxu1 %v15989_v29  ;;  %v6930_v29 = vmax.f32 %v6880_v56, 0.0  ;;  %v16036_v52 = vld [vmem:[#allocation16 + $0x474] ss:$8 sps:$4 sm:$0xff]   ;;  %v16034_v1 = vld [vmem:[#allocation16 + $0x470] ss:$8 sps:$4 sm:$0xff]  }
 0x868   :  { %12075 = vmatprep.subr.bf16.mxu1 %v15997_v61  ;;  %v21047_v11 = vpack.c.bf16 %v6992_v28, %v6987_v49  ;;  %v6935_v61 = vmax.f32 %v6885_v46, 0.0  ;;  %v16039_v12 = vld [vmem:[#allocation16 + $0x534] ss:$8 sps:$4 sm:$0xff]   ;;  %v16043_v58 = vld [vmem:[#allocation16 + $0x520] ss:$8 sps:$4 sm:$0xff]  }
 0x869   :  { %12027 = vmatpush2.bf16.msra.mxu0 %v15992_v16  ;;  %v16027_v16 = vld [vmem:[#allocation16 + $0x554] ss:$8 sps:$4 sm:$0xff]   ;;  %v16052_v49 = vld [vmem:[#allocation16 + $0x440] ss:$8 sps:$4 sm:$0xff]   ;;  %v16058_v25 = vld [vmem:[#allocation16 + $0x430] ss:$8 sps:$4 sm:$0xff]  }
 0x86a   :  { %12028 = vmatprep.subr.bf16.mxu0 %v16000_v7  ;;  %v16025_v7 = vld [vmem:[#allocation16 + $0x550] ss:$8 sps:$4 sm:$0xff]   ;;  %v6985_v44 = vmul.f32 %v6935_v61, %v21499_v8  ;;  %v16045_v8 = vld [vmem:[#allocation16 + $0x524] ss:$8 sps:$4 sm:$0xff]   ;;  %v16051_v5 = vld [vmem:[#allocation16 + $0x514] ss:$8 sps:$4 sm:$0xff]  }
 0x86b   :  { %12076 = vmatpush2.bf16.msra.mxu1 %v15995_v17  ;;  %v6980_v17 = vmul.f32 %v6930_v29, %v21497_v34  ;;  %v16037_v34 = vld [vmem:[#allocation16 + $0x530] ss:$8 sps:$4 sm:$0xff]   ;;  %v16060_v28 = vld [vmem:[#allocation16 + $0x434] ss:$8 sps:$4 sm:$0xff]   ;;  %v16055_v33 = vld [vmem:[#allocation16 + $0x500] ss:$8 sps:$4 sm:$0xff]  }
 0x86c   :  { %12077 = vmatprep.subr.bf16.mxu1 %v16003_v40  ;;  %v16031_v40 = vld [vmem:[#allocation16 + $0x540] ss:$8 sps:$4 sm:$0xff]   ;;  %v16063_v24 = vld [vmem:[#allocation16 + $0x5f4] ss:$8 sps:$4 sm:$0xff]   ;;  %v16066_v37 = vld [vmem:[#allocation16 + $0x424] ss:$8 sps:$4 sm:$0xff]  }
 0x86d   :  { %12029 = vmatpush2.bf16.msra.mxu0 %v15998_v53  ;;  %v7030_v53 = vpack.c.bf16 %v6985_v44, %v6980_v17  ;;  %v16064_v56 = vld [vmem:[#allocation16 + $0x420] ss:$8 sps:$4 sm:$0xff]   ;;  %v16072_v46 = vld [vmem:[#allocation16 + $0x414] ss:$8 sps:$4 sm:$0xff]   ;;  %v16081_v29 = vld [vmem:[#allocation16 + $0x5c4] ss:$8 sps:$4 sm:$0xff]  }
 0x86e   :  { %12030 = vmatprep.subr.bf16.mxu0 %v16006_v57  ;;  %v16042_v57 = vld [vmem:[#allocation16 + $0x464] ss:$8 sps:$4 sm:$0xff]   ;;  %v16076_v61 = vld [vmem:[#allocation16 + $0x400] ss:$8 sps:$4 sm:$0xff]   ;;  %v16085_v44 = vld [vmem:[#allocation16 + $0x5b0] ss:$8 sps:$4 sm:$0xff]  }
 0x86f   :  { %12078 = vmatpush2.bf16.msra.mxu1 %v16001_v27  ;;  %v7060_v27 = vrot.slane %v7030_v53, 4  ;;  %v16090_v17 = vld [vmem:[#allocation16 + $0x4e4] ss:$8 sps:$4 sm:$0xff]  }
 0x870   :  { %12079 = vmatprep.subr.bf16.mxu1 %v16009_v23  ;;  %v16040_v23 = vld [vmem:[#allocation16 + $0x460] ss:$8 sps:$4 sm:$0xff]  }
 0x871   :  { %12031 = vmatpush2.bf16.msra.mxu0 %v16004_v63  ;;  %v16048_v63 = vld [vmem:[#allocation16 + $0x454] ss:$8 sps:$4 sm:$0xff]  }
 0x872   :  { %12032 = vmatprep.subr.bf16.mxu0 %v16012_v47  ;;  %v16046_v47 = vld [vmem:[#allocation16 + $0x450] ss:$8 sps:$4 sm:$0xff]  }
 0x873   :  { %12080 = vmatpush2.bf16.msra.mxu1 %v16007_v36  ;;  %v16054_v36 = vld [vmem:[#allocation16 + $0x444] ss:$8 sps:$4 sm:$0xff]  }
 0x874   :  { %12131 = vmatprep.subr.bf16.mxu1 %v16015_v38  ;;  %v16049_v38 = vld [vmem:[#allocation16 + $0x510] ss:$8 sps:$4 sm:$0xff]  }
 0x875   :  { %12033 = vmatpush2.bf16.msra.mxu0 %v16010_v50  ;;  %v16057_v50 = vld [vmem:[#allocation16 + $0x504] ss:$8 sps:$4 sm:$0xff]  }
 0x876   :  { %12082 = vmatmul.mubr.bf16.vlgmr.msra.gmra.mxu1 %v7057_v54  ;;  %12034 = vmatprep.subr.bf16.mxu0 %v16018_v9  ;;  %v16061_v9 = vld [vmem:[#allocation16 + $0x5f0] ss:$8 sps:$4 sm:$0xff]   ;;  %v16067_v54 = vld [vmem:[#allocation16 + $0x5e0] ss:$8 sps:$4 sm:$0xff]  }
 0x877   :  { %12132 = vmatpush1.bf16.msra.mxu1 %v16013_v31  ;;  %12163 = vmatprep.mubr.bf16.mxu1 %v21047_v11  ;;  %v16069_v31 = vld [vmem:[#allocation16 + $0x5e4] ss:$8 sps:$4 sm:$0xff]  }
 0x878   :  { %12133 = vmatprep.subr.bf16.mxu1 %v16021_v14  ;;  %v16075_v14 = vld [vmem:[#allocation16 + $0x5d4] ss:$8 sps:$4 sm:$0xff]  }
 0x879   :  { %12035 = vmatpush2.bf16.msra.mxu0 %v16016_v6  ;;  %v16070_v6 = vld [vmem:[#allocation16 + $0x410] ss:$8 sps:$4 sm:$0xff]  }
 0x87a   :  { %12036 = vmatprep.subr.bf16.mxu0 %v16024_v60  ;;  %v16078_v60 = vld [vmem:[#allocation16 + $0x404] ss:$8 sps:$4 sm:$0xff]  }
 0x87b   :  { %12134 = vmatpush1.bf16.msra.mxu1 %v16019_v55  ;;  %v16073_v55 = vld [vmem:[#allocation16 + $0x5d0] ss:$8 sps:$4 sm:$0xff]  }
 0x87c   :  { %12135 = vmatprep.subr.bf16.mxu1 %v16027_v16  ;;  %v16084_v16 = vld [vmem:[#allocation16 + $0x4f4] ss:$8 sps:$4 sm:$0xff]  }
 0x87d   :  { %12037 = vmatpush2.bf16.msra.mxu0 %v16022_v15  ;;  %v16079_v15 = vld [vmem:[#allocation16 + $0x5c0] ss:$8 sps:$4 sm:$0xff]  }
 0x87e   :  { %12038 = vmatprep.subr.bf16.mxu0 %v16030_v22  ;;  %v16087_v22 = vld [vmem:[#allocation16 + $0x5b4] ss:$8 sps:$4 sm:$0xff]  }
 0x87f   :  { %12136 = vmatpush1.bf16.msra.mxu1 %v16025_v7  ;;  %v16082_v7 = vld [vmem:[#allocation16 + $0x4f0] ss:$8 sps:$4 sm:$0xff]  }
 0x880   :  { %12137 = vmatprep.subr.bf16.mxu1 %v16033_v20  ;;  %v16093_v20 = vld [vmem:[#allocation16 + $0x5a4] ss:$8 sps:$4 sm:$0xff]  }
 0x881   :  { %12039 = vmatpush2.bf16.msra.mxu0 %v16028_v62  ;;  %v16088_v62 = vld [vmem:[#allocation16 + $0x4e0] ss:$8 sps:$4 sm:$0xff]  }
 0x882   :  { %12090 = vmatprep.subr.bf16.mxu0 %v16036_v52  ;;  %v16096_v52 = vld [vmem:[#allocation16 + $0x4d4] ss:$8 sps:$4 sm:$0xff]  }
 0x883   :  { %12138 = vmatpush1.bf16.msra.mxu1 %v16031_v40  ;;  %v16091_v40 = vld [vmem:[#allocation16 + $0x5a0] ss:$8 sps:$4 sm:$0xff]  }
 0x884   :  { %12041 = vmatmul.mubr.bf16.vlgmr.msra.gmra.mxu0 %v7030_v53  ;;  %12139 = vmatprep.subr.bf16.mxu1 %v16039_v12  ;;  %v16099_v53 = vld [vmem:[#allocation16 + $0x594] ss:$8 sps:$4 sm:$0xff]   ;;  %v16094_v12 = vld [vmem:[#allocation16 + $0x4d0] ss:$8 sps:$4 sm:$0xff]  }
 0x885   :  { %12091 = vmatpush1.bf16.msra.mxu0 %v16034_v1  ;;  %12122 = vmatprep.mubr.bf16.mxu0 %v7060_v27  ;;  %v16102_v1 = vld [vmem:[#allocation16 + $0x4c4] ss:$8 sps:$4 sm:$0xff]  }
 0x886   :  { %12092 = vmatprep.subr.bf16.mxu0 %v16042_v57  ;;  %v16097_v57 = vld [vmem:[#allocation16 + $0x590] ss:$8 sps:$4 sm:$0xff]   ;;  %v16105_v27 = vld [vmem:[#allocation16 + $0x584] ss:$8 sps:$4 sm:$0xff]  }
 0x887   :  { %12140 = vmatpush1.bf16.msra.mxu1 %v16037_v34  ;;  %v16100_v34 = vld [vmem:[#allocation16 + $0x4c0] ss:$8 sps:$4 sm:$0xff]  }
 0x888   :  { %12141 = vmatprep.subr.bf16.mxu1 %v16045_v8  ;;  %v16108_v8 = vld [vmem:[#allocation16 + $0x4b4] ss:$8 sps:$4 sm:$0xff]  }
 0x889   :  { %12093 = vmatpush1.bf16.msra.mxu0 %v16040_v23  ;;  %v16103_v23 = vld [vmem:[#allocation16 + $0x580] ss:$8 sps:$4 sm:$0xff]  }
 0x88a   :  { %12094 = vmatprep.subr.bf16.mxu0 %v16048_v63  ;;  %v16111_v63 = vld [vmem:[#allocation16 + $0x774] ss:$8 sps:$4 sm:$0xff]  }
 0x88b   :  { %12142 = vmatpush1.bf16.msra.mxu1 %v16043_v58  ;;  %v16106_v58 = vld [vmem:[#allocation16 + $0x4b0] ss:$8 sps:$4 sm:$0xff]  }
 0x88c   :  { %12143 = vmatprep.subr.bf16.mxu1 %v16051_v5  ;;  %v16114_v5 = vld [vmem:[#allocation16 + $0x4a4] ss:$8 sps:$4 sm:$0xff]  }
 0x88d   :  { %12095 = vmatpush1.bf16.msra.mxu0 %v16046_v47  ;;  %v16109_v47 = vld [vmem:[#allocation16 + $0x770] ss:$8 sps:$4 sm:$0xff]  }
 0x88e   :  { %12096 = vmatprep.subr.bf16.mxu0 %v16054_v36  ;;  %v16117_v36 = vld [vmem:[#allocation16 + $0x764] ss:$8 sps:$4 sm:$0xff]  }
 0x88f   :  { %12144 = vmatpush1.bf16.msra.mxu1 %v16049_v38  ;;  %v7071_v38 = vrot.slane %v20893_v26, 4 }
 0x890   :  { %12145 = vmatprep.subr.bf16.mxu1 %v16057_v50  ;;  %v16112_v50 = vld [vmem:[#allocation16 + $0x4a0] ss:$8 sps:$4 sm:$0xff]  }
 0x891   :  { %12097 = vmatpush1.bf16.msra.mxu0 %v16052_v49  ;;  %v16120_v49 = vld [vmem:[#allocation16 + $0x494] ss:$8 sps:$4 sm:$0xff]  }
 0x892   :  { %12098 = vmatprep.subr.bf16.mxu0 %v16060_v28  ;;  %v16115_v28 = vld [vmem:[#allocation16 + $0x760] ss:$8 sps:$4 sm:$0xff]  }
 0x893   :  { %12146 = vmatpush1.bf16.msra.mxu1 %v16055_v33  ;;  %v16123_v33 = vld [vmem:[#allocation16 + $0x754] ss:$8 sps:$4 sm:$0xff]  }
 0x894   :  { %12147 = vmatprep.subr.bf16.mxu1 %v16063_v24  ;;  %v16118_v24 = vld [vmem:[#allocation16 + $0x490] ss:$8 sps:$4 sm:$0xff]  }
 0x895   :  { %12099 = vmatpush1.bf16.msra.mxu0 %v16058_v25  ;;  %v16126_v25 = vld [vmem:[#allocation16 + $0x484] ss:$8 sps:$4 sm:$0xff]  }
 0x896   :  { %12100 = vmatprep.subr.bf16.mxu0 %v16066_v37  ;;  %v16121_v37 = vld [vmem:[#allocation16 + $0x750] ss:$8 sps:$4 sm:$0xff]  }
 0x897   :  { %12148 = vmatpush2.bf16.msra.mxu1 %v16061_v9  ;;  %v16129_v9 = vld [vmem:[#allocation16 + $0x744] ss:$8 sps:$4 sm:$0xff]  }
 0x898   :  { %12149 = vmatprep.subr.bf16.mxu1 %v16069_v31  ;;  %v16124_v31 = vld [vmem:[#allocation16 + $0x480] ss:$8 sps:$4 sm:$0xff]  }
 0x899   :  { %12101 = vmatpush1.bf16.msra.mxu0 %v16064_v56  ;;  %v16132_v56 = vld [vmem:[#allocation16 + $0x674] ss:$8 sps:$4 sm:$0xff]  }
 0x89a   :  { %12102 = vmatprep.subr.bf16.mxu0 %v16072_v46  ;;  %v16135_v46 = vld [vmem:[#allocation16 + $0x734] ss:$8 sps:$4 sm:$0xff]  }
 0x89b   :  { %12150 = vmatpush2.bf16.msra.mxu1 %v16067_v54  ;;  %v16130_v54 = vld [vmem:[#allocation16 + $0x670] ss:$8 sps:$4 sm:$0xff]  }
 0x89c   :  { %12151 = vmatprep.subr.bf16.mxu1 %v16075_v14  ;;  %v7059_v14 = vrot.slane %v20828_v2, 4  ;;  %v16150_v2 = vld [vmem:[#allocation16 + $0x644] ss:$8 sps:$4 sm:$0xff]  }
 0x89d   :  { %12103 = vmatpush1.bf16.msra.mxu0 %v16070_v6  ;;  %v16138_v6 = vld [vmem:[#allocation16 + $0x664] ss:$8 sps:$4 sm:$0xff]  }
 0x89e   :  { %12104 = vmatprep.subr.bf16.mxu0 %v16078_v60  ;;  %v16133_v60 = vld [vmem:[#allocation16 + $0x730] ss:$8 sps:$4 sm:$0xff]  }
 0x89f   :  { %12152 = vmatpush2.bf16.msra.mxu1 %v16073_v55  ;;  %v16141_v55 = vld [vmem:[#allocation16 + $0x724] ss:$8 sps:$4 sm:$0xff]  }
 0x8a0   :  { %12153 = vmatprep.subr.bf16.mxu1 %v16081_v29  ;;  %v16136_v29 = vld [vmem:[#allocation16 + $0x660] ss:$8 sps:$4 sm:$0xff]  }
 0x8a1   :  { %12105 = vmatpush1.bf16.msra.mxu0 %v16076_v61  ;;  %v16144_v61 = vld [vmem:[#allocation16 + $0x654] ss:$8 sps:$4 sm:$0xff]  }
 0x8a2   :  { %12106 = vmatprep.subr.bf16.mxu0 %v16084_v16  ;;  %v16139_v16 = vld [vmem:[#allocation16 + $0x720] ss:$8 sps:$4 sm:$0xff]  }
 0x8a3   :  { %12154 = vmatpush2.bf16.msra.mxu1 %v16079_v15  ;;  %v16147_v15 = vld [vmem:[#allocation16 + $0x714] ss:$8 sps:$4 sm:$0xff]  }
 0x8a4   :  { %12155 = vmatprep.subr.bf16.mxu1 %v16087_v22  ;;  %v16142_v22 = vld [vmem:[#allocation16 + $0x650] ss:$8 sps:$4 sm:$0xff]  }
 0x8a5   :  { %12107 = vmatpush2.bf16.msra.mxu0 %v16082_v7  ;;  %v16145_v7 = vld [vmem:[#allocation16 + $0x710] ss:$8 sps:$4 sm:$0xff]  }
 0x8a6   :  { %12108 = vmatprep.subr.bf16.mxu0 %v16090_v17  ;;  %v16153_v17 = vld [vmem:[#allocation16 + $0x704] ss:$8 sps:$4 sm:$0xff]  }
 0x8a7   :  { %12156 = vmatpush2.bf16.msra.mxu1 %v16085_v44  ;;  %v16148_v44 = vld [vmem:[#allocation16 + $0x640] ss:$8 sps:$4 sm:$0xff]  }
 0x8a8   :  { %12157 = vmatprep.subr.bf16.mxu1 %v16093_v20  ;;  %v16156_v20 = vld [vmem:[#allocation16 + $0x634] ss:$8 sps:$4 sm:$0xff]  }
 0x8a9   :  { %12109 = vmatpush2.bf16.msra.mxu0 %v16088_v62  ;;  %v16151_v62 = vld [vmem:[#allocation16 + $0x700] ss:$8 sps:$4 sm:$0xff]  }
 0x8aa   :  { %12110 = vmatprep.subr.bf16.mxu0 %v16096_v52  ;;  %v16159_v52 = vld [vmem:[#allocation16 + $0x7f4] ss:$8 sps:$4 sm:$0xff]  }
 0x8ab   :  { %12158 = vmatpush2.bf16.msra.mxu1 %v16091_v40  ;;  %v16154_v40 = vld [vmem:[#allocation16 + $0x630] ss:$8 sps:$4 sm:$0xff]  }
 0x8ac   :  { %12159 = vmatprep.subr.bf16.mxu1 %v16099_v53  ;;  %v16162_v53 = vld [vmem:[#allocation16 + $0x624] ss:$8 sps:$4 sm:$0xff]  }
 0x8ad   :  { %12111 = vmatpush2.bf16.msra.mxu0 %v16094_v12  ;;  %v16157_v12 = vld [vmem:[#allocation16 + $0x7f0] ss:$8 sps:$4 sm:$0xff]  }
 0x8ae   :  { %12112 = vmatprep.subr.bf16.mxu0 %v16102_v1  ;;  %v16165_v1 = vld [vmem:[#allocation16 + $0x7e4] ss:$8 sps:$4 sm:$0xff]  }
 0x8af   :  { %12160 = vmatpush2.bf16.msra.mxu1 %v16097_v57  ;;  %v16160_v57 = vld [vmem:[#allocation16 + $0x620] ss:$8 sps:$4 sm:$0xff]  }
 0x8b0   :  { %12161 = vmatprep.subr.bf16.mxu1 %v16105_v27  ;;  %v16168_v27 = vld [vmem:[#allocation16 + $0x614] ss:$8 sps:$4 sm:$0xff]  }
 0x8b1   :  { %12113 = vmatpush2.bf16.msra.mxu0 %v16100_v34  ;;  %v16163_v34 = vld [vmem:[#allocation16 + $0x7e0] ss:$8 sps:$4 sm:$0xff]  }
 0x8b2   :  { %12114 = vmatprep.subr.bf16.mxu0 %v16108_v8  ;;  %v16171_v8 = vld [vmem:[#allocation16 + $0x7d4] ss:$8 sps:$4 sm:$0xff]  }
 0x8b3   :  { %12162 = vmatpush2.bf16.msra.mxu1 %v16103_v23  ;;  %v16166_v23 = vld [vmem:[#allocation16 + $0x610] ss:$8 sps:$4 sm:$0xff]  }
 0x8b4   :  { %12213 = vmatprep.subr.bf16.mxu1 %v16111_v63  ;;  %v16174_v63 = vld [vmem:[#allocation16 + $0x604] ss:$8 sps:$4 sm:$0xff]  }
 0x8b5   :  { %12115 = vmatpush2.bf16.msra.mxu0 %v16106_v58  ;;  %v16169_v58 = vld [vmem:[#allocation16 + $0x7d0] ss:$8 sps:$4 sm:$0xff]  }
 0x8b6   :  { %12164 = vmatmul.mubr.bf16.vlgmr.msra.gmra.mxu1 %v20893_v26  ;;  %12116 = vmatprep.subr.bf16.mxu0 %v16114_v5  ;;  %v16127_v26 = vld [vmem:[#allocation16 + $0x740] ss:$8 sps:$4 sm:$0xff]   ;;  %v16177_v5 = vld [vmem:[#allocation16 + $0x7c4] ss:$8 sps:$4 sm:$0xff]  }
 0x8b7   :  { %12214 = vmatpush1.bf16.msra.mxu1 %v16109_v47  ;;  %12245 = vmatprep.mubr.bf16.mxu1 %v7071_v38  ;;  %v16172_v47 = vld [vmem:[#allocation16 + $0x600] ss:$8 sps:$4 sm:$0xff]  }
 0x8b8   :  { %12215 = vmatprep.subr.bf16.mxu1 %v16117_v36  ;;  %v16180_v36 = vld [vmem:[#allocation16 + $0x6f4] ss:$8 sps:$4 sm:$0xff]   ;;  %v16175_v38 = vld [vmem:[#allocation16 + $0x7c0] ss:$8 sps:$4 sm:$0xff]  }
 0x8b9   :  { %12117 = vmatpush2.bf16.msra.mxu0 %v16112_v50  ;;  %v16183_v50 = vld [vmem:[#allocation16 + $0x7b4] ss:$8 sps:$4 sm:$0xff]  }
 0x8ba   :  { %12118 = vmatprep.subr.bf16.mxu0 %v16120_v49  ;;  %v16178_v49 = vld [vmem:[#allocation16 + $0x6f0] ss:$8 sps:$4 sm:$0xff]  }
 0x8bb   :  { %12216 = vmatpush1.bf16.msra.mxu1 %v16115_v28  ;;  %v16186_v28 = vld [vmem:[#allocation16 + $0x6e4] ss:$8 sps:$4 sm:$0xff]  }
 0x8bc   :  { %12217 = vmatprep.subr.bf16.mxu1 %v16123_v33  ;;  %v16181_v33 = vld [vmem:[#allocation16 + $0x7b0] ss:$8 sps:$4 sm:$0xff]  }
 0x8bd   :  { %12119 = vmatpush2.bf16.msra.mxu0 %v16118_v24  ;;  %v16189_v24 = vld [vmem:[#allocation16 + $0x7a4] ss:$8 sps:$4 sm:$0xff]  }
 0x8be   :  { %12120 = vmatprep.subr.bf16.mxu0 %v16126_v25  ;;  %v16184_v25 = vld [vmem:[#allocation16 + $0x6e0] ss:$8 sps:$4 sm:$0xff]  }
 0x8bf   :  { %12218 = vmatpush1.bf16.msra.mxu1 %v16121_v37  ;;  %v16192_v37 = vld [vmem:[#allocation16 + $0x6d4] ss:$8 sps:$4 sm:$0xff]  }
 0x8c0   :  { %12219 = vmatprep.subr.bf16.mxu1 %v16129_v9  ;;  %v16187_v9 = vld [vmem:[#allocation16 + $0x7a0] ss:$8 sps:$4 sm:$0xff]  }
 0x8c1   :  { %12121 = vmatpush2.bf16.msra.mxu0 %v16124_v31  ;;  %v16195_v31 = vld [vmem:[#allocation16 + $0x794] ss:$8 sps:$4 sm:$0xff]  }
 0x8c2   :  { %12172 = vmatprep.subr.bf16.mxu0 %v16132_v56  ;;  %v16190_v56 = vld [vmem:[#allocation16 + $0x6d0] ss:$8 sps:$4 sm:$0xff]  }
 0x8c3   :  { %12220 = vmatpush1.bf16.msra.mxu1 %v16127_v26  ;;  %v16198_v26 = vld [vmem:[#allocation16 + $0x6c4] ss:$8 sps:$4 sm:$0xff]  }
 0x8c4   :  { %12123 = vmatmul.mubr.bf16.vlgmr.msra.gmra.mxu0 %v7059_v14  ;;  %12221 = vmatprep.subr.bf16.mxu1 %v16135_v46  ;;  %v16193_v46 = vld [vmem:[#allocation16 + $0x790] ss:$8 sps:$4 sm:$0xff]   ;;  %v16196_v14 = vld [vmem:[#allocation16 + $0x6c0] ss:$8 sps:$4 sm:$0xff]  }
 0x8c5   :  { %12173 = vmatpush1.bf16.msra.mxu0 %v16130_v54  ;;  %12204 = vmatprep.mubr.bf16.mxu0 %v20836_v13  ;;  %v16201_v54 = vld [vmem:[#allocation16 + $0x784] ss:$8 sps:$4 sm:$0xff]  }
 0x8c6   :  { %12174 = vmatprep.subr.bf16.mxu0 %v16138_v6  ;;  %v16204_v6 = vld [vmem:[#allocation16 + $0x6b4] ss:$8 sps:$4 sm:$0xff]  }
 0x8c7   :  { %12222 = vmatpush1.bf16.msra.mxu1 %v16133_v60  ;;  %v16199_v60 = vld [vmem:[#allocation16 + $0x780] ss:$8 sps:$4 sm:$0xff]  }
 0x8c8   :  { %12223 = vmatprep.subr.bf16.mxu1 %v16141_v55  ;;  %v16207_v55 = vld [vmem:[#allocation16 + $0x974] ss:$8 sps:$4 sm:$0xff]  }
 0x8c9   :  { %12175 = vmatpush1.bf16.msra.mxu0 %v16136_v29  ;;  %v16202_v29 = vld [vmem:[#allocation16 + $0x6b0] ss:$8 sps:$4 sm:$0xff]  }
 0x8ca   :  { %12176 = vmatprep.subr.bf16.mxu0 %v16144_v61  ;;  %v16210_v61 = vld [vmem:[#allocation16 + $0x6a4] ss:$8 sps:$4 sm:$0xff]  }
 0x8cb   :  { %12224 = vmatpush1.bf16.msra.mxu1 %v16139_v16  ;;  %v16205_v16 = vld [vmem:[#allocation16 + $0x970] ss:$8 sps:$4 sm:$0xff]  }
 0x8cc   :  { %12225 = vmatprep.subr.bf16.mxu1 %v16147_v15  ;;  %v16213_v15 = vld [vmem:[#allocation16 + $0x964] ss:$8 sps:$4 sm:$0xff]  }
 0x8cd   :  { %12177 = vmatpush1.bf16.msra.mxu0 %v16142_v22  ;;  %v7075_v22 = vrot.slane %v20963_v35, 4 }
 0x8ce   :  { %12178 = vmatprep.subr.bf16.mxu0 %v16150_v2  ;;  %v16208_v2 = vld [vmem:[#allocation16 + $0x6a0] ss:$8 sps:$4 sm:$0xff]  }
 0x8cf   :  { %12226 = vmatpush1.bf16.msra.mxu1 %v16145_v7 }
 0x8d0   :  { %12227 = vmatprep.subr.bf16.mxu1 %v16153_v17  ;;  %v16216_v17 = vld [vmem:[#allocation16 + $0x694] ss:$8 sps:$4 sm:$0xff]  }
 0x8d1   :  { %12179 = vmatpush1.bf16.msra.mxu0 %v16148_v44  ;;  %v16211_v44 = vld [vmem:[#allocation16 + $0x960] ss:$8 sps:$4 sm:$0xff]  }
 0x8d2   :  { %12180 = vmatprep.subr.bf16.mxu0 %v16156_v20 }
 0x8d3   :  { %12228 = vmatpush1.bf16.msra.mxu1 %v16151_v62  ;;  %v16219_v62 = vld [vmem:[#allocation16 + $0x954] ss:$8 sps:$4 sm:$0xff]  }
 0x8d4   :  { %12229 = vmatprep.subr.bf16.mxu1 %v16159_v52  ;;  %v16214_v52 = vld [vmem:[#allocation16 + $0x690] ss:$8 sps:$4 sm:$0xff]  }
 0x8d5   :  { %12181 = vmatpush1.bf16.msra.mxu0 %v16154_v40 }
 0x8d6   :  { %12182 = vmatprep.subr.bf16.mxu0 %v16162_v53  ;;  %v16222_v53 = vld [vmem:[#allocation16 + $0x684] ss:$8 sps:$4 sm:$0xff]  }
 0x8d7   :  { %12230 = vmatpush2.bf16.msra.mxu1 %v16157_v12  ;;  %v16217_v12 = vld [vmem:[#allocation16 + $0x950] ss:$8 sps:$4 sm:$0xff]  }
 0x8d8   :  { %12231 = vmatprep.subr.bf16.mxu1 %v16165_v1 }
 0x8d9   :  { %12183 = vmatpush1.bf16.msra.mxu0 %v16160_v57  ;;  %v16225_v57 = vld [vmem:[#allocation16 + $0x944] ss:$8 sps:$4 sm:$0xff]  }
 0x8da   :  { %12184 = vmatprep.subr.bf16.mxu0 %v16168_v27  ;;  %v16228_v27 = vld [vmem:[#allocation16 + $0x874] ss:$8 sps:$4 sm:$0xff]  }
 0x8db   :  { %12232 = vmatpush2.bf16.msra.mxu1 %v16163_v34  ;;  %v16223_v34 = vld [vmem:[#allocation16 + $0x940] ss:$8 sps:$4 sm:$0xff]  }
 0x8dc   :  { %12233 = vmatprep.subr.bf16.mxu1 %v16171_v8  ;;  %v16231_v8 = vld [vmem:[#allocation16 + $0x934] ss:$8 sps:$4 sm:$0xff]  }
 0x8dd   :  { %12185 = vmatpush1.bf16.msra.mxu0 %v16166_v23  ;;  %v16226_v23 = vld [vmem:[#allocation16 + $0x870] ss:$8 sps:$4 sm:$0xff]  }
 0x8de   :  { %12186 = vmatprep.subr.bf16.mxu0 %v16174_v63  ;;  %v16234_v63 = vld [vmem:[#allocation16 + $0x864] ss:$8 sps:$4 sm:$0xff]  }
 0x8df   :  { %12234 = vmatpush2.bf16.msra.mxu1 %v16169_v58  ;;  %v7073_v58 = vrot.slane %v20824_v21, 4 }
 0x8e0   :  { %12235 = vmatprep.subr.bf16.mxu1 %v16177_v5  ;;  %v16229_v5 = vld [vmem:[#allocation16 + $0x930] ss:$8 sps:$4 sm:$0xff]  }
 0x8e1   :  { %12187 = vmatpush1.bf16.msra.mxu0 %v16172_v47 }
 0x8e2   :  { %12188 = vmatprep.subr.bf16.mxu0 %v16180_v36  ;;  %v16237_v36 = vld [vmem:[#allocation16 + $0x924] ss:$8 sps:$4 sm:$0xff]  }
 0x8e3   :  { %12236 = vmatpush2.bf16.msra.mxu1 %v16175_v38 }
 0x8e4   :  { %12237 = vmatprep.subr.bf16.mxu1 %v16183_v50  ;;  %v16232_v50 = vld [vmem:[#allocation16 + $0x860] ss:$8 sps:$4 sm:$0xff]  }
 0x8e5   :  { %12189 = vmatpush2.bf16.msra.mxu0 %v16178_v49 }
 0x8e6   :  { %12190 = vmatprep.subr.bf16.mxu0 %v16186_v28  ;;  %v16240_v28 = vld [vmem:[#allocation16 + $0x854] ss:$8 sps:$4 sm:$0xff]  }
 0x8e7   :  { %12238 = vmatpush2.bf16.msra.mxu1 %v16181_v33 }
 0x8e8   :  { %12239 = vmatprep.subr.bf16.mxu1 %v16189_v24  ;;  %v16235_v24 = vld [vmem:[#allocation16 + $0x920] ss:$8 sps:$4 sm:$0xff]  }
 0x8e9   :  { %12191 = vmatpush2.bf16.msra.mxu0 %v16184_v25 }
 0x8ea   :  { %12192 = vmatprep.subr.bf16.mxu0 %v16192_v37  ;;  %v16243_v37 = vld [vmem:[#allocation16 + $0x914] ss:$8 sps:$4 sm:$0xff]  }
 0x8eb   :  { %12240 = vmatpush2.bf16.msra.mxu1 %v16187_v9 }
 0x8ec   :  { %12241 = vmatprep.subr.bf16.mxu1 %v16195_v31  ;;  %v16246_v31 = vld [vmem:[#allocation16 + $0x844] ss:$8 sps:$4 sm:$0xff]  }
 0x8ed   :  { %12193 = vmatpush2.bf16.msra.mxu0 %v16190_v56  ;;  %v16241_v56 = vld [vmem:[#allocation16 + $0x910] ss:$8 sps:$4 sm:$0xff]  }
 0x8ee   :  { %12194 = vmatprep.subr.bf16.mxu0 %v16198_v26  ;;  %v16249_v26 = vld [vmem:[#allocation16 + $0x904] ss:$8 sps:$4 sm:$0xff]  }
 0x8ef   :  { %12242 = vmatpush2.bf16.msra.mxu1 %v16193_v46  ;;  %v16244_v46 = vld [vmem:[#allocation16 + $0x840] ss:$8 sps:$4 sm:$0xff]  }
 0x8f0   :  { %12243 = vmatprep.subr.bf16.mxu1 %v16201_v54  ;;  %v16252_v54 = vld [vmem:[#allocation16 + $0x834] ss:$8 sps:$4 sm:$0xff]  }
 0x8f1   :  { %12195 = vmatpush2.bf16.msra.mxu0 %v16196_v14  ;;  %v16247_v14 = vld [vmem:[#allocation16 + $0x900] ss:$8 sps:$4 sm:$0xff]  }
 0x8f2   :  { %12196 = vmatprep.subr.bf16.mxu0 %v16204_v6  ;;  %v16255_v6 = vld [vmem:[#allocation16 + $0x9f4] ss:$8 sps:$4 sm:$0xff]  }
 0x8f3   :  { %12244 = vmatpush2.bf16.msra.mxu1 %v16199_v60  ;;  %v16250_v60 = vld [vmem:[#allocation16 + $0x830] ss:$8 sps:$4 sm:$0xff]  }
 0x8f4   :  { %12295 = vmatprep.subr.bf16.mxu1 %v16207_v55  ;;  %v16258_v55 = vld [vmem:[#allocation16 + $0x824] ss:$8 sps:$4 sm:$0xff]  }
 0x8f5   :  { %12197 = vmatpush2.bf16.msra.mxu0 %v16202_v29  ;;  %v16253_v29 = vld [vmem:[#allocation16 + $0x9f0] ss:$8 sps:$4 sm:$0xff]  }
 0x8f6   :  { %12246 = vmatmul.mubr.bf16.vlgmr.msra.gmra.mxu1 %v20963_v35  ;;  %v12001_v7 = vpop.f32.mrf.mxu1  ;;  %12198 = vmatprep.subr.bf16.mxu0 %v16210_v61  ;;  %v16220_v35 = vld [vmem:[#allocation16 + $0x680] ss:$8 sps:$4 sm:$0xff]   ;;  %v16261_v61 = vld [vmem:[#allocation16 + $0x9e4] ss:$8 sps:$4 sm:$0xff]  }
 0x8f7   :  { %12296 = vmatpush1.bf16.msra.mxu1 %v16205_v16  ;;  %12327 = vmatprep.mubr.bf16.mxu1 %v7075_v22  ;;  %v16256_v16 = vld [vmem:[#allocation16 + $0x820] ss:$8 sps:$4 sm:$0xff]  }
 0x8f8   :  { %v12003_v20 = vpop.f32.mrf.mxu1  ;;  %12297 = vmatprep.subr.bf16.mxu1 %v16213_v15  ;;  %v16264_v15 = vld [vmem:[#allocation16 + $0x814] ss:$8 sps:$4 sm:$0xff]   ;;  %v16259_v22 = vld [vmem:[#allocation16 + $0x9e0] ss:$8 sps:$4 sm:$0xff]  }
 0x8f9   :  { %12199 = vmatpush2.bf16.msra.mxu0 %v16208_v2  ;;  %v16267_v2 = vld [vmem:[#allocation16 + $0x9d4] ss:$8 sps:$4 sm:$0xff]  }
 0x8fa   :  { %v12005_v40 = vpop.f32.mrf.mxu1  ;;  %12200 = vmatprep.subr.bf16.mxu0 %v16216_v17  ;;  %v16270_v17 = vld [vmem:[#allocation16 + $0x804] ss:$8 sps:$4 sm:$0xff]  }
 0x8fb   :  { %12298 = vmatpush1.bf16.msra.mxu1 %v16211_v44  ;;  %v16265_v44 = vld [vmem:[#allocation16 + $0x9d0] ss:$8 sps:$4 sm:$0xff]   ;;  %v16271_v40 = vld [vmem:[#allocation16 + $0x9c0] ss:$8 sps:$4 sm:$0xff]  }
 0x8fc   :  { %v12006_v1 = vpop.f32.mrf.mxu1  ;;  %12299 = vmatprep.subr.bf16.mxu1 %v16219_v62  ;;  %v16268_v62 = vld [vmem:[#allocation16 + $0x800] ss:$8 sps:$4 sm:$0xff]  }
 0x8fd   :  { %12201 = vmatpush2.bf16.msra.mxu0 %v16214_v52  ;;  %v16276_v52 = vld [vmem:[#allocation16 + $0x8f4] ss:$8 sps:$4 sm:$0xff]   ;;  %v16282_v1 = vld [vmem:[#allocation16 + $0x8e4] ss:$8 sps:$4 sm:$0xff]  }
 0x8fe   :  { %12202 = vmatprep.subr.bf16.mxu0 %v16222_v53  ;;  %v16279_v53 = vld [vmem:[#allocation16 + $0x9b4] ss:$8 sps:$4 sm:$0xff]  }
 0x8ff   :  { %12300 = vmatpush1.bf16.msra.mxu1 %v16217_v12  ;;  %v16274_v12 = vld [vmem:[#allocation16 + $0x8f0] ss:$8 sps:$4 sm:$0xff]  }
 0x900   :  { %12301 = vmatprep.subr.bf16.mxu1 %v16225_v57  ;;  %v16277_v57 = vld [vmem:[#allocation16 + $0x9b0] ss:$8 sps:$4 sm:$0xff]  }
 0x901   :  { %12203 = vmatpush2.bf16.msra.mxu0 %v16220_v35  ;;  %v16285_v35 = vld [vmem:[#allocation16 + $0x9a4] ss:$8 sps:$4 sm:$0xff]  }
 0x902   :  { %12254 = vmatprep.subr.bf16.mxu0 %v16228_v27  ;;  %v16280_v27 = vld [vmem:[#allocation16 + $0x8e0] ss:$8 sps:$4 sm:$0xff]  }
 0x903   :  { %12302 = vmatpush1.bf16.msra.mxu1 %v16223_v34  ;;  %v16288_v34 = vld [vmem:[#allocation16 + $0x8d4] ss:$8 sps:$4 sm:$0xff]  }
 0x904   :  { %12205 = vmatmul.mubr.bf16.vlgmr.msra.gmra.mxu0 %v20824_v21  ;;  %v11960_v47 = vpop.f32.mrf.mxu0  ;;  %12303 = vmatprep.subr.bf16.mxu1 %v16231_v8  ;;  %v16238_v21 = vld [vmem:[#allocation16 + $0x850] ss:$8 sps:$4 sm:$0xff]   ;;  %v16283_v8 = vld [vmem:[#allocation16 + $0x9a0] ss:$8 sps:$4 sm:$0xff]  }
 0x905   :  { %v21060_v38 = vadd.f32 %v12001_v7, %v11960_v47  ;;  %12255 = vmatpush1.bf16.msra.mxu0 %v16226_v23  ;;  %12286 = vmatprep.mubr.bf16.mxu0 %v7073_v58  ;;  %v16262_v7 = vld [vmem:[#allocation16 + $0x810] ss:$8 sps:$4 sm:$0xff]   ;;  %v16291_v23 = vld [vmem:[#allocation16 + $0x994] ss:$8 sps:$4 sm:$0xff]   ;;  %v16294_v58 = vld [vmem:[#allocation16 + $0x8c4] ss:$8 sps:$4 sm:$0xff]  }
 0x906   :  { %v11962_v49 = vpop.f32.mrf.mxu0  ;;  %12256 = vmatprep.subr.bf16.mxu0 %v16234_v63  ;;  %v16286_v63 = vld [vmem:[#allocation16 + $0x8d0] ss:$8 sps:$4 sm:$0xff]   ;;  %v16297_v47 = vld [vmem:[#allocation16 + $0x984] ss:$8 sps:$4 sm:$0xff]  }
 0x907   :  { %v21062_v33 = vadd.f32 %v12003_v20, %v11962_v49  ;;  %12304 = vmatpush1.bf16.msra.mxu1 %v16229_v5  ;;  %v16273_v20 = vld [vmem:[#allocation16 + $0x9c4] ss:$8 sps:$4 sm:$0xff]   ;;  %v16289_v5 = vld [vmem:[#allocation16 + $0x990] ss:$8 sps:$4 sm:$0xff]   ;;  %v16295_v49 = vld [vmem:[#allocation16 + $0x980] ss:$8 sps:$4 sm:$0xff]  }
 0x908   :  { %v11964_v25 = vpop.f32.mrf.mxu0  ;;  %12305 = vmatprep.subr.bf16.mxu1 %v16237_v36  ;;  %v16292_v36 = vld [vmem:[#allocation16 + $0x8c0] ss:$8 sps:$4 sm:$0xff]  }
 0x909   :  { %12257 = vmatpush1.bf16.msra.mxu0 %v16232_v50  ;;  %v16300_v50 = vld [vmem:[#allocation16 + $0x8b4] ss:$8 sps:$4 sm:$0xff]   ;;  %v16306_v25 = vld [vmem:[#allocation16 + $0x8a4] ss:$8 sps:$4 sm:$0xff]  }
 0x90a   :  { %v11965_v9 = vpop.f32.mrf.mxu0  ;;  %12258 = vmatprep.subr.bf16.mxu0 %v16240_v28  ;;  %v16303_v28 = vld [vmem:[#allocation16 + $0xb74] ss:$8 sps:$4 sm:$0xff]  }
 0x90b   :  { %12306 = vmatpush1.bf16.msra.mxu1 %v16235_v24  ;;  %v16298_v24 = vld [vmem:[#allocation16 + $0x8b0] ss:$8 sps:$4 sm:$0xff]   ;;  %v16309_v9 = vld [vmem:[#allocation16 + $0xb64] ss:$8 sps:$4 sm:$0xff]  }
 0x90c   :  { %12307 = vmatprep.subr.bf16.mxu1 %v16243_v37  ;;  %v16301_v37 = vld [vmem:[#allocation16 + $0xb70] ss:$8 sps:$4 sm:$0xff]  }
 0x90d   :  { %12259 = vmatpush1.bf16.msra.mxu0 %v16238_v21  ;;  %v7074_v21 = vrot.slane %v20836_v13, 4  ;;  %v16318_v13 = vld [vmem:[#allocation16 + $0x884] ss:$8 sps:$4 sm:$0xff]  }
 0x90e   :  { %12260 = vmatprep.subr.bf16.mxu0 %v16246_v31  ;;  %v16304_v31 = vld [vmem:[#allocation16 + $0x8a0] ss:$8 sps:$4 sm:$0xff]  }
 0x90f   :  { %12308 = vmatpush1.bf16.msra.mxu1 %v16241_v56 }
 0x910   :  { %12309 = vmatprep.subr.bf16.mxu1 %v16249_v26  ;;  %v16312_v26 = vld [vmem:[#allocation16 + $0x894] ss:$8 sps:$4 sm:$0xff]  }
 0x911   :  { %12261 = vmatpush1.bf16.msra.mxu0 %v16244_v46  ;;  %v16307_v46 = vld [vmem:[#allocation16 + $0xb60] ss:$8 sps:$4 sm:$0xff]  }
 0x912   :  { %12262 = vmatprep.subr.bf16.mxu0 %v16252_v54 }
 0x913   :  { %12310 = vmatpush1.bf16.msra.mxu1 %v16247_v14  ;;  %v16315_v14 = vld [vmem:[#allocation16 + $0xb54] ss:$8 sps:$4 sm:$0xff]  }
 0x914   :  { %12311 = vmatprep.subr.bf16.mxu1 %v16255_v6  ;;  %v16310_v6 = vld [vmem:[#allocation16 + $0x890] ss:$8 sps:$4 sm:$0xff]  }
 0x915   :  { %12263 = vmatpush1.bf16.msra.mxu0 %v16250_v60 }
 0x916   :  { %12264 = vmatprep.subr.bf16.mxu0 %v16258_v55  ;;  %v16313_v55 = vld [vmem:[#allocation16 + $0xb50] ss:$8 sps:$4 sm:$0xff]  }
 0x917   :  { %12312 = vmatpush2.bf16.msra.mxu1 %v16253_v29 }
 0x918   :  { %12313 = vmatprep.subr.bf16.mxu1 %v16261_v61  ;;  %v16321_v61 = vld [vmem:[#allocation16 + $0xb44] ss:$8 sps:$4 sm:$0xff]  }
 0x919   :  { %12265 = vmatpush1.bf16.msra.mxu0 %v16256_v16  ;;  %v16316_v16 = vld [vmem:[#allocation16 + $0x880] ss:$8 sps:$4 sm:$0xff]  }
 0x91a   :  { %12266 = vmatprep.subr.bf16.mxu0 %v16264_v15  ;;  %v16324_v15 = vld [vmem:[#allocation16 + $0xa74] ss:$8 sps:$4 sm:$0xff]  }
 0x91b   :  { %12314 = vmatpush2.bf16.msra.mxu1 %v16259_v22  ;;  %v16319_v22 = vld [vmem:[#allocation16 + $0xb40] ss:$8 sps:$4 sm:$0xff]  }
 0x91c   :  { %12315 = vmatprep.subr.bf16.mxu1 %v16267_v2  ;;  %v16327_v2 = vld [vmem:[#allocation16 + $0xb34] ss:$8 sps:$4 sm:$0xff]  }
 0x91d   :  { %12267 = vmatpush1.bf16.msra.mxu0 %v16262_v7  ;;  %v16322_v7 = vld [vmem:[#allocation16 + $0xa70] ss:$8 sps:$4 sm:$0xff]  }
 0x91e   :  { %12268 = vmatprep.subr.bf16.mxu0 %v16270_v17  ;;  %v7072_v17 = vrot.slane %v21047_v11, 4  ;;  %v16331_v11 = vld [vmem:[#allocation16 + $0xb20] ss:$8 sps:$4 sm:$0xff]  }
 0x91f   :  { %12316 = vmatpush2.bf16.msra.mxu1 %v16265_v44  ;;  %v16330_v44 = vld [vmem:[#allocation16 + $0xa64] ss:$8 sps:$4 sm:$0xff]  }
 0x920   :  { %12317 = vmatprep.subr.bf16.mxu1 %v16273_v20  ;;  %v16325_v20 = vld [vmem:[#allocation16 + $0xb30] ss:$8 sps:$4 sm:$0xff]  }
 0x921   :  { %12269 = vmatpush1.bf16.msra.mxu0 %v16268_v62 }
 0x922   :  { %12270 = vmatprep.subr.bf16.mxu0 %v16276_v52  ;;  %v16333_v52 = vld [vmem:[#allocation16 + $0xb24] ss:$8 sps:$4 sm:$0xff]  }
 0x923   :  { %12318 = vmatpush2.bf16.msra.mxu1 %v16271_v40 }
 0x924   :  { %12319 = vmatprep.subr.bf16.mxu1 %v16279_v53  ;;  %v16328_v53 = vld [vmem:[#allocation16 + $0xa60] ss:$8 sps:$4 sm:$0xff]  }
 0x925   :  { %12271 = vmatpush2.bf16.msra.mxu0 %v16274_v12 }
 0x926   :  { %12272 = vmatprep.subr.bf16.mxu0 %v16282_v1  ;;  %v16336_v1 = vld [vmem:[#allocation16 + $0xa54] ss:$8 sps:$4 sm:$0xff]  }
 0x927   :  { %12320 = vmatpush2.bf16.msra.mxu1 %v16277_v57 }
 0x928   :  { %12321 = vmatprep.subr.bf16.mxu1 %v16285_v35 }
 0x929   :  { %12273 = vmatpush2.bf16.msra.mxu0 %v16280_v27 }
 0x92a   :  { %12274 = vmatprep.subr.bf16.mxu0 %v16288_v34  ;;  %v16339_v34 = vld [vmem:[#allocation16 + $0xb14] ss:$8 sps:$4 sm:$0xff]  }
 0x92b   :  { %12322 = vmatpush2.bf16.msra.mxu1 %v16283_v8  ;;  %v16334_v8 = vld [vmem:[#allocation16 + $0xa50] ss:$8 sps:$4 sm:$0xff]  }
 0x92c   :  { %12323 = vmatprep.subr.bf16.mxu1 %v16291_v23 }
 0x92d   :  { %12275 = vmatpush2.bf16.msra.mxu0 %v16286_v63  ;;  %v16342_v63 = vld [vmem:[#allocation16 + $0xa44] ss:$8 sps:$4 sm:$0xff]  }
 0x92e   :  { %12276 = vmatprep.subr.bf16.mxu0 %v16294_v58  ;;  %v16337_v58 = vld [vmem:[#allocation16 + $0xb10] ss:$8 sps:$4 sm:$0xff]  }
 0x92f   :  { %12324 = vmatpush2.bf16.msra.mxu1 %v16289_v5  ;;  %v16345_v5 = vld [vmem:[#allocation16 + $0xb04] ss:$8 sps:$4 sm:$0xff]  }
 0x930   :  { %12325 = vmatprep.subr.bf16.mxu1 %v16297_v47  ;;  %v16348_v47 = vld [vmem:[#allocation16 + $0xa34] ss:$8 sps:$4 sm:$0xff]  }
 0x931   :  { %12277 = vmatpush2.bf16.msra.mxu0 %v16292_v36  ;;  %v16343_v36 = vld [vmem:[#allocation16 + $0xb00] ss:$8 sps:$4 sm:$0xff]  }
 0x932   :  { %12278 = vmatprep.subr.bf16.mxu0 %v16300_v50  ;;  %v16351_v50 = vld [vmem:[#allocation16 + $0xbf4] ss:$8 sps:$4 sm:$0xff]  }
 0x933   :  { %12326 = vmatpush2.bf16.msra.mxu1 %v16295_v49  ;;  %v16346_v49 = vld [vmem:[#allocation16 + $0xa30] ss:$8 sps:$4 sm:$0xff]  }
 0x934   :  { %12377 = vmatprep.subr.bf16.mxu1 %v16303_v28  ;;  %v16354_v28 = vld [vmem:[#allocation16 + $0xa24] ss:$8 sps:$4 sm:$0xff]  }
 0x935   :  { %12279 = vmatpush2.bf16.msra.mxu0 %v16298_v24  ;;  %v16349_v24 = vld [vmem:[#allocation16 + $0xbf0] ss:$8 sps:$4 sm:$0xff]  }
 0x936   :  { %v12083_v56 = vpop.f32.mrf.mxu1  ;;  %12328 = vmatmul.mubr.bf16.vlgmr.msra.gmra.mxu1 %v7074_v21  ;;  %12280 = vmatprep.subr.bf16.mxu0 %v16306_v25  ;;  %v16357_v25 = vld [vmem:[#allocation16 + $0xbe4] ss:$8 sps:$4 sm:$0xff]   ;;  %v16360_v21 = vld [vmem:[#allocation16 + $0xa14] ss:$8 sps:$4 sm:$0xff]  }
 0x937   :  { %12378 = vmatpush1.bf16.msra.mxu1 %v16301_v37  ;;  %12409 = vmatprep.mubr.bf16.mxu1 %v20876_v10  ;;  %v16352_v37 = vld [vmem:[#allocation16 + $0xa20] ss:$8 sps:$4 sm:$0xff]  }
 0x938   :  { %v12085_v54 = vpop.f32.mrf.mxu1  ;;  %12379 = vmatprep.subr.bf16.mxu1 %v16309_v9  ;;  %v16355_v9 = vld [vmem:[#allocation16 + $0xbe0] ss:$8 sps:$4 sm:$0xff]  }
 0x939   :  { %12281 = vmatpush2.bf16.msra.mxu0 %v16304_v31  ;;  %v16363_v31 = vld [vmem:[#allocation16 + $0xbd4] ss:$8 sps:$4 sm:$0xff]  }
 0x93a   :  { %v12087_v60 = vpop.f32.mrf.mxu1  ;;  %12282 = vmatprep.subr.bf16.mxu0 %v16312_v26  ;;  %v16366_v26 = vld [vmem:[#allocation16 + $0xa04] ss:$8 sps:$4 sm:$0xff]  }
 0x93b   :  { %12380 = vmatpush1.bf16.msra.mxu1 %v16307_v46  ;;  %v16361_v46 = vld [vmem:[#allocation16 + $0xbd0] ss:$8 sps:$4 sm:$0xff]   ;;  %v16367_v60 = vld [vmem:[#allocation16 + $0xbc0] ss:$8 sps:$4 sm:$0xff]  }
 0x93c   :  { %v12088_v29 = vpop.f32.mrf.mxu1  ;;  %12381 = vmatprep.subr.bf16.mxu1 %v16315_v14  ;;  %v16364_v14 = vld [vmem:[#allocation16 + $0xa00] ss:$8 sps:$4 sm:$0xff]  }
 0x93d   :  { %12283 = vmatpush2.bf16.msra.mxu0 %v16310_v6  ;;  %v16372_v6 = vld [vmem:[#allocation16 + $0xaf4] ss:$8 sps:$4 sm:$0xff]   ;;  %v16378_v29 = vld [vmem:[#allocation16 + $0xae4] ss:$8 sps:$4 sm:$0xff]  }
 0x93e   :  { %12284 = vmatprep.subr.bf16.mxu0 %v16318_v13  ;;  %v16375_v13 = vld [vmem:[#allocation16 + $0xbb4] ss:$8 sps:$4 sm:$0xff]  }
 0x93f   :  { %12382 = vmatpush1.bf16.msra.mxu1 %v16313_v55  ;;  %v16370_v55 = vld [vmem:[#allocation16 + $0xaf0] ss:$8 sps:$4 sm:$0xff]  }
 0x940   :  { %12383 = vmatprep.subr.bf16.mxu1 %v16321_v61  ;;  %v16373_v61 = vld [vmem:[#allocation16 + $0xbb0] ss:$8 sps:$4 sm:$0xff]  }
 0x941   :  { %12285 = vmatpush2.bf16.msra.mxu0 %v16316_v16  ;;  %v16381_v16 = vld [vmem:[#allocation16 + $0xba4] ss:$8 sps:$4 sm:$0xff]  }
 0x942   :  { %12336 = vmatprep.subr.bf16.mxu0 %v16324_v15  ;;  %v16376_v15 = vld [vmem:[#allocation16 + $0xae0] ss:$8 sps:$4 sm:$0xff]  }
 0x943   :  { %12384 = vmatpush1.bf16.msra.mxu1 %v16319_v22  ;;  %v16384_v22 = vld [vmem:[#allocation16 + $0xad4] ss:$8 sps:$4 sm:$0xff]  }
 0x944   :  { %v12042_v62 = vpop.f32.mrf.mxu0  ;;  %12287 = vmatmul.mubr.bf16.vlgmr.msra.gmra.mxu0 %v7072_v17  ;;  %12385 = vmatprep.subr.bf16.mxu1 %v16327_v2  ;;  %v16379_v2 = vld [vmem:[#allocation16 + $0xba0] ss:$8 sps:$4 sm:$0xff]   ;;  %v16382_v17 = vld [vmem:[#allocation16 + $0xad0] ss:$8 sps:$4 sm:$0xff]  }
 0x945   :  { %v12043_v40 = vadd.f32 %v12042_v62, %v21060_v38  ;;  %12337 = vmatpush1.bf16.msra.mxu0 %v16322_v7  ;;  %12368 = vmatprep.mubr.bf16.mxu0 %v20928_v19  ;;  %v16387_v7 = vld [vmem:[#allocation16 + $0xb94] ss:$8 sps:$4 sm:$0xff]   ;;  %v16393_v62 = vld [vmem:[#allocation16 + $0xb84] ss:$8 sps:$4 sm:$0xff]  }
 0x946   :  { %v12044_v12 = vpop.f32.mrf.mxu0  ;;  %12338 = vmatprep.subr.bf16.mxu0 %v16330_v44  ;;  %v16390_v44 = vld [vmem:[#allocation16 + $0xac4] ss:$8 sps:$4 sm:$0xff]  }
 0x947   :  { %v12045_v57 = vadd.f32 %v12044_v12, %v21062_v33  ;;  %12386 = vmatpush1.bf16.msra.mxu1 %v16325_v20  ;;  %v21070_v35 = vadd.f32 %v12083_v56, %v12043_v40  ;;  %v16340_v33 = vld [vmem:[#allocation16 + $0xa40] ss:$8 sps:$4 sm:$0xff]   ;;  %v16358_v56 = vld [vmem:[#allocation16 + $0xa10] ss:$8 sps:$4 sm:$0xff]   ;;  %v16396_v40 = vld [vmem:[#allocation16 + $0xab4] ss:$8 sps:$4 sm:$0xff]  }
 0x948   :  { %v12046_v27 = vpop.f32.mrf.mxu0  ;;  %12387 = vmatprep.subr.bf16.mxu1 %v16333_v52  ;;  %v16385_v20 = vld [vmem:[#allocation16 + $0xb90] ss:$8 sps:$4 sm:$0xff]   ;;  %v16388_v52 = vld [vmem:[#allocation16 + $0xac0] ss:$8 sps:$4 sm:$0xff]   ;;  %v16399_v12 = vld [vmem:[#allocation16 + $0xd74] ss:$8 sps:$4 sm:$0xff]  }
 0x949   :  { %12339 = vmatpush1.bf16.msra.mxu0 %v16328_v53  ;;  %v21072_v23 = vadd.f32 %v12085_v54, %v12045_v57  ;;  %v16369_v54 = vld [vmem:[#allocation16 + $0xbc4] ss:$8 sps:$4 sm:$0xff]   ;;  %v16391_v53 = vld [vmem:[#allocation16 + $0xb80] ss:$8 sps:$4 sm:$0xff]  }
 0x94a   :  { %v12047_v38 = vpop.f32.mrf.mxu0  ;;  %12340 = vmatprep.subr.bf16.mxu0 %v16336_v1  ;;  %v16394_v1 = vld [vmem:[#allocation16 + $0xab0] ss:$8 sps:$4 sm:$0xff]   ;;  %v16402_v57 = vld [vmem:[#allocation16 + $0xaa4] ss:$8 sps:$4 sm:$0xff]  }
 0x94b   :  { %12388 = vmatpush1.bf16.msra.mxu1 %v16331_v11  ;;  %v16397_v11 = vld [vmem:[#allocation16 + $0xd70] ss:$8 sps:$4 sm:$0xff]   ;;  %v16405_v27 = vld [vmem:[#allocation16 + $0xd64] ss:$8 sps:$4 sm:$0xff]  }
 0x94c   :  { %12389 = vmatprep.subr.bf16.mxu1 %v16339_v34  ;;  %v7088_v34 = vrot.slane %v20903_v45, 4 }
 0x94d   :  { %12341 = vmatpush1.bf16.msra.mxu0 %v16334_v8  ;;  %v16400_v8 = vld [vmem:[#allocation16 + $0xaa0] ss:$8 sps:$4 sm:$0xff]  }
 0x94e   :  { %12342 = vmatprep.subr.bf16.mxu0 %v16342_v63  ;;  %v16408_v63 = vld [vmem:[#allocation16 + $0xa94] ss:$8 sps:$4 sm:$0xff]  }
 0x94f   :  { %12390 = vmatpush1.bf16.msra.mxu1 %v16337_v58  ;;  %v16403_v58 = vld [vmem:[#allocation16 + $0xd60] ss:$8 sps:$4 sm:$0xff]  }
 0x950   :  { %12391 = vmatprep.subr.bf16.mxu1 %v16345_v5 }
 0x951   :  { %12343 = vmatpush1.bf16.msra.mxu0 %v16340_v33  ;;  %v16411_v33 = vld [vmem:[#allocation16 + $0xd54] ss:$8 sps:$4 sm:$0xff]  }
 0x952   :  { %12344 = vmatprep.subr.bf16.mxu0 %v16348_v47  ;;  %v16406_v47 = vld [vmem:[#allocation16 + $0xa90] ss:$8 sps:$4 sm:$0xff]  }
 0x953   :  { %12392 = vmatpush1.bf16.msra.mxu1 %v16343_v36 }
 0x954   :  { %12393 = vmatprep.subr.bf16.mxu1 %v16351_v50  ;;  %v16414_v50 = vld [vmem:[#allocation16 + $0xa84] ss:$8 sps:$4 sm:$0xff]  }
 0x955   :  { %12345 = vmatpush1.bf16.msra.mxu0 %v16346_v49  ;;  %v16409_v49 = vld [vmem:[#allocation16 + $0xd50] ss:$8 sps:$4 sm:$0xff]  }
 0x956   :  { %12346 = vmatprep.subr.bf16.mxu0 %v16354_v28 }
 0x957   :  { %12394 = vmatpush2.bf16.msra.mxu1 %v16349_v24  ;;  %v16417_v24 = vld [vmem:[#allocation16 + $0xd44] ss:$8 sps:$4 sm:$0xff]  }
 0x958   :  { %12395 = vmatprep.subr.bf16.mxu1 %v16357_v25  ;;  %v16420_v25 = vld [vmem:[#allocation16 + $0xc74] ss:$8 sps:$4 sm:$0xff]  }
 0x959   :  { %12347 = vmatpush1.bf16.msra.mxu0 %v16352_v37  ;;  %v16415_v37 = vld [vmem:[#allocation16 + $0xd40] ss:$8 sps:$4 sm:$0xff]  }
 0x95a   :  { %12348 = vmatprep.subr.bf16.mxu0 %v16360_v21  ;;  %v16423_v21 = vld [vmem:[#allocation16 + $0xd34] ss:$8 sps:$4 sm:$0xff]  }
 0x95b   :  { %12396 = vmatpush2.bf16.msra.mxu1 %v16355_v9  ;;  %v16418_v9 = vld [vmem:[#allocation16 + $0xc70] ss:$8 sps:$4 sm:$0xff]  }
 0x95c   :  { %12397 = vmatprep.subr.bf16.mxu1 %v16363_v31  ;;  %v16426_v31 = vld [vmem:[#allocation16 + $0xc64] ss:$8 sps:$4 sm:$0xff]  }
 0x95d   :  { %12349 = vmatpush1.bf16.msra.mxu0 %v16358_v56  ;;  %v7086_v56 = vrot.slane %v20930_v32, 4 }
 0x95e   :  { %12350 = vmatprep.subr.bf16.mxu0 %v16366_v26  ;;  %v16421_v26 = vld [vmem:[#allocation16 + $0xd30] ss:$8 sps:$4 sm:$0xff]  }
 0x95f   :  { %12398 = vmatpush2.bf16.msra.mxu1 %v16361_v46 }
 0x960   :  { %12399 = vmatprep.subr.bf16.mxu1 %v16369_v54  ;;  %v16429_v54 = vld [vmem:[#allocation16 + $0xd24] ss:$8 sps:$4 sm:$0xff]  }
 0x961   :  { %12351 = vmatpush1.bf16.msra.mxu0 %v16364_v14 }
 0x962   :  { %12352 = vmatprep.subr.bf16.mxu0 %v16372_v6  ;;  %v16424_v6 = vld [vmem:[#allocation16 + $0xc60] ss:$8 sps:$4 sm:$0xff]  }
 0x963   :  { %12400 = vmatpush2.bf16.msra.mxu1 %v16367_v60 }
 0x964   :  { %12401 = vmatprep.subr.bf16.mxu1 %v16375_v13  ;;  %v16432_v13 = vld [vmem:[#allocation16 + $0xc54] ss:$8 sps:$4 sm:$0xff]  }
 0x965   :  { %12353 = vmatpush2.bf16.msra.mxu0 %v16370_v55 }
 0x966   :  { %12354 = vmatprep.subr.bf16.mxu0 %v16378_v29  ;;  %v16427_v29 = vld [vmem:[#allocation16 + $0xd20] ss:$8 sps:$4 sm:$0xff]  }
 0x967   :  { %12402 = vmatpush2.bf16.msra.mxu1 %v16373_v61 }
 0x968   :  { %12403 = vmatprep.subr.bf16.mxu1 %v16381_v16 }
 0x969   :  { %12355 = vmatpush2.bf16.msra.mxu0 %v16376_v15  ;;  %v16435_v15 = vld [vmem:[#allocation16 + $0xd14] ss:$8 sps:$4 sm:$0xff]  }
 0x96a   :  { %12356 = vmatprep.subr.bf16.mxu0 %v16384_v22 }
 0x96b   :  { %12404 = vmatpush2.bf16.msra.mxu1 %v16379_v2  ;;  %v16438_v2 = vld [vmem:[#allocation16 + $0xc44] ss:$8 sps:$4 sm:$0xff]  }
 0x96c   :  { %12405 = vmatprep.subr.bf16.mxu1 %v16387_v7  ;;  %v16433_v7 = vld [vmem:[#allocation16 + $0xd10] ss:$8 sps:$4 sm:$0xff]  }
 0x96d   :  { %12357 = vmatpush2.bf16.msra.mxu0 %v16382_v17  ;;  %v16441_v17 = vld [vmem:[#allocation16 + $0xd04] ss:$8 sps:$4 sm:$0xff]  }
 0x96e   :  { %12358 = vmatprep.subr.bf16.mxu0 %v16390_v44  ;;  %v16444_v44 = vld [vmem:[#allocation16 + $0xc34] ss:$8 sps:$4 sm:$0xff]  }
 0x96f   :  { %12406 = vmatpush2.bf16.msra.mxu1 %v16385_v20  ;;  %v16439_v20 = vld [vmem:[#allocation16 + $0xd00] ss:$8 sps:$4 sm:$0xff]  }
 0x970   :  { %12407 = vmatprep.subr.bf16.mxu1 %v16393_v62  ;;  %v16447_v62 = vld [vmem:[#allocation16 + $0xdf4] ss:$8 sps:$4 sm:$0xff]  }
 0x971   :  { %12359 = vmatpush2.bf16.msra.mxu0 %v16388_v52  ;;  %v16442_v52 = vld [vmem:[#allocation16 + $0xc30] ss:$8 sps:$4 sm:$0xff]  }
 0x972   :  { %12360 = vmatprep.subr.bf16.mxu0 %v16396_v40  ;;  %v16450_v40 = vld [vmem:[#allocation16 + $0xc24] ss:$8 sps:$4 sm:$0xff]  }
 0x973   :  { %12408 = vmatpush2.bf16.msra.mxu1 %v16391_v53  ;;  %v16445_v53 = vld [vmem:[#allocation16 + $0xdf0] ss:$8 sps:$4 sm:$0xff]  }
 0x974   :  { %12459 = vmatprep.subr.bf16.mxu1 %v16399_v12  ;;  %v16453_v12 = vld [vmem:[#allocation16 + $0xde4] ss:$8 sps:$4 sm:$0xff]  }
 0x975   :  { %12361 = vmatpush2.bf16.msra.mxu0 %v16394_v1  ;;  %v16448_v1 = vld [vmem:[#allocation16 + $0xc20] ss:$8 sps:$4 sm:$0xff]  }
 0x976   :  { %v12165_v38 = vpop.f32.mrf.mxu1  ;;  %12410 = vmatmul.mubr.bf16.vlgmr.msra.gmra.mxu1 %v20903_v45  ;;  %12362 = vmatprep.subr.bf16.mxu0 %v16402_v57  ;;  %v16412_v45 = vld [vmem:[#allocation16 + $0xa80] ss:$8 sps:$4 sm:$0xff]   ;;  %v16456_v57 = vld [vmem:[#allocation16 + $0xc14] ss:$8 sps:$4 sm:$0xff]  }
 0x977   :  { %12460 = vmatpush1.bf16.msra.mxu1 %v16397_v11  ;;  %12491 = vmatprep.mubr.bf16.mxu1 %v7088_v34  ;;  %v16451_v11 = vld [vmem:[#allocation16 + $0xde0] ss:$8 sps:$4 sm:$0xff]   ;;  %v16454_v34 = vld [vmem:[#allocation16 + $0xc10] ss:$8 sps:$4 sm:$0xff]  }
 0x978   :  { %v12167_v5 = vpop.f32.mrf.mxu1  ;;  %12461 = vmatprep.subr.bf16.mxu1 %v16405_v27  ;;  %v16459_v27 = vld [vmem:[#allocation16 + $0xdd4] ss:$8 sps:$4 sm:$0xff]  }
 0x979   :  { %12363 = vmatpush2.bf16.msra.mxu0 %v16400_v8  ;;  %v16462_v8 = vld [vmem:[#allocation16 + $0xc04] ss:$8 sps:$4 sm:$0xff]  }
 0x97a   :  { %v12169_v36 = vpop.f32.mrf.mxu1  ;;  %12364 = vmatprep.subr.bf16.mxu0 %v16408_v63  ;;  %v16465_v63 = vld [vmem:[#allocation16 + $0xdc4] ss:$8 sps:$4 sm:$0xff]  }
 0x97b   :  { %12462 = vmatpush1.bf16.msra.mxu1 %v16403_v58  ;;  %v16460_v58 = vld [vmem:[#allocation16 + $0xc00] ss:$8 sps:$4 sm:$0xff]   ;;  %v16466_v36 = vld [vmem:[#allocation16 + $0xcf0] ss:$8 sps:$4 sm:$0xff]  }
 0x97c   :  { %v12170_v28 = vpop.f32.mrf.mxu1  ;;  %12463 = vmatprep.subr.bf16.mxu1 %v16411_v33  ;;  %v16463_v33 = vld [vmem:[#allocation16 + $0xdc0] ss:$8 sps:$4 sm:$0xff]  }
 0x97d   :  { %12365 = vmatpush2.bf16.msra.mxu0 %v16406_v47  ;;  %v16471_v47 = vld [vmem:[#allocation16 + $0xdb4] ss:$8 sps:$4 sm:$0xff]   ;;  %v16477_v28 = vld [vmem:[#allocation16 + $0xda4] ss:$8 sps:$4 sm:$0xff]  }
 0x97e   :  { %12366 = vmatprep.subr.bf16.mxu0 %v16414_v50  ;;  %v16474_v50 = vld [vmem:[#allocation16 + $0xce4] ss:$8 sps:$4 sm:$0xff]  }
 0x97f   :  { %12464 = vmatpush1.bf16.msra.mxu1 %v16409_v49  ;;  %v16469_v49 = vld [vmem:[#allocation16 + $0xdb0] ss:$8 sps:$4 sm:$0xff]  }
 0x980   :  { %12465 = vmatprep.subr.bf16.mxu1 %v16417_v24  ;;  %v16472_v24 = vld [vmem:[#allocation16 + $0xce0] ss:$8 sps:$4 sm:$0xff]  }
 0x981   :  { %12367 = vmatpush2.bf16.msra.mxu0 %v16412_v45  ;;  %v16480_v45 = vld [vmem:[#allocation16 + $0xcd4] ss:$8 sps:$4 sm:$0xff]  }
 0x982   :  { %12418 = vmatprep.subr.bf16.mxu0 %v16420_v25  ;;  %v16475_v25 = vld [vmem:[#allocation16 + $0xda0] ss:$8 sps:$4 sm:$0xff]  }
 0x983   :  { %12466 = vmatpush1.bf16.msra.mxu1 %v16415_v37  ;;  %v16483_v37 = vld [vmem:[#allocation16 + $0xd94] ss:$8 sps:$4 sm:$0xff]  }
 0x984   :  { %v12124_v46 = vpop.f32.mrf.mxu0  ;;  %12369 = vmatmul.mubr.bf16.vlgmr.msra.gmra.mxu0 %v20930_v32  ;;  %12467 = vmatprep.subr.bf16.mxu1 %v16423_v21  ;;  %v16430_v32 = vld [vmem:[#allocation16 + $0xc50] ss:$8 sps:$4 sm:$0xff]  }
 0x985   :  { %v12125_v14 = vadd.f32 %v12124_v46, %v21070_v35  ;;  %12419 = vmatpush1.bf16.msra.mxu0 %v16418_v9  ;;  %12450 = vmatprep.mubr.bf16.mxu0 %v7086_v56  ;;  %v16478_v21 = vld [vmem:[#allocation16 + $0xcd0] ss:$8 sps:$4 sm:$0xff]   ;;  %v16486_v9 = vld [vmem:[#allocation16 + $0xcc4] ss:$8 sps:$4 sm:$0xff]   ;;  %v16492_v46 = vld [vmem:[#allocation16 + $0xcb4] ss:$8 sps:$4 sm:$0xff]  }
 0x986   :  { %v12126_v60 = vpop.f32.mrf.mxu0  ;;  %12420 = vmatprep.subr.bf16.mxu0 %v16426_v31  ;;  %v16481_v31 = vld [vmem:[#allocation16 + $0xd90] ss:$8 sps:$4 sm:$0xff]   ;;  %v16489_v56 = vld [vmem:[#allocation16 + $0xd84] ss:$8 sps:$4 sm:$0xff]  }
 0x987   :  { %v12127_v55 = vadd.f32 %v12126_v60, %v21072_v23  ;;  %12468 = vmatpush1.bf16.msra.mxu1 %v16421_v26  ;;  %v21080_v61 = vadd.f32 %v12165_v38, %v12125_v14  ;;  %v16436_v23 = vld [vmem:[#allocation16 + $0xc40] ss:$8 sps:$4 sm:$0xff]   ;;  %v16457_v38 = vld [vmem:[#allocation16 + $0xdd0] ss:$8 sps:$4 sm:$0xff]   ;;  %v16495_v14 = vld [vmem:[#allocation16 + $0xf74] ss:$8 sps:$4 sm:$0xff]  }
 0x988   :  { %v12128_v16 = vpop.f32.mrf.mxu0  ;;  %12469 = vmatprep.subr.bf16.mxu1 %v16429_v54  ;;  %v16484_v26 = vld [vmem:[#allocation16 + $0xcc0] ss:$8 sps:$4 sm:$0xff]   ;;  %v16498_v60 = vld [vmem:[#allocation16 + $0xca4] ss:$8 sps:$4 sm:$0xff]  }
 0x989   :  { %12421 = vmatpush1.bf16.msra.mxu0 %v16424_v6  ;;  %v21082_v22 = vadd.f32 %v12167_v5, %v12127_v55  ;;  %v16468_v5 = vld [vmem:[#allocation16 + $0xcf4] ss:$8 sps:$4 sm:$0xff]   ;;  %v16487_v54 = vld [vmem:[#allocation16 + $0xd80] ss:$8 sps:$4 sm:$0xff]   ;;  %v16490_v6 = vld [vmem:[#allocation16 + $0xcb0] ss:$8 sps:$4 sm:$0xff]  }
 0x98a   :  { %v12129_v35 = vpop.f32.mrf.mxu0  ;;  %12422 = vmatprep.subr.bf16.mxu0 %v16432_v13  ;;  %v16493_v13 = vld [vmem:[#allocation16 + $0xf70] ss:$8 sps:$4 sm:$0xff]   ;;  %v7087_v55 = vrot.slane %v20928_v19, 4  ;;  %v16496_v16 = vld [vmem:[#allocation16 + $0xca0] ss:$8 sps:$4 sm:$0xff]  }
 0x98b   :  { %12470 = vmatpush1.bf16.msra.mxu1 %v16427_v29  ;;  %v16501_v29 = vld [vmem:[#allocation16 + $0xf64] ss:$8 sps:$4 sm:$0xff]   ;;  %v16499_v35 = vld [vmem:[#allocation16 + $0xf60] ss:$8 sps:$4 sm:$0xff]  }
 0x98c   :  { %12471 = vmatprep.subr.bf16.mxu1 %v16435_v15  ;;  %v16510_v19 = vld [vmem:[#allocation16 + $0xc84] ss:$8 sps:$4 sm:$0xff]  }
 0x98d   :  { %12423 = vmatpush1.bf16.msra.mxu0 %v16430_v32  ;;  %v16504_v32 = vld [vmem:[#allocation16 + $0xc94] ss:$8 sps:$4 sm:$0xff]  }
 0x98e   :  { %12424 = vmatprep.subr.bf16.mxu0 %v16438_v2 }
 0x98f   :  { %12472 = vmatpush1.bf16.msra.mxu1 %v16433_v7  ;;  %v16507_v7 = vld [vmem:[#allocation16 + $0xf54] ss:$8 sps:$4 sm:$0xff]  }
 0x990   :  { %12473 = vmatprep.subr.bf16.mxu1 %v16441_v17  ;;  %v16502_v17 = vld [vmem:[#allocation16 + $0xc90] ss:$8 sps:$4 sm:$0xff]  }
 0x991   :  { %12425 = vmatpush1.bf16.msra.mxu0 %v16436_v23 }
 0x992   :  { %12426 = vmatprep.subr.bf16.mxu0 %v16444_v44  ;;  %v16505_v44 = vld [vmem:[#allocation16 + $0xf50] ss:$8 sps:$4 sm:$0xff]  }
 0x993   :  { %12474 = vmatpush1.bf16.msra.mxu1 %v16439_v20 }
 0x994   :  { %12475 = vmatprep.subr.bf16.mxu1 %v16447_v62  ;;  %v16513_v62 = vld [vmem:[#allocation16 + $0xf44] ss:$8 sps:$4 sm:$0xff]  }
 0x995   :  { %12427 = vmatpush1.bf16.msra.mxu0 %v16442_v52  ;;  %v16508_v52 = vld [vmem:[#allocation16 + $0xc80] ss:$8 sps:$4 sm:$0xff]  }
 0x996   :  { %12428 = vmatprep.subr.bf16.mxu0 %v16450_v40  ;;  %v16516_v40 = vld [vmem:[#allocation16 + $0xe74] ss:$8 sps:$4 sm:$0xff]  }
 0x997   :  { %12476 = vmatpush2.bf16.msra.mxu1 %v16445_v53  ;;  %v16511_v53 = vld [vmem:[#allocation16 + $0xf40] ss:$8 sps:$4 sm:$0xff]  }
 0x998   :  { %12477 = vmatprep.subr.bf16.mxu1 %v16453_v12  ;;  %v16519_v12 = vld [vmem:[#allocation16 + $0xf34] ss:$8 sps:$4 sm:$0xff]  }
 0x999   :  { %12429 = vmatpush1.bf16.msra.mxu0 %v16448_v1  ;;  %v16514_v1 = vld [vmem:[#allocation16 + $0xe70] ss:$8 sps:$4 sm:$0xff]  }
 0x99a   :  { %12430 = vmatprep.subr.bf16.mxu0 %v16456_v57  ;;  %v16522_v57 = vld [vmem:[#allocation16 + $0xe64] ss:$8 sps:$4 sm:$0xff]  }
 0x99b   :  { %12478 = vmatpush2.bf16.msra.mxu1 %v16451_v11  ;;  %v7090_v11 = vrot.slane %v20968_v41, 4 }
 0x99c   :  { %12479 = vmatprep.subr.bf16.mxu1 %v16459_v27  ;;  %v16517_v27 = vld [vmem:[#allocation16 + $0xf30] ss:$8 sps:$4 sm:$0xff]  }
 0x99d   :  { %12431 = vmatpush1.bf16.msra.mxu0 %v16454_v34 }
 0x99e   :  { %12432 = vmatprep.subr.bf16.mxu0 %v16462_v8  ;;  %v16525_v8 = vld [vmem:[#allocation16 + $0xf24] ss:$8 sps:$4 sm:$0xff]  }
 0x99f   :  { %12480 = vmatpush2.bf16.msra.mxu1 %v16457_v38 }
 0x9a0   :  { %12481 = vmatprep.subr.bf16.mxu1 %v16465_v63  ;;  %v16520_v63 = vld [vmem:[#allocation16 + $0xe60] ss:$8 sps:$4 sm:$0xff]  }
 0x9a1   :  { %12433 = vmatpush1.bf16.msra.mxu0 %v16460_v58 }
 0x9a2   :  { %12434 = vmatprep.subr.bf16.mxu0 %v16468_v5  ;;  %v16528_v5 = vld [vmem:[#allocation16 + $0xe54] ss:$8 sps:$4 sm:$0xff]  }
 0x9a3   :  { %12482 = vmatpush2.bf16.msra.mxu1 %v16463_v33 }
 0x9a4   :  { %12483 = vmatprep.subr.bf16.mxu1 %v16471_v47  ;;  %v16523_v47 = vld [vmem:[#allocation16 + $0xf20] ss:$8 sps:$4 sm:$0xff]  }
 0x9a5   :  { %12435 = vmatpush2.bf16.msra.mxu0 %v16466_v36 }
 0x9a6   :  { %12436 = vmatprep.subr.bf16.mxu0 %v16474_v50 }
 0x9a7   :  { %12484 = vmatpush2.bf16.msra.mxu1 %v16469_v49  ;;  %v16531_v49 = vld [vmem:[#allocation16 + $0xf14] ss:$8 sps:$4 sm:$0xff]  }
 0x9a8   :  { %12485 = vmatprep.subr.bf16.mxu1 %v16477_v28 }
 0x9a9   :  { %12437 = vmatpush2.bf16.msra.mxu0 %v16472_v24  ;;  %v16534_v24 = vld [vmem:[#allocation16 + $0xe44] ss:$8 sps:$4 sm:$0xff]  }
 0x9aa   :  { %12438 = vmatprep.subr.bf16.mxu0 %v16480_v45  ;;  %v16529_v45 = vld [vmem:[#allocation16 + $0xf10] ss:$8 sps:$4 sm:$0xff]  }
 0x9ab   :  { %12486 = vmatpush2.bf16.msra.mxu1 %v16475_v25  ;;  %v16537_v25 = vld [vmem:[#allocation16 + $0xf04] ss:$8 sps:$4 sm:$0xff]  }
 0x9ac   :  { %12487 = vmatprep.subr.bf16.mxu1 %v16483_v37  ;;  %v16540_v37 = vld [vmem:[#allocation16 + $0xe34] ss:$8 sps:$4 sm:$0xff]  }
 0x9ad   :  { %12439 = vmatpush2.bf16.msra.mxu0 %v16478_v21  ;;  %v16535_v21 = vld [vmem:[#allocation16 + $0xf00] ss:$8 sps:$4 sm:$0xff]  }
 0x9ae   :  { %12440 = vmatprep.subr.bf16.mxu0 %v16486_v9  ;;  %v16543_v9 = vld [vmem:[#allocation16 + $0xff4] ss:$8 sps:$4 sm:$0xff]  }
 0x9af   :  { %12488 = vmatpush2.bf16.msra.mxu1 %v16481_v31  ;;  %v16538_v31 = vld [vmem:[#allocation16 + $0xe30] ss:$8 sps:$4 sm:$0xff]  }
 0x9b0   :  { %12489 = vmatprep.subr.bf16.mxu1 %v16489_v56  ;;  %v16546_v56 = vld [vmem:[#allocation16 + $0xe24] ss:$8 sps:$4 sm:$0xff]  }
 0x9b1   :  { %12441 = vmatpush2.bf16.msra.mxu0 %v16484_v26  ;;  %v16541_v26 = vld [vmem:[#allocation16 + $0xff0] ss:$8 sps:$4 sm:$0xff]  }
 0x9b2   :  { %12442 = vmatprep.subr.bf16.mxu0 %v16492_v46  ;;  %v16549_v46 = vld [vmem:[#allocation16 + $0xfe4] ss:$8 sps:$4 sm:$0xff]  }
 0x9b3   :  { %12490 = vmatpush2.bf16.msra.mxu1 %v16487_v54  ;;  %v16544_v54 = vld [vmem:[#allocation16 + $0xe20] ss:$8 sps:$4 sm:$0xff]  }
 0x9b4   :  { %12541 = vmatprep.subr.bf16.mxu1 %v16495_v14  ;;  %v16552_v14 = vld [vmem:[#allocation16 + $0xe14] ss:$8 sps:$4 sm:$0xff]  }
 0x9b5   :  { %12443 = vmatpush2.bf16.msra.mxu0 %v16490_v6  ;;  %v16547_v6 = vld [vmem:[#allocation16 + $0xfe0] ss:$8 sps:$4 sm:$0xff]  }
 0x9b6   :  { %v12247_v15 = vpop.f32.mrf.mxu1  ;;  %12492 = vmatmul.mubr.bf16.vlgmr.msra.gmra.mxu1 %v7087_v55  ;;  %12444 = vmatprep.subr.bf16.mxu0 %v16498_v60  ;;  %v16555_v60 = vld [vmem:[#allocation16 + $0xfd4] ss:$8 sps:$4 sm:$0xff]   ;;  %v16558_v55 = vld [vmem:[#allocation16 + $0xe04] ss:$8 sps:$4 sm:$0xff]  }
 0x9b7   :  { %12542 = vmatpush1.bf16.msra.mxu1 %v16493_v13  ;;  %12573 = vmatprep.mubr.bf16.mxu1 %v20945_v51  ;;  %v16550_v13 = vld [vmem:[#allocation16 + $0xe10] ss:$8 sps:$4 sm:$0xff]  }
 0x9b8   :  { %v12249_v2 = vpop.f32.mrf.mxu1  ;;  %12543 = vmatprep.subr.bf16.mxu1 %v16501_v29  ;;  %v16553_v29 = vld [vmem:[#allocation16 + $0xfd0] ss:$8 sps:$4 sm:$0xff]  }
 0x9b9   :  { %12445 = vmatpush2.bf16.msra.mxu0 %v16496_v16  ;;  %v16561_v16 = vld [vmem:[#allocation16 + $0xfc4] ss:$8 sps:$4 sm:$0xff]  }
 0x9ba   :  { %v12251_v23 = vpop.f32.mrf.mxu1  ;;  %12446 = vmatprep.subr.bf16.mxu0 %v16504_v32  ;;  %v16564_v32 = vld [vmem:[#allocation16 + $0xef4] ss:$8 sps:$4 sm:$0xff]  }
 0x9bb   :  { %12544 = vmatpush1.bf16.msra.mxu1 %v16499_v35  ;;  %v16559_v35 = vld [vmem:[#allocation16 + $0xfc0] ss:$8 sps:$4 sm:$0xff]   ;;  %v16565_v23 = vld [vmem:[#allocation16 + $0xfb0] ss:$8 sps:$4 sm:$0xff]  }
 0x9bc   :  { %v12252_v20 = vpop.f32.mrf.mxu1  ;;  %12545 = vmatprep.subr.bf16.mxu1 %v16507_v7  ;;  %v16562_v7 = vld [vmem:[#allocation16 + $0xef0] ss:$8 sps:$4 sm:$0xff]  }
 0x9bd   :  { %12447 = vmatpush2.bf16.msra.mxu0 %v16502_v17  ;;  %v16570_v17 = vld [vmem:[#allocation16 + $0xee4] ss:$8 sps:$4 sm:$0xff]   ;;  %v16576_v20 = vld [vmem:[#allocation16 + $0xed4] ss:$8 sps:$4 sm:$0xff]  }
 0x9be   :  { %12448 = vmatprep.subr.bf16.mxu0 %v16510_v19  ;;  %v16573_v19 = vld [vmem:[#allocation16 + $0xfa4] ss:$8 sps:$4 sm:$0xff]  }
 0x9bf   :  { %12546 = vmatpush1.bf16.msra.mxu1 %v16505_v44  ;;  %v16568_v44 = vld [vmem:[#allocation16 + $0xee0] ss:$8 sps:$4 sm:$0xff]  }
 0x9c0   :  { %12547 = vmatprep.subr.bf16.mxu1 %v16513_v62  ;;  %v16571_v62 = vld [vmem:[#allocation16 + $0xfa0] ss:$8 sps:$4 sm:$0xff]  }
 0x9c1   :  { %12449 = vmatpush2.bf16.msra.mxu0 %v16508_v52  ;;  %v16579_v52 = vld [vmem:[#allocation16 + $0xf94] ss:$8 sps:$4 sm:$0xff]  }
 0x9c2   :  { %12500 = vmatprep.subr.bf16.mxu0 %v16516_v40  ;;  %v16574_v40 = vld [vmem:[#allocation16 + $0xed0] ss:$8 sps:$4 sm:$0xff]  }
 0x9c3   :  { %12548 = vmatpush1.bf16.msra.mxu1 %v16511_v53  ;;  %v16582_v53 = vld [vmem:[#allocation16 + $0xec4] ss:$8 sps:$4 sm:$0xff]  }
 0x9c4   :  { %v12206_v34 = vpop.f32.mrf.mxu0  ;;  %12451 = vmatmul.mubr.bf16.vlgmr.msra.gmra.mxu0 %v20968_v41  ;;  %12549 = vmatprep.subr.bf16.mxu1 %v16519_v12  ;;  %v16526_v41 = vld [vmem:[#allocation16 + $0xe50] ss:$8 sps:$4 sm:$0xff]  }
 0x9c5   :  { %v12207_v38 = vadd.f32 %v12206_v34, %v21080_v61  ;;  %12501 = vmatpush1.bf16.msra.mxu0 %v16514_v1  ;;  %12532 = vmatprep.mubr.bf16.mxu0 %v7090_v11  ;;  %v16577_v12 = vld [vmem:[#allocation16 + $0xf90] ss:$8 sps:$4 sm:$0xff]   ;;  %v16585_v1 = vld [vmem:[#allocation16 + $0xf84] ss:$8 sps:$4 sm:$0xff]   ;;  %v16588_v11 = vld [vmem:[#allocation16 + $0xeb4] ss:$8 sps:$4 sm:$0xff]  }
 0x9c6   :  { %v12208_v58 = vpop.f32.mrf.mxu0  ;;  %12502 = vmatprep.subr.bf16.mxu0 %v16522_v57  ;;  %v16580_v57 = vld [vmem:[#allocation16 + $0xec0] ss:$8 sps:$4 sm:$0xff]   ;;  %v16591_v34 = vld [vmem:[#allocation16 + $0x1174] ss:$8 sps:$4 sm:$0xff]  }
 0x9c7   :  { %v12209_v33 = vadd.f32 %v12208_v58, %v21082_v22  ;;  %12550 = vmatpush1.bf16.msra.mxu1 %v16517_v27  ;;  %v21090_v36 = vadd.f32 %v12247_v15, %v12207_v38  ;;  %v16532_v22 = vld [vmem:[#allocation16 + $0xe40] ss:$8 sps:$4 sm:$0xff]   ;;  %v16594_v38 = vld [vmem:[#allocation16 + $0xea4] ss:$8 sps:$4 sm:$0xff]  }
 0x9c8   :  { %v12210_v50 = vpop.f32.mrf.mxu0  ;;  %12551 = vmatprep.subr.bf16.mxu1 %v16525_v8  ;;  %v16556_v15 = vld [vmem:[#allocation16 + $0xe00] ss:$8 sps:$4 sm:$0xff]   ;;  %v16586_v8 = vld [vmem:[#allocation16 + $0xeb0] ss:$8 sps:$4 sm:$0xff]   ;;  %v16597_v58 = vld [vmem:[#allocation16 + $0x1164] ss:$8 sps:$4 sm:$0xff]  }
 0x9c9   :  { %12503 = vmatpush1.bf16.msra.mxu0 %v16520_v63  ;;  %v21092_v28 = vadd.f32 %v12249_v2, %v12209_v33  ;;  %v16567_v2 = vld [vmem:[#allocation16 + $0xfb4] ss:$8 sps:$4 sm:$0xff]   ;;  %v16583_v27 = vld [vmem:[#allocation16 + $0xf80] ss:$8 sps:$4 sm:$0xff]   ;;  %v16589_v63 = vld [vmem:[#allocation16 + $0x1170] ss:$8 sps:$4 sm:$0xff]  }
 0x9ca   :  { %v12211_v61 = vpop.f32.mrf.mxu0  ;;  %12504 = vmatprep.subr.bf16.mxu0 %v16528_v5  ;;  %v7101_v5 = vrot.slane %v20958_v3, 4  ;;  %v16592_v33 = vld [vmem:[#allocation16 + $0xea0] ss:$8 sps:$4 sm:$0xff]   ;;  %v16600_v50 = vld [vmem:[#allocation16 + $0xe94] ss:$8 sps:$4 sm:$0xff]  }
 0x9cb   :  { %12552 = vmatpush1.bf16.msra.mxu1 %v16523_v47  ;;  %v16603_v61 = vld [vmem:[#allocation16 + $0x1154] ss:$8 sps:$4 sm:$0xff]  }
 0x9cc   :  { %12553 = vmatprep.subr.bf16.mxu1 %v16531_v49  ;;  %v16595_v49 = vld [vmem:[#allocation16 + $0x1160] ss:$8 sps:$4 sm:$0xff]  }
 0x9cd   :  { %12505 = vmatpush1.bf16.msra.mxu0 %v16526_v41 }
 0x9ce   :  { %12506 = vmatprep.subr.bf16.mxu0 %v16534_v24  ;;  %v16598_v24 = vld [vmem:[#allocation16 + $0xe90] ss:$8 sps:$4 sm:$0xff]  }
 0x9cf   :  { %12554 = vmatpush1.bf16.msra.mxu1 %v16529_v45 }
 0x9d0   :  { %12555 = vmatprep.subr.bf16.mxu1 %v16537_v25  ;;  %v16606_v25 = vld [vmem:[#allocation16 + $0xe84] ss:$8 sps:$4 sm:$0xff]  }
 0x9d1   :  { %12507 = vmatpush1.bf16.msra.mxu0 %v16532_v22  ;;  %v16601_v22 = vld [vmem:[#allocation16 + $0x1150] ss:$8 sps:$4 sm:$0xff]  }
 0x9d2   :  { %12508 = vmatprep.subr.bf16.mxu0 %v16540_v37 }
 0x9d3   :  { %12556 = vmatpush1.bf16.msra.mxu1 %v16535_v21  ;;  %v16609_v21 = vld [vmem:[#allocation16 + $0x1144] ss:$8 sps:$4 sm:$0xff]  }
 0x9d4   :  { %12557 = vmatprep.subr.bf16.mxu1 %v16543_v9  ;;  %v16612_v9 = vld [vmem:[#allocation16 + $0x1074] ss:$8 sps:$4 sm:$0xff]  }
 0x9d5   :  { %12509 = vmatpush1.bf16.msra.mxu0 %v16538_v31  ;;  %v16607_v31 = vld [vmem:[#allocation16 + $0x1140] ss:$8 sps:$4 sm:$0xff]  }
 0x9d6   :  { %12510 = vmatprep.subr.bf16.mxu0 %v16546_v56  ;;  %v16615_v56 = vld [vmem:[#allocation16 + $0x1134] ss:$8 sps:$4 sm:$0xff]  }
 0x9d7   :  { %12558 = vmatpush2.bf16.msra.mxu1 %v16541_v26  ;;  %v16610_v26 = vld [vmem:[#allocation16 + $0x1070] ss:$8 sps:$4 sm:$0xff]  }
 0x9d8   :  { %12559 = vmatprep.subr.bf16.mxu1 %v16549_v46  ;;  %v7089_v46 = vrot.slane %v20876_v10, 4  ;;  %v16619_v10 = vld [vmem:[#allocation16 + $0x1120] ss:$8 sps:$4 sm:$0xff]  }
 0x9d9   :  { %12511 = vmatpush1.bf16.msra.mxu0 %v16544_v54  ;;  %v16618_v54 = vld [vmem:[#allocation16 + $0x1064] ss:$8 sps:$4 sm:$0xff]  }
 0x9da   :  { %12512 = vmatprep.subr.bf16.mxu0 %v16552_v14  ;;  %v16613_v14 = vld [vmem:[#allocation16 + $0x1130] ss:$8 sps:$4 sm:$0xff]  }
 0x9db   :  { %12560 = vmatpush2.bf16.msra.mxu1 %v16547_v6 }
 0x9dc   :  { %12561 = vmatprep.subr.bf16.mxu1 %v16555_v60  ;;  %v16621_v60 = vld [vmem:[#allocation16 + $0x1124] ss:$8 sps:$4 sm:$0xff]  }
 0x9dd   :  { %12513 = vmatpush1.bf16.msra.mxu0 %v16550_v13 }
 0x9de   :  { %12514 = vmatprep.subr.bf16.mxu0 %v16558_v55  ;;  %v16616_v55 = vld [vmem:[#allocation16 + $0x1060] ss:$8 sps:$4 sm:$0xff]  }
 0x9df   :  { %12562 = vmatpush2.bf16.msra.mxu1 %v16553_v29 }
 0x9e0   :  { %12563 = vmatprep.subr.bf16.mxu1 %v16561_v16  ;;  %v16624_v16 = vld [vmem:[#allocation16 + $0x1054] ss:$8 sps:$4 sm:$0xff]  }
 0x9e1   :  { %12515 = vmatpush1.bf16.msra.mxu0 %v16556_v15 }
 0x9e2   :  { %12516 = vmatprep.subr.bf16.mxu0 %v16564_v32 }
 0x9e3   :  { %12564 = vmatpush2.bf16.msra.mxu1 %v16559_v35 }
 0x9e4   :  { %12565 = vmatprep.subr.bf16.mxu1 %v16567_v2  ;;  %v16627_v2 = vld [vmem:[#allocation16 + $0x1114] ss:$8 sps:$4 sm:$0xff]  }
 0x9e5   :  { %12517 = vmatpush2.bf16.msra.mxu0 %v16562_v7  ;;  %v16622_v7 = vld [vmem:[#allocation16 + $0x1050] ss:$8 sps:$4 sm:$0xff]  }
 0x9e6   :  { %12518 = vmatprep.subr.bf16.mxu0 %v16570_v17 }
 0x9e7   :  { %12566 = vmatpush2.bf16.msra.mxu1 %v16565_v23  ;;  %v16630_v23 = vld [vmem:[#allocation16 + $0x1044] ss:$8 sps:$4 sm:$0xff]  }
 0x9e8   :  { %12567 = vmatprep.subr.bf16.mxu1 %v16573_v19  ;;  %v16625_v19 = vld [vmem:[#allocation16 + $0x1110] ss:$8 sps:$4 sm:$0xff]  }
 0x9e9   :  { %12519 = vmatpush2.bf16.msra.mxu0 %v16568_v44  ;;  %v16633_v44 = vld [vmem:[#allocation16 + $0x1104] ss:$8 sps:$4 sm:$0xff]  }
 0x9ea   :  { %12520 = vmatprep.subr.bf16.mxu0 %v16576_v20  ;;  %v16636_v20 = vld [vmem:[#allocation16 + $0x1034] ss:$8 sps:$4 sm:$0xff]  }
 0x9eb   :  { %12568 = vmatpush2.bf16.msra.mxu1 %v16571_v62  ;;  %v16631_v62 = vld [vmem:[#allocation16 + $0x1100] ss:$8 sps:$4 sm:$0xff]  }
 0x9ec   :  { %12569 = vmatprep.subr.bf16.mxu1 %v16579_v52  ;;  %v16639_v52 = vld [vmem:[#allocation16 + $0x11f4] ss:$8 sps:$4 sm:$0xff]  }
 0x9ed   :  { %12521 = vmatpush2.bf16.msra.mxu0 %v16574_v40  ;;  %v16634_v40 = vld [vmem:[#allocation16 + $0x1030] ss:$8 sps:$4 sm:$0xff]  }
 0x9ee   :  { %12522 = vmatprep.subr.bf16.mxu0 %v16582_v53  ;;  %v16642_v53 = vld [vmem:[#allocation16 + $0x1024] ss:$8 sps:$4 sm:$0xff]  }
 0x9ef   :  { %12570 = vmatpush2.bf16.msra.mxu1 %v16577_v12  ;;  %v16637_v12 = vld [vmem:[#allocation16 + $0x11f0] ss:$8 sps:$4 sm:$0xff]  }
 0x9f0   :  { %12571 = vmatprep.subr.bf16.mxu1 %v16585_v1  ;;  %v16645_v1 = vld [vmem:[#allocation16 + $0x11e4] ss:$8 sps:$4 sm:$0xff]  }
 0x9f1   :  { %12523 = vmatpush2.bf16.msra.mxu0 %v16580_v57  ;;  %v16640_v57 = vld [vmem:[#allocation16 + $0x1020] ss:$8 sps:$4 sm:$0xff]  }
 0x9f2   :  { %12524 = vmatprep.subr.bf16.mxu0 %v16588_v11  ;;  %v16648_v11 = vld [vmem:[#allocation16 + $0x1014] ss:$8 sps:$4 sm:$0xff]  }
 0x9f3   :  { %12572 = vmatpush2.bf16.msra.mxu1 %v16583_v27  ;;  %v16643_v27 = vld [vmem:[#allocation16 + $0x11e0] ss:$8 sps:$4 sm:$0xff]  }
 0x9f4   :  { %12623 = vmatprep.subr.bf16.mxu1 %v16591_v34  ;;  %v16651_v34 = vld [vmem:[#allocation16 + $0x11d4] ss:$8 sps:$4 sm:$0xff]  }
 0x9f5   :  { %12525 = vmatpush2.bf16.msra.mxu0 %v16586_v8  ;;  %v16646_v8 = vld [vmem:[#allocation16 + $0x1010] ss:$8 sps:$4 sm:$0xff]  }
 0x9f6   :  { %v12329_v47 = vpop.f32.mrf.mxu1  ;;  %12574 = vmatmul.mubr.bf16.vlgmr.msra.gmra.mxu1 %v20958_v3  ;;  %12526 = vmatprep.subr.bf16.mxu0 %v16594_v38  ;;  %v16604_v3 = vld [vmem:[#allocation16 + $0xe80] ss:$8 sps:$4 sm:$0xff]   ;;  %v16654_v38 = vld [vmem:[#allocation16 + $0x1004] ss:$8 sps:$4 sm:$0xff]  }
 0x9f7   :  { %12624 = vmatpush1.bf16.msra.mxu1 %v16589_v63  ;;  %12655 = vmatprep.mubr.bf16.mxu1 %v7101_v5  ;;  %v16649_v63 = vld [vmem:[#allocation16 + $0x11d0] ss:$8 sps:$4 sm:$0xff]   ;;  %v16652_v5 = vld [vmem:[#allocation16 + $0x1000] ss:$8 sps:$4 sm:$0xff]  }
 0x9f8   :  { %v12331_v41 = vpop.f32.mrf.mxu1  ;;  %12625 = vmatprep.subr.bf16.mxu1 %v16597_v58  ;;  %v16657_v58 = vld [vmem:[#allocation16 + $0x11c4] ss:$8 sps:$4 sm:$0xff]  }
 0x9f9   :  { %12527 = vmatpush2.bf16.msra.mxu0 %v16592_v33  ;;  %v16660_v33 = vld [vmem:[#allocation16 + $0x10f4] ss:$8 sps:$4 sm:$0xff]  }
 0x9fa   :  { %v12333_v45 = vpop.f32.mrf.mxu1  ;;  %12528 = vmatprep.subr.bf16.mxu0 %v16600_v50  ;;  %v16663_v50 = vld [vmem:[#allocation16 + $0x11b4] ss:$8 sps:$4 sm:$0xff]  }
 0x9fb   :  { %12626 = vmatpush1.bf16.msra.mxu1 %v16595_v49  ;;  %v16658_v49 = vld [vmem:[#allocation16 + $0x10f0] ss:$8 sps:$4 sm:$0xff]   ;;  %v16664_v45 = vld [vmem:[#allocation16 + $0x10e0] ss:$8 sps:$4 sm:$0xff]  }
 0x9fc   :  { %v12334_v37 = vpop.f32.mrf.mxu1  ;;  %12627 = vmatprep.subr.bf16.mxu1 %v16603_v61  ;;  %v16661_v61 = vld [vmem:[#allocation16 + $0x11b0] ss:$8 sps:$4 sm:$0xff]  }
 0x9fd   :  { %12529 = vmatpush2.bf16.msra.mxu0 %v16598_v24  ;;  %v16669_v24 = vld [vmem:[#allocation16 + $0x11a4] ss:$8 sps:$4 sm:$0xff]   ;;  %v16675_v37 = vld [vmem:[#allocation16 + $0x1194] ss:$8 sps:$4 sm:$0xff]  }
 0x9fe   :  { %12530 = vmatprep.subr.bf16.mxu0 %v16606_v25  ;;  %v16672_v25 = vld [vmem:[#allocation16 + $0x10d4] ss:$8 sps:$4 sm:$0xff]  }
 0x9ff   :  { %12628 = vmatpush1.bf16.msra.mxu1 %v16601_v22  ;;  %v16667_v22 = vld [vmem:[#allocation16 + $0x11a0] ss:$8 sps:$4 sm:$0xff]  }
 0xa00   :  { %12629 = vmatprep.subr.bf16.mxu1 %v16609_v21  ;;  %v16670_v21 = vld [vmem:[#allocation16 + $0x10d0] ss:$8 sps:$4 sm:$0xff]  }
 0xa01   :  { %12531 = vmatpush2.bf16.msra.mxu0 %v16604_v3  ;;  %v16678_v3 = vld [vmem:[#allocation16 + $0x10c4] ss:$8 sps:$4 sm:$0xff]  }
 0xa02   :  { %12582 = vmatprep.subr.bf16.mxu0 %v16612_v9  ;;  %v16673_v9 = vld [vmem:[#allocation16 + $0x1190] ss:$8 sps:$4 sm:$0xff]  }
 0xa03   :  { %12630 = vmatpush1.bf16.msra.mxu1 %v16607_v31  ;;  %v16681_v31 = vld [vmem:[#allocation16 + $0x1184] ss:$8 sps:$4 sm:$0xff]  }
 0xa04   :  { %v12288_v6 = vpop.f32.mrf.mxu0  ;;  %12533 = vmatmul.mubr.bf16.vlgmr.msra.gmra.mxu0 %v7089_v46  ;;  %12631 = vmatprep.subr.bf16.mxu1 %v16615_v56  ;;  %v16676_v56 = vld [vmem:[#allocation16 + $0x10c0] ss:$8 sps:$4 sm:$0xff]  }
 0xa05   :  { %v12289_v13 = vadd.f32 %v12288_v6, %v21090_v36  ;;  %12583 = vmatpush1.bf16.msra.mxu0 %v16610_v26  ;;  %12614 = vmatprep.mubr.bf16.mxu0 %v20973_v18  ;;  %v16684_v26 = vld [vmem:[#allocation16 + $0x10b4] ss:$8 sps:$4 sm:$0xff]   ;;  %v16679_v46 = vld [vmem:[#allocation16 + $0x1180] ss:$8 sps:$4 sm:$0xff]   ;;  %v16690_v6 = vld [vmem:[#allocation16 + $0x10a4] ss:$8 sps:$4 sm:$0xff]  }
 0xa06   :  { %v12290_v29 = vpop.f32.mrf.mxu0  ;;  %12584 = vmatprep.subr.bf16.mxu0 %v16618_v54  ;;  %v16687_v54 = vld [vmem:[#allocation16 + $0x1374] ss:$8 sps:$4 sm:$0xff]  }
 0xa07   :  { %v12291_v15 = vadd.f32 %v12290_v29, %v21092_v28  ;;  %12632 = vmatpush1.bf16.msra.mxu1 %v16613_v14  ;;  %v21100_v32 = vadd.f32 %v12329_v47, %v12289_v13  ;;  %v16628_v28 = vld [vmem:[#allocation16 + $0x1040] ss:$8 sps:$4 sm:$0xff]   ;;  %v16682_v14 = vld [vmem:[#allocation16 + $0x10b0] ss:$8 sps:$4 sm:$0xff]   ;;  %v16693_v13 = vld [vmem:[#allocation16 + $0x1364] ss:$8 sps:$4 sm:$0xff]  }
 0xa08   :  { %v12292_v35 = vpop.f32.mrf.mxu0  ;;  %12633 = vmatprep.subr.bf16.mxu1 %v16621_v60  ;;  %v16655_v47 = vld [vmem:[#allocation16 + $0x11c0] ss:$8 sps:$4 sm:$0xff]   ;;  %v16685_v60 = vld [vmem:[#allocation16 + $0x1370] ss:$8 sps:$4 sm:$0xff]  }
 0xa09   :  { %12585 = vmatpush1.bf16.msra.mxu0 %v16616_v55  ;;  %v21102_v17 = vadd.f32 %v12331_v41, %v12291_v15  ;;  %v16666_v41 = vld [vmem:[#allocation16 + $0x10e4] ss:$8 sps:$4 sm:$0xff]   ;;  %v7105_v55 = vrot.slane %v20991_v30, 4  ;;  %v16688_v29 = vld [vmem:[#allocation16 + $0x10a0] ss:$8 sps:$4 sm:$0xff]  }
 0xa0a   :  { %v12293_v36 = vpop.f32.mrf.mxu0  ;;  %12586 = vmatprep.subr.bf16.mxu0 %v16624_v16  ;;  %v16696_v15 = vld [vmem:[#allocation16 + $0x1094] ss:$8 sps:$4 sm:$0xff]  }
 0xa0b   :  { %12634 = vmatpush1.bf16.msra.mxu1 %v16619_v10  ;;  %v16691_v10 = vld [vmem:[#allocation16 + $0x1360] ss:$8 sps:$4 sm:$0xff]  }
 0xa0c   :  { %12635 = vmatprep.subr.bf16.mxu1 %v16627_v2  ;;  %v16699_v2 = vld [vmem:[#allocation16 + $0x1354] ss:$8 sps:$4 sm:$0xff]  }
 0xa0d   :  { %12587 = vmatpush1.bf16.msra.mxu0 %v16622_v7  ;;  %v16694_v7 = vld [vmem:[#allocation16 + $0x1090] ss:$8 sps:$4 sm:$0xff]  }
 0xa0e   :  { %12588 = vmatprep.subr.bf16.mxu0 %v16630_v23  ;;  %v16702_v23 = vld [vmem:[#allocation16 + $0x1084] ss:$8 sps:$4 sm:$0xff]  }
 0xa0f   :  { %12636 = vmatpush1.bf16.msra.mxu1 %v16625_v19  ;;  %v16697_v19 = vld [vmem:[#allocation16 + $0x1350] ss:$8 sps:$4 sm:$0xff]  }
 0xa10   :  { %12637 = vmatprep.subr.bf16.mxu1 %v16633_v44 }
 0xa11   :  { %12589 = vmatpush1.bf16.msra.mxu0 %v16628_v28  ;;  %v16705_v28 = vld [vmem:[#allocation16 + $0x1344] ss:$8 sps:$4 sm:$0xff]  }
 0xa12   :  { %12590 = vmatprep.subr.bf16.mxu0 %v16636_v20  ;;  %v16708_v20 = vld [vmem:[#allocation16 + $0x1274] ss:$8 sps:$4 sm:$0xff]  }
 0xa13   :  { %12638 = vmatpush1.bf16.msra.mxu1 %v16631_v62  ;;  %v16703_v62 = vld [vmem:[#allocation16 + $0x1340] ss:$8 sps:$4 sm:$0xff]  }
 0xa14   :  { %12639 = vmatprep.subr.bf16.mxu1 %v16639_v52  ;;  %v16711_v52 = vld [vmem:[#allocation16 + $0x1334] ss:$8 sps:$4 sm:$0xff]  }
 0xa15   :  { %12591 = vmatpush1.bf16.msra.mxu0 %v16634_v40  ;;  %v16706_v40 = vld [vmem:[#allocation16 + $0x1270] ss:$8 sps:$4 sm:$0xff]  }
 0xa16   :  { %12592 = vmatprep.subr.bf16.mxu0 %v16642_v53  ;;  %v16714_v53 = vld [vmem:[#allocation16 + $0x1264] ss:$8 sps:$4 sm:$0xff]  }
 0xa17   :  { %12640 = vmatpush2.bf16.msra.mxu1 %v16637_v12  ;;  %v7103_v12 = vrot.slane %v21003_v42, 4 }
 0xa18   :  { %12641 = vmatprep.subr.bf16.mxu1 %v16645_v1  ;;  %v16709_v1 = vld [vmem:[#allocation16 + $0x1330] ss:$8 sps:$4 sm:$0xff]  }
 0xa19   :  { %12593 = vmatpush1.bf16.msra.mxu0 %v16640_v57 }
 0xa1a   :  { %12594 = vmatprep.subr.bf16.mxu0 %v16648_v11  ;;  %v16717_v11 = vld [vmem:[#allocation16 + $0x1324] ss:$8 sps:$4 sm:$0xff]  }
 0xa1b   :  { %12642 = vmatpush2.bf16.msra.mxu1 %v16643_v27 }
 0xa1c   :  { %12643 = vmatprep.subr.bf16.mxu1 %v16651_v34  ;;  %v16712_v34 = vld [vmem:[#allocation16 + $0x1260] ss:$8 sps:$4 sm:$0xff]  }
 0xa1d   :  { %12595 = vmatpush1.bf16.msra.mxu0 %v16646_v8 }
 0xa1e   :  { %12596 = vmatprep.subr.bf16.mxu0 %v16654_v38  ;;  %v16720_v38 = vld [vmem:[#allocation16 + $0x1254] ss:$8 sps:$4 sm:$0xff]  }
 0xa1f   :  { %12644 = vmatpush2.bf16.msra.mxu1 %v16649_v63 }
 0xa20   :  { %12645 = vmatprep.subr.bf16.mxu1 %v16657_v58  ;;  %v16715_v58 = vld [vmem:[#allocation16 + $0x1320] ss:$8 sps:$4 sm:$0xff]  }
 0xa21   :  { %12597 = vmatpush1.bf16.msra.mxu0 %v16652_v5 }
 0xa22   :  { %12598 = vmatprep.subr.bf16.mxu0 %v16660_v33 }
 0xa23   :  { %12646 = vmatpush2.bf16.msra.mxu1 %v16655_v47  ;;  %v16723_v47 = vld [vmem:[#allocation16 + $0x1314] ss:$8 sps:$4 sm:$0xff]  }
 0xa24   :  { %12647 = vmatprep.subr.bf16.mxu1 %v16663_v50 }
 0xa25   :  { %12599 = vmatpush2.bf16.msra.mxu0 %v16658_v49  ;;  %v16726_v49 = vld [vmem:[#allocation16 + $0x1244] ss:$8 sps:$4 sm:$0xff]  }
 0xa26   :  { %12600 = vmatprep.subr.bf16.mxu0 %v16666_v41  ;;  %v16721_v41 = vld [vmem:[#allocation16 + $0x1310] ss:$8 sps:$4 sm:$0xff]  }
 0xa27   :  { %12648 = vmatpush2.bf16.msra.mxu1 %v16661_v61  ;;  %v16729_v61 = vld [vmem:[#allocation16 + $0x1304] ss:$8 sps:$4 sm:$0xff]  }
 0xa28   :  { %12649 = vmatprep.subr.bf16.mxu1 %v16669_v24  ;;  %v16732_v24 = vld [vmem:[#allocation16 + $0x1234] ss:$8 sps:$4 sm:$0xff]  }
 0xa29   :  { %12601 = vmatpush2.bf16.msra.mxu0 %v16664_v45  ;;  %v16727_v45 = vld [vmem:[#allocation16 + $0x1300] ss:$8 sps:$4 sm:$0xff]  }
 0xa2a   :  { %12602 = vmatprep.subr.bf16.mxu0 %v16672_v25  ;;  %v16735_v25 = vld [vmem:[#allocation16 + $0x13f4] ss:$8 sps:$4 sm:$0xff]  }
 0xa2b   :  { %12650 = vmatpush2.bf16.msra.mxu1 %v16667_v22  ;;  %v16730_v22 = vld [vmem:[#allocation16 + $0x1230] ss:$8 sps:$4 sm:$0xff]  }
 0xa2c   :  { %12651 = vmatprep.subr.bf16.mxu1 %v16675_v37  ;;  %v16738_v37 = vld [vmem:[#allocation16 + $0x1224] ss:$8 sps:$4 sm:$0xff]  }
 0xa2d   :  { %12603 = vmatpush2.bf16.msra.mxu0 %v16670_v21  ;;  %v16733_v21 = vld [vmem:[#allocation16 + $0x13f0] ss:$8 sps:$4 sm:$0xff]  }
 0xa2e   :  { %12604 = vmatprep.subr.bf16.mxu0 %v16678_v3  ;;  %v16741_v3 = vld [vmem:[#allocation16 + $0x13e4] ss:$8 sps:$4 sm:$0xff]  }
 0xa2f   :  { %12652 = vmatpush2.bf16.msra.mxu1 %v16673_v9  ;;  %v16736_v9 = vld [vmem:[#allocation16 + $0x1220] ss:$8 sps:$4 sm:$0xff]  }
 0xa30   :  { %12653 = vmatprep.subr.bf16.mxu1 %v16681_v31  ;;  %v16744_v31 = vld [vmem:[#allocation16 + $0x1214] ss:$8 sps:$4 sm:$0xff]  }
 0xa31   :  { %12605 = vmatpush2.bf16.msra.mxu0 %v16676_v56  ;;  %v16739_v56 = vld [vmem:[#allocation16 + $0x13e0] ss:$8 sps:$4 sm:$0xff]  }
 0xa32   :  { %12606 = vmatprep.subr.bf16.mxu0 %v16684_v26  ;;  %v16747_v26 = vld [vmem:[#allocation16 + $0x13d4] ss:$8 sps:$4 sm:$0xff]  }
 0xa33   :  { %12654 = vmatpush2.bf16.msra.mxu1 %v16679_v46  ;;  %v16742_v46 = vld [vmem:[#allocation16 + $0x1210] ss:$8 sps:$4 sm:$0xff]  }
 0xa34   :  { %12705 = vmatprep.subr.bf16.mxu1 %v16687_v54  ;;  %v16750_v54 = vld [vmem:[#allocation16 + $0x1204] ss:$8 sps:$4 sm:$0xff]  }
 0xa35   :  { %12607 = vmatpush2.bf16.msra.mxu0 %v16682_v14  ;;  %v16745_v14 = vld [vmem:[#allocation16 + $0x13d0] ss:$8 sps:$4 sm:$0xff]  }
 0xa36   :  { %v12411_v16 = vpop.f32.mrf.mxu1  ;;  %12656 = vmatmul.mubr.bf16.vlgmr.msra.gmra.mxu1 %v20991_v30  ;;  %12608 = vmatprep.subr.bf16.mxu0 %v16690_v6  ;;  %v16700_v30 = vld [vmem:[#allocation16 + $0x1080] ss:$8 sps:$4 sm:$0xff]   ;;  %v16753_v6 = vld [vmem:[#allocation16 + $0x13c4] ss:$8 sps:$4 sm:$0xff]  }
 0xa37   :  { %12706 = vmatpush1.bf16.msra.mxu1 %v16685_v60  ;;  %12737 = vmatprep.mubr.bf16.mxu1 %v7105_v55  ;;  %v16748_v60 = vld [vmem:[#allocation16 + $0x1200] ss:$8 sps:$4 sm:$0xff]  }
 0xa38   :  { %v12413_v35 = vpop.f32.mrf.mxu1  ;;  %12707 = vmatprep.subr.bf16.mxu1 %v16693_v13  ;;  %v16756_v13 = vld [vmem:[#allocation16 + $0x12f4] ss:$8 sps:$4 sm:$0xff]   ;;  %v16751_v55 = vld [vmem:[#allocation16 + $0x13c0] ss:$8 sps:$4 sm:$0xff]  }
 0xa39   :  { %12609 = vmatpush2.bf16.msra.mxu0 %v16688_v29  ;;  %v16759_v29 = vld [vmem:[#allocation16 + $0x13b4] ss:$8 sps:$4 sm:$0xff]  }
 0xa3a   :  { %v12415_v36 = vpop.f32.mrf.mxu1  ;;  %12610 = vmatprep.subr.bf16.mxu0 %v16696_v15  ;;  %v16762_v15 = vld [vmem:[#allocation16 + $0x12e4] ss:$8 sps:$4 sm:$0xff]  }
 0xa3b   :  { %12708 = vmatpush1.bf16.msra.mxu1 %v16691_v10  ;;  %v16757_v10 = vld [vmem:[#allocation16 + $0x13b0] ss:$8 sps:$4 sm:$0xff]   ;;  %v16763_v36 = vld [vmem:[#allocation16 + $0x13a0] ss:$8 sps:$4 sm:$0xff]  }
 0xa3c   :  { %v12416_v44 = vpop.f32.mrf.mxu1  ;;  %12709 = vmatprep.subr.bf16.mxu1 %v16699_v2  ;;  %v16760_v2 = vld [vmem:[#allocation16 + $0x12e0] ss:$8 sps:$4 sm:$0xff]  }
 0xa3d   :  { %12611 = vmatpush2.bf16.msra.mxu0 %v16694_v7  ;;  %v16768_v7 = vld [vmem:[#allocation16 + $0x12d4] ss:$8 sps:$4 sm:$0xff]   ;;  %v16774_v44 = vld [vmem:[#allocation16 + $0x12c4] ss:$8 sps:$4 sm:$0xff]  }
 0xa3e   :  { %12612 = vmatprep.subr.bf16.mxu0 %v16702_v23  ;;  %v16771_v23 = vld [vmem:[#allocation16 + $0x1394] ss:$8 sps:$4 sm:$0xff]  }
 0xa3f   :  { %12710 = vmatpush1.bf16.msra.mxu1 %v16697_v19  ;;  %v16766_v19 = vld [vmem:[#allocation16 + $0x12d0] ss:$8 sps:$4 sm:$0xff]  }
 0xa40   :  { %12711 = vmatprep.subr.bf16.mxu1 %v16705_v28  ;;  %v16769_v28 = vld [vmem:[#allocation16 + $0x1390] ss:$8 sps:$4 sm:$0xff]  }
 0xa41   :  { %12613 = vmatpush2.bf16.msra.mxu0 %v16700_v30  ;;  %v16777_v30 = vld [vmem:[#allocation16 + $0x1384] ss:$8 sps:$4 sm:$0xff]  }
 0xa42   :  { %12664 = vmatprep.subr.bf16.mxu0 %v16708_v20  ;;  %v16772_v20 = vld [vmem:[#allocation16 + $0x12c0] ss:$8 sps:$4 sm:$0xff]  }
 0xa43   :  { %12712 = vmatpush1.bf16.msra.mxu1 %v16703_v62  ;;  %v16780_v62 = vld [vmem:[#allocation16 + $0x12b4] ss:$8 sps:$4 sm:$0xff]  }
 0xa44   :  { %v12370_v57 = vpop.f32.mrf.mxu0  ;;  %12615 = vmatmul.mubr.bf16.vlgmr.msra.gmra.mxu0 %v21003_v42  ;;  %12713 = vmatprep.subr.bf16.mxu1 %v16711_v52  ;;  %v16718_v42 = vld [vmem:[#allocation16 + $0x1250] ss:$8 sps:$4 sm:$0xff]   ;;  %v16775_v52 = vld [vmem:[#allocation16 + $0x1380] ss:$8 sps:$4 sm:$0xff]  }
 0xa45   :  { %v12371_v27 = vadd.f32 %v12370_v57, %v21100_v32  ;;  %12665 = vmatpush1.bf16.msra.mxu0 %v16706_v40  ;;  %12696 = vmatprep.mubr.bf16.mxu0 %v7103_v12  ;;  %v16783_v40 = vld [vmem:[#allocation16 + $0x1574] ss:$8 sps:$4 sm:$0xff]   ;;  %v16786_v12 = vld [vmem:[#allocation16 + $0x12a4] ss:$8 sps:$4 sm:$0xff]   ;;  %v7104_v57 = vrot.slane %v20973_v18, 4 }
 0xa46   :  { %v12372_v8 = vpop.f32.mrf.mxu0  ;;  %12666 = vmatprep.subr.bf16.mxu0 %v16714_v53  ;;  %v16778_v53 = vld [vmem:[#allocation16 + $0x12b0] ss:$8 sps:$4 sm:$0xff]   ;;  %v16798_v18 = vld [vmem:[#allocation16 + $0x1284] ss:$8 sps:$4 sm:$0xff]  }
 0xa47   :  { %v12373_v63 = vadd.f32 %v12372_v8, %v21102_v17  ;;  %12714 = vmatpush1.bf16.msra.mxu1 %v16709_v1  ;;  %v21110_v5 = vadd.f32 %v12411_v16, %v12371_v27  ;;  %v16724_v17 = vld [vmem:[#allocation16 + $0x1240] ss:$8 sps:$4 sm:$0xff]   ;;  %v16754_v16 = vld [vmem:[#allocation16 + $0x12f0] ss:$8 sps:$4 sm:$0xff]   ;;  %v16792_v8 = vld [vmem:[#allocation16 + $0x1294] ss:$8 sps:$4 sm:$0xff]  }
 0xa48   :  { %v12374_v33 = vpop.f32.mrf.mxu0  ;;  %12715 = vmatprep.subr.bf16.mxu1 %v16717_v11  ;;  %v16781_v1 = vld [vmem:[#allocation16 + $0x1570] ss:$8 sps:$4 sm:$0xff]   ;;  %v16789_v11 = vld [vmem:[#allocation16 + $0x1564] ss:$8 sps:$4 sm:$0xff]   ;;  %v16784_v27 = vld [vmem:[#allocation16 + $0x12a0] ss:$8 sps:$4 sm:$0xff]  }
 0xa49   :  { %12667 = vmatpush1.bf16.msra.mxu0 %v16712_v34  ;;  %v21112_v50 = vadd.f32 %v12413_v35, %v12373_v63  ;;  %v16765_v35 = vld [vmem:[#allocation16 + $0x13a4] ss:$8 sps:$4 sm:$0xff]   ;;  %v16790_v33 = vld [vmem:[#allocation16 + $0x1290] ss:$8 sps:$4 sm:$0xff]  }
 0xa4a   :  { %v12375_v32 = vpop.f32.mrf.mxu0  ;;  %12668 = vmatprep.subr.bf16.mxu0 %v16720_v38  ;;  %v16787_v38 = vld [vmem:[#allocation16 + $0x1560] ss:$8 sps:$4 sm:$0xff]  }
 0xa4b   :  { %12716 = vmatpush1.bf16.msra.mxu1 %v16715_v58  ;;  %v16795_v58 = vld [vmem:[#allocation16 + $0x1554] ss:$8 sps:$4 sm:$0xff]  }
 0xa4c   :  { %12717 = vmatprep.subr.bf16.mxu1 %v16723_v47 }
 0xa4d   :  { %12669 = vmatpush1.bf16.msra.mxu0 %v16718_v42  ;;  %v16793_v42 = vld [vmem:[#allocation16 + $0x1550] ss:$8 sps:$4 sm:$0xff]  }
 0xa4e   :  { %12670 = vmatprep.subr.bf16.mxu0 %v16726_v49  ;;  %v16801_v49 = vld [vmem:[#allocation16 + $0x1544] ss:$8 sps:$4 sm:$0xff]  }
 0xa4f   :  { %12718 = vmatpush1.bf16.msra.mxu1 %v16721_v41  ;;  %v16796_v41 = vld [vmem:[#allocation16 + $0x1280] ss:$8 sps:$4 sm:$0xff]  }
 0xa50   :  { %12719 = vmatprep.subr.bf16.mxu1 %v16729_v61  ;;  %v16804_v61 = vld [vmem:[#allocation16 + $0x1474] ss:$8 sps:$4 sm:$0xff]  }
 0xa51   :  { %12671 = vmatpush1.bf16.msra.mxu0 %v16724_v17  ;;  %v16799_v17 = vld [vmem:[#allocation16 + $0x1540] ss:$8 sps:$4 sm:$0xff]  }
 0xa52   :  { %12672 = vmatprep.subr.bf16.mxu0 %v16732_v24  ;;  %v16807_v24 = vld [vmem:[#allocation16 + $0x1534] ss:$8 sps:$4 sm:$0xff]  }
 0xa53   :  { %12720 = vmatpush1.bf16.msra.mxu1 %v16727_v45  ;;  %v16802_v45 = vld [vmem:[#allocation16 + $0x1470] ss:$8 sps:$4 sm:$0xff]  }
 0xa54   :  { %12721 = vmatprep.subr.bf16.mxu1 %v16735_v25  ;;  %v7102_v25 = vrot.slane %v20945_v51, 4  ;;  %v16811_v51 = vld [vmem:[#allocation16 + $0x1520] ss:$8 sps:$4 sm:$0xff]  }
 0xa55   :  { %12673 = vmatpush1.bf16.msra.mxu0 %v16730_v22  ;;  %v16810_v22 = vld [vmem:[#allocation16 + $0x1464] ss:$8 sps:$4 sm:$0xff]  }
 0xa56   :  { %12674 = vmatprep.subr.bf16.mxu0 %v16738_v37  ;;  %v16805_v37 = vld [vmem:[#allocation16 + $0x1530] ss:$8 sps:$4 sm:$0xff]  }
 0xa57   :  { %12722 = vmatpush2.bf16.msra.mxu1 %v16733_v21 }
 0xa58   :  { %12723 = vmatprep.subr.bf16.mxu1 %v16741_v3  ;;  %v16813_v3 = vld [vmem:[#allocation16 + $0x1524] ss:$8 sps:$4 sm:$0xff]  }
 0xa59   :  { %12675 = vmatpush1.bf16.msra.mxu0 %v16736_v9 }
 0xa5a   :  { %12676 = vmatprep.subr.bf16.mxu0 %v16744_v31  ;;  %v16808_v31 = vld [vmem:[#allocation16 + $0x1460] ss:$8 sps:$4 sm:$0xff]  }
 0xa5b   :  { %12724 = vmatpush2.bf16.msra.mxu1 %v16739_v56 }
 0xa5c   :  { %12725 = vmatprep.subr.bf16.mxu1 %v16747_v26  ;;  %v16816_v26 = vld [vmem:[#allocation16 + $0x1454] ss:$8 sps:$4 sm:$0xff]  }
 0xa5d   :  { %12677 = vmatpush1.bf16.msra.mxu0 %v16742_v46 }
 0xa5e   :  { %12678 = vmatprep.subr.bf16.mxu0 %v16750_v54 }
 0xa5f   :  { %12726 = vmatpush2.bf16.msra.mxu1 %v16745_v14 }
 0xa60   :  { %12727 = vmatprep.subr.bf16.mxu1 %v16753_v6  ;;  %v16819_v6 = vld [vmem:[#allocation16 + $0x1514] ss:$8 sps:$4 sm:$0xff]  }
 0xa61   :  { %12679 = vmatpush1.bf16.msra.mxu0 %v16748_v60  ;;  %v16814_v60 = vld [vmem:[#allocation16 + $0x1450] ss:$8 sps:$4 sm:$0xff]  }
 0xa62   :  { %12680 = vmatprep.subr.bf16.mxu0 %v16756_v13 }
 0xa63   :  { %12728 = vmatpush2.bf16.msra.mxu1 %v16751_v55  ;;  %v16822_v55 = vld [vmem:[#allocation16 + $0x1444] ss:$8 sps:$4 sm:$0xff]  }
 0xa64   :  { %12729 = vmatprep.subr.bf16.mxu1 %v16759_v29  ;;  %v16817_v29 = vld [vmem:[#allocation16 + $0x1510] ss:$8 sps:$4 sm:$0xff]  }
 0xa65   :  { %12681 = vmatpush2.bf16.msra.mxu0 %v16754_v16  ;;  %v16825_v16 = vld [vmem:[#allocation16 + $0x1504] ss:$8 sps:$4 sm:$0xff]  }
 0xa66   :  { %12682 = vmatprep.subr.bf16.mxu0 %v16762_v15  ;;  %v16828_v15 = vld [vmem:[#allocation16 + $0x1434] ss:$8 sps:$4 sm:$0xff]  }
 0xa67   :  { %12730 = vmatpush2.bf16.msra.mxu1 %v16757_v10  ;;  %v16823_v10 = vld [vmem:[#allocation16 + $0x1500] ss:$8 sps:$4 sm:$0xff]  }
 0xa68   :  { %12731 = vmatprep.subr.bf16.mxu1 %v16765_v35  ;;  %v16831_v35 = vld [vmem:[#allocation16 + $0x15f4] ss:$8 sps:$4 sm:$0xff]  }
 0xa69   :  { %12683 = vmatpush2.bf16.msra.mxu0 %v16760_v2  ;;  %v16826_v2 = vld [vmem:[#allocation16 + $0x1430] ss:$8 sps:$4 sm:$0xff]  }
 0xa6a   :  { %12684 = vmatprep.subr.bf16.mxu0 %v16768_v7  ;;  %v16834_v7 = vld [vmem:[#allocation16 + $0x1424] ss:$8 sps:$4 sm:$0xff]  }
 0xa6b   :  { %12732 = vmatpush2.bf16.msra.mxu1 %v16763_v36  ;;  %v16829_v36 = vld [vmem:[#allocation16 + $0x15f0] ss:$8 sps:$4 sm:$0xff]  }
 0xa6c   :  { %12733 = vmatprep.subr.bf16.mxu1 %v16771_v23  ;;  %v16837_v23 = vld [vmem:[#allocation16 + $0x15e4] ss:$8 sps:$4 sm:$0xff]  }
 0xa6d   :  { %12685 = vmatpush2.bf16.msra.mxu0 %v16766_v19  ;;  %v16832_v19 = vld [vmem:[#allocation16 + $0x1420] ss:$8 sps:$4 sm:$0xff]  }
 0xa6e   :  { %12686 = vmatprep.subr.bf16.mxu0 %v16774_v44  ;;  %v16840_v44 = vld [vmem:[#allocation16 + $0x1414] ss:$8 sps:$4 sm:$0xff]  }
 0xa6f   :  { %12734 = vmatpush2.bf16.msra.mxu1 %v16769_v28  ;;  %v16835_v28 = vld [vmem:[#allocation16 + $0x15e0] ss:$8 sps:$4 sm:$0xff]  }
 0xa70   :  { %12735 = vmatprep.subr.bf16.mxu1 %v16777_v30  ;;  %v16843_v30 = vld [vmem:[#allocation16 + $0x15d4] ss:$8 sps:$4 sm:$0xff]  }
 0xa71   :  { %12687 = vmatpush2.bf16.msra.mxu0 %v16772_v20  ;;  %v16838_v20 = vld [vmem:[#allocation16 + $0x1410] ss:$8 sps:$4 sm:$0xff]  }
 0xa72   :  { %12688 = vmatprep.subr.bf16.mxu0 %v16780_v62  ;;  %v16846_v62 = vld [vmem:[#allocation16 + $0x1404] ss:$8 sps:$4 sm:$0xff]  }
 0xa73   :  { %12736 = vmatpush2.bf16.msra.mxu1 %v16775_v52  ;;  %v16841_v52 = vld [vmem:[#allocation16 + $0x15d0] ss:$8 sps:$4 sm:$0xff]  }
 0xa74   :  { %12787 = vmatprep.subr.bf16.mxu1 %v16783_v40  ;;  %v16849_v40 = vld [vmem:[#allocation16 + $0x15c4] ss:$8 sps:$4 sm:$0xff]  }
 0xa75   :  { %12689 = vmatpush2.bf16.msra.mxu0 %v16778_v53  ;;  %v16844_v53 = vld [vmem:[#allocation16 + $0x1400] ss:$8 sps:$4 sm:$0xff]  }
 0xa76   :  { %v12493_v34 = vpop.f32.mrf.mxu1  ;;  %12738 = vmatmul.mubr.bf16.vlgmr.msra.gmra.mxu1 %v7104_v57  ;;  %12690 = vmatprep.subr.bf16.mxu0 %v16786_v12  ;;  %v16852_v12 = vld [vmem:[#allocation16 + $0x14f4] ss:$8 sps:$4 sm:$0xff]  }
 0xa77   :  { %12788 = vmatpush1.bf16.msra.mxu1 %v16781_v1  ;;  %12819 = vmatprep.mubr.bf16.mxu1 %v21015_v0  ;;  %v16847_v1 = vld [vmem:[#allocation16 + $0x15c0] ss:$8 sps:$4 sm:$0xff]   ;;  %v16855_v57 = vld [vmem:[#allocation16 + $0x15b4] ss:$8 sps:$4 sm:$0xff]  }
 0xa78   :  { %v12495_v63 = vpop.f32.mrf.mxu1  ;;  %12789 = vmatprep.subr.bf16.mxu1 %v16789_v11  ;;  %v16850_v11 = vld [vmem:[#allocation16 + $0x14f0] ss:$8 sps:$4 sm:$0xff]  }
 0xa79   :  { %12691 = vmatpush2.bf16.msra.mxu0 %v16784_v27  ;;  %v16858_v27 = vld [vmem:[#allocation16 + $0x14e4] ss:$8 sps:$4 sm:$0xff]  }
 0xa7a   :  { %v12497_v47 = vpop.f32.mrf.mxu1  ;;  %12692 = vmatprep.subr.bf16.mxu0 %v16792_v8  ;;  %v16861_v8 = vld [vmem:[#allocation16 + $0x15a4] ss:$8 sps:$4 sm:$0xff]  }
 0xa7b   :  { %12790 = vmatpush1.bf16.msra.mxu1 %v16787_v38  ;;  %v16856_v38 = vld [vmem:[#allocation16 + $0x14e0] ss:$8 sps:$4 sm:$0xff]   ;;  %v16862_v47 = vld [vmem:[#allocation16 + $0x14d0] ss:$8 sps:$4 sm:$0xff]  }
 0xa7c   :  { %v12498_v32 = vpop.f32.mrf.mxu1  ;;  %12791 = vmatprep.subr.bf16.mxu1 %v16795_v58  ;;  %v16859_v58 = vld [vmem:[#allocation16 + $0x15a0] ss:$8 sps:$4 sm:$0xff]  }
 0xa7d   :  { %12693 = vmatpush2.bf16.msra.mxu0 %v16790_v33  ;;  %v16867_v33 = vld [vmem:[#allocation16 + $0x1594] ss:$8 sps:$4 sm:$0xff]   ;;  %v16873_v32 = vld [vmem:[#allocation16 + $0x1584] ss:$8 sps:$4 sm:$0xff]  }
 0xa7e   :  { %12694 = vmatprep.subr.bf16.mxu0 %v16798_v18  ;;  %v16870_v18 = vld [vmem:[#allocation16 + $0x14c4] ss:$8 sps:$4 sm:$0xff]  }
 0xa7f   :  { %12792 = vmatpush1.bf16.msra.mxu1 %v16793_v42  ;;  %v16865_v42 = vld [vmem:[#allocation16 + $0x1590] ss:$8 sps:$4 sm:$0xff]  }
 0xa80   :  { %12793 = vmatprep.subr.bf16.mxu1 %v16801_v49  ;;  %v16868_v49 = vld [vmem:[#allocation16 + $0x14c0] ss:$8 sps:$4 sm:$0xff]  }
 0xa81   :  { %12695 = vmatpush2.bf16.msra.mxu0 %v16796_v41  ;;  %v16876_v41 = vld [vmem:[#allocation16 + $0x14b4] ss:$8 sps:$4 sm:$0xff]  }
 0xa82   :  { %12746 = vmatprep.subr.bf16.mxu0 %v16804_v61  ;;  %v16871_v61 = vld [vmem:[#allocation16 + $0x1580] ss:$8 sps:$4 sm:$0xff]  }
 0xa83   :  { %12794 = vmatpush1.bf16.msra.mxu1 %v16799_v17  ;;  %v16879_v17 = vld [vmem:[#allocation16 + $0x1774] ss:$8 sps:$4 sm:$0xff]  }
 0xa84   :  { %v12452_v21 = vpop.f32.mrf.mxu0  ;;  %12697 = vmatmul.mubr.bf16.vlgmr.msra.gmra.mxu0 %v7102_v25  ;;  %12795 = vmatprep.subr.bf16.mxu1 %v16807_v24  ;;  %v16874_v24 = vld [vmem:[#allocation16 + $0x14b0] ss:$8 sps:$4 sm:$0xff]  }
 0xa85   :  { %v12453_v9 = vadd.f32 %v12452_v21, %v21110_v5  ;;  %12747 = vmatpush1.bf16.msra.mxu0 %v16802_v45  ;;  %12778 = vmatprep.mubr.bf16.mxu0 %v21017_v4  ;;  %v16882_v45 = vld [vmem:[#allocation16 + $0x14a4] ss:$8 sps:$4 sm:$0xff]   ;;  %v16877_v25 = vld [vmem:[#allocation16 + $0x1770] ss:$8 sps:$4 sm:$0xff]   ;;  %v16880_v21 = vld [vmem:[#allocation16 + $0x14a0] ss:$8 sps:$4 sm:$0xff]  }
 0xa86   :  { %v12454_v56 = vpop.f32.mrf.mxu0  ;;  %12748 = vmatprep.subr.bf16.mxu0 %v16810_v22  ;;  %v16885_v22 = vld [vmem:[#allocation16 + $0x1764] ss:$8 sps:$4 sm:$0xff]  }
 0xa87   :  { %v12455_v46 = vadd.f32 %v12454_v56, %v21112_v50  ;;  %12796 = vmatpush1.bf16.msra.mxu1 %v16805_v37  ;;  %v21120_v54 = vadd.f32 %v12493_v34, %v12453_v9  ;;  %v16820_v50 = vld [vmem:[#allocation16 + $0x1440] ss:$8 sps:$4 sm:$0xff]   ;;  %v16853_v34 = vld [vmem:[#allocation16 + $0x15b0] ss:$8 sps:$4 sm:$0xff]   ;;  %v7118_v37 = vrot.slane %v21023_v59, 4 }
 0xa88   :  { %v12456_v14 = vpop.f32.mrf.mxu0  ;;  %12797 = vmatprep.subr.bf16.mxu1 %v16813_v3  ;;  %v16888_v9 = vld [vmem:[#allocation16 + $0x1494] ss:$8 sps:$4 sm:$0xff]  }
 0xa89   :  { %12749 = vmatpush1.bf16.msra.mxu0 %v16808_v31  ;;  %v21122_v13 = vadd.f32 %v12495_v63, %v12455_v46  ;;  %v16864_v63 = vld [vmem:[#allocation16 + $0x14d4] ss:$8 sps:$4 sm:$0xff]   ;;  %v16883_v31 = vld [vmem:[#allocation16 + $0x1760] ss:$8 sps:$4 sm:$0xff]   ;;  %v16886_v46 = vld [vmem:[#allocation16 + $0x1490] ss:$8 sps:$4 sm:$0xff]  }
 0xa8a   :  { %v12457_v5 = vpop.f32.mrf.mxu0  ;;  %12750 = vmatprep.subr.bf16.mxu0 %v16816_v26  ;;  %v16891_v26 = vld [vmem:[#allocation16 + $0x1754] ss:$8 sps:$4 sm:$0xff]   ;;  %v16894_v14 = vld [vmem:[#allocation16 + $0x1484] ss:$8 sps:$4 sm:$0xff]  }
 0xa8b   :  { %12798 = vmatpush1.bf16.msra.mxu1 %v16811_v51  ;;  %v16897_v5 = vld [vmem:[#allocation16 + $0x1744] ss:$8 sps:$4 sm:$0xff]  }
 0xa8c   :  { %12799 = vmatprep.subr.bf16.mxu1 %v16819_v6  ;;  %v16889_v6 = vld [vmem:[#allocation16 + $0x1750] ss:$8 sps:$4 sm:$0xff]  }
 0xa8d   :  { %12751 = vmatpush1.bf16.msra.mxu0 %v16814_v60 }
 0xa8e   :  { %12752 = vmatprep.subr.bf16.mxu0 %v16822_v55  ;;  %v16900_v55 = vld [vmem:[#allocation16 + $0x1674] ss:$8 sps:$4 sm:$0xff]  }
 0xa8f   :  { %12800 = vmatpush1.bf16.msra.mxu1 %v16817_v29  ;;  %v16895_v29 = vld [vmem:[#allocation16 + $0x1740] ss:$8 sps:$4 sm:$0xff]  }
 0xa90   :  { %12801 = vmatprep.subr.bf16.mxu1 %v16825_v16  ;;  %v16903_v16 = vld [vmem:[#allocation16 + $0x1734] ss:$8 sps:$4 sm:$0xff]  }
 0xa91   :  { %12753 = vmatpush1.bf16.msra.mxu0 %v16820_v50  ;;  %v16898_v50 = vld [vmem:[#allocation16 + $0x1670] ss:$8 sps:$4 sm:$0xff]  }
 0xa92   :  { %12754 = vmatprep.subr.bf16.mxu0 %v16828_v15  ;;  %v16906_v15 = vld [vmem:[#allocation16 + $0x1664] ss:$8 sps:$4 sm:$0xff]  }
 0xa93   :  { %12802 = vmatpush1.bf16.msra.mxu1 %v16823_v10  ;;  %v7116_v10 = vrot.slane %v21027_v43, 4 }
 0xa94   :  { %12803 = vmatprep.subr.bf16.mxu1 %v16831_v35  ;;  %v16901_v35 = vld [vmem:[#allocation16 + $0x1730] ss:$8 sps:$4 sm:$0xff]  }
 0xa95   :  { %12755 = vmatpush1.bf16.msra.mxu0 %v16826_v2 }
 0xa96   :  { %12756 = vmatprep.subr.bf16.mxu0 %v16834_v7  ;;  %v16909_v7 = vld [vmem:[#allocation16 + $0x1724] ss:$8 sps:$4 sm:$0xff]  }
 0xa97   :  { %12804 = vmatpush2.bf16.msra.mxu1 %v16829_v36 }
 0xa98   :  { %12805 = vmatprep.subr.bf16.mxu1 %v16837_v23  ;;  %v16904_v23 = vld [vmem:[#allocation16 + $0x1660] ss:$8 sps:$4 sm:$0xff]  }
 0xa99   :  { %12757 = vmatpush1.bf16.msra.mxu0 %v16832_v19 }
 0xa9a   :  { %12758 = vmatprep.subr.bf16.mxu0 %v16840_v44  ;;  %v16912_v44 = vld [vmem:[#allocation16 + $0x1654] ss:$8 sps:$4 sm:$0xff]  }
 0xa9b   :  { %12806 = vmatpush2.bf16.msra.mxu1 %v16835_v28 }
 0xa9c   :  { %12807 = vmatprep.subr.bf16.mxu1 %v16843_v30  ;;  %v16907_v30 = vld [vmem:[#allocation16 + $0x1720] ss:$8 sps:$4 sm:$0xff]  }
 0xa9d   :  { %12759 = vmatpush1.bf16.msra.mxu0 %v16838_v20 }
 0xa9e   :  { %12760 = vmatprep.subr.bf16.mxu0 %v16846_v62 }
 0xa9f   :  { %12808 = vmatpush2.bf16.msra.mxu1 %v16841_v52  ;;  %v16915_v52 = vld [vmem:[#allocation16 + $0x1714] ss:$8 sps:$4 sm:$0xff]  }
 0xaa0   :  { %12809 = vmatprep.subr.bf16.mxu1 %v16849_v40 }
 0xaa1   :  { %12761 = vmatpush1.bf16.msra.mxu0 %v16844_v53  ;;  %v16918_v53 = vld [vmem:[#allocation16 + $0x1644] ss:$8 sps:$4 sm:$0xff]  }
 0xaa2   :  { %12762 = vmatprep.subr.bf16.mxu0 %v16852_v12  ;;  %v16913_v12 = vld [vmem:[#allocation16 + $0x1710] ss:$8 sps:$4 sm:$0xff]  }
 0xaa3   :  { %12810 = vmatpush2.bf16.msra.mxu1 %v16847_v1  ;;  %v16921_v1 = vld [vmem:[#allocation16 + $0x1704] ss:$8 sps:$4 sm:$0xff]  }
 0xaa4   :  { %12811 = vmatprep.subr.bf16.mxu1 %v16855_v57  ;;  %v16924_v57 = vld [vmem:[#allocation16 + $0x1634] ss:$8 sps:$4 sm:$0xff]  }
 0xaa5   :  { %12763 = vmatpush2.bf16.msra.mxu0 %v16850_v11  ;;  %v16919_v11 = vld [vmem:[#allocation16 + $0x1700] ss:$8 sps:$4 sm:$0xff]  }
 0xaa6   :  { %12764 = vmatprep.subr.bf16.mxu0 %v16858_v27  ;;  %v16927_v27 = vld [vmem:[#allocation16 + $0x17f4] ss:$8 sps:$4 sm:$0xff]  }
 0xaa7   :  { %12812 = vmatpush2.bf16.msra.mxu1 %v16853_v34  ;;  %v16922_v34 = vld [vmem:[#allocation16 + $0x1630] ss:$8 sps:$4 sm:$0xff]  }
 0xaa8   :  { %12813 = vmatprep.subr.bf16.mxu1 %v16861_v8  ;;  %v16930_v8 = vld [vmem:[#allocation16 + $0x1624] ss:$8 sps:$4 sm:$0xff]  }
 0xaa9   :  { %12765 = vmatpush2.bf16.msra.mxu0 %v16856_v38  ;;  %v16925_v38 = vld [vmem:[#allocation16 + $0x17f0] ss:$8 sps:$4 sm:$0xff]  }
 0xaaa   :  { %12766 = vmatprep.subr.bf16.mxu0 %v16864_v63  ;;  %v16933_v63 = vld [vmem:[#allocation16 + $0x17e4] ss:$8 sps:$4 sm:$0xff]  }
 0xaab   :  { %12814 = vmatpush2.bf16.msra.mxu1 %v16859_v58  ;;  %v16928_v58 = vld [vmem:[#allocation16 + $0x1620] ss:$8 sps:$4 sm:$0xff]  }
 0xaac   :  { %12815 = vmatprep.subr.bf16.mxu1 %v16867_v33  ;;  %v16936_v33 = vld [vmem:[#allocation16 + $0x1614] ss:$8 sps:$4 sm:$0xff]  }
 0xaad   :  { %12767 = vmatpush2.bf16.msra.mxu0 %v16862_v47  ;;  %v16931_v47 = vld [vmem:[#allocation16 + $0x17e0] ss:$8 sps:$4 sm:$0xff]  }
 0xaae   :  { %12768 = vmatprep.subr.bf16.mxu0 %v16870_v18  ;;  %v16939_v18 = vld [vmem:[#allocation16 + $0x17d4] ss:$8 sps:$4 sm:$0xff]  }
 0xaaf   :  { %12816 = vmatpush2.bf16.msra.mxu1 %v16865_v42  ;;  %v16934_v42 = vld [vmem:[#allocation16 + $0x1610] ss:$8 sps:$4 sm:$0xff]  }
 0xab0   :  { %12817 = vmatprep.subr.bf16.mxu1 %v16873_v32  ;;  %v16942_v32 = vld [vmem:[#allocation16 + $0x1604] ss:$8 sps:$4 sm:$0xff]  }
 0xab1   :  { %12769 = vmatpush2.bf16.msra.mxu0 %v16868_v49  ;;  %v16937_v49 = vld [vmem:[#allocation16 + $0x17d0] ss:$8 sps:$4 sm:$0xff]  }
 0xab2   :  { %12770 = vmatprep.subr.bf16.mxu0 %v16876_v41  ;;  %v16945_v41 = vld [vmem:[#allocation16 + $0x17c4] ss:$8 sps:$4 sm:$0xff]  }
 0xab3   :  { %12818 = vmatpush2.bf16.msra.mxu1 %v16871_v61  ;;  %v16940_v61 = vld [vmem:[#allocation16 + $0x1600] ss:$8 sps:$4 sm:$0xff]  }
 0xab4   :  { %12869 = vmatprep.subr.bf16.mxu1 %v16879_v17  ;;  %v16948_v17 = vld [vmem:[#allocation16 + $0x16f4] ss:$8 sps:$4 sm:$0xff]  }
 0xab5   :  { %12771 = vmatpush2.bf16.msra.mxu0 %v16874_v24  ;;  %v16943_v24 = vld [vmem:[#allocation16 + $0x17c0] ss:$8 sps:$4 sm:$0xff]  }
 0xab6   :  { %v12575_v3 = vpop.f32.mrf.mxu1  ;;  %12820 = vmatmul.mubr.bf16.vlgmr.msra.gmra.mxu1 %v21023_v59  ;;  %12772 = vmatprep.subr.bf16.mxu0 %v16882_v45  ;;  %v16892_v59 = vld [vmem:[#allocation16 + $0x1480] ss:$8 sps:$4 sm:$0xff]   ;;  %v16951_v45 = vld [vmem:[#allocation16 + $0x17b4] ss:$8 sps:$4 sm:$0xff]  }
 0xab7   :  { %12870 = vmatpush1.bf16.msra.mxu1 %v16877_v25  ;;  %12901 = vmatprep.mubr.bf16.mxu1 %v7118_v37  ;;  %v16946_v25 = vld [vmem:[#allocation16 + $0x16f0] ss:$8 sps:$4 sm:$0xff]  }
 0xab8   :  { %v12577_v56 = vpop.f32.mrf.mxu1  ;;  %12871 = vmatprep.subr.bf16.mxu1 %v16885_v22  ;;  %v16954_v22 = vld [vmem:[#allocation16 + $0x16e4] ss:$8 sps:$4 sm:$0xff]   ;;  %v16949_v37 = vld [vmem:[#allocation16 + $0x17b0] ss:$8 sps:$4 sm:$0xff]  }
 0xab9   :  { %12773 = vmatpush2.bf16.msra.mxu0 %v16880_v21  ;;  %v16957_v21 = vld [vmem:[#allocation16 + $0x17a4] ss:$8 sps:$4 sm:$0xff]  }
 0xaba   :  { %v12579_v51 = vpop.f32.mrf.mxu1  ;;  %12774 = vmatprep.subr.bf16.mxu0 %v16888_v9  ;;  %v16960_v9 = vld [vmem:[#allocation16 + $0x16d4] ss:$8 sps:$4 sm:$0xff]  }
 0xabb   :  { %12872 = vmatpush1.bf16.msra.mxu1 %v16883_v31  ;;  %v16955_v31 = vld [vmem:[#allocation16 + $0x17a0] ss:$8 sps:$4 sm:$0xff]   ;;  %v16961_v51 = vld [vmem:[#allocation16 + $0x1790] ss:$8 sps:$4 sm:$0xff]  }
 0xabc   :  { %v12580_v60 = vpop.f32.mrf.mxu1  ;;  %12873 = vmatprep.subr.bf16.mxu1 %v16891_v26  ;;  %v16958_v26 = vld [vmem:[#allocation16 + $0x16d0] ss:$8 sps:$4 sm:$0xff]  }
 0xabd   :  { %12775 = vmatpush2.bf16.msra.mxu0 %v16886_v46  ;;  %v16966_v46 = vld [vmem:[#allocation16 + $0x16c4] ss:$8 sps:$4 sm:$0xff]   ;;  %v16972_v60 = vld [vmem:[#allocation16 + $0x16b4] ss:$8 sps:$4 sm:$0xff]  }
 0xabe   :  { %12776 = vmatprep.subr.bf16.mxu0 %v16894_v14  ;;  %v16969_v14 = vld [vmem:[#allocation16 + $0x1784] ss:$8 sps:$4 sm:$0xff]  }
 0xabf   :  { %12874 = vmatpush1.bf16.msra.mxu1 %v16889_v6  ;;  %v16964_v6 = vld [vmem:[#allocation16 + $0x16c0] ss:$8 sps:$4 sm:$0xff]  }
 0xac0   :  { %12875 = vmatprep.subr.bf16.mxu1 %v16897_v5  ;;  %v16967_v5 = vld [vmem:[#allocation16 + $0x1780] ss:$8 sps:$4 sm:$0xff]  }
 0xac1   :  { %12777 = vmatpush2.bf16.msra.mxu0 %v16892_v59  ;;  %v16970_v59 = vld [vmem:[#allocation16 + $0x16b0] ss:$8 sps:$4 sm:$0xff]  }
 0xac2   :  { %12828 = vmatprep.subr.bf16.mxu0 %v16900_v55  ;;  %v16975_v55 = vld [vmem:[#allocation16 + $0x16a4] ss:$8 sps:$4 sm:$0xff]  }
 0xac3   :  { %12876 = vmatpush1.bf16.msra.mxu1 %v16895_v29  ;;  %v7117_v29 = vrot.slane %v21017_v4, 4  ;;  %v16987_v4 = vld [vmem:[#allocation16 + $0x1864] ss:$8 sps:$4 sm:$0xff]  }
 0xac4   :  { %v12534_v2 = vpop.f32.mrf.mxu0  ;;  %12779 = vmatmul.mubr.bf16.vlgmr.msra.gmra.mxu0 %v21027_v43  ;;  %12877 = vmatprep.subr.bf16.mxu1 %v16903_v16  ;;  %v16910_v43 = vld [vmem:[#allocation16 + $0x1650] ss:$8 sps:$4 sm:$0xff]   ;;  %v16973_v16 = vld [vmem:[#allocation16 + $0x16a0] ss:$8 sps:$4 sm:$0xff]  }
 0xac5   :  { %v12535_v36 = vadd.f32 %v12534_v2, %v21120_v54  ;;  %12829 = vmatpush1.bf16.msra.mxu0 %v16898_v50  ;;  %12860 = vmatprep.mubr.bf16.mxu0 %v7116_v10 }
 0xac6   :  { %v12536_v19 = vpop.f32.mrf.mxu0  ;;  %12830 = vmatprep.subr.bf16.mxu0 %v16906_v15  ;;  %v16978_v15 = vld [vmem:[#allocation16 + $0x1694] ss:$8 sps:$4 sm:$0xff]  }
 0xac7   :  { %v12537_v28 = vadd.f32 %v12536_v19, %v21122_v13  ;;  %12878 = vmatpush1.bf16.msra.mxu1 %v16901_v35  ;;  %v21130_v20 = vadd.f32 %v12575_v3, %v12535_v36  ;;  %v16916_v13 = vld [vmem:[#allocation16 + $0x1640] ss:$8 sps:$4 sm:$0xff]   ;;  %v16976_v35 = vld [vmem:[#allocation16 + $0x1690] ss:$8 sps:$4 sm:$0xff]   ;;  %v16984_v19 = vld [vmem:[#allocation16 + $0x1874] ss:$8 sps:$4 sm:$0xff]  }
 0xac8   :  { %v12538_v62 = vpop.f32.mrf.mxu0  ;;  %12879 = vmatprep.subr.bf16.mxu1 %v16909_v7  ;;  %v16952_v3 = vld [vmem:[#allocation16 + $0x16e0] ss:$8 sps:$4 sm:$0xff]   ;;  %v16981_v7 = vld [vmem:[#allocation16 + $0x1684] ss:$8 sps:$4 sm:$0xff]  }
 0xac9   :  { %12831 = vmatpush1.bf16.msra.mxu0 %v16904_v23  ;;  %v21132_v40 = vadd.f32 %v12577_v56, %v12537_v28  ;;  %v16963_v56 = vld [vmem:[#allocation16 + $0x1794] ss:$8 sps:$4 sm:$0xff]   ;;  %v16979_v23 = vld [vmem:[#allocation16 + $0x1680] ss:$8 sps:$4 sm:$0xff]   ;;  %v7120_v28 = vrot.slane %v21030_v39, 4 }
 0xaca   :  { %v12539_v54 = vpop.f32.mrf.mxu0  ;;  %12832 = vmatprep.subr.bf16.mxu0 %v16912_v44  ;;  %v16982_v44 = vld [vmem:[#allocation16 + $0x1870] ss:$8 sps:$4 sm:$0xff]  }
 0xacb   :  { %12880 = vmatpush1.bf16.msra.mxu1 %v16907_v30  ;;  %v16990_v54 = vld [vmem:[#allocation16 + $0x1854] ss:$8 sps:$4 sm:$0xff]  }
 0xacc   :  { %12881 = vmatprep.subr.bf16.mxu1 %v16915_v52  ;;  %v16985_v52 = vld [vmem:[#allocation16 + $0x1860] ss:$8 sps:$4 sm:$0xff]  }
 0xacd   :  { %12833 = vmatpush1.bf16.msra.mxu0 %v16910_v43 }
 0xace   :  { %12834 = vmatprep.subr.bf16.mxu0 %v16918_v53 }
 0xacf   :  { %12882 = vmatpush1.bf16.msra.mxu1 %v16913_v12 }
 0xad0   :  { %12883 = vmatprep.subr.bf16.mxu1 %v16921_v1 }
 0xad1   :  { %12835 = vmatpush1.bf16.msra.mxu0 %v16916_v13  ;;  %v16988_v13 = vld [vmem:[#allocation16 + $0x1850] ss:$8 sps:$4 sm:$0xff]  }
 0xad2   :  { %12836 = vmatprep.subr.bf16.mxu0 %v16924_v57 }
 0xad3   :  { %12884 = vmatpush1.bf16.msra.mxu1 %v16919_v11 }
 0xad4   :  { %12885 = vmatprep.subr.bf16.mxu1 %v16927_v27  ;;  %v16996_v27 = vld [vmem:[#allocation16 + $0x1834] ss:$8 sps:$4 sm:$0xff]  }
 0xad5   :  { %12837 = vmatpush1.bf16.msra.mxu0 %v16922_v34  ;;  %v16994_v34 = vld [vmem:[#allocation16 + $0x1830] ss:$8 sps:$4 sm:$0xff]  }
 0xad6   :  { %12838 = vmatprep.subr.bf16.mxu0 %v16930_v8  ;;  %v16999_v8 = vld [vmem:[#allocation16 + $0x1824] ss:$8 sps:$4 sm:$0xff]  }
 0xad7   :  { %12886 = vmatpush2.bf16.msra.mxu1 %v16925_v38  ;;  %v17002_v38 = vld [vmem:[#allocation16 + $0x1814] ss:$8 sps:$4 sm:$0xff]  }
 0xad8   :  { %12887 = vmatprep.subr.bf16.mxu1 %v16933_v63  ;;  %v17000_v63 = vld [vmem:[#allocation16 + $0x1810] ss:$8 sps:$4 sm:$0xff]  }
 0xad9   :  { %12839 = vmatpush1.bf16.msra.mxu0 %v16928_v58  ;;  %v17005_v58 = vld [vmem:[#allocation16 + $0x1804] ss:$8 sps:$4 sm:$0xff]  }
 0xada   :  { %12840 = vmatprep.subr.bf16.mxu0 %v16936_v33  ;;  %v17003_v33 = vld [vmem:[#allocation16 + $0x1800] ss:$8 sps:$4 sm:$0xff]  }
 0xadb   :  { %12888 = vmatpush2.bf16.msra.mxu1 %v16931_v47  ;;  %v17008_v47 = vld [vmem:[#allocation16 + $0x18f4] ss:$8 sps:$4 sm:$0xff]  }
 0xadc   :  { %12889 = vmatprep.subr.bf16.mxu1 %v16939_v18  ;;  %v17006_v18 = vld [vmem:[#allocation16 + $0x18f0] ss:$8 sps:$4 sm:$0xff]  }
 0xadd   :  { %12841 = vmatpush1.bf16.msra.mxu0 %v16934_v42  ;;  %v17011_v42 = vld [vmem:[#allocation16 + $0x18e4] ss:$8 sps:$4 sm:$0xff]  }
 0xade   :  { %12842 = vmatprep.subr.bf16.mxu0 %v16942_v32  ;;  %v17009_v32 = vld [vmem:[#allocation16 + $0x18e0] ss:$8 sps:$4 sm:$0xff]  }
 0xadf   :  { %12890 = vmatpush2.bf16.msra.mxu1 %v16937_v49  ;;  %v17014_v49 = vld [vmem:[#allocation16 + $0x18d4] ss:$8 sps:$4 sm:$0xff]  }
 0xae0   :  { %12891 = vmatprep.subr.bf16.mxu1 %v16945_v41  ;;  %v17012_v41 = vld [vmem:[#allocation16 + $0x18d0] ss:$8 sps:$4 sm:$0xff]  }
 0xae1   :  { %12843 = vmatpush1.bf16.msra.mxu0 %v16940_v61  ;;  %v17017_v61 = vld [vmem:[#allocation16 + $0x18c4] ss:$8 sps:$4 sm:$0xff]  }
 0xae2   :  { %12844 = vmatprep.subr.bf16.mxu0 %v16948_v17  ;;  %v17015_v17 = vld [vmem:[#allocation16 + $0x18c0] ss:$8 sps:$4 sm:$0xff]  }
 0xae3   :  { %12892 = vmatpush2.bf16.msra.mxu1 %v16943_v24  ;;  %v17020_v24 = vld [vmem:[#allocation16 + $0x18b4] ss:$8 sps:$4 sm:$0xff]  }
 0xae4   :  { %12893 = vmatprep.subr.bf16.mxu1 %v16951_v45  ;;  %v17018_v45 = vld [vmem:[#allocation16 + $0x18b0] ss:$8 sps:$4 sm:$0xff]  }
 0xae5   :  { %12845 = vmatpush2.bf16.msra.mxu0 %v16946_v25  ;;  %v17023_v25 = vld [vmem:[#allocation16 + $0x18a4] ss:$8 sps:$4 sm:$0xff]  }
 0xae6   :  { %12846 = vmatprep.subr.bf16.mxu0 %v16954_v22  ;;  %v17021_v22 = vld [vmem:[#allocation16 + $0x18a0] ss:$8 sps:$4 sm:$0xff]  }
 0xae7   :  { %12894 = vmatpush2.bf16.msra.mxu1 %v16949_v37 }
 0xae8   :  { %12895 = vmatprep.subr.bf16.mxu1 %v16957_v21  ;;  %v17026_v21 = vld [vmem:[#allocation16 + $0x1894] ss:$8 sps:$4 sm:$0xff]  }
 0xae9   :  { %12847 = vmatpush2.bf16.msra.mxu0 %v16952_v3 }
 0xaea   :  { %12848 = vmatprep.subr.bf16.mxu0 %v16960_v9  ;;  %v17024_v9 = vld [vmem:[#allocation16 + $0x1890] ss:$8 sps:$4 sm:$0xff]  }
 0xaeb   :  { %12896 = vmatpush2.bf16.msra.mxu1 %v16955_v31 }
 0xaec   :  { %12897 = vmatprep.subr.bf16.mxu1 %v16963_v56  ;;  %v17029_v56 = vld [vmem:[#allocation16 + $0x1884] ss:$8 sps:$4 sm:$0xff]  }
 0xaed   :  { %12849 = vmatpush2.bf16.msra.mxu0 %v16958_v26 }
 0xaee   :  { %12850 = vmatprep.subr.bf16.mxu0 %v16966_v46  ;;  %v17027_v46 = vld [vmem:[#allocation16 + $0x1880] ss:$8 sps:$4 sm:$0xff]  }
 0xaef   :  { %12898 = vmatpush2.bf16.msra.mxu1 %v16961_v51  ;;  %v7119_v51 = vrot.slane %v21015_v0, 4 }
 0xaf0   :  { %12899 = vmatprep.subr.bf16.mxu1 %v16969_v14 }
 0xaf1   :  { %12851 = vmatpush2.bf16.msra.mxu0 %v16964_v6 }
 0xaf2   :  { %12852 = vmatprep.subr.bf16.mxu0 %v16972_v60 }
 0xaf3   :  { %12900 = vmatpush2.bf16.msra.mxu1 %v16967_v5 }
 0xaf5   :  { %12853 = vmatpush2.bf16.msra.mxu0 %v16970_v59 }
 0xaf6   :  { %v12657_v50 = vpop.f32.mrf.mxu1  ;;  %12902 = vmatmul.mubr.bf16.vlgmr.msra.gmra.mxu1 %v7117_v29  ;;  %12854 = vmatprep.subr.bf16.mxu0 %v16975_v55 }
 0xaf8   :  { %v12659_v10 = vpop.f32.mrf.mxu1 }
 0xaf9   :  { %12855 = vmatpush2.bf16.msra.mxu0 %v16973_v16 }
 0xafa   :  { %v12661_v2 = vpop.f32.mrf.mxu1  ;;  %12856 = vmatprep.subr.bf16.mxu0 %v16978_v15 }
 0xafc   :  { %v12662_v36 = vpop.f32.mrf.mxu1 }
 0xafd   :  { %12857 = vmatpush2.bf16.msra.mxu0 %v16976_v35 }
 0xafe   :  { %12858 = vmatprep.subr.bf16.mxu0 %v16981_v7 }
 0xb01   :  { %12859 = vmatpush2.bf16.msra.mxu0 %v16979_v23 }
 0xb02   :  { %12910 = vmatprep.subr.bf16.mxu0 %v16984_v19 }
 0xb04   :  { %v12616_v30 = vpop.f32.mrf.mxu0  ;;  %12861 = vmatmul.mubr.bf16.vlgmr.msra.gmra.mxu0 %v21030_v39  ;;  %v16993_v39 = vld [vmem:[#allocation16 + $0x1844] ss:$8 sps:$4 sm:$0xff]  }
 0xb05   :  { %v12617_v62 = vadd.f32 %v12616_v30, %v21130_v20  ;;  %12911 = vmatpush1.bf16.msra.mxu0 %v16982_v44  ;;  %12942 = vmatprep.mubr.bf16.mxu0 %v7120_v28  ;;  %v16991_v20 = vld [vmem:[#allocation16 + $0x1840] ss:$8 sps:$4 sm:$0xff]  }
 0xb06   :  { %v12618_v43 = vpop.f32.mrf.mxu0  ;;  %12912 = vmatprep.subr.bf16.mxu0 %v16987_v4  ;;  %v17030_v28 = vld [vmem:[%s21221_s15 + $0x78] sm:$0xff]  }
 0xb07   :  { %v12619_v53 = vadd.f32 %v12618_v43, %v21132_v40  ;;  %v21139_v12 = vadd.f32 %v12657_v50, %v12617_v62  ;;  %v16997_v40 = vld [vmem:[#allocation16 + $0x1820] ss:$8 sps:$4 sm:$0xff]   ;;  %v17032_v62 = vld [vmem:[%s21221_s15 + $0x70] sm:$0xff]   ;;  %14984 = vmatprep.subr.bf16.mxu1 %v17030_v28  ;;  %v17034_v43 = vld [vmem:[%s21221_s15 + $0x68] sm:$0xff]  }
 0xb08   :  { %v12620_v1 = vpop.f32.mrf.mxu0  ;;  %v17031_v30 = vld [vmem:[%s21221_s15 + $0x38] sm:$0xff]  }
 0xb09   :  { %12913 = vmatpush1.bf16.msra.mxu0 %v16985_v52  ;;  %v21141_v57 = vadd.f32 %v12659_v10, %v12619_v53  ;;  %14985 = vmatpush3.bf16.msra.mxu1 %v17031_v30  ;;  %v17033_v52 = vld [vmem:[%s21221_s15 + $0x30] sm:$0xff]   ;;  %v17036_v53 = vld [vmem:[%s21221_s15 + $0x60] sm:$0xff]   ;;  %v17038_v1 = vld [vmem:[%s21221_s15 + $0x58] sm:$0xff]  }
 0xb0a   :  { %v12621_v11 = vpop.f32.mrf.mxu0  ;;  %12914 = vmatprep.subr.bf16.mxu0 %v16990_v54  ;;  %14986 = vmatprep.subr.bf16.mxu1 %v17032_v62  ;;  %v17035_v54 = vld [vmem:[%s21221_s15 + $0x28] sm:$0xff]  }
 0xb0b   :  { %v17039_v11 = vld [vmem:[%s21221_s15 + $0x18] sm:$0xff]  }
 0xb0d   :  { %12915 = vmatpush1.bf16.msra.mxu0 %v16988_v13  ;;  %14987 = vmatpush3.bf16.msra.mxu1 %v17033_v52 }
 0xb0e   :  { %12916 = vmatprep.subr.bf16.mxu0 %v16993_v39  ;;  %14988 = vmatprep.subr.bf16.mxu1 %v17034_v43  ;;  %v17040_v39 = vld [vmem:[%s21221_s15 + $0x50] sm:$0xff]  }
 0xb11   :  { %12917 = vmatpush1.bf16.msra.mxu0 %v16991_v20  ;;  %14989 = vmatpush3.bf16.msra.mxu1 %v17035_v54 }
 0xb12   :  { %12918 = vmatprep.subr.bf16.mxu0 %v16996_v27  ;;  %14990 = vmatprep.subr.bf16.mxu1 %v17036_v53 }
 0xb15   :  { %12919 = vmatpush1.bf16.msra.mxu0 %v16994_v34  ;;  %v17041_v34 = vld [vmem:[%s21221_s15 + $0x10] sm:$0xff]  }
 0xb16   :  { %12920 = vmatprep.subr.bf16.mxu0 %v16999_v8  ;;  %v17042_v8 = vld [vmem:[%s21221_s15 + $0x48] sm:$0xff]  }
 0xb19   :  { %12921 = vmatpush1.bf16.msra.mxu0 %v16997_v40  ;;  %v17043_v40 = vld [vmem:[%s21221_s15 + $0x8] sm:$0xff]  }
 0xb1a   :  { %12922 = vmatprep.subr.bf16.mxu0 %v17002_v38  ;;  %v17044_v38 = vld [vmem:[%s21221_s15 + $0x40] sm:$0xff]  }
 0xb1d   :  { %12923 = vmatpush1.bf16.msra.mxu0 %v17000_v63 }
 0xb1e   :  { %12924 = vmatprep.subr.bf16.mxu0 %v17005_v58  ;;  %v17045_v58 = vld [vmem:[%s21221_s15] sm:$0xff]  }
 0xb21   :  { %12925 = vmatpush1.bf16.msra.mxu0 %v17003_v33 }
 0xb22   :  { %12926 = vmatprep.subr.bf16.mxu0 %v17008_v47 }
 0xb25   :  { %12927 = vmatpush2.bf16.msra.mxu0 %v17006_v18 }
 0xb26   :  { %12928 = vmatprep.subr.bf16.mxu0 %v17011_v42 }
 0xb29   :  { %12929 = vmatpush2.bf16.msra.mxu0 %v17009_v32 }
 0xb2a   :  { %12930 = vmatprep.subr.bf16.mxu0 %v17014_v49 }
 0xb2d   :  { %12931 = vmatpush2.bf16.msra.mxu0 %v17012_v41 }
 0xb2e   :  { %12932 = vmatprep.subr.bf16.mxu0 %v17017_v61 }
 0xb31   :  { %12933 = vmatpush2.bf16.msra.mxu0 %v17015_v17 }
 0xb32   :  { %12934 = vmatprep.subr.bf16.mxu0 %v17020_v24 }
 0xb35   :  { %12935 = vmatpush2.bf16.msra.mxu0 %v17018_v45 }
 0xb36   :  { %v12739_v37 = vpop.f32.mrf.mxu1  ;;  %12936 = vmatprep.subr.bf16.mxu0 %v17023_v25 }
 0xb38   :  { %v12741_v3 = vpop.f32.mrf.mxu1 }
 0xb39   :  { %12937 = vmatpush2.bf16.msra.mxu0 %v17021_v22 }
 0xb3a   :  { %v12743_v31 = vpop.f32.mrf.mxu1  ;;  %12938 = vmatprep.subr.bf16.mxu0 %v17026_v21 }
 0xb3c   :  { %v12744_v26 = vpop.f32.mrf.mxu1 }
 0xb3d   :  { %12939 = vmatpush2.bf16.msra.mxu0 %v17024_v9 }
 0xb3e   :  { %12940 = vmatprep.subr.bf16.mxu0 %v17029_v56 }
 0xb41   :  { %12941 = vmatpush2.bf16.msra.mxu0 %v17027_v46 }
 0xb44   :  { %v12698_v14 = vpop.f32.mrf.mxu0  ;;  %12943 = vmatmul.mubr.bf16.vlgmr.msra.gmra.mxu0 %v7119_v51 }
 0xb45   :  { %v12699_v6 = vadd.f32 %v12698_v14, %v21139_v12  ;;  %v17037_v12 = vld [vmem:[%s21221_s15 + $0x20] sm:$0xff]   ;;  %s17463_s15 = smov 120  }
 0xb46   :  { %v12700_v60 = vpop.f32.mrf.mxu0  ;;  %14991 = vmatpush3.bf16.msra.mxu1 %v17037_v12  ;;  %v12994_v12 = vld [vmem:[#allocation17] sm:$0x3] }
 0xb47   :  { %v12701_v5 = vadd.f32 %v12700_v60, %v21141_v57  ;;  %v12740_v59 = vadd.f32 %v12739_v37, %v12699_v6  ;;  %14992 = vmatprep.subr.bf16.mxu1 %v17038_v1  ;;  %v21711_v1 = vld [vmem:[#allocation36_spill] sm:$0xff] }
 0xb48   :  { %v12702_v55 = vpop.f32.mrf.mxu0 }
 0xb49   :  { %v12742_v29 = vadd.f32 %v12741_v3, %v12701_v5 }
 0xb4a   :  { %v12703_v16 = vpop.f32.mrf.mxu0  ;;  %14993 = vmatpush3.bf16.msra.mxu1 %v17039_v11 }
 0xb4b   :  { %14994 = vmatprep.subr.bf16.mxu1 %v17040_v39  ;;  %v12999_v39 = vrot.slane %v12994_v12, %v21662_v48 }
 0xb4e   :  { %14995 = vmatpush3.bf16.msra.mxu1 %v17041_v34 }
 0xb4f   :  { %14996 = vmatprep.subr.bf16.mxu1 %v17042_v8 }
 0xb52   :  { %14997 = vmatpush3.bf16.msra.mxu1 %v17043_v40 }
 0xb53   :  { %14998 = vmatprep.subr.bf16.mxu1 %v17044_v38 }
 0xb56   :  { %14999 = vmatpush3.bf16.msra.mxu1 %v17045_v58 }
 0xb76   :  { %v12821_v50 = vpop.f32.mrf.mxu1 }
 0xb78   :  { %v12823_v15 = vpop.f32.mrf.mxu1 }
 0xb7a   :  { %v12825_v10 = vpop.f32.mrf.mxu1 }
 0xb7c   :  { %v12826_v35 = vpop.f32.mrf.mxu1 }
 0xb84   :  { %v12780_v2 = vpop.f32.mrf.mxu0 }
 0xb85   :  { %v12781_v7 = vadd.f32 %v12780_v2, %v12740_v59 }
 0xb86   :  { %v12782_v36 = vpop.f32.mrf.mxu0 }
 0xb87   :  { %v12783_v23 = vadd.f32 %v12782_v36, %v12742_v29  ;;  %v12822_v0 = vadd.f32 %v12821_v50, %v12781_v7 }
 0xb88   :  { %v12784_v19 = vpop.f32.mrf.mxu0 }
 0xb89   :  { %v12824_v44 = vadd.f32 %v12823_v15, %v12783_v23 }
 0xb8a   :  { %v12785_v4 = vpop.f32.mrf.mxu0 }
 0xbb6   :  { %v12903_v13 = vpop.f32.mrf.mxu1 }
 0xbb8   :  { %v12905_v57 = vpop.f32.mrf.mxu1 }
 0xbba   :  { %v12907_v20 = vpop.f32.mrf.mxu1 }
 0xbbc   :  { %v12908_v27 = vpop.f32.mrf.mxu1 }
 0xbc4   :  { %v12862_v63 = vpop.f32.mrf.mxu0 }
 0xbc5   :  { %v12863_v33 = vadd.f32 %v12862_v63, %v12822_v0 }
 0xbc6   :  { %v12864_v47 = vpop.f32.mrf.mxu0 }
 0xbc7   :  { %v12865_v18 = vadd.f32 %v12864_v47, %v12824_v44  ;;  %v12904_v42 = vadd.f32 %v12903_v13, %v12863_v33  ;;  %v13002_v13 = vsub.s32 1, %v21711_v1 }
 0xbc8   :  { %v12866_v32 = vpop.f32.mrf.mxu0 }
 0xbc9   :  { %v12906_v49 = vadd.f32 %v12905_v57, %v12865_v18  ;;  %v13008_v57 = vld [vmem:[#allocation19] sm:$0x3]  ;;  %v13003_v40 = vrot.slane %v12994_v12, %v13002_v13 }
 0xbca   :  { %v12867_v41 = vpop.f32.mrf.mxu0  ;;  %v13013_v34 = vrot.slane %v13008_v57, %v21662_v48  ;;  %v13017_v33 = vrot.slane %v13008_v57, %v13002_v13 }
 0xc04   :  { %v12944_v61 = vpop.f32.mrf.mxu0 }
 0xc05   :  { %v12945_v17 = vadd.f32 %v12944_v61, %v12904_v42 }
 0xc06   :  { %v12946_v24 = vpop.f32.mrf.mxu0 }
 0xc07   :  { %v12951_v45 = vrot.slane %v12945_v17, 4  ;;  %v12966_v25 = vmul.f32 %v12945_v17, %v12945_v17  ;;  %v12947_v22 = vadd.f32 %v12946_v24, %v12906_v49  ;;  %v14488_v24 = vld [vmem:[#allocation20] ss:$0 sm:$0xff] }
 0xc08   :  { %v12948_v37 = vpop.f32.mrf.mxu0 }
 0xc09   :  { %v12952_v21 = vadd.f32 %v12951_v45, %v12945_v17  ;;  %v12968_v3 = vrot.slane %v12966_v25, 4  ;;  %v12957_v9 = vrot.slane %v12947_v22, 4  ;;  %v12967_v31 = vmul.f32 %v12947_v22, %v12947_v22 }
 0xc0a   :  { %v12949_v56 = vpop.f32.mrf.mxu0 }
 0xc0b   :  { %v12953_v26 = vrot.slane %v12952_v21, 2  ;;  %v12969_v46 = vadd.f32 %v12968_v3, %v12966_v25  ;;  %v12958_v51 = vadd.f32 %v12957_v9, %v12947_v22  ;;  %v12974_v14 = vrot.slane %v12967_v31, 4 }
 0xc0d   :  { %v12954_v6 = vadd.f32 %v12953_v26, %v12952_v21  ;;  %v12970_v60 = vrot.slane %v12969_v46, 2  ;;  %v12959_v5 = vrot.slane %v12958_v51, 2  ;;  %v12975_v59 = vadd.f32 %v12974_v14, %v12967_v31 }
 0xc0f   :  { %v12955_v55 = vrot.slane %v12954_v6, 1  ;;  %v12971_v29 = vadd.f32 %v12970_v60, %v12969_v46  ;;  %v12960_v16 = vadd.f32 %v12959_v5, %v12958_v51  ;;  %v12976_v50 = vrot.slane %v12975_v59, 2 }
 0xc11   :  { %v12956_v15 = vadd.f32 %v12955_v55, %v12954_v6  ;;  %v12972_v10 = vrot.slane %v12971_v29, 1  ;;  %v12961_v35 = vrot.slane %v12960_v16, 1  ;;  %v12977_v2 = vadd.f32 %v12976_v50, %v12975_v59 }
 0xc13   :  { %v12964_v7 = vmul.f32 0.125, %v12956_v15  ;;  %v12973_v36 = vadd.f32 %v12972_v10, %v12971_v29  ;;  %v12962_v23 = vadd.f32 %v12961_v35, %v12960_v16  ;;  %v12978_v0 = vrot.slane %v12977_v2, 1 }
 0xc15   :  { %v12980_v19 = vmul.f32 0.125, %v12973_v36  ;;  %v12982_v44 = vmul.f32 %v12964_v7, %v12964_v7  ;;  %v12965_v4 = vmul.f32 0.125, %v12962_v23  ;;  %v12979_v28 = vadd.f32 %v12978_v0, %v12977_v2 }
 0xc16   :  { %v12986_v11 = vsub.f32 %v12945_v17, %v12964_v7 }
 0xc17   :  { %v12984_v30 = vsub.f32 %v12980_v19, %v12982_v44  ;;  %v12983_v62 = vmul.f32 %v12965_v4, %v12965_v4  ;;  %v12981_v52 = vmul.f32 0.125, %v12979_v28  ;;  %v12987_v8 = vsub.f32 %v12947_v22, %v12965_v4 }
 0xc19   :  { %v12988_v43 = vadd.f32 1e-05, %v12984_v30  ;;  %v12985_v54 = vsub.f32 %v12981_v52, %v12983_v62 }
 0xc1b   :  { %17050 = vrsqrt.f32 %v12988_v43  ;;  %v12989_v53 = vadd.f32 1e-05, %v12985_v54 }
 0xc1d   :  { %17052 = vrsqrt.f32 %v12989_v53 }
 0xc28   :  { %v17051_v20 = vpop.eup %17050 }
 0xc29   :  { %v12992_v27 = vmul.f32 %v17051_v20, %v12986_v11 }
 0xc2a   :  { %v17053_v38 = vpop.eup %17052 }
 0xc2b   :  { %v13006_v63 = vmul.f32 %v12999_v39, %v12992_v27  ;;  %v12993_v58 = vmul.f32 %v17053_v38, %v12987_v8 }
 0xc2d   :  { %v13020_v47 = vadd.f32 %v13013_v34, %v13006_v63  ;;  %v13007_v18 = vmul.f32 %v13003_v40, %v12993_v58 }
 0xc2f   :  { %v13021_v42 = vadd.f32 %v13017_v33, %v13007_v18  ;;  %v13022_v32 = vmax.f32 %v13020_v47, 0.0 }
 0xc31   :  { %v13023_v49 = vmax.f32 %v13021_v42, 0.0  ;;  %v13024_v61 = vpack.c.bf16 %v13022_v32, %v13022_v32 }
 0xc33   :  { %v13025_v41 = vpack.c.bf16 %v13023_v49, %v13023_v49 }
 0xc35   :  { %13193 = vmatprep.mubr.bf16.mxu1 %v13025_v41 }
 0xc36   :  { %13194 = vmatmul.mubr.bf16.vlgmr.msra.gmra.mxu1 %v13024_v61 }
 0xcf6   :  { %v15000_v17 = vpop.f32.mrf.mxu1 }
 0xcf8   :  { %v15001_v45 = vpop.f32.mrf.mxu1 }
 0xcf9   :  { %v15002_v25 = vadd.f32 %v15001_v45, %v15000_v17 }
 0xcfa   :  { %v15003_v48 = vpop.f32.mrf.mxu1 }
 0xcfb   :  { %v13196_v22 = vadd.f32 %v15002_v25, %v14488_v24 }
 0xcfc   :  { %v15004_v37 = vpop.f32.mrf.mxu1 }
 0xcfd   :  { %v13202_v21 = vsel %vm13201_vm6, %v13196_v22, -inf  ;;  %17054 = vtanh.f32 %v13196_v22 }
 0xcfe   :  { %13203 = vmax.xlane.f32.xlu0 %v13202_v21 }
 0xd0a   :  { %v17055_v3 = vpop.eup %17054 }
 0xd14   :  { %13217 = vrot.lane.b32.xlu0 %v17055_v3, %s17463_s15 }
 0xd87   :  { %v13204_v9 = vpop.xlane.xlu0 %13203 }
 0xd88   :  { %v13205_v31 = vsub.f32 %v13196_v22, %v13204_v9 }
 0xd8a   :  { %v13206_v56 = vmul.f32 1.442695, %v13205_v31 }
 0xd8b   :  { %v13218_v26 = vpop.permute.xlu0 %13217 }
 0xd8c   :  { %17056 = vpow2.f32 %v13206_v56  ;;  %13221 = vst.msk [vmem:[%s21224_s18] sm:$0xff] %vm13220_vm7, %v13218_v26 }
 0xd99   :  { %v17057_v46 = vpop.eup %17056 }
 0xd9a   :  { %v13208_v51 = vsel %vm13201_vm6, %v17057_v46, 0.0 }
 0xd9b   :  { %13209 = vadd.xlane.f32.xlu1 %v13208_v51 }
 0xe24   :  { %v13210_v14 = vpop.xlane.xlu1 %13209 }
 0xe25   :  { %17058 = vlog2.f32 %v13210_v14 }
 0xe32   :  { %v17059_v6 = vpop.eup %17058 }
 0xe33   :  { %v13212_v60 = vmul.f32 0.6931472, %v17059_v6 }
 0xe35   :  { %v13213_v5 = vsub.f32 %v13205_v31, %v13212_v60 }
 0xe37   :  { %13214 = vst.msk [vmem:[#allocation22] sm:$0xff] %vm13201_vm6, %v13213_v5 }
 0xe38   :  { %17413 = shalt.err (!%p17410_p8)
}
 0xe39   :  { %13231 = dma.vmem_to_hbm [thread:$0]  %s13229_s29, 128, %s21223_s17, [#allocation4]  }
 0xe3a   :  { %17436 = dma.done.wait [#allocation4], 128  }
 0xe3b   :  { %17437 = vsyncadd [#allocation4], 4294967168 }
 0xe3c   :  { %13239 = vsyncpa [#allocation3], 1 }
 0xe3d   :  { %13240 = vsyncpa [#allocation6], 1 }
 0xe3e   :  { %13241 = vsyncpa [#allocation9], 1 }
 0xe3f   :  { %13242 = vsyncpa [#allocation12], 1 }
 0xe40   :  { %13243 = vsyncpa [#allocation15], 1 }
 0xe41   :  { %13244 = vsyncpa [#allocation18], 1 }
 0xe42   :  { %13245 = vsyncpa [#allocation21], 1 }
 0xe43   :  { %13246 = vsyncpa [#allocation4], 1 }

</bundles_post_ra>
